<compile_context>
chip_gen: v6e
topology: v6e:2x2x1
jax: 0.10.0
libtpu: 0.0.40
codegen_flags: <defaults>
</compile_context>

<pallas_src>
import math

import numpy as np
import jax
import jax.numpy as jnp
from jax.experimental import pallas as pl
from jax.experimental.pallas import tpu as pltpu

PB = 256   # per pool-phase output-column block (>= Wo*Cout for both convs), lane aligned


# ----------------------------------------------------------------------------
# Fused kernel (one image per grid step; everything VMEM-resident)
# ----------------------------------------------------------------------------
def _ptmnist_fused_kernel(x4_ref, b1m_ref, bias1_ref, b2m_ref, bias2_ref,
                          w3_ref, b3_ref, wl_ref, bl_ref, out_ref,
                          xe_scr, xo_scr):
    # ---- conv1 (5x5 'same') + 2x2 maxpool + relu ---------------------------
    # Output produced already split by output-row parity e so that conv2's
    # taps below are unit-stride slabs.  For parity e, pool row dh, kernel row
    # p the required padded-input row is 4*oe + s, s = 2e+dh+p; the wrapper
    # pre-split the 32 padded input rows mod 4, so each tap is rows
    # [s//4, s//4+7) of phase s%4.  b1m[p] maps the 28 input columns to
    # (dw, wo1, co) with 'same' W-padding folded in as zero bands.
    p1 = []                                    # p1[e]: (7, 256) bf16, rows ho1 = 2*oe+e
    for e in (0, 1):
        pooled = None
        for dh in (0, 1):
            acc = None
            for p in range(5):
                s = 2 * e + dh + p                                     # 0..7
                slab = x4_ref[0, s % 4, (s // 4):(s // 4) + 7, :]      # (7, 28) bf16
                c = jnp.dot(slab, b1m_ref[p],
                            preferred_element_type=jnp.float32)        # (7, 512) f32
                acc = c if acc is None else acc + c
            m = jnp.maximum(acc[:, :PB], acc[:, PB:])                  # pool over dw
            pooled = m if pooled is None else jnp.maximum(pooled, m)   # pool over dh
        p1.append(jnp.maximum(pooled + bias1_ref[...], 0.0).astype(jnp.bfloat16))

    # ---- stage conv2's padded, row-parity-split input in VMEM scratch ------
    # Padded conv2 input rows r in [0,18): even rows -> xe_scr, odd -> xo_scr;
    # rows 0/1 and 16/17 are the 'same' zero padding.
    for scr, val in ((xe_scr, p1[0]), (xo_scr, p1[1])):
        scr[...] = jnp.zeros(scr.shape, scr.dtype)
        scr[1:8, :] = val

    # ---- conv2 (5x5 'same') + 2x2 maxpool + relu ---------------------------
    pooled2 = None
    for dh in (0, 1):
        acc = None
        for p in range(5):
            t = dh + p                                                 # 0..5
            src = xe_scr if t % 2 == 0 else xo_scr
            slab = src[(t // 2):(t // 2) + 7, :]                       # (7, 256) bf16
            c = jnp.dot(slab, b2m_ref[p],
                        preferred_element_type=jnp.float32)            # (7, 512) f32
            acc = c if acc is None else acc + c
        m = jnp.maximum(acc[:, :PB], acc[:, PB:])
        pooled2 = m if pooled2 is None else jnp.maximum(pooled2, m)
    p2 = jnp.maximum(pooled2 + bias2_ref[...], 0.0).astype(jnp.bfloat16)   # (7, 256)

    # ---- fc3 + relu3 (flatten done by pre-permuted fc3 weight rows) --------
    h = None
    for r in range(7):
        c = jnp.dot(p2[r:r + 1, :], w3_ref[r * PB:(r + 1) * PB, :],
                    preferred_element_type=jnp.float32)                # (1, 512) f32
        h = c if h is None else h + c
    h = jnp.maximum(h + b3_ref[...], 0.0).astype(jnp.bfloat16)         # (1, 512) bf16

    # ---- logits -------------------------------------------------------------
    logit = jnp.dot(h, wl_ref[...], preferred_element_type=jnp.float32) + bl_ref[...]
    out_ref[0, :, :] = logit                                           # (1, 10) f32


# ----------------------------------------------------------------------------
# Forward pass (mirrors PTMNIST.forward)
# ----------------------------------------------------------------------------
def _w_spec(a):
    nd = len(a.shape)
    shape = a.shape
    return pl.BlockSpec(shape, lambda i: (0,) * nd)


def ptmnist_forward(kp, x_nchw):
    """PTMNIST forward.  x_nchw: (N, 1, 28, 28) f32 -> logits (N, 10) f32."""
    n = x_nchw.shape[0]
    # Only wrapper-side glue: pad H by 2 ('same' conv1), split the 32 padded
    # rows mod 4 and cast to bf16 -> (N, 4, 8, 28).
    x = x_nchw.reshape(n, 28, 28)
    x = jnp.pad(x, ((0, 0), (2, 2), (0, 0)))
    x4 = x.reshape(n, 8, 4, 28).transpose(0, 2, 1, 3).astype(jnp.bfloat16)

    out = pl.pallas_call(
        _ptmnist_fused_kernel,
        out_shape=jax.ShapeDtypeStruct((n, 1, 10), jnp.float32),
        grid=(n,),
        in_specs=[pl.BlockSpec((1, 4, 8, 28), lambda i: (i, 0, 0, 0)),
                  _w_spec(kp["b1m"]), _w_spec(kp["bias1"]),
                  _w_spec(kp["b2m"]), _w_spec(kp["bias2"]),
                  _w_spec(kp["w3"]), _w_spec(kp["b3"]),
                  _w_spec(kp["wl"]), _w_spec(kp["bl"])],
        out_specs=pl.BlockSpec((1, 1, 10), lambda i: (i, 0, 0)),
        scratch_shapes=[pltpu.VMEM((9, PB), jnp.bfloat16),
                        pltpu.VMEM((9, PB), jnp.bfloat16)],
        compiler_params=pltpu.CompilerParams(dimension_semantics=("parallel",)),
    )(x4, kp["b1m"], kp["bias1"], kp["b2m"], kp["bias2"],
      kp["w3"], kp["b3"], kp["wl"], kp["bl"])
    return out[:, 0, :]


# ----------------------------------------------------------------------------
# Parameters (PyTorch layouts, matching PTMNIST.reset_parameters semantics)
# ----------------------------------------------------------------------------
def init_params(key):
    ks = jax.random.split(key, 5)

    def kaiming_normal(k, shape, fan_in):
        return jax.random.normal(k, shape, jnp.float32) * math.sqrt(2.0 / fan_in)

    params = {
        "conv1_w": kaiming_normal(ks[0], (16, 1, 5, 5), 1 * 5 * 5),
        "conv1_b": jnp.zeros((16,), jnp.float32),
        "conv2_w": kaiming_normal(ks[1], (32, 16, 5, 5), 16 * 5 * 5),
        "conv2_b": jnp.zeros((32,), jnp.float32),
        "fc3_w": kaiming_normal(ks[2], (512, 32 * 7 * 7), 32 * 7 * 7),
        "fc3_b": jnp.zeros((512,), jnp.float32),
    }
    bound = 1.0 / math.sqrt(512)   # logits: default nn.Linear reset (uniform)
    params["logits_w"] = jax.random.uniform(ks[3], (10, 512), jnp.float32, -bound, bound)
    params["logits_b"] = jax.random.uniform(ks[4], (10,), jnp.float32, -bound, bound)
    return params


def _band_weight(w_oihw, w_in, wo):
    """(Cout,Cin,5,5) conv weight -> (5, W_in*Cin, 2*PB) block-Toeplitz matrix.

    Column layout: (pool phase dw in {0,1}) x (output col wo) x (out chan co),
    each dw block zero-padded to PB lanes.  'same' padding along W is encoded
    by omitting out-of-range bands (zeros)."""
    w = np.asarray(w_oihw, np.float32)
    cout, cin = w.shape[:2]
    bm = np.zeros((5, w_in * cin, 2 * PB), np.float32)
    for p in range(5):
        for q in range(5):
            for dw in range(2):
                for o in range(wo):
                    wi = 2 * o + dw + q - 2
                    if 0 <= wi < w_in:
                        col = dw * PB + o * cout
                        bm[p, wi * cin:(wi + 1) * cin, col:col + cout] = w[:, :, p, q].T
    return bm


def prepare_params(p):
    """One-time conversion of PyTorch-layout params to fused-kernel layout."""
    b1m = _band_weight(p["conv1_w"], w_in=28, wo=14)            # (5, 28, 512)
    b2m = _band_weight(p["conv2_w"], w_in=14, wo=7)             # (5, 224, 512)
    b2m = np.pad(b2m, ((0, 0), (0, PB - 224), (0, 0)))          # K pad -> (5, 256, 512)

    bias1 = np.zeros((1, PB), np.float32)
    bias1[0, :14 * 16] = np.tile(np.asarray(p["conv1_b"], np.float32), 14)
    bias2 = np.zeros((1, PB), np.float32)
    bias2[0, :7 * 32] = np.tile(np.asarray(p["conv2_b"], np.float32), 7)

    # fc3: PyTorch flattens (c, h, w); the resident activation is (h, w*32+c),
    # so permute + zero-pad the weight rows once here (row = h*256 + w*32 + c).
    w3 = np.asarray(p["fc3_w"], np.float32).reshape(512, 32, 7, 7)
    w3 = w3.transpose(2, 3, 1, 0).reshape(7, 224, 512)
    w3 = np.pad(w3, ((0, 0), (0, PB - 224), (0, 0))).reshape(7 * PB, 512)

    bf16 = jnp.bfloat16
    return {
        "b1m": jnp.asarray(b1m, bf16), "bias1": jnp.asarray(bias1),
        "b2m": jnp.asarray(b2m, bf16), "bias2": jnp.asarray(bias2),
        "w3": jnp.asarray(w3, bf16),
        "b3": jnp.asarray(np.asarray(p["fc3_b"], np.float32).reshape(1, 512)),
        "wl": jnp.asarray(np.asarray(p["logits_w"], np.float32).T, bf16),   # (512, 10)
        "bl": jnp.asarray(np.asarray(p["logits_b"], np.float32).reshape(1, 10)),
    }


if __name__ == "__main__":
    key = jax.random.PRNGKey(0)
    kx, kparam = jax.random.split(key)
    # MNIST-shaped input (1 channel, 28x28) is required by fc3 (32*7*7); batch=2.
    x = jax.random.normal(kx, (2, 1, 28, 28), jnp.float32)
    params = init_params(kparam)
    kparams = prepare_params(params)      # all layout/padding work hoisted, done once

    out = jax.jit(ptmnist_forward)(kparams, x)
    out = jax.block_until_ready(out)
    assert out.shape == (2, 10) and out.dtype == jnp.float32
    print("KERNEL_OK")
</pallas_src>

<mosaic_0001>
module attributes {stable_mosaic.version = 11 : i64} {
  func.func @_ptmnist_fused_kernel(%arg0: i32, %arg1: memref<1x4x8x28xbf16, #tpu.memory_space<vmem>>, %arg2: memref<5x28x512xbf16, #tpu.memory_space<vmem>>, %arg3: memref<1x256xf32, #tpu.memory_space<vmem>>, %arg4: memref<5x256x512xbf16, #tpu.memory_space<vmem>>, %arg5: memref<1x256xf32, #tpu.memory_space<vmem>>, %arg6: memref<1792x512xbf16, #tpu.memory_space<vmem>>, %arg7: memref<1x512xf32, #tpu.memory_space<vmem>>, %arg8: memref<512x10xbf16, #tpu.memory_space<vmem>>, %arg9: memref<1x10xf32, #tpu.memory_space<vmem>>, %arg10: memref<1x1x10xf32, #tpu.memory_space<vmem>>, %arg11: memref<9x256xbf16, #tpu.memory_space<vmem>>, %arg12: memref<9x256xbf16, #tpu.memory_space<vmem>>) attributes {dimension_semantics = [#tpu.dimension_semantics<parallel>], iteration_bounds = array<i64: 2>, scalar_prefetch = 0 : i64, scratch_operands = 2 : i64, tpu.core_type = #tpu.core_type<tc>, window_params = [{transform_indices = @transform_0, window_bounds = array<i64: 1, 4, 8, 28>}, {pipeline_mode = #tpu.pipeline_mode<synchronous>, transform_indices = @transform_1, window_bounds = array<i64: 5, 28, 512>}, {pipeline_mode = #tpu.pipeline_mode<synchronous>, transform_indices = @transform_2, window_bounds = array<i64: 1, 256>}, {pipeline_mode = #tpu.pipeline_mode<synchronous>, transform_indices = @transform_3, window_bounds = array<i64: 5, 256, 512>}, {pipeline_mode = #tpu.pipeline_mode<synchronous>, transform_indices = @transform_4, window_bounds = array<i64: 1, 256>}, {pipeline_mode = #tpu.pipeline_mode<synchronous>, transform_indices = @transform_5, window_bounds = array<i64: 1792, 512>}, {pipeline_mode = #tpu.pipeline_mode<synchronous>, transform_indices = @transform_6, window_bounds = array<i64: 1, 512>}, {pipeline_mode = #tpu.pipeline_mode<synchronous>, transform_indices = @transform_7, window_bounds = array<i64: 512, 10>}, {pipeline_mode = #tpu.pipeline_mode<synchronous>, transform_indices = @transform_8, window_bounds = array<i64: 1, 10>}, {transform_indices = @transform_9, window_bounds = array<i64: 1, 1, 10>}]} {
    %c0 = arith.constant 0 : index
    %c0_0 = arith.constant 0 : index
    %c0_1 = arith.constant 0 : index
    %c0_2 = arith.constant 0 : index
    %0 = vector.load %arg1[%c0, %c0_0, %c0_1, %c0_2] : memref<1x4x8x28xbf16, #tpu.memory_space<vmem>>, vector<1x1x7x28xbf16>
    %1 = vector.shape_cast %0 : vector<1x1x7x28xbf16> to vector<7x28xbf16>
    %c0_3 = arith.constant 0 : index
    %c0_4 = arith.constant 0 : index
    %c0_5 = arith.constant 0 : index
    %2 = vector.load %arg2[%c0_3, %c0_4, %c0_5] : memref<5x28x512xbf16, #tpu.memory_space<vmem>>, vector<1x28x512xbf16>
    %3 = vector.shape_cast %2 : vector<1x28x512xbf16> to vector<28x512xbf16>
    %cst = arith.constant dense<0.000000e+00> : vector<7x512xf32>
    %4 = tpu.matmul %1, %3, %cst {dimension_numbers = #tpu.dot_dimension_numbers<[1], [0], [0], [1], [0, 0, 1, 1], [], []>} : vector<7x28xbf16>, vector<28x512xbf16>, vector<7x512xf32> -> vector<7x512xf32>
    %c0_6 = arith.constant 0 : index
    %c1 = arith.constant 1 : index
    %c0_7 = arith.constant 0 : index
    %c0_8 = arith.constant 0 : index
    %5 = vector.load %arg1[%c0_6, %c1, %c0_7, %c0_8] : memref<1x4x8x28xbf16, #tpu.memory_space<vmem>>, vector<1x1x7x28xbf16>
    %6 = vector.shape_cast %5 : vector<1x1x7x28xbf16> to vector<7x28xbf16>
    %c1_9 = arith.constant 1 : index
    %c0_10 = arith.constant 0 : index
    %c0_11 = arith.constant 0 : index
    %7 = vector.load %arg2[%c1_9, %c0_10, %c0_11] : memref<5x28x512xbf16, #tpu.memory_space<vmem>>, vector<1x28x512xbf16>
    %8 = vector.shape_cast %7 : vector<1x28x512xbf16> to vector<28x512xbf16>
    %cst_12 = arith.constant dense<0.000000e+00> : vector<7x512xf32>
    %9 = tpu.matmul %6, %8, %cst_12 {dimension_numbers = #tpu.dot_dimension_numbers<[1], [0], [0], [1], [0, 0, 1, 1], [], []>} : vector<7x28xbf16>, vector<28x512xbf16>, vector<7x512xf32> -> vector<7x512xf32>
    %10 = arith.addf %4, %9 : vector<7x512xf32>
    %c0_13 = arith.constant 0 : index
    %c2 = arith.constant 2 : index
    %c0_14 = arith.constant 0 : index
    %c0_15 = arith.constant 0 : index
    %11 = vector.load %arg1[%c0_13, %c2, %c0_14, %c0_15] : memref<1x4x8x28xbf16, #tpu.memory_space<vmem>>, vector<1x1x7x28xbf16>
    %12 = vector.shape_cast %11 : vector<1x1x7x28xbf16> to vector<7x28xbf16>
    %c2_16 = arith.constant 2 : index
    %c0_17 = arith.constant 0 : index
    %c0_18 = arith.constant 0 : index
    %13 = vector.load %arg2[%c2_16, %c0_17, %c0_18] : memref<5x28x512xbf16, #tpu.memory_space<vmem>>, vector<1x28x512xbf16>
    %14 = vector.shape_cast %13 : vector<1x28x512xbf16> to vector<28x512xbf16>
    %cst_19 = arith.constant dense<0.000000e+00> : vector<7x512xf32>
    %15 = tpu.matmul %12, %14, %cst_19 {dimension_numbers = #tpu.dot_dimension_numbers<[1], [0], [0], [1], [0, 0, 1, 1], [], []>} : vector<7x28xbf16>, vector<28x512xbf16>, vector<7x512xf32> -> vector<7x512xf32>
    %16 = arith.addf %10, %15 : vector<7x512xf32>
    %c0_20 = arith.constant 0 : index
    %c3 = arith.constant 3 : index
    %c0_21 = arith.constant 0 : index
    %c0_22 = arith.constant 0 : index
    %17 = vector.load %arg1[%c0_20, %c3, %c0_21, %c0_22] : memref<1x4x8x28xbf16, #tpu.memory_space<vmem>>, vector<1x1x7x28xbf16>
    %18 = vector.shape_cast %17 : vector<1x1x7x28xbf16> to vector<7x28xbf16>
    %c3_23 = arith.constant 3 : index
    %c0_24 = arith.constant 0 : index
    %c0_25 = arith.constant 0 : index
    %19 = vector.load %arg2[%c3_23, %c0_24, %c0_25] : memref<5x28x512xbf16, #tpu.memory_space<vmem>>, vector<1x28x512xbf16>
    %20 = vector.shape_cast %19 : vector<1x28x512xbf16> to vector<28x512xbf16>
    %cst_26 = arith.constant dense<0.000000e+00> : vector<7x512xf32>
    %21 = tpu.matmul %18, %20, %cst_26 {dimension_numbers = #tpu.dot_dimension_numbers<[1], [0], [0], [1], [0, 0, 1, 1], [], []>} : vector<7x28xbf16>, vector<28x512xbf16>, vector<7x512xf32> -> vector<7x512xf32>
    %22 = arith.addf %16, %21 : vector<7x512xf32>
    %c0_27 = arith.constant 0 : index
    %c0_28 = arith.constant 0 : index
    %c1_29 = arith.constant 1 : index
    %c0_30 = arith.constant 0 : index
    %23 = vector.load %arg1[%c0_27, %c0_28, %c1_29, %c0_30] : memref<1x4x8x28xbf16, #tpu.memory_space<vmem>>, vector<1x1x7x28xbf16>
    %24 = vector.shape_cast %23 : vector<1x1x7x28xbf16> to vector<7x28xbf16>
    %c4 = arith.constant 4 : index
    %c0_31 = arith.constant 0 : index
    %c0_32 = arith.constant 0 : index
    %25 = vector.load %arg2[%c4, %c0_31, %c0_32] : memref<5x28x512xbf16, #tpu.memory_space<vmem>>, vector<1x28x512xbf16>
    %26 = vector.shape_cast %25 : vector<1x28x512xbf16> to vector<28x512xbf16>
    %cst_33 = arith.constant dense<0.000000e+00> : vector<7x512xf32>
    %27 = tpu.matmul %24, %26, %cst_33 {dimension_numbers = #tpu.dot_dimension_numbers<[1], [0], [0], [1], [0, 0, 1, 1], [], []>} : vector<7x28xbf16>, vector<28x512xbf16>, vector<7x512xf32> -> vector<7x512xf32>
    %28 = arith.addf %22, %27 : vector<7x512xf32>
    %29 = vector.extract_strided_slice %28 {offsets = [0, 0], sizes = [7, 256], strides = [1, 1]} : vector<7x512xf32> to vector<7x256xf32>
    %30 = vector.extract_strided_slice %28 {offsets = [0, 256], sizes = [7, 256], strides = [1, 1]} : vector<7x512xf32> to vector<7x256xf32>
    %31 = arith.maximumf %29, %30 : vector<7x256xf32>
    %c0_34 = arith.constant 0 : index
    %c1_35 = arith.constant 1 : index
    %c0_36 = arith.constant 0 : index
    %c0_37 = arith.constant 0 : index
    %32 = vector.load %arg1[%c0_34, %c1_35, %c0_36, %c0_37] : memref<1x4x8x28xbf16, #tpu.memory_space<vmem>>, vector<1x1x7x28xbf16>
    %33 = vector.shape_cast %32 : vector<1x1x7x28xbf16> to vector<7x28xbf16>
    %c0_38 = arith.constant 0 : index
    %c0_39 = arith.constant 0 : index
    %c0_40 = arith.constant 0 : index
    %34 = vector.load %arg2[%c0_38, %c0_39, %c0_40] : memref<5x28x512xbf16, #tpu.memory_space<vmem>>, vector<1x28x512xbf16>
    %35 = vector.shape_cast %34 : vector<1x28x512xbf16> to vector<28x512xbf16>
    %cst_41 = arith.constant dense<0.000000e+00> : vector<7x512xf32>
    %36 = tpu.matmul %33, %35, %cst_41 {dimension_numbers = #tpu.dot_dimension_numbers<[1], [0], [0], [1], [0, 0, 1, 1], [], []>} : vector<7x28xbf16>, vector<28x512xbf16>, vector<7x512xf32> -> vector<7x512xf32>
    %c0_42 = arith.constant 0 : index
    %c2_43 = arith.constant 2 : index
    %c0_44 = arith.constant 0 : index
    %c0_45 = arith.constant 0 : index
    %37 = vector.load %arg1[%c0_42, %c2_43, %c0_44, %c0_45] : memref<1x4x8x28xbf16, #tpu.memory_space<vmem>>, vector<1x1x7x28xbf16>
    %38 = vector.shape_cast %37 : vector<1x1x7x28xbf16> to vector<7x28xbf16>
    %c1_46 = arith.constant 1 : index
    %c0_47 = arith.constant 0 : index
    %c0_48 = arith.constant 0 : index
    %39 = vector.load %arg2[%c1_46, %c0_47, %c0_48] : memref<5x28x512xbf16, #tpu.memory_space<vmem>>, vector<1x28x512xbf16>
    %40 = vector.shape_cast %39 : vector<1x28x512xbf16> to vector<28x512xbf16>
    %cst_49 = arith.constant dense<0.000000e+00> : vector<7x512xf32>
    %41 = tpu.matmul %38, %40, %cst_49 {dimension_numbers = #tpu.dot_dimension_numbers<[1], [0], [0], [1], [0, 0, 1, 1], [], []>} : vector<7x28xbf16>, vector<28x512xbf16>, vector<7x512xf32> -> vector<7x512xf32>
    %42 = arith.addf %36, %41 : vector<7x512xf32>
    %c0_50 = arith.constant 0 : index
    %c3_51 = arith.constant 3 : index
    %c0_52 = arith.constant 0 : index
    %c0_53 = arith.constant 0 : index
    %43 = vector.load %arg1[%c0_50, %c3_51, %c0_52, %c0_53] : memref<1x4x8x28xbf16, #tpu.memory_space<vmem>>, vector<1x1x7x28xbf16>
    %44 = vector.shape_cast %43 : vector<1x1x7x28xbf16> to vector<7x28xbf16>
    %c2_54 = arith.constant 2 : index
    %c0_55 = arith.constant 0 : index
    %c0_56 = arith.constant 0 : index
    %45 = vector.load %arg2[%c2_54, %c0_55, %c0_56] : memref<5x28x512xbf16, #tpu.memory_space<vmem>>, vector<1x28x512xbf16>
    %46 = vector.shape_cast %45 : vector<1x28x512xbf16> to vector<28x512xbf16>
    %cst_57 = arith.constant dense<0.000000e+00> : vector<7x512xf32>
    %47 = tpu.matmul %44, %46, %cst_57 {dimension_numbers = #tpu.dot_dimension_numbers<[1], [0], [0], [1], [0, 0, 1, 1], [], []>} : vector<7x28xbf16>, vector<28x512xbf16>, vector<7x512xf32> -> vector<7x512xf32>
    %48 = arith.addf %42, %47 : vector<7x512xf32>
    %c0_58 = arith.constant 0 : index
    %c0_59 = arith.constant 0 : index
    %c1_60 = arith.constant 1 : index
    %c0_61 = arith.constant 0 : index
    %49 = vector.load %arg1[%c0_58, %c0_59, %c1_60, %c0_61] : memref<1x4x8x28xbf16, #tpu.memory_space<vmem>>, vector<1x1x7x28xbf16>
    %50 = vector.shape_cast %49 : vector<1x1x7x28xbf16> to vector<7x28xbf16>
    %c3_62 = arith.constant 3 : index
    %c0_63 = arith.constant 0 : index
    %c0_64 = arith.constant 0 : index
    %51 = vector.load %arg2[%c3_62, %c0_63, %c0_64] : memref<5x28x512xbf16, #tpu.memory_space<vmem>>, vector<1x28x512xbf16>
    %52 = vector.shape_cast %51 : vector<1x28x512xbf16> to vector<28x512xbf16>
    %cst_65 = arith.constant dense<0.000000e+00> : vector<7x512xf32>
    %53 = tpu.matmul %50, %52, %cst_65 {dimension_numbers = #tpu.dot_dimension_numbers<[1], [0], [0], [1], [0, 0, 1, 1], [], []>} : vector<7x28xbf16>, vector<28x512xbf16>, vector<7x512xf32> -> vector<7x512xf32>
    %54 = arith.addf %48, %53 : vector<7x512xf32>
    %c0_66 = arith.constant 0 : index
    %c1_67 = arith.constant 1 : index
    %c1_68 = arith.constant 1 : index
    %c0_69 = arith.constant 0 : index
    %55 = vector.load %arg1[%c0_66, %c1_67, %c1_68, %c0_69] : memref<1x4x8x28xbf16, #tpu.memory_space<vmem>>, vector<1x1x7x28xbf16>
    %56 = vector.shape_cast %55 : vector<1x1x7x28xbf16> to vector<7x28xbf16>
    %c4_70 = arith.constant 4 : index
    %c0_71 = arith.constant 0 : index
    %c0_72 = arith.constant 0 : index
    %57 = vector.load %arg2[%c4_70, %c0_71, %c0_72] : memref<5x28x512xbf16, #tpu.memory_space<vmem>>, vector<1x28x512xbf16>
    %58 = vector.shape_cast %57 : vector<1x28x512xbf16> to vector<28x512xbf16>
    %cst_73 = arith.constant dense<0.000000e+00> : vector<7x512xf32>
    %59 = tpu.matmul %56, %58, %cst_73 {dimension_numbers = #tpu.dot_dimension_numbers<[1], [0], [0], [1], [0, 0, 1, 1], [], []>} : vector<7x28xbf16>, vector<28x512xbf16>, vector<7x512xf32> -> vector<7x512xf32>
    %60 = arith.addf %54, %59 : vector<7x512xf32>
    %61 = vector.extract_strided_slice %60 {offsets = [0, 0], sizes = [7, 256], strides = [1, 1]} : vector<7x512xf32> to vector<7x256xf32>
    %62 = vector.extract_strided_slice %60 {offsets = [0, 256], sizes = [7, 256], strides = [1, 1]} : vector<7x512xf32> to vector<7x256xf32>
    %63 = arith.maximumf %61, %62 : vector<7x256xf32>
    %64 = arith.maximumf %31, %63 : vector<7x256xf32>
    %c0_74 = arith.constant 0 : index
    %c0_75 = arith.constant 0 : index
    %65 = vector.load %arg3[%c0_74, %c0_75] : memref<1x256xf32, #tpu.memory_space<vmem>>, vector<1x256xf32>
    %66 = vector.broadcast %65 : vector<1x256xf32> to vector<7x256xf32>
    %67 = arith.addf %64, %66 : vector<7x256xf32>
    %cst_76 = arith.constant 0.000000e+00 : f32
    %68 = vector.broadcast %cst_76 : f32 to vector<7x256xf32>
    %69 = arith.maximumf %67, %68 : vector<7x256xf32>
    %70 = arith.truncf %69 : vector<7x256xf32> to vector<7x256xbf16>
    %c0_77 = arith.constant 0 : index
    %c2_78 = arith.constant 2 : index
    %c0_79 = arith.constant 0 : index
    %c0_80 = arith.constant 0 : index
    %71 = vector.load %arg1[%c0_77, %c2_78, %c0_79, %c0_80] : memref<1x4x8x28xbf16, #tpu.memory_space<vmem>>, vector<1x1x7x28xbf16>
    %72 = vector.shape_cast %71 : vector<1x1x7x28xbf16> to vector<7x28xbf16>
    %c0_81 = arith.constant 0 : index
    %c0_82 = arith.constant 0 : index
    %c0_83 = arith.constant 0 : index
    %73 = vector.load %arg2[%c0_81, %c0_82, %c0_83] : memref<5x28x512xbf16, #tpu.memory_space<vmem>>, vector<1x28x512xbf16>
    %74 = vector.shape_cast %73 : vector<1x28x512xbf16> to vector<28x512xbf16>
    %cst_84 = arith.constant dense<0.000000e+00> : vector<7x512xf32>
    %75 = tpu.matmul %72, %74, %cst_84 {dimension_numbers = #tpu.dot_dimension_numbers<[1], [0], [0], [1], [0, 0, 1, 1], [], []>} : vector<7x28xbf16>, vector<28x512xbf16>, vector<7x512xf32> -> vector<7x512xf32>
    %c0_85 = arith.constant 0 : index
    %c3_86 = arith.constant 3 : index
    %c0_87 = arith.constant 0 : index
    %c0_88 = arith.constant 0 : index
    %76 = vector.load %arg1[%c0_85, %c3_86, %c0_87, %c0_88] : memref<1x4x8x28xbf16, #tpu.memory_space<vmem>>, vector<1x1x7x28xbf16>
    %77 = vector.shape_cast %76 : vector<1x1x7x28xbf16> to vector<7x28xbf16>
    %c1_89 = arith.constant 1 : index
    %c0_90 = arith.constant 0 : index
    %c0_91 = arith.constant 0 : index
    %78 = vector.load %arg2[%c1_89, %c0_90, %c0_91] : memref<5x28x512xbf16, #tpu.memory_space<vmem>>, vector<1x28x512xbf16>
    %79 = vector.shape_cast %78 : vector<1x28x512xbf16> to vector<28x512xbf16>
    %cst_92 = arith.constant dense<0.000000e+00> : vector<7x512xf32>
    %80 = tpu.matmul %77, %79, %cst_92 {dimension_numbers = #tpu.dot_dimension_numbers<[1], [0], [0], [1], [0, 0, 1, 1], [], []>} : vector<7x28xbf16>, vector<28x512xbf16>, vector<7x512xf32> -> vector<7x512xf32>
    %81 = arith.addf %75, %80 : vector<7x512xf32>
    %c0_93 = arith.constant 0 : index
    %c0_94 = arith.constant 0 : index
    %c1_95 = arith.constant 1 : index
    %c0_96 = arith.constant 0 : index
    %82 = vector.load %arg1[%c0_93, %c0_94, %c1_95, %c0_96] : memref<1x4x8x28xbf16, #tpu.memory_space<vmem>>, vector<1x1x7x28xbf16>
    %83 = vector.shape_cast %82 : vector<1x1x7x28xbf16> to vector<7x28xbf16>
    %c2_97 = arith.constant 2 : index
    %c0_98 = arith.constant 0 : index
    %c0_99 = arith.constant 0 : index
    %84 = vector.load %arg2[%c2_97, %c0_98, %c0_99] : memref<5x28x512xbf16, #tpu.memory_space<vmem>>, vector<1x28x512xbf16>
    %85 = vector.shape_cast %84 : vector<1x28x512xbf16> to vector<28x512xbf16>
    %cst_100 = arith.constant dense<0.000000e+00> : vector<7x512xf32>
    %86 = tpu.matmul %83, %85, %cst_100 {dimension_numbers = #tpu.dot_dimension_numbers<[1], [0], [0], [1], [0, 0, 1, 1], [], []>} : vector<7x28xbf16>, vector<28x512xbf16>, vector<7x512xf32> -> vector<7x512xf32>
    %87 = arith.addf %81, %86 : vector<7x512xf32>
    %c0_101 = arith.constant 0 : index
    %c1_102 = arith.constant 1 : index
    %c1_103 = arith.constant 1 : index
    %c0_104 = arith.constant 0 : index
    %88 = vector.load %arg1[%c0_101, %c1_102, %c1_103, %c0_104] : memref<1x4x8x28xbf16, #tpu.memory_space<vmem>>, vector<1x1x7x28xbf16>
    %89 = vector.shape_cast %88 : vector<1x1x7x28xbf16> to vector<7x28xbf16>
    %c3_105 = arith.constant 3 : index
    %c0_106 = arith.constant 0 : index
    %c0_107 = arith.constant 0 : index
    %90 = vector.load %arg2[%c3_105, %c0_106, %c0_107] : memref<5x28x512xbf16, #tpu.memory_space<vmem>>, vector<1x28x512xbf16>
    %91 = vector.shape_cast %90 : vector<1x28x512xbf16> to vector<28x512xbf16>
    %cst_108 = arith.constant dense<0.000000e+00> : vector<7x512xf32>
    %92 = tpu.matmul %89, %91, %cst_108 {dimension_numbers = #tpu.dot_dimension_numbers<[1], [0], [0], [1], [0, 0, 1, 1], [], []>} : vector<7x28xbf16>, vector<28x512xbf16>, vector<7x512xf32> -> vector<7x512xf32>
    %93 = arith.addf %87, %92 : vector<7x512xf32>
    %c0_109 = arith.constant 0 : index
    %c2_110 = arith.constant 2 : index
    %c1_111 = arith.constant 1 : index
    %c0_112 = arith.constant 0 : index
    %94 = vector.load %arg1[%c0_109, %c2_110, %c1_111, %c0_112] : memref<1x4x8x28xbf16, #tpu.memory_space<vmem>>, vector<1x1x7x28xbf16>
    %95 = vector.shape_cast %94 : vector<1x1x7x28xbf16> to vector<7x28xbf16>
    %c4_113 = arith.constant 4 : index
    %c0_114 = arith.constant 0 : index
    %c0_115 = arith.constant 0 : index
    %96 = vector.load %arg2[%c4_113, %c0_114, %c0_115] : memref<5x28x512xbf16, #tpu.memory_space<vmem>>, vector<1x28x512xbf16>
    %97 = vector.shape_cast %96 : vector<1x28x512xbf16> to vector<28x512xbf16>
    %cst_116 = arith.constant dense<0.000000e+00> : vector<7x512xf32>
    %98 = tpu.matmul %95, %97, %cst_116 {dimension_numbers = #tpu.dot_dimension_numbers<[1], [0], [0], [1], [0, 0, 1, 1], [], []>} : vector<7x28xbf16>, vector<28x512xbf16>, vector<7x512xf32> -> vector<7x512xf32>
    %99 = arith.addf %93, %98 : vector<7x512xf32>
    %100 = vector.extract_strided_slice %99 {offsets = [0, 0], sizes = [7, 256], strides = [1, 1]} : vector<7x512xf32> to vector<7x256xf32>
    %101 = vector.extract_strided_slice %99 {offsets = [0, 256], sizes = [7, 256], strides = [1, 1]} : vector<7x512xf32> to vector<7x256xf32>
    %102 = arith.maximumf %100, %101 : vector<7x256xf32>
    %c0_117 = arith.constant 0 : index
    %c3_118 = arith.constant 3 : index
    %c0_119 = arith.constant 0 : index
    %c0_120 = arith.constant 0 : index
    %103 = vector.load %arg1[%c0_117, %c3_118, %c0_119, %c0_120] : memref<1x4x8x28xbf16, #tpu.memory_space<vmem>>, vector<1x1x7x28xbf16>
    %104 = vector.shape_cast %103 : vector<1x1x7x28xbf16> to vector<7x28xbf16>
    %c0_121 = arith.constant 0 : index
    %c0_122 = arith.constant 0 : index
    %c0_123 = arith.constant 0 : index
    %105 = vector.load %arg2[%c0_121, %c0_122, %c0_123] : memref<5x28x512xbf16, #tpu.memory_space<vmem>>, vector<1x28x512xbf16>
    %106 = vector.shape_cast %105 : vector<1x28x512xbf16> to vector<28x512xbf16>
    %cst_124 = arith.constant dense<0.000000e+00> : vector<7x512xf32>
    %107 = tpu.matmul %104, %106, %cst_124 {dimension_numbers = #tpu.dot_dimension_numbers<[1], [0], [0], [1], [0, 0, 1, 1], [], []>} : vector<7x28xbf16>, vector<28x512xbf16>, vector<7x512xf32> -> vector<7x512xf32>
    %c0_125 = arith.constant 0 : index
    %c0_126 = arith.constant 0 : index
    %c1_127 = arith.constant 1 : index
    %c0_128 = arith.constant 0 : index
    %108 = vector.load %arg1[%c0_125, %c0_126, %c1_127, %c0_128] : memref<1x4x8x28xbf16, #tpu.memory_space<vmem>>, vector<1x1x7x28xbf16>
    %109 = vector.shape_cast %108 : vector<1x1x7x28xbf16> to vector<7x28xbf16>
    %c1_129 = arith.constant 1 : index
    %c0_130 = arith.constant 0 : index
    %c0_131 = arith.constant 0 : index
    %110 = vector.load %arg2[%c1_129, %c0_130, %c0_131] : memref<5x28x512xbf16, #tpu.memory_space<vmem>>, vector<1x28x512xbf16>
    %111 = vector.shape_cast %110 : vector<1x28x512xbf16> to vector<28x512xbf16>
    %cst_132 = arith.constant dense<0.000000e+00> : vector<7x512xf32>
    %112 = tpu.matmul %109, %111, %cst_132 {dimension_numbers = #tpu.dot_dimension_numbers<[1], [0], [0], [1], [0, 0, 1, 1], [], []>} : vector<7x28xbf16>, vector<28x512xbf16>, vector<7x512xf32> -> vector<7x512xf32>
    %113 = arith.addf %107, %112 : vector<7x512xf32>
    %c0_133 = arith.constant 0 : index
    %c1_134 = arith.constant 1 : index
    %c1_135 = arith.constant 1 : index
    %c0_136 = arith.constant 0 : index
    %114 = vector.load %arg1[%c0_133, %c1_134, %c1_135, %c0_136] : memref<1x4x8x28xbf16, #tpu.memory_space<vmem>>, vector<1x1x7x28xbf16>
    %115 = vector.shape_cast %114 : vector<1x1x7x28xbf16> to vector<7x28xbf16>
    %c2_137 = arith.constant 2 : index
    %c0_138 = arith.constant 0 : index
    %c0_139 = arith.constant 0 : index
    %116 = vector.load %arg2[%c2_137, %c0_138, %c0_139] : memref<5x28x512xbf16, #tpu.memory_space<vmem>>, vector<1x28x512xbf16>
    %117 = vector.shape_cast %116 : vector<1x28x512xbf16> to vector<28x512xbf16>
    %cst_140 = arith.constant dense<0.000000e+00> : vector<7x512xf32>
    %118 = tpu.matmul %115, %117, %cst_140 {dimension_numbers = #tpu.dot_dimension_numbers<[1], [0], [0], [1], [0, 0, 1, 1], [], []>} : vector<7x28xbf16>, vector<28x512xbf16>, vector<7x512xf32> -> vector<7x512xf32>
    %119 = arith.addf %113, %118 : vector<7x512xf32>
    %c0_141 = arith.constant 0 : index
    %c2_142 = arith.constant 2 : index
    %c1_143 = arith.constant 1 : index
    %c0_144 = arith.constant 0 : index
    %120 = vector.load %arg1[%c0_141, %c2_142, %c1_143, %c0_144] : memref<1x4x8x28xbf16, #tpu.memory_space<vmem>>, vector<1x1x7x28xbf16>
    %121 = vector.shape_cast %120 : vector<1x1x7x28xbf16> to vector<7x28xbf16>
    %c3_145 = arith.constant 3 : index
    %c0_146 = arith.constant 0 : index
    %c0_147 = arith.constant 0 : index
    %122 = vector.load %arg2[%c3_145, %c0_146, %c0_147] : memref<5x28x512xbf16, #tpu.memory_space<vmem>>, vector<1x28x512xbf16>
    %123 = vector.shape_cast %122 : vector<1x28x512xbf16> to vector<28x512xbf16>
    %cst_148 = arith.constant dense<0.000000e+00> : vector<7x512xf32>
    %124 = tpu.matmul %121, %123, %cst_148 {dimension_numbers = #tpu.dot_dimension_numbers<[1], [0], [0], [1], [0, 0, 1, 1], [], []>} : vector<7x28xbf16>, vector<28x512xbf16>, vector<7x512xf32> -> vector<7x512xf32>
    %125 = arith.addf %119, %124 : vector<7x512xf32>
    %c0_149 = arith.constant 0 : index
    %c3_150 = arith.constant 3 : index
    %c1_151 = arith.constant 1 : index
    %c0_152 = arith.constant 0 : index
    %126 = vector.load %arg1[%c0_149, %c3_150, %c1_151, %c0_152] : memref<1x4x8x28xbf16, #tpu.memory_space<vmem>>, vector<1x1x7x28xbf16>
    %127 = vector.shape_cast %126 : vector<1x1x7x28xbf16> to vector<7x28xbf16>
    %c4_153 = arith.constant 4 : index
    %c0_154 = arith.constant 0 : index
    %c0_155 = arith.constant 0 : index
    %128 = vector.load %arg2[%c4_153, %c0_154, %c0_155] : memref<5x28x512xbf16, #tpu.memory_space<vmem>>, vector<1x28x512xbf16>
    %129 = vector.shape_cast %128 : vector<1x28x512xbf16> to vector<28x512xbf16>
    %cst_156 = arith.constant dense<0.000000e+00> : vector<7x512xf32>
    %130 = tpu.matmul %127, %129, %cst_156 {dimension_numbers = #tpu.dot_dimension_numbers<[1], [0], [0], [1], [0, 0, 1, 1], [], []>} : vector<7x28xbf16>, vector<28x512xbf16>, vector<7x512xf32> -> vector<7x512xf32>
    %131 = arith.addf %125, %130 : vector<7x512xf32>
    %132 = vector.extract_strided_slice %131 {offsets = [0, 0], sizes = [7, 256], strides = [1, 1]} : vector<7x512xf32> to vector<7x256xf32>
    %133 = vector.extract_strided_slice %131 {offsets = [0, 256], sizes = [7, 256], strides = [1, 1]} : vector<7x512xf32> to vector<7x256xf32>
    %134 = arith.maximumf %132, %133 : vector<7x256xf32>
    %135 = arith.maximumf %102, %134 : vector<7x256xf32>
    %c0_157 = arith.constant 0 : index
    %c0_158 = arith.constant 0 : index
    %136 = vector.load %arg3[%c0_157, %c0_158] : memref<1x256xf32, #tpu.memory_space<vmem>>, vector<1x256xf32>
    %137 = vector.broadcast %136 : vector<1x256xf32> to vector<7x256xf32>
    %138 = arith.addf %135, %137 : vector<7x256xf32>
    %cst_159 = arith.constant 0.000000e+00 : f32
    %139 = vector.broadcast %cst_159 : f32 to vector<7x256xf32>
    %140 = arith.maximumf %138, %139 : vector<7x256xf32>
    %141 = arith.truncf %140 : vector<7x256xf32> to vector<7x256xbf16>
    %cst_160 = arith.constant 0.000000e+00 : bf16
    %142 = vector.broadcast %cst_160 : bf16 to vector<9x256xbf16>
    %c0_161 = arith.constant 0 : index
    %c0_162 = arith.constant 0 : index
    %143 = vector.load %arg11[%c0_161, %c0_162] : memref<9x256xbf16, #tpu.memory_space<vmem>>, vector<9x256xbf16>
    tpu.vector_store %arg11[%c0_161, %c0_162], %142 {strides = array<i32>} : memref<9x256xbf16, #tpu.memory_space<vmem>>, vector<9x256xbf16>,
    %c1_163 = arith.constant 1 : index
    %c0_164 = arith.constant 0 : index
    %144 = vector.load %arg11[%c1_163, %c0_164] : memref<9x256xbf16, #tpu.memory_space<vmem>>, vector<7x256xbf16>
    tpu.vector_store %arg11[%c1_163, %c0_164], %70 {strides = array<i32>} : memref<9x256xbf16, #tpu.memory_space<vmem>>, vector<7x256xbf16>,
    %cst_165 = arith.constant 0.000000e+00 : bf16
    %145 = vector.broadcast %cst_165 : bf16 to vector<9x256xbf16>
    %c0_166 = arith.constant 0 : index
    %c0_167 = arith.constant 0 : index
    %146 = vector.load %arg12[%c0_166, %c0_167] : memref<9x256xbf16, #tpu.memory_space<vmem>>, vector<9x256xbf16>
    tpu.vector_store %arg12[%c0_166, %c0_167], %145 {strides = array<i32>} : memref<9x256xbf16, #tpu.memory_space<vmem>>, vector<9x256xbf16>,
    %c1_168 = arith.constant 1 : index
    %c0_169 = arith.constant 0 : index
    %147 = vector.load %arg12[%c1_168, %c0_169] : memref<9x256xbf16, #tpu.memory_space<vmem>>, vector<7x256xbf16>
    tpu.vector_store %arg12[%c1_168, %c0_169], %141 {strides = array<i32>} : memref<9x256xbf16, #tpu.memory_space<vmem>>, vector<7x256xbf16>,
    %c0_170 = arith.constant 0 : index
    %c0_171 = arith.constant 0 : index
    %148 = vector.load %arg11[%c0_170, %c0_171] : memref<9x256xbf16, #tpu.memory_space<vmem>>, vector<7x256xbf16>
    %c0_172 = arith.constant 0 : index
    %c0_173 = arith.constant 0 : index
    %c0_174 = arith.constant 0 : index
    %149 = vector.load %arg4[%c0_172, %c0_173, %c0_174] : memref<5x256x512xbf16, #tpu.memory_space<vmem>>, vector<1x256x512xbf16>
    %150 = vector.shape_cast %149 : vector<1x256x512xbf16> to vector<256x512xbf16>
    %cst_175 = arith.constant dense<0.000000e+00> : vector<7x512xf32>
    %151 = tpu.matmul %148, %150, %cst_175 {dimension_numbers = #tpu.dot_dimension_numbers<[1], [0], [0], [1], [0, 0, 1, 1], [], []>} : vector<7x256xbf16>, vector<256x512xbf16>, vector<7x512xf32> -> vector<7x512xf32>
    %c0_176 = arith.constant 0 : index
    %c0_177 = arith.constant 0 : index
    %152 = vector.load %arg12[%c0_176, %c0_177] : memref<9x256xbf16, #tpu.memory_space<vmem>>, vector<7x256xbf16>
    %c1_178 = arith.constant 1 : index
    %c0_179 = arith.constant 0 : index
    %c0_180 = arith.constant 0 : index
    %153 = vector.load %arg4[%c1_178, %c0_179, %c0_180] : memref<5x256x512xbf16, #tpu.memory_space<vmem>>, vector<1x256x512xbf16>
    %154 = vector.shape_cast %153 : vector<1x256x512xbf16> to vector<256x512xbf16>
    %cst_181 = arith.constant dense<0.000000e+00> : vector<7x512xf32>
    %155 = tpu.matmul %152, %154, %cst_181 {dimension_numbers = #tpu.dot_dimension_numbers<[1], [0], [0], [1], [0, 0, 1, 1], [], []>} : vector<7x256xbf16>, vector<256x512xbf16>, vector<7x512xf32> -> vector<7x512xf32>
    %156 = arith.addf %151, %155 : vector<7x512xf32>
    %c1_182 = arith.constant 1 : index
    %c0_183 = arith.constant 0 : index
    %157 = vector.load %arg11[%c1_182, %c0_183] : memref<9x256xbf16, #tpu.memory_space<vmem>>, vector<7x256xbf16>
    %c2_184 = arith.constant 2 : index
    %c0_185 = arith.constant 0 : index
    %c0_186 = arith.constant 0 : index
    %158 = vector.load %arg4[%c2_184, %c0_185, %c0_186] : memref<5x256x512xbf16, #tpu.memory_space<vmem>>, vector<1x256x512xbf16>
    %159 = vector.shape_cast %158 : vector<1x256x512xbf16> to vector<256x512xbf16>
    %cst_187 = arith.constant dense<0.000000e+00> : vector<7x512xf32>
    %160 = tpu.matmul %157, %159, %cst_187 {dimension_numbers = #tpu.dot_dimension_numbers<[1], [0], [0], [1], [0, 0, 1, 1], [], []>} : vector<7x256xbf16>, vector<256x512xbf16>, vector<7x512xf32> -> vector<7x512xf32>
    %161 = arith.addf %156, %160 : vector<7x512xf32>
    %c1_188 = arith.constant 1 : index
    %c0_189 = arith.constant 0 : index
    %162 = vector.load %arg12[%c1_188, %c0_189] : memref<9x256xbf16, #tpu.memory_space<vmem>>, vector<7x256xbf16>
    %c3_190 = arith.constant 3 : index
    %c0_191 = arith.constant 0 : index
    %c0_192 = arith.constant 0 : index
    %163 = vector.load %arg4[%c3_190, %c0_191, %c0_192] : memref<5x256x512xbf16, #tpu.memory_space<vmem>>, vector<1x256x512xbf16>
    %164 = vector.shape_cast %163 : vector<1x256x512xbf16> to vector<256x512xbf16>
    %cst_193 = arith.constant dense<0.000000e+00> : vector<7x512xf32>
    %165 = tpu.matmul %162, %164, %cst_193 {dimension_numbers = #tpu.dot_dimension_numbers<[1], [0], [0], [1], [0, 0, 1, 1], [], []>} : vector<7x256xbf16>, vector<256x512xbf16>, vector<7x512xf32> -> vector<7x512xf32>
    %166 = arith.addf %161, %165 : vector<7x512xf32>
    %c2_194 = arith.constant 2 : index
    %c0_195 = arith.constant 0 : index
    %167 = vector.load %arg11[%c2_194, %c0_195] : memref<9x256xbf16, #tpu.memory_space<vmem>>, vector<7x256xbf16>
    %c4_196 = arith.constant 4 : index
    %c0_197 = arith.constant 0 : index
    %c0_198 = arith.constant 0 : index
    %168 = vector.load %arg4[%c4_196, %c0_197, %c0_198] : memref<5x256x512xbf16, #tpu.memory_space<vmem>>, vector<1x256x512xbf16>
    %169 = vector.shape_cast %168 : vector<1x256x512xbf16> to vector<256x512xbf16>
    %cst_199 = arith.constant dense<0.000000e+00> : vector<7x512xf32>
    %170 = tpu.matmul %167, %169, %cst_199 {dimension_numbers = #tpu.dot_dimension_numbers<[1], [0], [0], [1], [0, 0, 1, 1], [], []>} : vector<7x256xbf16>, vector<256x512xbf16>, vector<7x512xf32> -> vector<7x512xf32>
    %171 = arith.addf %166, %170 : vector<7x512xf32>
    %172 = vector.extract_strided_slice %171 {offsets = [0, 0], sizes = [7, 256], strides = [1, 1]} : vector<7x512xf32> to vector<7x256xf32>
    %173 = vector.extract_strided_slice %171 {offsets = [0, 256], sizes = [7, 256], strides = [1, 1]} : vector<7x512xf32> to vector<7x256xf32>
    %174 = arith.maximumf %172, %173 : vector<7x256xf32>
    %c0_200 = arith.constant 0 : index
    %c0_201 = arith.constant 0 : index
    %175 = vector.load %arg12[%c0_200, %c0_201] : memref<9x256xbf16, #tpu.memory_space<vmem>>, vector<7x256xbf16>
    %c0_202 = arith.constant 0 : index
    %c0_203 = arith.constant 0 : index
    %c0_204 = arith.constant 0 : index
    %176 = vector.load %arg4[%c0_202, %c0_203, %c0_204] : memref<5x256x512xbf16, #tpu.memory_space<vmem>>, vector<1x256x512xbf16>
    %177 = vector.shape_cast %176 : vector<1x256x512xbf16> to vector<256x512xbf16>
    %cst_205 = arith.constant dense<0.000000e+00> : vector<7x512xf32>
    %178 = tpu.matmul %175, %177, %cst_205 {dimension_numbers = #tpu.dot_dimension_numbers<[1], [0], [0], [1], [0, 0, 1, 1], [], []>} : vector<7x256xbf16>, vector<256x512xbf16>, vector<7x512xf32> -> vector<7x512xf32>
    %c1_206 = arith.constant 1 : index
    %c0_207 = arith.constant 0 : index
    %179 = vector.load %arg11[%c1_206, %c0_207] : memref<9x256xbf16, #tpu.memory_space<vmem>>, vector<7x256xbf16>
    %c1_208 = arith.constant 1 : index
    %c0_209 = arith.constant 0 : index
    %c0_210 = arith.constant 0 : index
    %180 = vector.load %arg4[%c1_208, %c0_209, %c0_210] : memref<5x256x512xbf16, #tpu.memory_space<vmem>>, vector<1x256x512xbf16>
    %181 = vector.shape_cast %180 : vector<1x256x512xbf16> to vector<256x512xbf16>
    %cst_211 = arith.constant dense<0.000000e+00> : vector<7x512xf32>
    %182 = tpu.matmul %179, %181, %cst_211 {dimension_numbers = #tpu.dot_dimension_numbers<[1], [0], [0], [1], [0, 0, 1, 1], [], []>} : vector<7x256xbf16>, vector<256x512xbf16>, vector<7x512xf32> -> vector<7x512xf32>
    %183 = arith.addf %178, %182 : vector<7x512xf32>
    %c1_212 = arith.constant 1 : index
    %c0_213 = arith.constant 0 : index
    %184 = vector.load %arg12[%c1_212, %c0_213] : memref<9x256xbf16, #tpu.memory_space<vmem>>, vector<7x256xbf16>
    %c2_214 = arith.constant 2 : index
    %c0_215 = arith.constant 0 : index
    %c0_216 = arith.constant 0 : index
    %185 = vector.load %arg4[%c2_214, %c0_215, %c0_216] : memref<5x256x512xbf16, #tpu.memory_space<vmem>>, vector<1x256x512xbf16>
    %186 = vector.shape_cast %185 : vector<1x256x512xbf16> to vector<256x512xbf16>
    %cst_217 = arith.constant dense<0.000000e+00> : vector<7x512xf32>
    %187 = tpu.matmul %184, %186, %cst_217 {dimension_numbers = #tpu.dot_dimension_numbers<[1], [0], [0], [1], [0, 0, 1, 1], [], []>} : vector<7x256xbf16>, vector<256x512xbf16>, vector<7x512xf32> -> vector<7x512xf32>
    %188 = arith.addf %183, %187 : vector<7x512xf32>
    %c2_218 = arith.constant 2 : index
    %c0_219 = arith.constant 0 : index
    %189 = vector.load %arg11[%c2_218, %c0_219] : memref<9x256xbf16, #tpu.memory_space<vmem>>, vector<7x256xbf16>
    %c3_220 = arith.constant 3 : index
    %c0_221 = arith.constant 0 : index
    %c0_222 = arith.constant 0 : index
    %190 = vector.load %arg4[%c3_220, %c0_221, %c0_222] : memref<5x256x512xbf16, #tpu.memory_space<vmem>>, vector<1x256x512xbf16>
    %191 = vector.shape_cast %190 : vector<1x256x512xbf16> to vector<256x512xbf16>
    %cst_223 = arith.constant dense<0.000000e+00> : vector<7x512xf32>
    %192 = tpu.matmul %189, %191, %cst_223 {dimension_numbers = #tpu.dot_dimension_numbers<[1], [0], [0], [1], [0, 0, 1, 1], [], []>} : vector<7x256xbf16>, vector<256x512xbf16>, vector<7x512xf32> -> vector<7x512xf32>
    %193 = arith.addf %188, %192 : vector<7x512xf32>
    %c2_224 = arith.constant 2 : index
    %c0_225 = arith.constant 0 : index
    %194 = vector.load %arg12[%c2_224, %c0_225] : memref<9x256xbf16, #tpu.memory_space<vmem>>, vector<7x256xbf16>
    %c4_226 = arith.constant 4 : index
    %c0_227 = arith.constant 0 : index
    %c0_228 = arith.constant 0 : index
    %195 = vector.load %arg4[%c4_226, %c0_227, %c0_228] : memref<5x256x512xbf16, #tpu.memory_space<vmem>>, vector<1x256x512xbf16>
    %196 = vector.shape_cast %195 : vector<1x256x512xbf16> to vector<256x512xbf16>
    %cst_229 = arith.constant dense<0.000000e+00> : vector<7x512xf32>
    %197 = tpu.matmul %194, %196, %cst_229 {dimension_numbers = #tpu.dot_dimension_numbers<[1], [0], [0], [1], [0, 0, 1, 1], [], []>} : vector<7x256xbf16>, vector<256x512xbf16>, vector<7x512xf32> -> vector<7x512xf32>
    %198 = arith.addf %193, %197 : vector<7x512xf32>
    %199 = vector.extract_strided_slice %198 {offsets = [0, 0], sizes = [7, 256], strides = [1, 1]} : vector<7x512xf32> to vector<7x256xf32>
    %200 = vector.extract_strided_slice %198 {offsets = [0, 256], sizes = [7, 256], strides = [1, 1]} : vector<7x512xf32> to vector<7x256xf32>
    %201 = arith.maximumf %199, %200 : vector<7x256xf32>
    %202 = arith.maximumf %174, %201 : vector<7x256xf32>
    %c0_230 = arith.constant 0 : index
    %c0_231 = arith.constant 0 : index
    %203 = vector.load %arg5[%c0_230, %c0_231] : memref<1x256xf32, #tpu.memory_space<vmem>>, vector<1x256xf32>
    %204 = vector.broadcast %203 : vector<1x256xf32> to vector<7x256xf32>
    %205 = arith.addf %202, %204 : vector<7x256xf32>
    %cst_232 = arith.constant 0.000000e+00 : f32
    %206 = vector.broadcast %cst_232 : f32 to vector<7x256xf32>
    %207 = arith.maximumf %205, %206 : vector<7x256xf32>
    %208 = arith.truncf %207 : vector<7x256xf32> to vector<7x256xbf16>
    %209 = vector.extract_strided_slice %208 {offsets = [0, 0], sizes = [1, 256], strides = [1, 1]} : vector<7x256xbf16> to vector<1x256xbf16>
    %c0_233 = arith.constant 0 : index
    %c0_234 = arith.constant 0 : index
    %210 = vector.load %arg6[%c0_233, %c0_234] : memref<1792x512xbf16, #tpu.memory_space<vmem>>, vector<256x512xbf16>
    %cst_235 = arith.constant dense<0.000000e+00> : vector<1x512xf32>
    %211 = tpu.matmul %209, %210, %cst_235 {dimension_numbers = #tpu.dot_dimension_numbers<[1], [0], [0], [1], [0, 0, 1, 1], [], []>} : vector<1x256xbf16>, vector<256x512xbf16>, vector<1x512xf32> -> vector<1x512xf32>
    %212 = vector.extract_strided_slice %208 {offsets = [1, 0], sizes = [1, 256], strides = [1, 1]} : vector<7x256xbf16> to vector<1x256xbf16>
    %c256 = arith.constant 256 : index
    %c0_236 = arith.constant 0 : index
    %213 = vector.load %arg6[%c256, %c0_236] : memref<1792x512xbf16, #tpu.memory_space<vmem>>, vector<256x512xbf16>
    %cst_237 = arith.constant dense<0.000000e+00> : vector<1x512xf32>
    %214 = tpu.matmul %212, %213, %cst_237 {dimension_numbers = #tpu.dot_dimension_numbers<[1], [0], [0], [1], [0, 0, 1, 1], [], []>} : vector<1x256xbf16>, vector<256x512xbf16>, vector<1x512xf32> -> vector<1x512xf32>
    %215 = arith.addf %211, %214 : vector<1x512xf32>
    %216 = vector.extract_strided_slice %208 {offsets = [2, 0], sizes = [1, 256], strides = [1, 1]} : vector<7x256xbf16> to vector<1x256xbf16>
    %c512 = arith.constant 512 : index
    %c0_238 = arith.constant 0 : index
    %217 = vector.load %arg6[%c512, %c0_238] : memref<1792x512xbf16, #tpu.memory_space<vmem>>, vector<256x512xbf16>
    %cst_239 = arith.constant dense<0.000000e+00> : vector<1x512xf32>
    %218 = tpu.matmul %216, %217, %cst_239 {dimension_numbers = #tpu.dot_dimension_numbers<[1], [0], [0], [1], [0, 0, 1, 1], [], []>} : vector<1x256xbf16>, vector<256x512xbf16>, vector<1x512xf32> -> vector<1x512xf32>
    %219 = arith.addf %215, %218 : vector<1x512xf32>
    %220 = vector.extract_strided_slice %208 {offsets = [3, 0], sizes = [1, 256], strides = [1, 1]} : vector<7x256xbf16> to vector<1x256xbf16>
    %c768 = arith.constant 768 : index
    %c0_240 = arith.constant 0 : index
    %221 = vector.load %arg6[%c768, %c0_240] : memref<1792x512xbf16, #tpu.memory_space<vmem>>, vector<256x512xbf16>
    %cst_241 = arith.constant dense<0.000000e+00> : vector<1x512xf32>
    %222 = tpu.matmul %220, %221, %cst_241 {dimension_numbers = #tpu.dot_dimension_numbers<[1], [0], [0], [1], [0, 0, 1, 1], [], []>} : vector<1x256xbf16>, vector<256x512xbf16>, vector<1x512xf32> -> vector<1x512xf32>
    %223 = arith.addf %219, %222 : vector<1x512xf32>
    %224 = vector.extract_strided_slice %208 {offsets = [4, 0], sizes = [1, 256], strides = [1, 1]} : vector<7x256xbf16> to vector<1x256xbf16>
    %c1024 = arith.constant 1024 : index
    %c0_242 = arith.constant 0 : index
    %225 = vector.load %arg6[%c1024, %c0_242] : memref<1792x512xbf16, #tpu.memory_space<vmem>>, vector<256x512xbf16>
    %cst_243 = arith.constant dense<0.000000e+00> : vector<1x512xf32>
    %226 = tpu.matmul %224, %225, %cst_243 {dimension_numbers = #tpu.dot_dimension_numbers<[1], [0], [0], [1], [0, 0, 1, 1], [], []>} : vector<1x256xbf16>, vector<256x512xbf16>, vector<1x512xf32> -> vector<1x512xf32>
    %227 = arith.addf %223, %226 : vector<1x512xf32>
    %228 = vector.extract_strided_slice %208 {offsets = [5, 0], sizes = [1, 256], strides = [1, 1]} : vector<7x256xbf16> to vector<1x256xbf16>
    %c1280 = arith.constant 1280 : index
    %c0_244 = arith.constant 0 : index
    %229 = vector.load %arg6[%c1280, %c0_244] : memref<1792x512xbf16, #tpu.memory_space<vmem>>, vector<256x512xbf16>
    %cst_245 = arith.constant dense<0.000000e+00> : vector<1x512xf32>
    %230 = tpu.matmul %228, %229, %cst_245 {dimension_numbers = #tpu.dot_dimension_numbers<[1], [0], [0], [1], [0, 0, 1, 1], [], []>} : vector<1x256xbf16>, vector<256x512xbf16>, vector<1x512xf32> -> vector<1x512xf32>
    %231 = arith.addf %227, %230 : vector<1x512xf32>
    %232 = vector.extract_strided_slice %208 {offsets = [6, 0], sizes = [1, 256], strides = [1, 1]} : vector<7x256xbf16> to vector<1x256xbf16>
    %c1536 = arith.constant 1536 : index
    %c0_246 = arith.constant 0 : index
    %233 = vector.load %arg6[%c1536, %c0_246] : memref<1792x512xbf16, #tpu.memory_space<vmem>>, vector<256x512xbf16>
    %cst_247 = arith.constant dense<0.000000e+00> : vector<1x512xf32>
    %234 = tpu.matmul %232, %233, %cst_247 {dimension_numbers = #tpu.dot_dimension_numbers<[1], [0], [0], [1], [0, 0, 1, 1], [], []>} : vector<1x256xbf16>, vector<256x512xbf16>, vector<1x512xf32> -> vector<1x512xf32>
    %235 = arith.addf %231, %234 : vector<1x512xf32>
    %c0_248 = arith.constant 0 : index
    %c0_249 = arith.constant 0 : index
    %236 = vector.load %arg7[%c0_248, %c0_249] : memref<1x512xf32, #tpu.memory_space<vmem>>, vector<1x512xf32>
    %237 = arith.addf %235, %236 : vector<1x512xf32>
    %cst_250 = arith.constant 0.000000e+00 : f32
    %238 = vector.broadcast %cst_250 : f32 to vector<1x512xf32>
    %239 = arith.maximumf %237, %238 : vector<1x512xf32>
    %240 = arith.truncf %239 : vector<1x512xf32> to vector<1x512xbf16>
    %c0_251 = arith.constant 0 : index
    %c0_252 = arith.constant 0 : index
    %241 = vector.load %arg8[%c0_251, %c0_252] : memref<512x10xbf16, #tpu.memory_space<vmem>>, vector<512x10xbf16>
    %cst_253 = arith.constant dense<0.000000e+00> : vector<1x10xf32>
    %242 = tpu.matmul %240, %241, %cst_253 {dimension_numbers = #tpu.dot_dimension_numbers<[1], [0], [0], [1], [0, 0, 1, 1], [], []>} : vector<1x512xbf16>, vector<512x10xbf16>, vector<1x10xf32> -> vector<1x10xf32>
    %c0_254 = arith.constant 0 : index
    %c0_255 = arith.constant 0 : index
    %243 = vector.load %arg9[%c0_254, %c0_255] : memref<1x10xf32, #tpu.memory_space<vmem>>, vector<1x10xf32>
    %244 = arith.addf %242, %243 : vector<1x10xf32>
    %c0_256 = arith.constant 0 : index
    %c0_257 = arith.constant 0 : index
    %c0_258 = arith.constant 0 : index
    %245 = vector.load %arg10[%c0_256, %c0_257, %c0_258] : memref<1x1x10xf32, #tpu.memory_space<vmem>>, vector<1x1x10xf32>
    %246 = vector.shape_cast %245 : vector<1x1x10xf32> to vector<1x10xf32>
    %247 = vector.shape_cast %244 : vector<1x10xf32> to vector<1x1x10xf32>
    tpu.vector_store %arg10[%c0_256, %c0_257, %c0_258], %247 {strides = array<i32>} : memref<1x1x10xf32, #tpu.memory_space<vmem>>, vector<1x1x10xf32>,
    return
  }
  func.func @transform_0(%arg0: i32) -> (i32, i32, i32, i32) {
    %c0_i32 = arith.constant 0 : i32
    %c0_i32_0 = arith.constant 0 : i32
    %c0_i32_1 = arith.constant 0 : i32
    %c0_i32_2 = arith.constant 0 : i32
    return %arg0, %c0_i32, %c0_i32_0, %c0_i32_1 : i32, i32, i32, i32
  }
  func.func @transform_1(%arg0: i32) -> (i32, i32, i32) {
    %c0_i32 = arith.constant 0 : i32
    %c0_i32_0 = arith.constant 0 : i32
    %c0_i32_1 = arith.constant 0 : i32
    %c0_i32_2 = arith.constant 0 : i32
    return %c0_i32, %c0_i32_0, %c0_i32_1 : i32, i32, i32
  }
  func.func @transform_2(%arg0: i32) -> (i32, i32) {
    %c0_i32 = arith.constant 0 : i32
    %c0_i32_0 = arith.constant 0 : i32
    %c0_i32_1 = arith.constant 0 : i32
    return %c0_i32, %c0_i32_0 : i32, i32
  }
  func.func @transform_3(%arg0: i32) -> (i32, i32, i32) {
    %c0_i32 = arith.constant 0 : i32
    %c0_i32_0 = arith.constant 0 : i32
    %c0_i32_1 = arith.constant 0 : i32
    %c0_i32_2 = arith.constant 0 : i32
    return %c0_i32, %c0_i32_0, %c0_i32_1 : i32, i32, i32
  }
  func.func @transform_4(%arg0: i32) -> (i32, i32) {
    %c0_i32 = arith.constant 0 : i32
    %c0_i32_0 = arith.constant 0 : i32
    %c0_i32_1 = arith.constant 0 : i32
    return %c0_i32, %c0_i32_0 : i32, i32
  }
  func.func @transform_5(%arg0: i32) -> (i32, i32) {
    %c0_i32 = arith.constant 0 : i32
    %c0_i32_0 = arith.constant 0 : i32
    %c0_i32_1 = arith.constant 0 : i32
    return %c0_i32, %c0_i32_0 : i32, i32
  }
  func.func @transform_6(%arg0: i32) -> (i32, i32) {
    %c0_i32 = arith.constant 0 : i32
    %c0_i32_0 = arith.constant 0 : i32
    %c0_i32_1 = arith.constant 0 : i32
    return %c0_i32, %c0_i32_0 : i32, i32
  }
  func.func @transform_7(%arg0: i32) -> (i32, i32) {
    %c0_i32 = arith.constant 0 : i32
    %c0_i32_0 = arith.constant 0 : i32
    %c0_i32_1 = arith.constant 0 : i32
    return %c0_i32, %c0_i32_0 : i32, i32
  }
  func.func @transform_8(%arg0: i32) -> (i32, i32) {
    %c0_i32 = arith.constant 0 : i32
    %c0_i32_0 = arith.constant 0 : i32
    %c0_i32_1 = arith.constant 0 : i32
    return %c0_i32, %c0_i32_0 : i32, i32
  }
  func.func @transform_9(%arg0: i32) -> (i32, i32, i32) {
    %c0_i32 = arith.constant 0 : i32
    %c0_i32_0 = arith.constant 0 : i32
    %c0_i32_1 = arith.constant 0 : i32
    return %arg0, %c0_i32, %c0_i32_0 : i32, i32, i32
  }
}

</mosaic_0001>

<bundles_post_ra>
// kernel: ptmnist_forward.1
= control target key start
LH: loop header
LB: loop body
LE: loop exit
PB: predicated region body
PF: predicated region fallthrough
CT: control target
= control target key end

     0   :  { %s13627_s0 = inlined_call_operand.vmem [shape: bf16[2,4,8,28], index: 0, kind: input, shape index: {}]   ;;  %s13628_s1 = inlined_call_operand.hbm [shape: bf16[5,28,512], index: 1, kind: input, shape index: {}]   ;;  %s13629_s2 = inlined_call_operand.hbm [shape: f32[1,256], index: 2, kind: input, shape index: {}]   ;;  %s13630_s3 = inlined_call_operand.hbm [shape: bf16[5,256,512], index: 3, kind: input, shape index: {}]   ;;  %s13631_s4 = inlined_call_operand.hbm [shape: f32[1,256], index: 4, kind: input, shape index: {}]   ;;  %s13632_s5 = inlined_call_operand.hbm [shape: bf16[1792,512], index: 5, kind: input, shape index: {}]   ;;  %s13633_s6 = inlined_call_operand.hbm [shape: f32[1,512], index: 6, kind: input, shape index: {}]   ;;  %s13634_s7 = inlined_call_operand.vmem [shape: bf16[512,10], index: 7, kind: input, shape index: {}]   ;;  %s13635_s8 = inlined_call_operand.hbm [shape: f32[1,10], index: 8, kind: input, shape index: {}]   ;;  %s13636_s9 = inlined_call_operand.hbm [shape: f32[2,1,10], index: 9, kind: output, shape index: {}]  }
   0x1   :  { %13710 = sst [smem:[#allocation88_spill]] %s13629_s2 }
   0x2   :  { %14 = vsyncpa [#allocation5], 0 }
   0x3   :  { %15 = vsyncpa [#allocation8], 0 }
   0x4   :  { %16 = vsyncpa [#allocation11], 0 }
   0x5   :  { %17 = vsyncpa [#allocation14], 0 }
   0x6   :  { %18 = vsyncpa [#allocation6], 0 }
   0x7   :  { %20 = vsyncpa [#allocation6 + $0x1], 0  ;;  %s12194_s30 = smov 0   ;;  %s12196_s10 = smov 0  }
   0x8   :  { %s12198_s11 = smov 0   ;;  %s12200_s12 = smov 0  }
   0x9 LB: > { %s12215_s13 = sadd.s32 4294967295, %s12131_s12   ;;  %s9250_s14 = sadd.s32 4294967294, %s12131_s12   ;;  %s12131_s12 = sphi %s12200_s12, %s13871_s12   ;;  %s12127_s11 = sphi %s12198_s11, %s13870_s11   ;;  %s12123_s10 = sphi %s12196_s10, %s13869_s10   ;;  %s12119_s30 = sphi %s12194_s30, %s13868_s30  }
   0xa   : > { %s12219_s15 = sadd.s32 1, %s12131_s12   ;;  %s227_s16 = sadd.s32 1, %s12127_s11 }
   0xb   : > { %s224_s17 = ssub.s32 %s12131_s12, %s12219_s15  ;;  %p237_p0 = scmp.ne.s32.totalorder %s12127_s11, %s12123_s10 }
   0xc   : > { %p225_p1 = scmp.eq.s32.totalorder %s224_s17, 0  ;;  %p238_p2 = scmp.eq.s32.totalorder %s12215_s13, 1 }
   0xd   : > { %p243_p3 = scmp.ne.s32.totalorder %s12123_s10, %s12119_s30  ;;  %p244_p4 = scmp.eq.s32.totalorder %s9250_s14, 1 }
   0xe   : > { %s12230_s18 = scalar_select %p225_p1, %s12127_s11, %s227_s16  }
   0xf   : > { %p12232_p5 = por %p238_p2, %p237_p0  ;;  %p12236_p6 = por %p244_p4, %p243_p3 }
  0x10   : > { %p9251_p7 = scmp.ge.s32.totalorder %s12131_s12, 1  ;;  %p251_p8 = scmp.lt.s32.totalorder %s12131_s12, 3 }
  0x11   : > { %s13711_s19 = scalar_select %p12232_p5, 1, 0 }
  0x12   : > { %s13712_s20 = scalar_select %p12236_p6, 1, 0 }
  0x13   : > { %p13637_p9 = scmp.eq.s32.totalorder %s12215_s13, 0  ;;  %p12243_p10 = pnand %p9251_p7, %p251_p8 }
  0x14   : > { %s12133_s22 = smov [#allocation7]   ;;  %s12134_s24 = smov [#allocation10]  }
  0x15   : > { %s13713_s21 = scalar_select %p12243_p10, 1, 0 }
  0x16   : > { %s277_s23 = sshll.u32 %s12133_s22, 4  ;;  %p10287_p11 = pneg %p12243_p10  ;;  %s278_s23 = int_to_ptr.vmem [resolvable:$true] %s277_s23 }
  0x17   : > { %s301_s25 = sshll.u32 %s12134_s24, 4  ;;  %s12135_s27 = smov [#allocation13]   ;;  %s302_s25 = int_to_ptr.vmem [resolvable:$true] %s301_s25 }
  0x18   : > { %p12251_p12 = pnand %p13637_p9, %p10287_p11  ;;  %s325_s28 = sshll.u32 %s12135_s27, 4  ;;  %s12255_s28 = int_to_ptr.vmem [resolvable:$true] %s325_s28 }
  0x19   : > { %s11884_s14 = scalar_lea.vmem %s278_s23, 32  ;;  %p11892_p3 = scmp.lt.s32.totalorder %s278_s23, %s278_s23 }
  0x1a   : > { %p12259_p13 = pneg %p12251_p12  ;;  %p11885_p0 = scmp.ne.s32.totalorder %s278_s23, %s11884_s14 }
  0x1b   : > { %p11893_p4 = scmp.lt.s32.totalorder %s11884_s14, %s11884_s14 }
  0x1c   : > { %p11887_p1 = pnand %p11885_p0, %p12259_p13 }
  0x1d   : > { %p11894_p7 = por %p11893_p4, %p11892_p3 }
  0x1e   : > { %p11888_p2 = pneg %p11887_p1 }
  0x20   : > { %p11895_p8 = pnand %p11894_p7, %p11888_p2 }
  0x22   : > { %11898 = shalt.err (!%p11895_p8)
}
  0x23   : > { %s13716_s2 = sld [smem:[#allocation88_spill]]  ;;  %s11910_s22 = scalar_lea.vmem %s302_s25, 32 }
  0x24   : > { %p11911_p11 = scmp.ne.s32.totalorder %s302_s25, %s11910_s22  ;;  %p11918_p5 = scmp.lt.s32.totalorder %s302_s25, %s302_s25 }
  0x25   : > { %p11919_p0 = scmp.lt.s32.totalorder %s11910_s22, %s11910_s22 }
  0x26   : > { %p11913_p9 = pnand %p11911_p11, %p12259_p13 }
  0x27   : > { %p11920_p1 = por %p11919_p0, %p11918_p5 }
  0x28   : > { %p11914_p6 = pneg %p11913_p9 }
  0x29   : > { %10293 = dma.hbm_to_vmem [thread:$0]  (!%p12251_p12), %s13716_s2, 32, %s278_s23, [#allocation8]  }
  0x2a   : > { %p11921_p10 = pnand %p11920_p1, %p11914_p6 }
  0x2c   : > { %11924 = shalt.err (!%p11921_p10)
}
  0x2d   : > { %10299 = dma.hbm_to_vmem [thread:$0]  (!%p12251_p12), %s13631_s4, 32, %s302_s25, [#allocation11]  }
  0x2e   : > { %s11936_s23 = scalar_lea.vmem %s12255_s28, 64  ;;  %p11944_p4 = scmp.lt.s32.totalorder %s12255_s28, %s12255_s28 }
  0x2f   : > { %p11937_p2 = scmp.ne.s32.totalorder %s12255_s28, %s11936_s23  ;;  %p11945_p5 = scmp.lt.s32.totalorder %s11936_s23, %s11936_s23 }
  0x31   : > { %p11939_p3 = pnand %p11937_p2, %p12259_p13  ;;  %p11946_p6 = por %p11945_p5, %p11944_p4 }
  0x33   : > { %p11940_p9 = pneg %p11939_p3 }
  0x35   : > { %p11947_p10 = pnand %p11946_p6, %p11940_p9 }
  0x37   : > { %11950 = shalt.err (!%p11947_p10)
}
  0x38   : > { %10305 = dma.hbm_to_vmem [thread:$0]  (!%p12251_p12), %s13633_s6, 64, %s12255_s28, [#allocation14]  }
  0x39   : > { %s12136_s25 = smov [#allocation4]  }
  0x3a   : > { %s263_s17 = sshll.u32 %s12136_s25, 4  ;;  %s264_s17 = int_to_ptr.vmem [resolvable:$true] %s263_s17 }
  0x3b   : > { %s11962_s22 = scalar_lea.vmem %s264_s17, 5120  ;;  %p11970_p0 = scmp.lt.s32.totalorder %s264_s17, %s264_s17 }
  0x3c   : > { %p11963_p7 = scmp.ne.s32.totalorder %s264_s17, %s11962_s22  ;;  %p11971_p1 = scmp.lt.s32.totalorder %s11962_s22, %s11962_s22 }
  0x3e   : > { %p11965_p8 = pnand %p11963_p7, %p12259_p13  ;;  %p11972_p2 = por %p11971_p1, %p11970_p0 }
  0x40   : > { %p11966_p11 = pneg %p11965_p8 }
  0x42   : > { %p11973_p3 = pnand %p11972_p2, %p11966_p11 }
  0x44   : > { %11976 = shalt.err (!%p11973_p3)
}
  0x45   : > { %s12137_s24 = smov 256   ;;  %s12138_s27 = smov 16  }
  0x46   : > { %10290 = dma.hbm_to_vmem [thread:$0]  (!%p12251_p12), %s13628_s1, 5120, %s264_s17, [#allocation5], %s12137_s24, %s12137_s24, %s12138_s27  }
  0x47   : > { %s12139_s14 = smov [#allocation9]   ;;  %s12140_s25 = smov [#allocation12]  }
  0x48   : > { %s287_s16 = sshll.u32 %s12139_s14, 4  ;;  %s311_s2 = sshll.u32 %s12140_s25, 4  ;;  %s288_s16 = int_to_ptr.vmem [resolvable:$true] %s287_s16  ;;  %s312_s2 = int_to_ptr.vmem [resolvable:$true] %s311_s2 }
  0x49   : > { %s11988_s22 = scalar_lea.vmem %s288_s16, 40960  ;;  %p11996_p6 = scmp.lt.s32.totalorder %s288_s16, %s288_s16 }
  0x4a   : > { %p11989_p9 = scmp.ne.s32.totalorder %s288_s16, %s11988_s22  ;;  %p11997_p10 = scmp.lt.s32.totalorder %s11988_s22, %s11988_s22 }
  0x4c   : > { %p11991_p4 = pnand %p11989_p9, %p12259_p13  ;;  %p11998_p7 = por %p11997_p10, %p11996_p6 }
  0x4e   : > { %p11992_p5 = pneg %p11991_p4 }
  0x50   : > { %p11999_p8 = pnand %p11998_p7, %p11992_p5 }
  0x52   : > { %12002 = shalt.err (!%p11999_p8)
}
  0x53   : > { %10296 = dma.hbm_to_vmem [thread:$0]  (!%p12251_p12), %s13630_s3, 40960, %s288_s16, [#allocation8], %s12137_s24, %s12137_s24, %s12138_s27  }
  0x54   : > { %s12014_s23 = scalar_lea.vmem %s312_s2, 57344  ;;  %p12022_p2 = scmp.lt.s32.totalorder %s312_s2, %s312_s2 }
  0x55   : > { %p12015_p11 = scmp.ne.s32.totalorder %s312_s2, %s12014_s23  ;;  %p12023_p3 = scmp.lt.s32.totalorder %s12014_s23, %s12014_s23 }
  0x57   : > { %p12017_p0 = pnand %p12015_p11, %p12259_p13  ;;  %p12024_p9 = por %p12023_p3, %p12022_p2 }
  0x59   : > { %p12018_p1 = pneg %p12017_p0 }
  0x5b   : > { %p12025_p4 = pnand %p12024_p9, %p12018_p1 }
  0x5d   : > { %12028 = shalt.err (!%p12025_p4)
}
  0x5e   : > { %10302 = dma.hbm_to_vmem [thread:$0]  (!%p12251_p12), %s13632_s5, 57344, %s312_s2, [#allocation11], %s12137_s24, %s12137_s24, %s12138_s27  }
  0x5f   : > { %s12141_s16 = smov [#allocation15]  }
  0x60   : > { %s339_s22 = sshll.u32 %s12141_s16, 4  ;;  %s340_s22 = int_to_ptr.vmem [resolvable:$true] %s339_s22 }
  0x61   : > { %s12040_s17 = scalar_lea.vmem %s340_s22, 16  ;;  %s12047_s28 = scalar_lea.vmem %s340_s22, 32 }
  0x62   : > { %p12041_p5 = scmp.ne.s32.totalorder %s340_s22, %s12040_s17  ;;  %p12048_p7 = scmp.lt.s32.totalorder %s340_s22, %s340_s22 }
  0x63   : > { %p12049_p8 = scmp.lt.s32.totalorder %s12047_s28, %s12040_s17 }
  0x64   : > { %p12043_p6 = pnand %p12041_p5, %p12259_p13 }
  0x65   : > { %p12050_p11 = por %p12049_p8, %p12048_p7 }
  0x66   : > { %p12044_p10 = pneg %p12043_p6 }
  0x68   : > { %p12051_p0 = pnand %p12050_p11, %p12044_p10 }
  0x6a   : > { %12054 = shalt.err (!%p12051_p0)
}
  0x6b   : > { %10308 = dma.hbm_to_vmem [thread:$0]  (!%p12251_p12), %s13635_s8, 16, %s340_s22, [#allocation14]  }
  0x6c   : > { %p13717_p1 = scmp.ne.s32.totalorder %s13713_s21, 0 }
  0x6e   : > { %360 = sbr.rel (%p13717_p1) target bundleno = 2097 (0x831), region = 56 }
  0x73   : > { %p13718_p2 = scmp.eq.s32.totalorder %s12215_s13, 0 }
  0x75   : > { %12098 = dma.done.wait (%p13718_p2), [#allocation5], 5120   ;;  %p13719_p13 = pmov %p13718_p2 }
  0x76   : > { %p13720_p3 = pmov %p13718_p2 }
  0x77   : > { %12100 = vsyncadd (%p13719_p13), [#allocation5], 4294962176 }
  0x78   : > { %12102 = dma.done.wait (%p13720_p3), [#allocation8], 40992   ;;  %p13721_p9 = pmov %p13718_p2 }
  0x79   : > { %p13722_p4 = pmov %p13718_p2 }
  0x7a   : > { %12104 = vsyncadd (%p13721_p9), [#allocation8], 4294926304 }
  0x7b   : > { %12106 = dma.done.wait (%p13722_p4), [#allocation11], 57376   ;;  %p13723_p12 = pmov %p13718_p2 }
  0x7c   : > { %p13724_p5 = pmov %p13718_p2 }
  0x7d   : > { %12108 = vsyncadd (%p13723_p12), [#allocation11], 4294909920 }
  0x7e   : > { %12110 = dma.done.wait (%p13724_p5), [#allocation14], 80   ;;  %p13725_p6 = pmov %p13718_p2 }
  0x7f   : > { %p419_p10 = scmp.lt.s32.totalorder %s12215_s13, 1  ;;  %v12142_v0 = vmov 0   ;;  %vm485_vm0 = vcmask 1045504   ;;  %v12348_v1 = vld [vmem:[#allocation4 + $0x64] ss:$16 sps:$4 sm:$0x3f]  }
  0x80   : > { %12112 = vsyncadd (%p13725_p6), [#allocation14], 4294967216  ;;  %530 = vmatprep.mubr.bf16.mxu0 %v12142_v0  ;;  %571 = vmatprep.mubr.bf16.mxu1 %v12142_v0  ;;  %v12350_v2 = vld [vmem:[#allocation4 + $0x6c] ss:$16 sps:$4 sm:$0x3f]   ;;  %vm481_vm1 = vcmask 228352  }
  0x81   : > { %s420_s2 = scalar_select %p419_p10, %s12215_s13, 1  ;;  %9279 = vmatprep.subr.msk.bf16.mxu0 %vm485_vm0, %v12348_v1  ;;  %v10374_v3 = vld [vmem:[#allocation4 + $0x60] ss:$16 sps:$4 sm:$0x3f]   ;;  %9281 = vmatprep.subr.msk.bf16.mxu1 %vm485_vm0, %v12350_v2  ;;  %v12356_v5 = vld [vmem:[#allocation4 + $0x44] ss:$16 sps:$4 sm:$0xff]  }
  0x82   : > { %v10375_v4 = vld [vmem:[#allocation4 + $0x68] ss:$16 sps:$4 sm:$0x3f]   ;;  %v12359_v6 = vsel %vm485_vm0, %v10374_v3, 0  ;;  %v12364_v8 = vld [vmem:[#allocation4 + $0x4c] ss:$16 sps:$4 sm:$0xff]  }
  0x83   : > { %s10210_s21 = sshll.u32 %s420_s2, 4  ;;  %v12362_v7 = vsel %vm485_vm0, %v10375_v4, 0  ;;  %511 = vmatpush1.bf16.msra.mxu0 %v12359_v6  ;;  %v12368_v9 = vld [vmem:[#allocation4 + $0x40] ss:$16 sps:$4 sm:$0xff]   ;;  %v12370_v10 = vld [vmem:[#allocation4 + $0x48] ss:$16 sps:$4 sm:$0xff]  }
  0x84   : > { %552 = vmatpush1.bf16.msra.mxu1 %v12362_v7  ;;  %s12375_s24 = scalar_lea.vmem %s13627_s0, %s10210_s21  ;;  %512 = vmatprep.subr.bf16.mxu0 %v12356_v5  ;;  %v12379_v11 = vld [vmem:[#allocation4 + $0x24] ss:$16 sps:$4 sm:$0x3f]   ;;  %v12384_v13 = vld [vmem:[#allocation4 + $0x2c] ss:$16 sps:$4 sm:$0x3f]  }
  0x85   : > { %553 = vmatprep.subr.bf16.mxu1 %v12364_v8  ;;  %v12382_v12 = vld [vmem:[%s12375_s24 + $0x4] sm:$0xf]  ;;  %v10387_v14 = vld [vmem:[#allocation4 + $0x20] ss:$16 sps:$4 sm:$0x3f]   ;;  %vm2507_vm2 = vcmask 1040384  }
  0x86   : > { %v10388_v15 = vld [vmem:[#allocation4 + $0x28] ss:$16 sps:$4 sm:$0x3f]   ;;  %v12392_v16 = vld [vmem:[#allocation4 + $0x4] ss:$16 sps:$4 sm:$0xff]   ;;  %v12395_v17 = vsel %vm485_vm0, %v10387_v14, 0  ;;  %v9350_v60 = vcombine.low %v12382_v12, %v12382_v12 }
  0x87   : > { %513 = vmatpush1.bf16.msra.mxu0 %v12368_v9  ;;  %v12398_v18 = vsel %vm485_vm0, %v10388_v15, 0  ;;  %v12400_v19 = vld [vmem:[#allocation4 + $0xc] ss:$16 sps:$4 sm:$0xff]   ;;  %v12406_v20 = vld [vmem:[#allocation4] ss:$16 sps:$4 sm:$0xff]   ;;  %vm2510_vm4 = vcmask 1044484  }
  0x88   : > { %554 = vmatpush1.bf16.msra.mxu1 %v12370_v10  ;;  %9291 = vmatprep.subr.msk.bf16.mxu0 %vm485_vm0, %v12379_v11  ;;  %v12408_v21 = vld [vmem:[#allocation4 + $0x8] ss:$16 sps:$4 sm:$0xff]   ;;  %v12412_v22 = vld [vmem:[#allocation4 + $0xa4] ss:$16 sps:$4 sm:$0x3f]   ;;  %v1509_v61 = vshll.u32 %v9350_v60, 16 }
  0x89   : > { %9293 = vmatprep.subr.msk.bf16.mxu1 %vm485_vm0, %v12384_v13  ;;  %v12416_v23 = vld [vmem:[#allocation4 + $0xac] ss:$16 sps:$4 sm:$0x3f]   ;;  %v10400_v24 = vld [vmem:[#allocation4 + $0xa0] ss:$16 sps:$4 sm:$0x3f]  }
  0x8a   : > { %9280 = vmatmul.mubr.msk.bf16.vlgmr.msra.gmra.mxu0 %vm481_vm1, %v12382_v12  ;;  %v425_v25 = vld [vmem:[%s12375_s24] sm:$0xf]  ;;  %v10401_v26 = vld [vmem:[#allocation4 + $0xa8] ss:$16 sps:$4 sm:$0x3f]   ;;  %v12430_v28 = vsel %vm485_vm0, %v10400_v24, 0 }
  0x8b   : > { %9282 = vmatmul.mubr.msk.bf16.vlgmr.msra.gmra.mxu1 %vm481_vm1, %v12382_v12  ;;  %644 = vmatpush1.bf16.msra.mxu0 %v12395_v17  ;;  %v12423_v27 = vld [vmem:[#allocation4 + $0x84] ss:$16 sps:$4 sm:$0xff]   ;;  %v12433_v29 = vsel %vm485_vm0, %v10401_v26, 0  ;;  %v12435_v30 = vld [vmem:[#allocation4 + $0x8c] ss:$16 sps:$4 sm:$0xff]   ;;  %v9321_v44 = vcombine.low %v425_v25, %v425_v25  ;;  %v1507_v62 = vshrl.u32 %v9350_v60, 16 }
  0x8c   : > { %685 = vmatpush1.bf16.msra.mxu1 %v12398_v18  ;;  %645 = vmatprep.subr.bf16.mxu0 %v12392_v16  ;;  %v12437_v31 = vld [vmem:[#allocation4 + $0x80] ss:$16 sps:$4 sm:$0xff]   ;;  %v12441_v32 = vld [vmem:[#allocation4 + $0x88] ss:$16 sps:$4 sm:$0xff]   ;;  %v12461_v39 = vld [vmem:[#allocation4 + $0xc4] ss:$16 sps:$4 sm:$0xff]  }
  0x8d   : > { %686 = vmatprep.subr.bf16.mxu1 %v12400_v19  ;;  %663 = vmatprep.mubr.bf16.mxu0 %v12142_v0  ;;  %v12443_v33 = vld [vmem:[#allocation4 + $0xe4] ss:$16 sps:$4 sm:$0x3f]   ;;  %v12447_v34 = vld [vmem:[#allocation4 + $0xec] ss:$16 sps:$4 sm:$0x3f]  }
  0x8e   : > { %704 = vmatprep.mubr.bf16.mxu1 %v12142_v0  ;;  %v10412_v35 = vld [vmem:[#allocation4 + $0xe0] ss:$16 sps:$4 sm:$0x3f]   ;;  %v10413_v36 = vld [vmem:[#allocation4 + $0xe8] ss:$16 sps:$4 sm:$0x3f]  }
  0x8f   : > { %646 = vmatpush1.bf16.msra.mxu0 %v12406_v20  ;;  %v12454_v37 = vld [vmem:[%s12375_s24 + $0x8] sm:$0xf]  ;;  %v12459_v38 = vsel %vm485_vm0, %v10412_v35, 0  ;;  %v12468_v40 = vsel %vm485_vm0, %v10413_v36, 0  ;;  %v12470_v41 = vld [vmem:[#allocation4 + $0xcc] ss:$16 sps:$4 sm:$0xff]  }
  0x90   : > { %687 = vmatpush1.bf16.msra.mxu1 %v12408_v21  ;;  %9304 = vmatprep.subr.msk.bf16.mxu0 %vm485_vm0, %v12412_v22  ;;  %v12472_v42 = vld [vmem:[#allocation4 + $0xc0] ss:$16 sps:$4 sm:$0xff]   ;;  %v12474_v43 = vld [vmem:[#allocation4 + $0xc8] ss:$16 sps:$4 sm:$0xff]   ;;  %v12489_v49 = vld [vmem:[%s12375_s24 + $0xc] sm:$0xf] }
  0x91   : > { %9306 = vmatprep.subr.msk.bf16.mxu1 %vm485_vm0, %v12416_v23  ;;  %v12480_v45 = vld [vmem:[#allocation4 + $0x124] ss:$16 sps:$4 sm:$0x3f]   ;;  %v12482_v46 = vld [vmem:[#allocation4 + $0x12c] ss:$16 sps:$4 sm:$0x3f]  }
  0x92   : > { %9292 = vmatmul.mubr.msk.bf16.vlgmr.msra.gmra.mxu0 %vm481_vm1, %v425_v25  ;;  %v10424_v47 = vld [vmem:[#allocation4 + $0x120] ss:$16 sps:$4 sm:$0x3f]   ;;  %v10425_v48 = vld [vmem:[#allocation4 + $0x128] ss:$16 sps:$4 sm:$0x3f]  }
  0x93   : > { %9294 = vmatmul.mubr.msk.bf16.vlgmr.msra.gmra.mxu1 %vm481_vm1, %v425_v25  ;;  %788 = vmatpush1.bf16.msra.mxu0 %v12430_v28  ;;  %v1024_v50 = vshll.u32 %v9321_v44, 16  ;;  %v12493_v51 = vld [vmem:[#allocation4 + $0x104] ss:$16 sps:$4 sm:$0xff]   ;;  %v12495_v52 = vld [vmem:[#allocation4 + $0x10c] ss:$16 sps:$4 sm:$0xff]   ;;  %v12504_v53 = vsel %vm485_vm0, %v10424_v47, 0 }
  0x94   : > { %829 = vmatpush1.bf16.msra.mxu1 %v12433_v29  ;;  %789 = vmatprep.subr.bf16.mxu0 %v12423_v27  ;;  %v12507_v54 = vsel %vm485_vm0, %v10425_v48, 0  ;;  %v12509_v55 = vld [vmem:[#allocation4 + $0x100] ss:$16 sps:$4 sm:$0xff]   ;;  %v12511_v56 = vld [vmem:[#allocation4 + $0x108] ss:$16 sps:$4 sm:$0xff]   ;;  %v1022_v57 = vshrl.u32 %v9321_v44, 16  ;;  %v1608_v44 = vlaneseq }
  0x95   : > { %830 = vmatprep.subr.bf16.mxu1 %v12435_v30  ;;  %807 = vmatprep.mubr.bf16.mxu0 %v12142_v0  ;;  %v1026_v58 = vrot.slane %v1024_v50, 1  ;;  %v1511_v63 = vrot.slane %v1509_v61, 1  ;;  %v11629_v14 = vld [vmem:[#allocation4 + $0x48] ss:$16 sps:$4 sm:$0xff]   ;;  %vm2508_vm3 = vsmask.f32 256 }
  0x96   : > { %848 = vmatprep.mubr.bf16.mxu1 %v12142_v0  ;;  %v11630_v15 = vld [vmem:[#allocation4 + $0x24] ss:$16 sps:$4 sm:$0x3f]   ;;  %v11641_v24 = vld [vmem:[#allocation4 + $0x88] ss:$16 sps:$4 sm:$0xff]   ;;  %vm12748_vm6 = vmand %vm2507_vm2, %vm2508_vm3  ;;  %vm2530_vm9 = vcmask 1043456  }
  0x97   : > { %790 = vmatpush1.bf16.msra.mxu0 %v12437_v31  ;;  %v12523_v59 = vor.u32 %v1026_v58, %v1022_v57  ;;  %v12607_v3 = vor.u32 %v1511_v63, %v1507_v62  ;;  %v11642_v25 = vld [vmem:[#allocation4 + $0xe4] ss:$16 sps:$4 sm:$0x3f]   ;;  %v11643_v26 = vld [vmem:[#allocation4 + $0xec] ss:$16 sps:$4 sm:$0x3f]  }
  0x98   : > { %831 = vmatpush1.bf16.msra.mxu1 %v12441_v32  ;;  %9317 = vmatprep.subr.msk.bf16.mxu0 %vm485_vm0, %v12443_v33  ;;  %v11650_v35 = vld [vmem:[#allocation4 + $0x12c] ss:$16 sps:$4 sm:$0x3f]   ;;  %vm2511_vm5 = vsmask.f32 4352  ;;  %vm2533_vm11 = vcmask 1047556  }
  0x99   : > { %9319 = vmatprep.subr.msk.bf16.mxu1 %vm485_vm0, %v12447_v34  ;;  %vm12752_vm7 = vmand %vm2510_vm4, %vm2511_vm5  ;;  %v10439_v47 = vld [vmem:[#allocation9 + $0x2ec] ss:$16 sps:$4 sm:$0xff]   ;;  %v10434_v48 = vld [vmem:[#allocation9 + $0x2e0] ss:$16 sps:$4 sm:$0xff]   ;;  %vm2531_vm10 = vsmask.f32 7938 }
  0x9a   : > { %9305 = vmatmul.mubr.msk.bf16.vlgmr.msra.gmra.mxu0 %vm481_vm1, %v12454_v37  ;;  %vm2513_vm8 = vmor %vm12752_vm7, %vm12748_vm6  ;;  %v10442_v50 = vld [vmem:[#allocation9 + $0x2c4] ss:$16 sps:$4 sm:$0xff]   ;;  %v10449_v57 = vld [vmem:[#allocation9 + $0x2a8] ss:$16 sps:$4 sm:$0xff]   ;;  %vm2534_vm12 = vsmask.f32 7954 }
  0x9b   : > { %9307 = vmatmul.mubr.msk.bf16.vlgmr.msra.gmra.mxu1 %vm481_vm1, %v12454_v37  ;;  %936 = vmatpush1.bf16.msra.mxu0 %v12459_v38  ;;  %v10454_v58 = vld [vmem:[#allocation9 + $0x284] ss:$16 sps:$4 sm:$0xff]   ;;  %v10452_v60 = vld [vmem:[#allocation9 + $0x280] ss:$16 sps:$4 sm:$0xff]   ;;  %v10455_v61 = vld [vmem:[#allocation9 + $0x288] ss:$16 sps:$4 sm:$0xff]  }
  0x9c   : > { %977 = vmatpush1.bf16.msra.mxu1 %v12468_v40  ;;  %937 = vmatprep.subr.bf16.mxu0 %v12461_v39  ;;  %v10460_v62 = vld [vmem:[#allocation9 + $0x264] ss:$16 sps:$4 sm:$0xff]   ;;  %v10463_v63 = vld [vmem:[#allocation9 + $0x26c] ss:$16 sps:$4 sm:$0xff]   ;;  %vm12816_vm13 = vmand %vm2530_vm9, %vm2531_vm10  ;;  %s10207_s27 = sshll.u32 %s12215_s13, 4  ;;  %p13866_p8 = scmp.ne.s32.totalorder %s13711_s19, 0 }
  0x9d   : > { %978 = vmatprep.subr.bf16.mxu1 %v12470_v41  ;;  %955 = vmatprep.mubr.bf16.mxu0 %v12142_v0  ;;  %vm12820_vm14 = vmand %vm2533_vm11, %vm2534_vm12  ;;  %s9124_s28 = scalar_lea.hbm %s13636_s9, %s10207_s27  ;;  %s12143_s13 = smov [#allocation16]  }
  0x9e   : > { %996 = vmatprep.mubr.bf16.mxu1 %v12142_v0  ;;  %vm2536_vm15 = vmor %vm12820_vm14, %vm12816_vm13  ;;  %s12059_s2 = sshll.u32 %s12143_s13, 4  ;;  %s12060_s2 = int_to_ptr.vmem [resolvable:$false] %s12059_s2 }
  0x9f   : > { %938 = vmatpush1.bf16.msra.mxu0 %v12472_v42  ;;  %s12061_s21 = scalar_lea.vmem %s12060_s2, 32 }
  0xa0   : > { %979 = vmatpush1.bf16.msra.mxu1 %v12474_v43  ;;  %9330 = vmatprep.subr.msk.bf16.mxu0 %vm485_vm0, %v12480_v45 }
  0xa1   : > { %9332 = vmatprep.subr.msk.bf16.mxu1 %vm485_vm0, %v12482_v46 }
  0xa2   : > { %9318 = vmatmul.mubr.msk.bf16.vlgmr.msra.gmra.mxu0 %vm481_vm1, %v12489_v49 }
  0xa3   : > { %9320 = vmatmul.mubr.msk.bf16.vlgmr.msra.gmra.mxu1 %vm481_vm1, %v12489_v49  ;;  %1092 = vmatpush1.bf16.msra.mxu0 %v12504_v53 }
  0xa4   : > { %1133 = vmatpush1.bf16.msra.mxu1 %v12507_v54  ;;  %1093 = vmatprep.subr.bf16.mxu0 %v12493_v51 }
  0xa5   : > { %1134 = vmatprep.subr.bf16.mxu1 %v12495_v52  ;;  %1111 = vmatprep.mubr.bf16.mxu0 %v12142_v0 }
  0xa6   : > { %1152 = vmatprep.mubr.bf16.mxu1 %v12142_v0 }
  0xa7   : > { %1094 = vmatpush1.bf16.msra.mxu0 %v12509_v55 }
  0xa8   : > { %1135 = vmatpush1.bf16.msra.mxu1 %v12511_v56  ;;  %9334 = vmatprep.subr.msk.bf16.mxu0 %vm485_vm0, %v12348_v1 }
  0xa9   : > { %9336 = vmatprep.subr.msk.bf16.mxu1 %vm485_vm0, %v12350_v2 }
  0xaa   : > { %9331 = vmatmul.mubr.msk.bf16.vlgmr.msra.gmra.mxu0 %vm481_vm1, %v12523_v59 }
  0xab   : > { %9333 = vmatmul.mubr.msk.bf16.vlgmr.msra.gmra.mxu1 %vm481_vm1, %v12523_v59  ;;  %1180 = vmatpush1.bf16.msra.mxu0 %v12359_v6 }
  0xac   : > { %1221 = vmatpush1.bf16.msra.mxu1 %v12362_v7  ;;  %1181 = vmatprep.subr.bf16.mxu0 %v12356_v5 }
  0xad   : > { %1222 = vmatprep.subr.bf16.mxu1 %v12364_v8  ;;  %1199 = vmatprep.mubr.bf16.mxu0 %v12142_v0 }
  0xae   : > { %1240 = vmatprep.mubr.bf16.mxu1 %v12142_v0 }
  0xaf   : > { %1182 = vmatpush1.bf16.msra.mxu0 %v12368_v9 }
  0xb0   : > { %1223 = vmatpush1.bf16.msra.mxu1 %v12370_v10  ;;  %9338 = vmatprep.subr.msk.bf16.mxu0 %vm485_vm0, %v12379_v11 }
  0xb1   : > { %9340 = vmatprep.subr.msk.bf16.mxu1 %vm485_vm0, %v12384_v13 }
  0xb2   : > { %9335 = vmatmul.mubr.msk.bf16.vlgmr.msra.gmra.mxu0 %vm481_vm1, %v12454_v37 }
  0xb3   : > { %9337 = vmatmul.mubr.msk.bf16.vlgmr.msra.gmra.mxu1 %vm481_vm1, %v12454_v37  ;;  %1262 = vmatpush1.bf16.msra.mxu0 %v12395_v17 }
  0xb4   : > { %1303 = vmatpush1.bf16.msra.mxu1 %v12398_v18  ;;  %1263 = vmatprep.subr.bf16.mxu0 %v12392_v16 }
  0xb5   : > { %1304 = vmatprep.subr.bf16.mxu1 %v12400_v19  ;;  %1281 = vmatprep.mubr.bf16.mxu0 %v12142_v0 }
  0xb6   : > { %1322 = vmatprep.mubr.bf16.mxu1 %v12142_v0 }
  0xb7   : > { %1264 = vmatpush1.bf16.msra.mxu0 %v12406_v20 }
  0xb8   : > { %1305 = vmatpush1.bf16.msra.mxu1 %v12408_v21  ;;  %9342 = vmatprep.subr.msk.bf16.mxu0 %vm485_vm0, %v12412_v22 }
  0xb9   : > { %9344 = vmatprep.subr.msk.bf16.mxu1 %vm485_vm0, %v12416_v23 }
  0xba   : > { %9339 = vmatmul.mubr.msk.bf16.vlgmr.msra.gmra.mxu0 %vm481_vm1, %v12382_v12 }
  0xbb   : > { %9341 = vmatmul.mubr.msk.bf16.vlgmr.msra.gmra.mxu1 %vm481_vm1, %v12382_v12  ;;  %1344 = vmatpush1.bf16.msra.mxu0 %v12430_v28  ;;  %v11627_v12 = vld [vmem:[#allocation4 + $0x4c] ss:$16 sps:$4 sm:$0xff]  }
  0xbc   : > { %1385 = vmatpush1.bf16.msra.mxu1 %v12433_v29  ;;  %1345 = vmatprep.subr.bf16.mxu0 %v12423_v27 }
  0xbd   : > { %1386 = vmatprep.subr.bf16.mxu1 %v12435_v30  ;;  %1363 = vmatprep.mubr.bf16.mxu0 %v12142_v0 }
  0xbe   : > { %1404 = vmatprep.mubr.bf16.mxu1 %v12142_v0 }
  0xbf   : > { %1346 = vmatpush1.bf16.msra.mxu0 %v12437_v31 }
  0xc0   : > { %1387 = vmatpush1.bf16.msra.mxu1 %v12441_v32  ;;  %9346 = vmatprep.subr.msk.bf16.mxu0 %vm485_vm0, %v12443_v33 }
  0xc1   : > { %9348 = vmatprep.subr.msk.bf16.mxu1 %vm485_vm0, %v12447_v34 }
  0xc2   : > { %9343 = vmatmul.mubr.msk.bf16.vlgmr.msra.gmra.mxu0 %vm481_vm1, %v12489_v49 }
  0xc3   : > { %9345 = vmatmul.mubr.msk.bf16.vlgmr.msra.gmra.mxu1 %vm481_vm1, %v12489_v49  ;;  %1430 = vmatpush1.bf16.msra.mxu0 %v12459_v38 }
  0xc4   : > { %1471 = vmatpush1.bf16.msra.mxu1 %v12468_v40  ;;  %1431 = vmatprep.subr.bf16.mxu0 %v12461_v39 }
  0xc5   : > { %1472 = vmatprep.subr.bf16.mxu1 %v12470_v41  ;;  %1449 = vmatprep.mubr.bf16.mxu0 %v12142_v0 }
  0xc6   : > { %1490 = vmatprep.mubr.bf16.mxu1 %v12142_v0 }
  0xc7   : > { %1432 = vmatpush1.bf16.msra.mxu0 %v12472_v42 }
  0xc8   : > { %1473 = vmatpush1.bf16.msra.mxu1 %v12474_v43  ;;  %9351 = vmatprep.subr.msk.bf16.mxu0 %vm485_vm0, %v12480_v45 }
  0xc9   : > { %9353 = vmatprep.subr.msk.bf16.mxu1 %vm485_vm0, %v12482_v46 }
  0xca   : > { %9347 = vmatmul.mubr.msk.bf16.vlgmr.msra.gmra.mxu0 %vm481_vm1, %v12523_v59 }
  0xcb   : > { %9349 = vmatmul.mubr.msk.bf16.vlgmr.msra.gmra.mxu1 %vm481_vm1, %v12523_v59  ;;  %1529 = vmatpush1.bf16.msra.mxu0 %v12504_v53 }
  0xcc   : > { %1570 = vmatpush1.bf16.msra.mxu1 %v12507_v54  ;;  %1530 = vmatprep.subr.bf16.mxu0 %v12493_v51 }
  0xcd   : > { %1571 = vmatprep.subr.bf16.mxu1 %v12495_v52  ;;  %1548 = vmatprep.mubr.bf16.mxu0 %v12142_v0 }
  0xce   : > { %1589 = vmatprep.mubr.bf16.mxu1 %v12142_v0 }
  0xcf   : > { %1531 = vmatpush1.bf16.msra.mxu0 %v12509_v55 }
  0xd0   : > { %1572 = vmatpush1.bf16.msra.mxu1 %v12511_v56  ;;  %9355 = vmatprep.subr.msk.bf16.mxu0 %vm485_vm0, %v12348_v1  ;;  %v9371_v1 = vcombine.low %v12454_v37, %v12454_v37 }
  0xd1   : > { %9357 = vmatprep.subr.msk.bf16.mxu1 %vm485_vm0, %v12350_v2 }
  0xd2   : > { %9352 = vmatmul.mubr.msk.bf16.vlgmr.msra.gmra.mxu0 %vm481_vm1, %v12607_v3  ;;  %v1966_v2 = vshll.u32 %v9371_v1, 16  ;;  %v1964_v4 = vshrl.u32 %v9371_v1, 16  ;;  %v10461_v1 = vld [vmem:[#allocation9 + $0x268] ss:$16 sps:$4 sm:$0xff]  }
  0xd3   : > { %9354 = vmatmul.mubr.msk.bf16.vlgmr.msra.gmra.mxu1 %vm481_vm1, %v12607_v3  ;;  %1637 = vmatpush1.bf16.msra.mxu0 %v12359_v6 }
  0xd4   : > { %1678 = vmatpush1.bf16.msra.mxu1 %v12362_v7  ;;  %1638 = vmatprep.subr.bf16.mxu0 %v12356_v5  ;;  %v1968_v5 = vrot.slane %v1966_v2, 1 }
  0xd5   : > { %1679 = vmatprep.subr.bf16.mxu1 %v12364_v8  ;;  %1656 = vmatprep.mubr.bf16.mxu0 %v12142_v0 }
  0xd6   : > { %1697 = vmatprep.mubr.bf16.mxu1 %v12142_v0  ;;  %v12691_v8 = vor.u32 %v1968_v5, %v1964_v4 }
  0xd7   : > { %1639 = vmatpush1.bf16.msra.mxu0 %v12368_v9  ;;  %v11624_v9 = vld [vmem:[#allocation4 + $0x64] ss:$16 sps:$4 sm:$0x3f]  }
  0xd8   : > { %1680 = vmatpush1.bf16.msra.mxu1 %v12370_v10  ;;  %9359 = vmatprep.subr.msk.bf16.mxu0 %vm485_vm0, %v12379_v11  ;;  %v11625_v10 = vld [vmem:[#allocation4 + $0x6c] ss:$16 sps:$4 sm:$0x3f]   ;;  %v11626_v11 = vld [vmem:[#allocation4 + $0x44] ss:$16 sps:$4 sm:$0xff]  }
  0xd9   : > { %9361 = vmatprep.subr.msk.bf16.mxu1 %vm485_vm0, %v12384_v13  ;;  %v11628_v13 = vld [vmem:[#allocation4 + $0x40] ss:$16 sps:$4 sm:$0xff]  }
  0xda   : > { %9356 = vmatmul.mubr.msk.bf16.vlgmr.msra.gmra.mxu0 %vm481_vm1, %v12489_v49 }
  0xdb   : > { %9358 = vmatmul.mubr.msk.bf16.vlgmr.msra.gmra.mxu1 %vm481_vm1, %v12489_v49  ;;  %1719 = vmatpush1.bf16.msra.mxu0 %v12395_v17 }
  0xdc   : > { %1760 = vmatpush1.bf16.msra.mxu1 %v12398_v18  ;;  %1720 = vmatprep.subr.bf16.mxu0 %v12392_v16  ;;  %v11631_v16 = vld [vmem:[#allocation4 + $0x2c] ss:$16 sps:$4 sm:$0x3f]  }
  0xdd   : > { %1761 = vmatprep.subr.bf16.mxu1 %v12400_v19  ;;  %1738 = vmatprep.mubr.bf16.mxu0 %v12142_v0  ;;  %v11634_v19 = vld [vmem:[#allocation4] ss:$16 sps:$4 sm:$0xff]  }
  0xde   : > { %1779 = vmatprep.mubr.bf16.mxu1 %v12142_v0 }
  0xdf   : > { %1721 = vmatpush1.bf16.msra.mxu0 %v12406_v20  ;;  %v11635_v20 = vld [vmem:[#allocation4 + $0x8] ss:$16 sps:$4 sm:$0xff]  }
  0xe0   : > { %1762 = vmatpush1.bf16.msra.mxu1 %v12408_v21  ;;  %9363 = vmatprep.subr.msk.bf16.mxu0 %vm485_vm0, %v12412_v22  ;;  %v11636_v21 = vld [vmem:[#allocation4 + $0xa4] ss:$16 sps:$4 sm:$0x3f]   ;;  %v11637_v22 = vld [vmem:[#allocation4 + $0xac] ss:$16 sps:$4 sm:$0x3f]  }
  0xe1   : > { %9365 = vmatprep.subr.msk.bf16.mxu1 %vm485_vm0, %v12416_v23  ;;  %v11640_v23 = vld [vmem:[#allocation4 + $0x80] ss:$16 sps:$4 sm:$0xff]  }
  0xe2   : > { %9360 = vmatmul.mubr.msk.bf16.vlgmr.msra.gmra.mxu0 %vm481_vm1, %v12454_v37 }
  0xe3   : > { %9362 = vmatmul.mubr.msk.bf16.vlgmr.msra.gmra.mxu1 %vm481_vm1, %v12454_v37  ;;  %1801 = vmatpush1.bf16.msra.mxu0 %v12430_v28 }
  0xe4   : > { %1842 = vmatpush1.bf16.msra.mxu1 %v12433_v29  ;;  %1802 = vmatprep.subr.bf16.mxu0 %v12423_v27  ;;  %v11644_v27 = vld [vmem:[%s12375_s24 + $0xc] sm:$0xf]  ;;  %s417_s24 = sand.u32 1, %s12123_s10  }
  0xe5   : > { %1843 = vmatprep.subr.bf16.mxu1 %v12435_v30  ;;  %1820 = vmatprep.mubr.bf16.mxu0 %v12142_v0  ;;  %v11646_v30 = vld [vmem:[#allocation4 + $0xcc] ss:$16 sps:$4 sm:$0xff]   ;;  %s418_s25 = scalar_lea.vmem [#allocation16], %s417_s24  ;;  %s9114_s23 = scalar_lea.sflag [#allocation6], %s417_s24 }
  0xe6   : > { %1861 = vmatprep.mubr.bf16.mxu1 %v12142_v0  ;;  %s9126_s16 = sshll.u32 %s418_s25, 4  ;;  %s9127_s16 = int_to_ptr.vmem [resolvable:$true] %s9126_s16 }
  0xe7   : > { %1803 = vmatpush1.bf16.msra.mxu0 %v12437_v31  ;;  %s12055_s14 = scalar_lea.vmem %s9127_s16, 16  ;;  %p12062_p1 = scmp.lt.s32.totalorder %s9127_s16, %s12060_s2 }
  0xe8   : > { %1844 = vmatpush1.bf16.msra.mxu1 %v12441_v32  ;;  %9367 = vmatprep.subr.msk.bf16.mxu0 %vm485_vm0, %v12443_v33  ;;  %v11647_v32 = vld [vmem:[#allocation4 + $0xc0] ss:$16 sps:$4 sm:$0xff]   ;;  %v11648_v33 = vld [vmem:[#allocation4 + $0xc8] ss:$16 sps:$4 sm:$0xff]   ;;  %p12056_p7 = scmp.ne.s32.totalorder %s9127_s16, %s12055_s14  ;;  %p12063_p2 = scmp.lt.s32.totalorder %s12061_s21, %s12055_s14 }
  0xe9   : > { %9369 = vmatprep.subr.msk.bf16.mxu1 %vm485_vm0, %v12447_v34  ;;  %v11649_v34 = vld [vmem:[#allocation4 + $0x124] ss:$16 sps:$4 sm:$0x3f]  }
  0xea   : > { %9364 = vmatmul.mubr.msk.bf16.vlgmr.msra.gmra.mxu0 %vm481_vm1, %v12523_v59  ;;  %p12057_p11 = pnand %p12056_p7, %p13866_p8  ;;  %p12064_p13 = por %p12063_p2, %p12062_p1 }
  0xeb   : > { %9366 = vmatmul.mubr.msk.bf16.vlgmr.msra.gmra.mxu1 %vm481_vm1, %v12523_v59  ;;  %1887 = vmatpush1.bf16.msra.mxu0 %v12459_v38 }
  0xec   : > { %1928 = vmatpush1.bf16.msra.mxu1 %v12468_v40  ;;  %1888 = vmatprep.subr.bf16.mxu0 %v12461_v39  ;;  %v11652_v39 = vld [vmem:[#allocation4 + $0x10c] ss:$16 sps:$4 sm:$0xff]   ;;  %p12058_p0 = pneg %p12057_p11 }
  0xed   : > { %1929 = vmatprep.subr.bf16.mxu1 %v12470_v41  ;;  %1906 = vmatprep.mubr.bf16.mxu0 %v12142_v0  ;;  %v11653_v41 = vld [vmem:[#allocation4 + $0x100] ss:$16 sps:$4 sm:$0xff]  }
  0xee   : > { %1947 = vmatprep.mubr.bf16.mxu1 %v12142_v0  ;;  %p12065_p3 = pnand %p12064_p13, %p12058_p0 }
  0xef   : > { %1889 = vmatpush1.bf16.msra.mxu0 %v12472_v42  ;;  %v11654_v42 = vld [vmem:[#allocation4 + $0x108] ss:$16 sps:$4 sm:$0xff]  }
  0xf0   : > { %1930 = vmatpush1.bf16.msra.mxu1 %v12474_v43  ;;  %9372 = vmatprep.subr.msk.bf16.mxu0 %vm485_vm0, %v12480_v45 }
  0xf1   : > { %9374 = vmatprep.subr.msk.bf16.mxu1 %vm485_vm0, %v12482_v46  ;;  %v10436_v46 = vld [vmem:[#allocation9 + $0x2e4] ss:$16 sps:$4 sm:$0xff]  }
  0xf2   : > { %9368 = vmatmul.mubr.msk.bf16.vlgmr.msra.gmra.mxu0 %vm481_vm1, %v12607_v3 }
  0xf3   : > { %9370 = vmatmul.mubr.msk.bf16.vlgmr.msra.gmra.mxu1 %vm481_vm1, %v12607_v3  ;;  %1986 = vmatpush1.bf16.msra.mxu0 %v12504_v53 }
  0xf4   : > { %2027 = vmatpush1.bf16.msra.mxu1 %v12507_v54  ;;  %1987 = vmatprep.subr.bf16.mxu0 %v12493_v51  ;;  %v10445_v51 = vld [vmem:[#allocation9 + $0x2cc] ss:$16 sps:$4 sm:$0xff]  }
  0xf5   : > { %2028 = vmatprep.subr.bf16.mxu1 %v12495_v52  ;;  %2005 = vmatprep.mubr.bf16.mxu0 %v12142_v0  ;;  %v10440_v52 = vld [vmem:[#allocation9 + $0x2c0] ss:$16 sps:$4 sm:$0xff]  }
  0xf6   : > { %2046 = vmatprep.mubr.bf16.mxu1 %v12142_v0 }
  0xf7   : > { %1988 = vmatpush1.bf16.msra.mxu0 %v12509_v55  ;;  %v10451_v55 = vld [vmem:[#allocation9 + $0x2ac] ss:$16 sps:$4 sm:$0xff]  }
  0xf8   : > { %2029 = vmatpush1.bf16.msra.mxu1 %v12511_v56  ;;  %9376 = vmatprep.subr.msk.bf16.mxu0 %vm485_vm0, %v11624_v9  ;;  %v10446_v56 = vld [vmem:[#allocation9 + $0x2a0] ss:$16 sps:$4 sm:$0xff]   ;;  %v10466_v9 = vld [vmem:[#allocation9 + $0x244] ss:$16 sps:$4 sm:$0xff]  }
  0xf9   : > { %9378 = vmatprep.subr.msk.bf16.mxu1 %vm485_vm0, %v11625_v10  ;;  %v10469_v10 = vld [vmem:[#allocation9 + $0x24c] ss:$16 sps:$4 sm:$0xff]  }
  0xfa   : > { %9373 = vmatmul.mubr.msk.bf16.vlgmr.msra.gmra.mxu0 %vm481_vm1, %v12691_v8 }
  0xfb   : > { %9375 = vmatmul.mubr.msk.bf16.vlgmr.msra.gmra.mxu1 %vm481_vm1, %v12691_v8  ;;  %2074 = vmatpush1.bf16.msra.mxu0 %v12359_v6  ;;  %v11632_v6 = vld [vmem:[#allocation4 + $0x4] ss:$16 sps:$4 sm:$0xff]  }
  0xfc   : > { %2115 = vmatpush1.bf16.msra.mxu1 %v12362_v7  ;;  %2075 = vmatprep.subr.bf16.mxu0 %v11626_v11  ;;  %v11633_v7 = vld [vmem:[#allocation4 + $0xc] ss:$16 sps:$4 sm:$0xff]   ;;  %v10464_v11 = vld [vmem:[#allocation9 + $0x240] ss:$16 sps:$4 sm:$0xff]  }
  0xfd   : > { %2116 = vmatprep.subr.bf16.mxu1 %v11627_v12  ;;  %2093 = vmatprep.mubr.bf16.mxu0 %v12142_v0  ;;  %v10467_v12 = vld [vmem:[#allocation9 + $0x248] ss:$16 sps:$4 sm:$0xff]  }
  0xfe   : > { %2134 = vmatprep.mubr.bf16.mxu1 %v12142_v0 }
  0xff   : > { %2076 = vmatpush1.bf16.msra.mxu0 %v11628_v13 }
 0x100   : > { %2117 = vmatpush1.bf16.msra.mxu1 %v11629_v14  ;;  %9380 = vmatprep.subr.msk.bf16.mxu0 %vm485_vm0, %v11630_v15 }
 0x101   : > { %9382 = vmatprep.subr.msk.bf16.mxu1 %vm485_vm0, %v11631_v16 }
 0x102   : > { %9377 = vmatmul.mubr.msk.bf16.vlgmr.msra.gmra.mxu0 %vm481_vm1, %v12523_v59 }
 0x103   : > { %9379 = vmatmul.mubr.msk.bf16.vlgmr.msra.gmra.mxu1 %vm481_vm1, %v12523_v59  ;;  %2156 = vmatpush1.bf16.msra.mxu0 %v12395_v17  ;;  %v11638_v17 = vld [vmem:[#allocation4 + $0x84] ss:$16 sps:$4 sm:$0xff]   ;;  %v10457_v59 = vld [vmem:[#allocation9 + $0x28c] ss:$16 sps:$4 sm:$0xff]  }
 0x104   : > { %2197 = vmatpush1.bf16.msra.mxu1 %v12398_v18  ;;  %2157 = vmatprep.subr.bf16.mxu0 %v11632_v6  ;;  %v11639_v18 = vld [vmem:[#allocation4 + $0x8c] ss:$16 sps:$4 sm:$0xff]   ;;  %v10472_v6 = vld [vmem:[#allocation9 + $0x224] ss:$16 sps:$4 sm:$0xff]  }
 0x105   : > { %2198 = vmatprep.subr.bf16.mxu1 %v11633_v7  ;;  %2175 = vmatprep.mubr.bf16.mxu0 %v12142_v0  ;;  %v10475_v7 = vld [vmem:[#allocation9 + $0x22c] ss:$16 sps:$4 sm:$0xff]  }
 0x106   : > { %2216 = vmatprep.mubr.bf16.mxu1 %v12142_v0 }
 0x107   : > { %2158 = vmatpush1.bf16.msra.mxu0 %v11634_v19  ;;  %v10470_v19 = vld [vmem:[#allocation9 + $0x220] ss:$16 sps:$4 sm:$0xff]  }
 0x108   : > { %2199 = vmatpush1.bf16.msra.mxu1 %v11635_v20  ;;  %9384 = vmatprep.subr.msk.bf16.mxu0 %vm485_vm0, %v11636_v21  ;;  %v10473_v20 = vld [vmem:[#allocation9 + $0x228] ss:$16 sps:$4 sm:$0xff]  }
 0x109   : > { %9386 = vmatprep.subr.msk.bf16.mxu1 %vm485_vm0, %v11637_v22 }
 0x10a   : > { %9381 = vmatmul.mubr.msk.bf16.vlgmr.msra.gmra.mxu0 %vm481_vm1, %v12489_v49 }
 0x10b   : > { %9383 = vmatmul.mubr.msk.bf16.vlgmr.msra.gmra.mxu1 %vm481_vm1, %v12489_v49  ;;  %2238 = vmatpush1.bf16.msra.mxu0 %v12430_v28  ;;  %v9392_v28 = vcombine.low %v11644_v27, %v11644_v27  ;;  %v10437_v49 = vld [vmem:[#allocation9 + $0x2e8] ss:$16 sps:$4 sm:$0xff]  }
 0x10c   : > { %2279 = vmatpush1.bf16.msra.mxu1 %v12433_v29  ;;  %2239 = vmatprep.subr.bf16.mxu0 %v11638_v17  ;;  %v11645_v29 = vld [vmem:[#allocation4 + $0xc4] ss:$16 sps:$4 sm:$0xff]  }
 0x10d   : > { %2280 = vmatprep.subr.bf16.mxu1 %v11639_v18  ;;  %2257 = vmatprep.mubr.bf16.mxu0 %v12142_v0  ;;  %v2403_v31 = vshll.u32 %v9392_v28, 16  ;;  %v2401_v36 = vshrl.u32 %v9392_v28, 16 }
 0x10e   : > { %2298 = vmatprep.mubr.bf16.mxu1 %v12142_v0 }
 0x10f   : > { %2240 = vmatpush1.bf16.msra.mxu0 %v11640_v23  ;;  %v2405_v37 = vrot.slane %v2403_v31, 1  ;;  %v10478_v23 = vld [vmem:[#allocation9 + $0x204] ss:$16 sps:$4 sm:$0xff]  }
 0x110   : > { %2281 = vmatpush1.bf16.msra.mxu1 %v11641_v24  ;;  %9388 = vmatprep.subr.msk.bf16.mxu0 %vm485_vm0, %v11642_v25  ;;  %v10481_v24 = vld [vmem:[#allocation9 + $0x20c] ss:$16 sps:$4 sm:$0xff]   ;;  %v10476_v25 = vld [vmem:[#allocation9 + $0x200] ss:$16 sps:$4 sm:$0xff]   ;;  %v10484_v31 = vld [vmem:[#allocation9 + $0x3e4] ss:$16 sps:$4 sm:$0xff]  }
 0x111   : > { %9390 = vmatprep.subr.msk.bf16.mxu1 %vm485_vm0, %v11643_v26  ;;  %v10479_v26 = vld [vmem:[#allocation9 + $0x208] ss:$16 sps:$4 sm:$0xff]  }
 0x112   : > { %9385 = vmatmul.mubr.msk.bf16.vlgmr.msra.gmra.mxu0 %vm481_vm1, %v12607_v3 }
 0x113   : > { %9387 = vmatmul.mubr.msk.bf16.vlgmr.msra.gmra.mxu1 %vm481_vm1, %v12607_v3  ;;  %2324 = vmatpush1.bf16.msra.mxu0 %v12459_v38  ;;  %v11651_v38 = vld [vmem:[#allocation4 + $0x104] ss:$16 sps:$4 sm:$0xff]  }
 0x114   : > { %2365 = vmatpush1.bf16.msra.mxu1 %v12468_v40  ;;  %2325 = vmatprep.subr.bf16.mxu0 %v11645_v29  ;;  %v2406_v40 = vor.u32 %v2405_v37, %v2401_v36  ;;  %v10458_v3 = vld [vmem:[#allocation9 + $0x260] ss:$16 sps:$4 sm:$0xff]  }
 0x115   : > { %2366 = vmatprep.subr.bf16.mxu1 %v11646_v30  ;;  %2343 = vmatprep.mubr.bf16.mxu0 %v12142_v0 }
 0x116   : > { %2384 = vmatprep.mubr.bf16.mxu1 %v12142_v0 }
 0x117   : > { %2326 = vmatpush1.bf16.msra.mxu0 %v11647_v32  ;;  %v10487_v32 = vld [vmem:[#allocation9 + $0x3ec] ss:$16 sps:$4 sm:$0xff]  }
 0x118   : > { %2367 = vmatpush1.bf16.msra.mxu1 %v11648_v33  ;;  %9393 = vmatprep.subr.msk.bf16.mxu0 %vm485_vm0, %v11649_v34  ;;  %v10482_v33 = vld [vmem:[#allocation9 + $0x3e0] ss:$16 sps:$4 sm:$0xff]   ;;  %v10485_v34 = vld [vmem:[#allocation9 + $0x3e8] ss:$16 sps:$4 sm:$0xff]  }
 0x119   : > { %9395 = vmatprep.subr.msk.bf16.mxu1 %vm485_vm0, %v11650_v35  ;;  %vm9111_vm0 = vcmask 73728  }
 0x11a   : > { %9389 = vmatmul.mubr.msk.bf16.vlgmr.msra.gmra.mxu0 %vm481_vm1, %v12691_v8 }
 0x11b   : > { %9391 = vmatmul.mubr.msk.bf16.vlgmr.msra.gmra.mxu1 %vm481_vm1, %v12691_v8  ;;  %2423 = vmatpush1.bf16.msra.mxu0 %v12504_v53  ;;  %v10443_v53 = vld [vmem:[#allocation9 + $0x2c8] ss:$16 sps:$4 sm:$0xff]  }
 0x11c   : > { %2464 = vmatpush1.bf16.msra.mxu1 %v12507_v54  ;;  %2424 = vmatprep.subr.bf16.mxu0 %v11651_v38  ;;  %v10448_v54 = vld [vmem:[#allocation9 + $0x2a4] ss:$16 sps:$4 sm:$0xff]  }
 0x11d   : > { %2465 = vmatprep.subr.bf16.mxu1 %v11652_v39  ;;  %2442 = vmatprep.mubr.bf16.mxu0 %v12142_v0  ;;  %v10490_v39 = vld [vmem:[#allocation9 + $0x3c4] ss:$16 sps:$4 sm:$0xff]  }
 0x11e   : > { %2483 = vmatprep.mubr.bf16.mxu1 %v12142_v0  ;;  %v2514_v0 = vld [vmem:[#allocation2 + $0x8] sm:$0x11] }
 0x11f   : > { %2425 = vmatpush1.bf16.msra.mxu0 %v11653_v41  ;;  %v2515_v45 = vsel %vm2513_vm8, 0, %v2514_v0  ;;  %v10488_v41 = vld [vmem:[#allocation9 + $0x3c0] ss:$16 sps:$4 sm:$0xff]  }
 0x120   : > { %2466 = vmatpush1.bf16.msra.mxu1 %v11654_v42  ;;  %2516 = vst [vmem:[#allocation2 + $0x8] sm:$0x11] %v2515_v45  ;;  %3018 = vmatprep.subr.bf16.mxu0 %v10436_v46  ;;  %v10491_v42 = vld [vmem:[#allocation9 + $0x3c8] ss:$16 sps:$4 sm:$0xff]  }
 0x121   : > { %3059 = vmatprep.subr.bf16.mxu1 %v10439_v47 }
 0x122   : > { %9394 = vmatmul.mubr.msk.bf16.vlgmr.msra.gmra.mxu0 %vm481_vm1, %v2406_v40 }
 0x123   : > { %9396 = vmatmul.mubr.msk.bf16.vlgmr.msra.gmra.mxu1 %vm481_vm1, %v2406_v40  ;;  %3019 = vmatpush1.bf16.msra.mxu0 %v10434_v48  ;;  %v10493_v40 = vld [vmem:[#allocation9 + $0x3cc] ss:$16 sps:$4 sm:$0xff]   ;;  %v10496_v48 = vld [vmem:[#allocation9 + $0x3a4] ss:$16 sps:$4 sm:$0xff]  }
 0x124   : > { %3060 = vmatpush1.bf16.msra.mxu1 %v10437_v49  ;;  %3020 = vmatprep.subr.bf16.mxu0 %v10442_v50  ;;  %v10499_v49 = vld [vmem:[#allocation9 + $0x3ac] ss:$16 sps:$4 sm:$0xff]   ;;  %v10494_v50 = vld [vmem:[#allocation9 + $0x3a0] ss:$16 sps:$4 sm:$0xff]  }
 0x125   : > { %3061 = vmatprep.subr.bf16.mxu1 %v10445_v51  ;;  %v10497_v51 = vld [vmem:[#allocation9 + $0x3a8] ss:$16 sps:$4 sm:$0xff]  }
 0x127   : > { %3021 = vmatpush1.bf16.msra.mxu0 %v10440_v52 }
 0x128   : > { %3062 = vmatpush1.bf16.msra.mxu1 %v10443_v53  ;;  %3022 = vmatprep.subr.bf16.mxu0 %v10448_v54 }
 0x129   : > { %3063 = vmatprep.subr.bf16.mxu1 %v10451_v55 }
 0x12b   : > { %3023 = vmatpush1.bf16.msra.mxu0 %v10446_v56  ;;  %v10502_v56 = vld [vmem:[#allocation9 + $0x384] ss:$16 sps:$4 sm:$0xff]  }
 0x12c   : > { %3064 = vmatpush1.bf16.msra.mxu1 %v10449_v57  ;;  %3024 = vmatprep.subr.bf16.mxu0 %v10454_v58  ;;  %v10505_v57 = vld [vmem:[#allocation9 + $0x38c] ss:$16 sps:$4 sm:$0xff]  }
 0x12d   : > { %3065 = vmatprep.subr.bf16.mxu1 %v10457_v59 }
 0x12f   : > { %3025 = vmatpush1.bf16.msra.mxu0 %v10452_v60  ;;  %v10500_v60 = vld [vmem:[#allocation9 + $0x380] ss:$16 sps:$4 sm:$0xff]  }
 0x130   : > { %3066 = vmatpush1.bf16.msra.mxu1 %v10455_v61  ;;  %3026 = vmatprep.subr.bf16.mxu0 %v10460_v62  ;;  %v10503_v61 = vld [vmem:[#allocation9 + $0x388] ss:$16 sps:$4 sm:$0xff]  }
 0x131   : > { %3067 = vmatprep.subr.bf16.mxu1 %v10463_v63 }
 0x133   : > { %3027 = vmatpush1.bf16.msra.mxu0 %v10458_v3 }
 0x134   : > { %3068 = vmatpush1.bf16.msra.mxu1 %v10461_v1  ;;  %3028 = vmatprep.subr.bf16.mxu0 %v10466_v9 }
 0x135   : > { %3069 = vmatprep.subr.bf16.mxu1 %v10469_v10 }
 0x137   : > { %3029 = vmatpush1.bf16.msra.mxu0 %v10464_v11 }
 0x138   : > { %3070 = vmatpush1.bf16.msra.mxu1 %v10467_v12  ;;  %3030 = vmatprep.subr.bf16.mxu0 %v10472_v6  ;;  %v10506_v6 = vld [vmem:[#allocation9 + $0x360] ss:$16 sps:$4 sm:$0xff]  }
 0x139   : > { %3071 = vmatprep.subr.bf16.mxu1 %v10475_v7 }
 0x13b   : > { %3031 = vmatpush1.bf16.msra.mxu0 %v10470_v19 }
 0x13c   : > { %3072 = vmatpush1.bf16.msra.mxu1 %v10473_v20  ;;  %3032 = vmatprep.subr.bf16.mxu0 %v10478_v23  ;;  %v10514_v23 = vld [vmem:[#allocation9 + $0x344] ss:$16 sps:$4 sm:$0xff]  }
 0x13d   : > { %3073 = vmatprep.subr.bf16.mxu1 %v10481_v24  ;;  %v10517_v24 = vld [vmem:[#allocation9 + $0x34c] ss:$16 sps:$4 sm:$0xff]  }
 0x13f   : > { %3033 = vmatpush1.bf16.msra.mxu0 %v10476_v25 }
 0x140   : > { %3074 = vmatpush1.bf16.msra.mxu1 %v10479_v26  ;;  %3034 = vmatprep.subr.bf16.mxu0 %v10484_v31 }
 0x141   : > { %3075 = vmatprep.subr.bf16.mxu1 %v10487_v32 }
 0x143   : > { %3035 = vmatpush2.bf16.msra.mxu0 %v10482_v33 }
 0x144   : > { %3076 = vmatpush2.bf16.msra.mxu1 %v10485_v34  ;;  %3036 = vmatprep.subr.bf16.mxu0 %v10490_v39 }
 0x145   : > { %3077 = vmatprep.subr.bf16.mxu1 %v10493_v40 }
 0x147   : > { %3037 = vmatpush2.bf16.msra.mxu0 %v10488_v41 }
 0x148   : > { %3078 = vmatpush2.bf16.msra.mxu1 %v10491_v42  ;;  %3038 = vmatprep.subr.bf16.mxu0 %v10496_v48 }
 0x149   : > { %3079 = vmatprep.subr.bf16.mxu1 %v10499_v49 }
 0x14a   : > { %v12765_v2 = vpop.f32.mrf.mxu0 }
 0x14b   : > { %v12767_v4 = vpop.f32.mrf.mxu1  ;;  %3039 = vmatpush2.bf16.msra.mxu0 %v10494_v50 }
 0x14c   : > { %v12769_v5 = vpop.f32.mrf.mxu0  ;;  %3080 = vmatpush2.bf16.msra.mxu1 %v10497_v51  ;;  %3040 = vmatprep.subr.bf16.mxu0 %v10502_v56 }
 0x14d   : > { %v12771_v8 = vpop.f32.mrf.mxu1  ;;  %3081 = vmatprep.subr.bf16.mxu1 %v10505_v57 }
 0x14e   : > { %v536_v13 = vpop.f32.mrf.mxu0 }
 0x14f   : > { %v577_v14 = vpop.f32.mrf.mxu1  ;;  %3041 = vmatpush2.bf16.msra.mxu0 %v10500_v60 }
 0x150   : > { %v537_v15 = vpop.f32.mrf.mxu0  ;;  %3082 = vmatpush2.bf16.msra.mxu1 %v10503_v61  ;;  %v10511_v14 = vld [vmem:[#allocation9 + $0x36c] ss:$16 sps:$4 sm:$0xff]  }
 0x151   : > { %v578_v16 = vpop.f32.mrf.mxu1  ;;  %3083 = vmatprep.subr.bf16.mxu1 %v10511_v14 }
 0x152   : > { %v665_v21 = vpop.f32.mrf.mxu0 }
 0x153   : > { %v706_v22 = vpop.f32.mrf.mxu1  ;;  %v666_v58 = vadd.f32 %v665_v21, %v12765_v2  ;;  %v10508_v2 = vld [vmem:[#allocation9 + $0x364] ss:$16 sps:$4 sm:$0xff]  }
 0x154   : > { %v667_v17 = vpop.f32.mrf.mxu0  ;;  %v707_v59 = vadd.f32 %v706_v22, %v12767_v4  ;;  %3042 = vmatprep.subr.bf16.mxu0 %v10508_v2 }
 0x155   : > { %v708_v18 = vpop.f32.mrf.mxu1  ;;  %v668_v62 = vadd.f32 %v667_v17, %v12769_v5  ;;  %v10509_v5 = vld [vmem:[#allocation9 + $0x368] ss:$16 sps:$4 sm:$0xff]   ;;  %3043 = vmatpush2.bf16.msra.mxu0 %v10506_v6 }
 0x156   : > { %v669_v27 = vpop.f32.mrf.mxu0  ;;  %v709_v1 = vadd.f32 %v708_v18, %v12771_v8  ;;  %3084 = vmatpush2.bf16.msra.mxu1 %v10509_v5  ;;  %3044 = vmatprep.subr.bf16.mxu0 %v10514_v23 }
 0x157   : > { %v710_v28 = vpop.f32.mrf.mxu1  ;;  %3085 = vmatprep.subr.bf16.mxu1 %v10517_v24 }
 0x158   : > { %v670_v29 = vpop.f32.mrf.mxu0  ;;  %v10512_v28 = vld [vmem:[#allocation9 + $0x340] ss:$16 sps:$4 sm:$0xff]  }
 0x159   : > { %v711_v30 = vpop.f32.mrf.mxu1  ;;  %v10515_v29 = vld [vmem:[#allocation9 + $0x348] ss:$16 sps:$4 sm:$0xff]   ;;  %3045 = vmatpush2.bf16.msra.mxu0 %v10512_v28 }
 0x15a   : > { %v809_v35 = vpop.f32.mrf.mxu0  ;;  %3086 = vmatpush2.bf16.msra.mxu1 %v10515_v29 }
 0x15b   : > { %v850_v36 = vpop.f32.mrf.mxu1  ;;  %v857_v9 = vadd.f32 %v809_v35, %v666_v58  ;;  %v10520_v35 = vld [vmem:[#allocation9 + $0x324] ss:$16 sps:$4 sm:$0xff]  }
 0x15c   : > { %v811_v37 = vpop.f32.mrf.mxu0  ;;  %v859_v10 = vadd.f32 %v850_v36, %v707_v59  ;;  %v10523_v36 = vld [vmem:[#allocation9 + $0x32c] ss:$16 sps:$4 sm:$0xff]   ;;  %3046 = vmatprep.subr.bf16.mxu0 %v10520_v35 }
 0x15d   : > { %v852_v38 = vpop.f32.mrf.mxu1  ;;  %v858_v11 = vadd.f32 %v811_v37, %v668_v62  ;;  %v10518_v37 = vld [vmem:[#allocation9 + $0x320] ss:$16 sps:$4 sm:$0xff]   ;;  %3087 = vmatprep.subr.bf16.mxu1 %v10523_v36 }
 0x15e   : > { %v813_v0 = vpop.f32.mrf.mxu0  ;;  %v860_v4 = vadd.f32 %v852_v38, %v709_v1  ;;  %v10521_v38 = vld [vmem:[#allocation9 + $0x328] ss:$16 sps:$4 sm:$0xff]   ;;  %3047 = vmatpush2.bf16.msra.mxu0 %v10518_v37 }
 0x15f   : > { %v854_v45 = vpop.f32.mrf.mxu1  ;;  %3088 = vmatpush2.bf16.msra.mxu1 %v10521_v38  ;;  %v10526_v0 = vld [vmem:[#allocation9 + $0x304] ss:$16 sps:$4 sm:$0xff]  }
 0x160   : > { %v814_v46 = vpop.f32.mrf.mxu0  ;;  %v10529_v45 = vld [vmem:[#allocation9 + $0x30c] ss:$16 sps:$4 sm:$0xff]   ;;  %3048 = vmatprep.subr.bf16.mxu0 %v10526_v0 }
 0x161   : > { %v855_v47 = vpop.f32.mrf.mxu1  ;;  %v10524_v46 = vld [vmem:[#allocation9 + $0x300] ss:$16 sps:$4 sm:$0xff]   ;;  %3089 = vmatprep.subr.bf16.mxu1 %v10529_v45 }
 0x162   : > { %v957_v52 = vpop.f32.mrf.mxu0  ;;  %v10527_v47 = vld [vmem:[#allocation9 + $0x308] ss:$16 sps:$4 sm:$0xff]   ;;  %3049 = vmatpush2.bf16.msra.mxu0 %v10524_v46 }
 0x163   : > { %v998_v53 = vpop.f32.mrf.mxu1  ;;  %v1005_v15 = vadd.f32 %v957_v52, %v857_v9  ;;  %3090 = vmatpush2.bf16.msra.mxu1 %v10527_v47  ;;  %v10532_v52 = vld [vmem:[#allocation9 + $0xe4] ss:$16 sps:$4 sm:$0xff]  }
 0x164   : > { %v959_v54 = vpop.f32.mrf.mxu0  ;;  %v1007_v16 = vadd.f32 %v998_v53, %v859_v10  ;;  %v10535_v53 = vld [vmem:[#allocation9 + $0xec] ss:$16 sps:$4 sm:$0xff]   ;;  %3427 = vmatprep.subr.bf16.mxu0 %v10532_v52 }
 0x165   : > { %v1000_v55 = vpop.f32.mrf.mxu1  ;;  %v1006_v7 = vadd.f32 %v959_v54, %v858_v11  ;;  %v2541_v54 = vld [vmem:[#allocation3] sm:$0x11]  ;;  %3468 = vmatprep.subr.bf16.mxu1 %v10535_v53 }
 0x166   : > { %v961_v63 = vpop.f32.mrf.mxu0  ;;  %v1008_v8 = vadd.f32 %v1000_v55, %v860_v4  ;;  %v2542_v57 = vsel %vm2513_vm8, 0, %v2541_v54 }
 0x167   : > { %v1002_v3 = vpop.f32.mrf.mxu1  ;;  %2543 = vst [vmem:[#allocation3] sm:$0x11] %v2542_v57 }
 0x168   : > { %v962_v12 = vpop.f32.mrf.mxu0 }
 0x169   : > { %v1003_v13 = vpop.f32.mrf.mxu1 }
 0x16a   : > { %v1113_v19 = vpop.f32.mrf.mxu0 }
 0x16b   : > { %v1154_v20 = vpop.f32.mrf.mxu1  ;;  %v12777_v21 = vadd.f32 %v1113_v19, %v1005_v15 }
 0x16c   : > { %v12779_v22 = vadd.f32 %v1154_v20, %v1007_v16  ;;  %v1115_v17 = vpop.f32.mrf.mxu0  ;;  %v12794_v16 = vshrl.u32 %v1608_v44, 7 }
 0x16d   : > { %v1156_v18 = vpop.f32.mrf.mxu1  ;;  %v12783_v26 = vadd.f32 %v1115_v17, %v1006_v7 }
 0x16e   : > { %v1165_v25 = vmax.f32 %v12777_v21, %v12779_v22  ;;  %v12785_v27 = vadd.f32 %v1156_v18, %v1008_v8  ;;  %v1117_v30 = vpop.f32.mrf.mxu0  ;;  %13730 = vst [vmem:[#allocation22_spill] sm:$0xff] %v12794_v16  ;;  %v12797_v28 = vsub.s32 0, %v12794_v16  ;;  %v12800_v37 = vsub.s32 1, %v12794_v16  ;;  %v13058_v16 = vld [vmem:[#allocation9 + $0x8a0] ss:$16 sps:$4 sm:$0xff]  }
 0x16f   : > { %v1158_v31 = vpop.f32.mrf.mxu1  ;;  %13745 = vst [vmem:[#allocation33_spill] sm:$0xff] %v13058_v16 }
 0x170   : > { %v1166_v32 = vmax.f32 %v12783_v26, %v12785_v27  ;;  %v1118_v33 = vpop.f32.mrf.mxu0  ;;  %13731 = vst [vmem:[#allocation23_spill] sm:$0xff] %v12797_v28  ;;  %13732 = vst [vmem:[#allocation24_spill] sm:$0xff] %v12800_v37 }
 0x171   : > { %v1159_v34 = vpop.f32.mrf.mxu1 }
 0x172   : > { %v1201_v39 = vpop.f32.mrf.mxu0  ;;  %v1606_v34 = vld [vmem:[#allocation7] sm:$0x3] }
 0x173   : > { %v1242_v40 = vpop.f32.mrf.mxu1  ;;  %v12803_v46 = vrot.slane %v1606_v34, %v12797_v28  ;;  %v12809_v53 = vrot.slane %v1606_v34, %v12800_v37 }
 0x174   : > { %v1203_v41 = vpop.f32.mrf.mxu0 }
 0x175   : > { %v1244_v42 = vpop.f32.mrf.mxu1 }
 0x176   : > { %v1205_v48 = vpop.f32.mrf.mxu0 }
 0x177   : > { %v1246_v49 = vpop.f32.mrf.mxu1 }
 0x178   : > { %v1206_v50 = vpop.f32.mrf.mxu0 }
 0x179   : > { %v1247_v51 = vpop.f32.mrf.mxu1 }
 0x17a   : > { %v1283_v55 = vpop.f32.mrf.mxu0 }
 0x17b   : > { %v1324_v56 = vpop.f32.mrf.mxu1  ;;  %v1284_v6 = vadd.f32 %v1283_v55, %v1201_v39 }
 0x17c   : > { %v1285_v58 = vpop.f32.mrf.mxu0  ;;  %v1325_v5 = vadd.f32 %v1324_v56, %v1242_v40 }
 0x17d   : > { %v1326_v59 = vpop.f32.mrf.mxu1  ;;  %v1286_v20 = vadd.f32 %v1285_v58, %v1203_v41 }
 0x17e   : > { %v1287_v60 = vpop.f32.mrf.mxu0  ;;  %v1327_v8 = vadd.f32 %v1326_v59, %v1244_v42 }
 0x17f   : > { %v1328_v61 = vpop.f32.mrf.mxu1 }
 0x180   : > { %v1288_v62 = vpop.f32.mrf.mxu0 }
 0x181   : > { %v1329_v63 = vpop.f32.mrf.mxu1 }
 0x182   : > { %v1365_v3 = vpop.f32.mrf.mxu0 }
 0x183   : > { %v1406_v1 = vpop.f32.mrf.mxu1  ;;  %v1413_v17 = vadd.f32 %v1365_v3, %v1284_v6 }
 0x184   : > { %v1367_v9 = vpop.f32.mrf.mxu0  ;;  %v1415_v18 = vadd.f32 %v1406_v1, %v1325_v5 }
 0x185   : > { %v1408_v10 = vpop.f32.mrf.mxu1  ;;  %v1414_v29 = vadd.f32 %v1367_v9, %v1286_v20  ;;  %v10536_v9 = vld [vmem:[#allocation9 + $0xc0] ss:$16 sps:$4 sm:$0xff]  }
 0x186   : > { %v1369_v11 = vpop.f32.mrf.mxu0  ;;  %v1416_v30 = vadd.f32 %v1408_v10, %v1327_v8 }
 0x187   : > { %v1410_v12 = vpop.f32.mrf.mxu1 }
 0x188   : > { %v1370_v13 = vpop.f32.mrf.mxu0 }
 0x189   : > { %v1411_v2 = vpop.f32.mrf.mxu1 }
 0x18a   : > { %v1451_v14 = vpop.f32.mrf.mxu0 }
 0x18b   : > { %v1492_v43 = vpop.f32.mrf.mxu1  ;;  %v1499_v31 = vadd.f32 %v1451_v14, %v1413_v17 }
 0x18c   : > { %v1453_v4 = vpop.f32.mrf.mxu0  ;;  %v1501_v33 = vadd.f32 %v1492_v43, %v1415_v18 }
 0x18d   : > { %v1494_v15 = vpop.f32.mrf.mxu1  ;;  %v1500_v38 = vadd.f32 %v1453_v4, %v1414_v29 }
 0x18e   : > { %v1455_v7 = vpop.f32.mrf.mxu0  ;;  %v1502_v39 = vadd.f32 %v1494_v15, %v1416_v30 }
 0x18f   : > { %v1496_v19 = vpop.f32.mrf.mxu1 }
 0x190   : > { %v1456_v23 = vpop.f32.mrf.mxu0 }
 0x191   : > { %v1497_v24 = vpop.f32.mrf.mxu1 }
 0x192   : > { %v1550_v35 = vpop.f32.mrf.mxu0 }
 0x193   : > { %v1591_v36 = vpop.f32.mrf.mxu1  ;;  %v1598_v40 = vadd.f32 %v1550_v35, %v1499_v31 }
 0x194   : > { %v1600_v41 = vadd.f32 %v1591_v36, %v1501_v33  ;;  %v1552_v42 = vpop.f32.mrf.mxu0 }
 0x195   : > { %v1593_v0 = vpop.f32.mrf.mxu1  ;;  %v1599_v47 = vadd.f32 %v1552_v42, %v1500_v38 }
 0x196   : > { %v1602_v45 = vmax.f32 %v1598_v40, %v1600_v41  ;;  %v1601_v48 = vadd.f32 %v1593_v0, %v1502_v39  ;;  %v1554_v49 = vpop.f32.mrf.mxu0 }
 0x197   : > { %v1595_v50 = vpop.f32.mrf.mxu1 }
 0x198   : > { %v1604_v51 = vmax.f32 %v1165_v25, %v1602_v45  ;;  %v1603_v52 = vmax.f32 %v1599_v47, %v1601_v48  ;;  %v1555_v54 = vpop.f32.mrf.mxu0 }
 0x199   : > { %v1596_v55 = vpop.f32.mrf.mxu1 }
 0x19a   : > { %v1618_v56 = vadd.f32 %v12803_v46, %v1604_v51  ;;  %v1605_v57 = vmax.f32 %v1166_v32, %v1603_v52  ;;  %v1658_v58 = vpop.f32.mrf.mxu0 }
 0x19b   : > { %v1699_v59 = vpop.f32.mrf.mxu1 }
 0x19c   : > { %v1619_v60 = vadd.f32 %v12809_v53, %v1605_v57  ;;  %v1660_v61 = vpop.f32.mrf.mxu0  ;;  %v1620_v21 = vmax.f32 %v1618_v56, 0.0 }
 0x19d   : > { %v1701_v62 = vpop.f32.mrf.mxu1 }
 0x19e   : > { %v1621_v22 = vmax.f32 %v1619_v60, 0.0  ;;  %v1662_v25 = vpop.f32.mrf.mxu0 }
 0x19f   : > { %v1703_v63 = vpop.f32.mrf.mxu1 }
 0x1a0   : > { %v10211_v3 = vpack.c.bf16 %v1621_v22, %v1620_v21  ;;  %v1663_v26 = vpop.f32.mrf.mxu0 }
 0x1a1   : > { %v1704_v27 = vpop.f32.mrf.mxu1 }
 0x1a2   : > { %v2523_v32 = vshrl.u32 %v10211_v3, 16  ;;  %v1740_v10 = vpop.f32.mrf.mxu0  ;;  %v2526_v13 = vshll.u32 %v10211_v3, 16 }
 0x1a3   : > { %v1781_v11 = vpop.f32.mrf.mxu1  ;;  %v1741_v34 = vadd.f32 %v1740_v10, %v1658_v58 }
 0x1a4   : > { %v2525_v12 = vrot.slane %v2523_v32, 7  ;;  %v1742_v2 = vpop.f32.mrf.mxu0  ;;  %v1782_v35 = vadd.f32 %v1781_v11, %v1699_v59 }
 0x1a5   : > { %v1783_v44 = vpop.f32.mrf.mxu1  ;;  %v1743_v39 = vadd.f32 %v1742_v2, %v1660_v61 }
 0x1a6   : > { %v2528_v14 = vor.u32 %v2526_v13, %v2525_v12  ;;  %v1744_v43 = vpop.f32.mrf.mxu0  ;;  %v1784_v40 = vadd.f32 %v1783_v44, %v1701_v62 }
 0x1a7   : > { %v1785_v4 = vpop.f32.mrf.mxu1 }
 0x1a8   : > { %v12833_v15 = vsel %vm2536_vm15, %v2528_v14, 0  ;;  %v1745_v6 = vpop.f32.mrf.mxu0 }
 0x1a9   : > { %2539 = vst [vmem:[#allocation2] sm:$0xff] %v12833_v15  ;;  %v1786_v5 = vpop.f32.mrf.mxu1  ;;  %v12871_v1 = vcombine.high %v12833_v15, %v12833_v15 }
 0x1aa   : > { %v1822_v7 = vpop.f32.mrf.mxu0 }
 0x1ab   : > { %v1863_v19 = vpop.f32.mrf.mxu1  ;;  %v1870_v41 = vadd.f32 %v1822_v7, %v1741_v34 }
 0x1ac   : > { %v1824_v20 = vpop.f32.mrf.mxu0  ;;  %v1872_v42 = vadd.f32 %v1863_v19, %v1782_v35 }
 0x1ad   : > { %v1865_v8 = vpop.f32.mrf.mxu1  ;;  %v1871_v47 = vadd.f32 %v1824_v20, %v1743_v39 }
 0x1ae   : > { %v1826_v17 = vpop.f32.mrf.mxu0  ;;  %v1873_v48 = vadd.f32 %v1865_v8, %v1784_v40 }
 0x1af   : > { %v1867_v18 = vpop.f32.mrf.mxu1 }
 0x1b0   : > { %v1827_v23 = vpop.f32.mrf.mxu0 }
 0x1b1   : > { %v1868_v24 = vpop.f32.mrf.mxu1 }
 0x1b2   : > { %v1908_v29 = vpop.f32.mrf.mxu0 }
 0x1b3   : > { %v1949_v30 = vpop.f32.mrf.mxu1  ;;  %v1956_v49 = vadd.f32 %v1908_v29, %v1870_v41 }
 0x1b4   : > { %v1910_v31 = vpop.f32.mrf.mxu0  ;;  %v1958_v50 = vadd.f32 %v1949_v30, %v1872_v42 }
 0x1b5   : > { %v1951_v33 = vpop.f32.mrf.mxu1  ;;  %v1957_v54 = vadd.f32 %v1910_v31, %v1871_v47 }
 0x1b6   : > { %v1912_v36 = vpop.f32.mrf.mxu0  ;;  %v1959_v55 = vadd.f32 %v1951_v33, %v1873_v48 }
 0x1b7   : > { %v1953_v38 = vpop.f32.mrf.mxu1 }
 0x1b8   : > { %v1913_v0 = vpop.f32.mrf.mxu0 }
 0x1b9   : > { %v1954_v45 = vpop.f32.mrf.mxu1 }
 0x1ba   : > { %v2007_v51 = vpop.f32.mrf.mxu0 }
 0x1bb   : > { %v2048_v52 = vpop.f32.mrf.mxu1  ;;  %v12836_v56 = vadd.f32 %v2007_v51, %v1956_v49 }
 0x1bc   : > { %v12838_v57 = vadd.f32 %v2048_v52, %v1958_v50  ;;  %v2009_v58 = vpop.f32.mrf.mxu0 }
 0x1bd   : > { %v2050_v59 = vpop.f32.mrf.mxu1  ;;  %v12842_v61 = vadd.f32 %v2009_v58, %v1957_v54 }
 0x1be   : > { %v2059_v60 = vmax.f32 %v12836_v56, %v12838_v57  ;;  %v12844_v62 = vadd.f32 %v2050_v59, %v1959_v55  ;;  %v2011_v21 = vpop.f32.mrf.mxu0  ;;  %v10530_v56 = vld [vmem:[#allocation9 + $0xe0] ss:$16 sps:$4 sm:$0xff]   ;;  %v10533_v57 = vld [vmem:[#allocation9 + $0xe8] ss:$16 sps:$4 sm:$0xff]  }
 0x1bf   : > { %v2052_v22 = vpop.f32.mrf.mxu1 }
 0x1c0   : > { %v2060_v25 = vmax.f32 %v12842_v61, %v12844_v62  ;;  %v2012_v63 = vpop.f32.mrf.mxu0  ;;  %v10541_v62 = vld [vmem:[#allocation9 + $0xcc] ss:$16 sps:$4 sm:$0xff]  }
 0x1c1   : > { %v2053_v3 = vpop.f32.mrf.mxu1 }
 0x1c2   : > { %v2095_v26 = vpop.f32.mrf.mxu0 }
 0x1c3   : > { %v2136_v27 = vpop.f32.mrf.mxu1 }
 0x1c4   : > { %v2097_v32 = vpop.f32.mrf.mxu0 }
 0x1c5   : > { %v2138_v10 = vpop.f32.mrf.mxu1 }
 0x1c6   : > { %v2099_v11 = vpop.f32.mrf.mxu0 }
 0x1c7   : > { %v2140_v12 = vpop.f32.mrf.mxu1 }
 0x1c8   : > { %v2100_v13 = vpop.f32.mrf.mxu0 }
 0x1c9   : > { %v2141_v2 = vpop.f32.mrf.mxu1 }
 0x1ca   : > { %v2177_v44 = vpop.f32.mrf.mxu0 }
 0x1cb   : > { %v2218_v14 = vpop.f32.mrf.mxu1  ;;  %v2178_v36 = vadd.f32 %v2177_v44, %v2095_v26 }
 0x1cc   : > { %v2179_v43 = vpop.f32.mrf.mxu0  ;;  %v2219_v38 = vadd.f32 %v2218_v14, %v2136_v27 }
 0x1cd   : > { %v2220_v4 = vpop.f32.mrf.mxu1  ;;  %v2180_v41 = vadd.f32 %v2179_v43, %v2097_v32 }
 0x1ce   : > { %v2181_v6 = vpop.f32.mrf.mxu0  ;;  %v2221_v42 = vadd.f32 %v2220_v4, %v2138_v10 }
 0x1cf   : > { %v2222_v5 = vpop.f32.mrf.mxu1 }
 0x1d0   : > { %v2182_v7 = vpop.f32.mrf.mxu0 }
 0x1d1   : > { %v2223_v19 = vpop.f32.mrf.mxu1 }
 0x1d2   : > { %v2259_v20 = vpop.f32.mrf.mxu0 }
 0x1d3   : > { %v2300_v8 = vpop.f32.mrf.mxu1  ;;  %v2307_v0 = vadd.f32 %v2259_v20, %v2178_v36  ;;  %v10559_v36 = vld [vmem:[#allocation9 + $0x6c] ss:$16 sps:$4 sm:$0xff]  }
 0x1d4   : > { %v2261_v17 = vpop.f32.mrf.mxu0  ;;  %v2309_v45 = vadd.f32 %v2300_v8, %v2219_v38  ;;  %v10554_v38 = vld [vmem:[#allocation9 + $0x60] ss:$16 sps:$4 sm:$0xff]  }
 0x1d5   : > { %v2302_v18 = vpop.f32.mrf.mxu1  ;;  %v2308_v49 = vadd.f32 %v2261_v17, %v2180_v41  ;;  %v10565_v41 = vld [vmem:[#allocation9 + $0x4c] ss:$16 sps:$4 sm:$0xff]  }
 0x1d6   : > { %v2263_v23 = vpop.f32.mrf.mxu0  ;;  %v2310_v50 = vadd.f32 %v2302_v18, %v2221_v42  ;;  %v10544_v18 = vld [vmem:[#allocation9 + $0xa4] ss:$16 sps:$4 sm:$0xff]   ;;  %v10560_v42 = vld [vmem:[#allocation9 + $0x40] ss:$16 sps:$4 sm:$0xff]  }
 0x1d7   : > { %v2304_v24 = vpop.f32.mrf.mxu1  ;;  %v10547_v23 = vld [vmem:[#allocation9 + $0xac] ss:$16 sps:$4 sm:$0xff]  }
 0x1d8   : > { %v2264_v29 = vpop.f32.mrf.mxu0  ;;  %v10542_v24 = vld [vmem:[#allocation9 + $0xa0] ss:$16 sps:$4 sm:$0xff]  }
 0x1d9   : > { %v2305_v30 = vpop.f32.mrf.mxu1  ;;  %v10545_v29 = vld [vmem:[#allocation9 + $0xa8] ss:$16 sps:$4 sm:$0xff]  }
 0x1da   : > { %v2345_v31 = vpop.f32.mrf.mxu0  ;;  %v10550_v30 = vld [vmem:[#allocation9 + $0x84] ss:$16 sps:$4 sm:$0xff]  }
 0x1db   : > { %v2386_v33 = vpop.f32.mrf.mxu1  ;;  %v2393_v51 = vadd.f32 %v2345_v31, %v2307_v0  ;;  %v10553_v31 = vld [vmem:[#allocation9 + $0x8c] ss:$16 sps:$4 sm:$0xff]   ;;  %v10563_v0 = vld [vmem:[#allocation9 + $0x48] ss:$16 sps:$4 sm:$0xff]  }
 0x1dc   : > { %v2347_v34 = vpop.f32.mrf.mxu0  ;;  %v2395_v52 = vadd.f32 %v2386_v33, %v2309_v45  ;;  %v10548_v33 = vld [vmem:[#allocation9 + $0x80] ss:$16 sps:$4 sm:$0xff]   ;;  %v10568_v45 = vld [vmem:[#allocation9 + $0x24] ss:$16 sps:$4 sm:$0xff]  }
 0x1dd   : > { %v2388_v35 = vpop.f32.mrf.mxu1  ;;  %v2394_v58 = vadd.f32 %v2347_v34, %v2308_v49  ;;  %v10551_v34 = vld [vmem:[#allocation9 + $0x88] ss:$16 sps:$4 sm:$0xff]  }
 0x1de   : > { %v2349_v39 = vpop.f32.mrf.mxu0  ;;  %v2396_v59 = vadd.f32 %v2388_v35, %v2310_v50  ;;  %v10556_v35 = vld [vmem:[#allocation9 + $0x64] ss:$16 sps:$4 sm:$0xff]   ;;  %v10569_v49 = vld [vmem:[#allocation9 + $0x28] ss:$16 sps:$4 sm:$0xff]  }
 0x1df   : > { %v2390_v40 = vpop.f32.mrf.mxu1  ;;  %v10557_v39 = vld [vmem:[#allocation9 + $0x68] ss:$16 sps:$4 sm:$0xff]   ;;  %v10574_v50 = vld [vmem:[#allocation9 + $0x4] ss:$16 sps:$4 sm:$0xff]  }
 0x1e0   : > { %v2350_v47 = vpop.f32.mrf.mxu0  ;;  %v10562_v40 = vld [vmem:[#allocation9 + $0x44] ss:$16 sps:$4 sm:$0xff]  }
 0x1e1   : > { %v2391_v48 = vpop.f32.mrf.mxu1  ;;  %v10571_v47 = vld [vmem:[#allocation9 + $0x2c] ss:$16 sps:$4 sm:$0xff]  }
 0x1e2   : > { %v2444_v54 = vpop.f32.mrf.mxu0  ;;  %v10566_v48 = vld [vmem:[#allocation9 + $0x20] ss:$16 sps:$4 sm:$0xff]  }
 0x1e3   : > { %v2485_v55 = vpop.f32.mrf.mxu1  ;;  %v2492_v21 = vadd.f32 %v2444_v54, %v2393_v51  ;;  %v10577_v51 = vld [vmem:[#allocation9 + $0xc] ss:$16 sps:$4 sm:$0xff]   ;;  %v10575_v54 = vld [vmem:[#allocation9 + $0x8] ss:$16 sps:$4 sm:$0xff]  }
 0x1e4   : > { %v2494_v22 = vadd.f32 %v2485_v55, %v2395_v52  ;;  %v2446_v63 = vpop.f32.mrf.mxu0  ;;  %v10572_v52 = vld [vmem:[#allocation9] ss:$16 sps:$4 sm:$0xff]   ;;  %v10580_v55 = vld [vmem:[#allocation9 + $0x1e4] ss:$16 sps:$4 sm:$0xff]  }
 0x1e5   : > { %v2487_v3 = vpop.f32.mrf.mxu1  ;;  %v2493_v27 = vadd.f32 %v2446_v63, %v2394_v58  ;;  %v10583_v58 = vld [vmem:[#allocation9 + $0x1ec] ss:$16 sps:$4 sm:$0xff]  }
 0x1e6   : > { %v2496_v26 = vmax.f32 %v2492_v21, %v2494_v22  ;;  %v2495_v32 = vadd.f32 %v2487_v3, %v2396_v59  ;;  %v2448_v10 = vpop.f32.mrf.mxu0  ;;  %v10578_v59 = vld [vmem:[#allocation9 + $0x1e0] ss:$16 sps:$4 sm:$0xff]   ;;  %v10581_v21 = vld [vmem:[#allocation9 + $0x1e8] ss:$16 sps:$4 sm:$0xff]   ;;  %v10586_v22 = vld [vmem:[#allocation9 + $0x1c4] ss:$16 sps:$4 sm:$0xff]  }
 0x1e7   : > { %v2489_v11 = vpop.f32.mrf.mxu1  ;;  %v10589_v63 = vld [vmem:[#allocation9 + $0x1cc] ss:$16 sps:$4 sm:$0xff]   ;;  %v10584_v3 = vld [vmem:[#allocation9 + $0x1c0] ss:$16 sps:$4 sm:$0xff]  }
 0x1e8   : > { %v2498_v12 = vmax.f32 %v2059_v60, %v2496_v26  ;;  %v2497_v13 = vmax.f32 %v2493_v27, %v2495_v32  ;;  %v2449_v2 = vpop.f32.mrf.mxu0  ;;  %v10587_v26 = vld [vmem:[#allocation9 + $0x1c8] ss:$16 sps:$4 sm:$0xff]   ;;  %v10592_v27 = vld [vmem:[#allocation9 + $0x1a4] ss:$16 sps:$4 sm:$0xff]   ;;  %v10595_v32 = vld [vmem:[#allocation9 + $0x1ac] ss:$16 sps:$4 sm:$0xff]  }
 0x1e9   : > { %v2490_v44 = vpop.f32.mrf.mxu1  ;;  %v10590_v10 = vld [vmem:[#allocation9 + $0x1a0] ss:$16 sps:$4 sm:$0xff]   ;;  %v10593_v11 = vld [vmem:[#allocation9 + $0x1a8] ss:$16 sps:$4 sm:$0xff]  }
 0x1ea   : > { %v2500_v14 = vadd.f32 %v2498_v12, %v12803_v46  ;;  %v2499_v43 = vmax.f32 %v2060_v25, %v2497_v13  ;;  %v10539_v25 = vld [vmem:[#allocation9 + $0xc8] ss:$16 sps:$4 sm:$0xff]   ;;  %v10598_v12 = vld [vmem:[#allocation9 + $0x184] ss:$16 sps:$4 sm:$0xff]   ;;  %v10601_v13 = vld [vmem:[#allocation9 + $0x18c] ss:$16 sps:$4 sm:$0xff]  }
 0x1eb   : > { %v10596_v2 = vld [vmem:[#allocation9 + $0x180] ss:$16 sps:$4 sm:$0xff]   ;;  %v10599_v44 = vld [vmem:[#allocation9 + $0x188] ss:$16 sps:$4 sm:$0xff]  }
 0x1ec   : > { %v2501_v4 = vadd.f32 %v2499_v43, %v12809_v53  ;;  %v2502_v6 = vmax.f32 %v2500_v14, 0.0  ;;  %v10538_v53 = vld [vmem:[#allocation9 + $0xc4] ss:$16 sps:$4 sm:$0xff]   ;;  %v10607_v43 = vld [vmem:[#allocation9 + $0x16c] ss:$16 sps:$4 sm:$0xff]  }
 0x1ed   : > { %v10604_v14 = vld [vmem:[#allocation9 + $0x164] ss:$16 sps:$4 sm:$0xff]  }
 0x1ee   : > { %v2503_v5 = vmax.f32 %v2501_v4, 0.0  ;;  %v10602_v4 = vld [vmem:[#allocation9 + $0x160] ss:$16 sps:$4 sm:$0xff]  }
 0x1f0   : > { %v10212_v7 = vpack.c.bf16 %v2503_v5, %v2502_v6  ;;  %v10605_v6 = vld [vmem:[#allocation9 + $0x168] ss:$16 sps:$4 sm:$0xff]   ;;  %v10610_v5 = vld [vmem:[#allocation9 + $0x144] ss:$16 sps:$4 sm:$0xff]  }
 0x1f2   : > { %v2550_v19 = vshrl.u32 %v10212_v7, 16  ;;  %v2553_v8 = vshll.u32 %v10212_v7, 16  ;;  %v10613_v7 = vld [vmem:[#allocation9 + $0x14c] ss:$16 sps:$4 sm:$0xff]  }
 0x1f4   : > { %v2552_v20 = vrot.slane %v2550_v19, 7  ;;  %v10608_v19 = vld [vmem:[#allocation9 + $0x140] ss:$16 sps:$4 sm:$0xff]  }
 0x1f6   : > { %v2555_v17 = vor.u32 %v2553_v8, %v2552_v20  ;;  %v10611_v20 = vld [vmem:[#allocation9 + $0x148] ss:$16 sps:$4 sm:$0xff]   ;;  %v10616_v8 = vld [vmem:[#allocation9 + $0x124] ss:$16 sps:$4 sm:$0xff]  }
 0x1f8   : > { %v2558_v46 = vsel %vm2536_vm15, %v2555_v17, 0  ;;  %v10619_v17 = vld [vmem:[#allocation9 + $0x12c] ss:$16 sps:$4 sm:$0xff]  }
 0x1f9   : > { %2559 = vst [vmem:[#allocation3 + $0x8] sm:$0xff] %v2558_v46  ;;  %v12861_v60 = vcombine.high %v2558_v46, %v2558_v46  ;;  %v12863_v61 = vcombine.low %v2558_v46, %v2558_v46  ;;  %v10622_v46 = vld [vmem:[#allocation9 + $0x104] ss:$16 sps:$4 sm:$0xff]  }
 0x1fb   : > { %3050 = vmatprep.mubr.bf16.mxu0 %v12861_v60  ;;  %3091 = vmatprep.mubr.bf16.mxu1 %v12861_v60 }
 0x1fc   : > { %3051 = vmatmul.mubr.bf16.vlgmr.msra.gmra.mxu0 %v12863_v61  ;;  %3092 = vmatmul.mubr.bf16.vlgmr.msra.gmra.mxu1 %v12863_v61 }
 0x1fd   : > { %3428 = vmatpush1.bf16.msra.mxu0 %v10530_v56  ;;  %3469 = vmatpush1.bf16.msra.mxu1 %v10533_v57  ;;  %v10614_v56 = vld [vmem:[#allocation9 + $0x120] ss:$16 sps:$4 sm:$0xff]   ;;  %v10617_v57 = vld [vmem:[#allocation9 + $0x128] ss:$16 sps:$4 sm:$0xff]  }
 0x1fe   : > { %3459 = vmatprep.mubr.bf16.mxu0 %v12871_v1  ;;  %3500 = vmatprep.mubr.bf16.mxu1 %v12871_v1 }
 0x1ff   : > { %3429 = vmatprep.subr.bf16.mxu0 %v10538_v53  ;;  %3470 = vmatprep.subr.bf16.mxu1 %v10541_v62  ;;  %v10625_v53 = vld [vmem:[#allocation9 + $0x10c] ss:$16 sps:$4 sm:$0xff]   ;;  %v3584_v62 = vshll.u32 %v12871_v1, 16 }
 0x201   : > { %3430 = vmatpush1.bf16.msra.mxu0 %v10536_v9  ;;  %3471 = vmatpush1.bf16.msra.mxu1 %v10539_v25  ;;  %v10620_v9 = vld [vmem:[#allocation9 + $0x100] ss:$16 sps:$4 sm:$0xff]   ;;  %v10623_v25 = vld [vmem:[#allocation9 + $0x108] ss:$16 sps:$4 sm:$0xff]  }
 0x202   : > { %3431 = vmatprep.subr.bf16.mxu0 %v10544_v18  ;;  %3472 = vmatprep.subr.bf16.mxu1 %v10547_v23  ;;  %v10628_v18 = vld [vmem:[#allocation9 + $0x4e4] ss:$16 sps:$4 sm:$0xff]   ;;  %v10631_v23 = vld [vmem:[#allocation9 + $0x4ec] ss:$16 sps:$4 sm:$0xff]  }
 0x205   : > { %3432 = vmatpush1.bf16.msra.mxu0 %v10542_v24  ;;  %3473 = vmatpush1.bf16.msra.mxu1 %v10545_v29  ;;  %v3586_v24 = vrot.slane %v3584_v62, 1  ;;  %v10626_v29 = vld [vmem:[#allocation9 + $0x4e0] ss:$16 sps:$4 sm:$0xff]   ;;  %v10706_v62 = vld [vmem:[#allocation9 + $0x544] ss:$16 sps:$4 sm:$0xff]  }
 0x206   : > { %3433 = vmatprep.subr.bf16.mxu0 %v10550_v30  ;;  %3474 = vmatprep.subr.bf16.mxu1 %v10553_v31  ;;  %v3582_v30 = vshrl.u32 %v12871_v1, 16  ;;  %v12879_v31 = vcombine.low %v12833_v15, %v12833_v15  ;;  %v10635_v15 = vld [vmem:[#allocation9 + $0x4c8] ss:$16 sps:$4 sm:$0xff]   ;;  %v10640_v1 = vld [vmem:[#allocation9 + $0x4a4] ss:$16 sps:$4 sm:$0xff]  }
 0x209   : > { %3434 = vmatpush1.bf16.msra.mxu0 %v10548_v33  ;;  %3475 = vmatpush1.bf16.msra.mxu1 %v10551_v34  ;;  %v10629_v33 = vld [vmem:[#allocation9 + $0x4e8] ss:$16 sps:$4 sm:$0xff]   ;;  %v12881_v34 = vor.u32 %v3586_v24, %v3582_v30  ;;  %v10715_v24 = vld [vmem:[#allocation9 + $0x52c] ss:$16 sps:$4 sm:$0xff]  }
 0x20a   : > { %3435 = vmatprep.subr.bf16.mxu0 %v10556_v35  ;;  %3476 = vmatprep.subr.bf16.mxu1 %v10559_v36  ;;  %v10634_v35 = vld [vmem:[#allocation9 + $0x4c4] ss:$16 sps:$4 sm:$0xff]   ;;  %v10637_v36 = vld [vmem:[#allocation9 + $0x4cc] ss:$16 sps:$4 sm:$0xff]   ;;  %v10713_v30 = vld [vmem:[#allocation9 + $0x528] ss:$16 sps:$4 sm:$0xff]  }
 0x20d   : > { %3436 = vmatpush1.bf16.msra.mxu0 %v10554_v38  ;;  %3477 = vmatpush1.bf16.msra.mxu1 %v10557_v39  ;;  %v10632_v38 = vld [vmem:[#allocation9 + $0x4c0] ss:$16 sps:$4 sm:$0xff]   ;;  %v10643_v39 = vld [vmem:[#allocation9 + $0x4ac] ss:$16 sps:$4 sm:$0xff]  }
 0x20e   : > { %3437 = vmatprep.subr.bf16.mxu0 %v10562_v40  ;;  %3478 = vmatprep.subr.bf16.mxu1 %v10565_v41  ;;  %v10638_v40 = vld [vmem:[#allocation9 + $0x4a0] ss:$16 sps:$4 sm:$0xff]   ;;  %v10641_v41 = vld [vmem:[#allocation9 + $0x4a8] ss:$16 sps:$4 sm:$0xff]  }
 0x211   : > { %3438 = vmatpush1.bf16.msra.mxu0 %v10560_v42  ;;  %3479 = vmatpush1.bf16.msra.mxu1 %v10563_v0  ;;  %v10646_v42 = vld [vmem:[#allocation9 + $0x484] ss:$16 sps:$4 sm:$0xff]   ;;  %v10649_v0 = vld [vmem:[#allocation9 + $0x48c] ss:$16 sps:$4 sm:$0xff]  }
 0x212   : > { %3439 = vmatprep.subr.bf16.mxu0 %v10568_v45  ;;  %3480 = vmatprep.subr.bf16.mxu1 %v10571_v47  ;;  %v10644_v45 = vld [vmem:[#allocation9 + $0x480] ss:$16 sps:$4 sm:$0xff]   ;;  %v10647_v47 = vld [vmem:[#allocation9 + $0x488] ss:$16 sps:$4 sm:$0xff]  }
 0x215   : > { %3440 = vmatpush1.bf16.msra.mxu0 %v10566_v48  ;;  %3481 = vmatpush1.bf16.msra.mxu1 %v10569_v49  ;;  %v10652_v48 = vld [vmem:[#allocation9 + $0x464] ss:$16 sps:$4 sm:$0xff]   ;;  %v10655_v49 = vld [vmem:[#allocation9 + $0x46c] ss:$16 sps:$4 sm:$0xff]  }
 0x216   : > { %3441 = vmatprep.subr.bf16.mxu0 %v10574_v50  ;;  %3482 = vmatprep.subr.bf16.mxu1 %v10577_v51  ;;  %v10650_v50 = vld [vmem:[#allocation9 + $0x460] ss:$16 sps:$4 sm:$0xff]   ;;  %v10653_v51 = vld [vmem:[#allocation9 + $0x468] ss:$16 sps:$4 sm:$0xff]  }
 0x219   : > { %3442 = vmatpush1.bf16.msra.mxu0 %v10572_v52  ;;  %3483 = vmatpush1.bf16.msra.mxu1 %v10575_v54  ;;  %v10658_v52 = vld [vmem:[#allocation9 + $0x444] ss:$16 sps:$4 sm:$0xff]   ;;  %v10661_v54 = vld [vmem:[#allocation9 + $0x44c] ss:$16 sps:$4 sm:$0xff]  }
 0x21a   : > { %3443 = vmatprep.subr.bf16.mxu0 %v10580_v55  ;;  %3484 = vmatprep.subr.bf16.mxu1 %v10583_v58  ;;  %v10656_v55 = vld [vmem:[#allocation9 + $0x440] ss:$16 sps:$4 sm:$0xff]   ;;  %v10659_v58 = vld [vmem:[#allocation9 + $0x448] ss:$16 sps:$4 sm:$0xff]  }
 0x21d   : > { %3444 = vmatpush2.bf16.msra.mxu0 %v10578_v59  ;;  %3485 = vmatpush2.bf16.msra.mxu1 %v10581_v21  ;;  %v10664_v59 = vld [vmem:[#allocation9 + $0x424] ss:$16 sps:$4 sm:$0xff]   ;;  %v10667_v21 = vld [vmem:[#allocation9 + $0x42c] ss:$16 sps:$4 sm:$0xff]  }
 0x21e   : > { %3445 = vmatprep.subr.bf16.mxu0 %v10586_v22  ;;  %3486 = vmatprep.subr.bf16.mxu1 %v10589_v63  ;;  %v10662_v22 = vld [vmem:[#allocation9 + $0x420] ss:$16 sps:$4 sm:$0xff]   ;;  %v10665_v63 = vld [vmem:[#allocation9 + $0x428] ss:$16 sps:$4 sm:$0xff]  }
 0x221   : > { %3446 = vmatpush2.bf16.msra.mxu0 %v10584_v3  ;;  %3487 = vmatpush2.bf16.msra.mxu1 %v10587_v26  ;;  %v10670_v3 = vld [vmem:[#allocation9 + $0x404] ss:$16 sps:$4 sm:$0xff]   ;;  %v10673_v26 = vld [vmem:[#allocation9 + $0x40c] ss:$16 sps:$4 sm:$0xff]  }
 0x222   : > { %3447 = vmatprep.subr.bf16.mxu0 %v10592_v27  ;;  %3488 = vmatprep.subr.bf16.mxu1 %v10595_v32  ;;  %v10668_v27 = vld [vmem:[#allocation9 + $0x400] ss:$16 sps:$4 sm:$0xff]   ;;  %v10671_v32 = vld [vmem:[#allocation9 + $0x408] ss:$16 sps:$4 sm:$0xff]  }
 0x225   : > { %3448 = vmatpush2.bf16.msra.mxu0 %v10590_v10  ;;  %3489 = vmatpush2.bf16.msra.mxu1 %v10593_v11  ;;  %v10676_v10 = vld [vmem:[#allocation9 + $0x5e4] ss:$16 sps:$4 sm:$0xff]   ;;  %v10679_v11 = vld [vmem:[#allocation9 + $0x5ec] ss:$16 sps:$4 sm:$0xff]  }
 0x226   : > { %3449 = vmatprep.subr.bf16.mxu0 %v10598_v12  ;;  %3490 = vmatprep.subr.bf16.mxu1 %v10601_v13  ;;  %v10674_v12 = vld [vmem:[#allocation9 + $0x5e0] ss:$16 sps:$4 sm:$0xff]   ;;  %v10677_v13 = vld [vmem:[#allocation9 + $0x5e8] ss:$16 sps:$4 sm:$0xff]  }
 0x229   : > { %3450 = vmatpush2.bf16.msra.mxu0 %v10596_v2  ;;  %3491 = vmatpush2.bf16.msra.mxu1 %v10599_v44  ;;  %v10682_v2 = vld [vmem:[#allocation9 + $0x5c4] ss:$16 sps:$4 sm:$0xff]   ;;  %v10685_v44 = vld [vmem:[#allocation9 + $0x5cc] ss:$16 sps:$4 sm:$0xff]  }
 0x22a   : > { %3451 = vmatprep.subr.bf16.mxu0 %v10604_v14  ;;  %3492 = vmatprep.subr.bf16.mxu1 %v10607_v43  ;;  %v10680_v14 = vld [vmem:[#allocation9 + $0x5c0] ss:$16 sps:$4 sm:$0xff]   ;;  %v10683_v43 = vld [vmem:[#allocation9 + $0x5c8] ss:$16 sps:$4 sm:$0xff]  }
 0x22d   : > { %3452 = vmatpush2.bf16.msra.mxu0 %v10602_v4  ;;  %3493 = vmatpush2.bf16.msra.mxu1 %v10605_v6  ;;  %v10688_v4 = vld [vmem:[#allocation9 + $0x5a4] ss:$16 sps:$4 sm:$0xff]   ;;  %v10691_v6 = vld [vmem:[#allocation9 + $0x5ac] ss:$16 sps:$4 sm:$0xff]  }
 0x22e   : > { %3453 = vmatprep.subr.bf16.mxu0 %v10610_v5  ;;  %3494 = vmatprep.subr.bf16.mxu1 %v10613_v7  ;;  %v10686_v5 = vld [vmem:[#allocation9 + $0x5a0] ss:$16 sps:$4 sm:$0xff]   ;;  %v10689_v7 = vld [vmem:[#allocation9 + $0x5a8] ss:$16 sps:$4 sm:$0xff]  }
 0x231   : > { %3454 = vmatpush2.bf16.msra.mxu0 %v10608_v19  ;;  %3495 = vmatpush2.bf16.msra.mxu1 %v10611_v20  ;;  %v10694_v19 = vld [vmem:[#allocation9 + $0x584] ss:$16 sps:$4 sm:$0xff]   ;;  %v10697_v20 = vld [vmem:[#allocation9 + $0x58c] ss:$16 sps:$4 sm:$0xff]  }
 0x232   : > { %3455 = vmatprep.subr.bf16.mxu0 %v10616_v8  ;;  %3496 = vmatprep.subr.bf16.mxu1 %v10619_v17  ;;  %v10692_v8 = vld [vmem:[#allocation9 + $0x580] ss:$16 sps:$4 sm:$0xff]   ;;  %v10695_v17 = vld [vmem:[#allocation9 + $0x588] ss:$16 sps:$4 sm:$0xff]  }
 0x235   : > { %3456 = vmatpush2.bf16.msra.mxu0 %v10614_v56  ;;  %3497 = vmatpush2.bf16.msra.mxu1 %v10617_v57  ;;  %v10700_v56 = vld [vmem:[#allocation9 + $0x564] ss:$16 sps:$4 sm:$0xff]   ;;  %v10703_v57 = vld [vmem:[#allocation9 + $0x56c] ss:$16 sps:$4 sm:$0xff]  }
 0x236   : > { %3457 = vmatprep.subr.bf16.mxu0 %v10622_v46  ;;  %3498 = vmatprep.subr.bf16.mxu1 %v10625_v53  ;;  %v10698_v46 = vld [vmem:[#allocation9 + $0x560] ss:$16 sps:$4 sm:$0xff]   ;;  %v10701_v53 = vld [vmem:[#allocation9 + $0x568] ss:$16 sps:$4 sm:$0xff]  }
 0x239   : > { %3458 = vmatpush2.bf16.msra.mxu0 %v10620_v9  ;;  %3499 = vmatpush2.bf16.msra.mxu1 %v10623_v25  ;;  %v10709_v9 = vld [vmem:[#allocation9 + $0x54c] ss:$16 sps:$4 sm:$0xff]   ;;  %v10704_v25 = vld [vmem:[#allocation9 + $0x540] ss:$16 sps:$4 sm:$0xff]  }
 0x23a   : > { %3910 = vmatprep.subr.bf16.mxu0 %v10628_v18  ;;  %3951 = vmatprep.subr.bf16.mxu1 %v10631_v23  ;;  %v10707_v18 = vld [vmem:[#allocation9 + $0x548] ss:$16 sps:$4 sm:$0xff]   ;;  %v10712_v23 = vld [vmem:[#allocation9 + $0x524] ss:$16 sps:$4 sm:$0xff]  }
 0x23c   : > { %3460 = vmatmul.mubr.bf16.vlgmr.msra.gmra.mxu0 %v12879_v31  ;;  %3501 = vmatmul.mubr.bf16.vlgmr.msra.gmra.mxu1 %v12879_v31 }
 0x23d   : > { %3911 = vmatpush1.bf16.msra.mxu0 %v10626_v29  ;;  %3942 = vmatprep.mubr.bf16.mxu0 %v12881_v34  ;;  %v10710_v29 = vld [vmem:[#allocation9 + $0x520] ss:$16 sps:$4 sm:$0xff]  }
 0x23e   : > { %3952 = vmatpush1.bf16.msra.mxu1 %v10629_v33  ;;  %3983 = vmatprep.mubr.bf16.mxu1 %v12881_v34  ;;  %v10718_v33 = vld [vmem:[#allocation9 + $0x504] ss:$16 sps:$4 sm:$0xff]  }
 0x23f   : > { %3912 = vmatprep.subr.bf16.mxu0 %v10634_v35  ;;  %3953 = vmatprep.subr.bf16.mxu1 %v10637_v36  ;;  %v3577_v35 = vshll.u32 %v12879_v31, 16  ;;  %v10721_v36 = vld [vmem:[#allocation9 + $0x50c] ss:$16 sps:$4 sm:$0xff]  }
 0x241   : > { %3913 = vmatpush1.bf16.msra.mxu0 %v10632_v38  ;;  %v4071_v38 = vshll.u32 %v12861_v60, 16 }
 0x242   : > { %3954 = vmatpush1.bf16.msra.mxu1 %v10635_v15  ;;  %3914 = vmatprep.subr.bf16.mxu0 %v10640_v1  ;;  %v10716_v15 = vld [vmem:[#allocation9 + $0x500] ss:$16 sps:$4 sm:$0xff]   ;;  %v10719_v1 = vld [vmem:[#allocation9 + $0x508] ss:$16 sps:$4 sm:$0xff]  }
 0x243   : > { %3955 = vmatprep.subr.bf16.mxu1 %v10643_v39  ;;  %v3579_v39 = vrot.slane %v3577_v35, 1  ;;  %v12960_v35 = vld [vmem:[#allocation9 + $0x788] ss:$16 sps:$4 sm:$0xff]  }
 0x245   : > { %3915 = vmatpush1.bf16.msra.mxu0 %v10638_v40  ;;  %v10724_v40 = vld [vmem:[#allocation9 + $0x6e4] ss:$16 sps:$4 sm:$0xff]  }
 0x246   : > { %3956 = vmatpush1.bf16.msra.mxu1 %v10641_v41  ;;  %3916 = vmatprep.subr.bf16.mxu0 %v10646_v42  ;;  %v10727_v41 = vld [vmem:[#allocation9 + $0x6ec] ss:$16 sps:$4 sm:$0xff]   ;;  %v3575_v42 = vshrl.u32 %v12879_v31, 16  ;;  %v10728_v31 = vld [vmem:[#allocation9 + $0x6c0] ss:$16 sps:$4 sm:$0xff]  }
 0x247   : > { %3957 = vmatprep.subr.bf16.mxu1 %v10649_v0  ;;  %v4073_v0 = vrot.slane %v4071_v38, 1  ;;  %v12965_v38 = vld [vmem:[#allocation9 + $0x76c] ss:$16 sps:$4 sm:$0xff]  }
 0x249   : > { %3917 = vmatpush1.bf16.msra.mxu0 %v10644_v45  ;;  %v10722_v45 = vld [vmem:[#allocation9 + $0x6e0] ss:$16 sps:$4 sm:$0xff]  }
 0x24a   : > { %3958 = vmatpush1.bf16.msra.mxu1 %v10647_v47  ;;  %3918 = vmatprep.subr.bf16.mxu0 %v10652_v48  ;;  %v12890_v47 = vor.u32 %v3579_v39, %v3575_v42  ;;  %v10725_v48 = vld [vmem:[#allocation9 + $0x6e8] ss:$16 sps:$4 sm:$0xff]   ;;  %v12974_v39 = vld [vmem:[#allocation9 + $0x744] ss:$16 sps:$4 sm:$0xff]  }
 0x24b   : > { %3959 = vmatprep.subr.bf16.mxu1 %v10655_v49  ;;  %v4069_v49 = vshrl.u32 %v12861_v60, 16  ;;  %v12984_v42 = vld [vmem:[#allocation9 + $0x748] ss:$16 sps:$4 sm:$0xff]  }
 0x24d   : > { %3919 = vmatpush1.bf16.msra.mxu0 %v10650_v50  ;;  %v10730_v50 = vld [vmem:[#allocation9 + $0x6c4] ss:$16 sps:$4 sm:$0xff]  }
 0x24e   : > { %3960 = vmatpush1.bf16.msra.mxu1 %v10653_v51  ;;  %3920 = vmatprep.subr.bf16.mxu0 %v10658_v52  ;;  %v12894_v51 = vor.u32 %v4073_v0, %v4069_v49  ;;  %v10733_v52 = vld [vmem:[#allocation9 + $0x6cc] ss:$16 sps:$4 sm:$0xff]   ;;  %v12986_v0 = vld [vmem:[#allocation9 + $0x724] ss:$16 sps:$4 sm:$0xff]   ;;  %v12996_v49 = vld [vmem:[#allocation9 + $0x728] ss:$16 sps:$4 sm:$0xff]  }
 0x24f   : > { %3961 = vmatprep.subr.bf16.mxu1 %v10661_v54  ;;  %v10731_v54 = vld [vmem:[#allocation9 + $0x6c8] ss:$16 sps:$4 sm:$0xff]  }
 0x251   : > { %3921 = vmatpush1.bf16.msra.mxu0 %v10656_v55  ;;  %v10736_v55 = vld [vmem:[#allocation9 + $0x6a4] ss:$16 sps:$4 sm:$0xff]  }
 0x252   : > { %3962 = vmatpush1.bf16.msra.mxu1 %v10659_v58  ;;  %3922 = vmatprep.subr.bf16.mxu0 %v10664_v59  ;;  %v10739_v58 = vld [vmem:[#allocation9 + $0x6ac] ss:$16 sps:$4 sm:$0xff]   ;;  %v10734_v59 = vld [vmem:[#allocation9 + $0x6a0] ss:$16 sps:$4 sm:$0xff]  }
 0x253   : > { %3963 = vmatprep.subr.bf16.mxu1 %v10667_v21  ;;  %v10737_v21 = vld [vmem:[#allocation9 + $0x6a8] ss:$16 sps:$4 sm:$0xff]  }
 0x255   : > { %3923 = vmatpush1.bf16.msra.mxu0 %v10662_v22  ;;  %v10742_v22 = vld [vmem:[#allocation9 + $0x684] ss:$16 sps:$4 sm:$0xff]  }
 0x256   : > { %3964 = vmatpush1.bf16.msra.mxu1 %v10665_v63  ;;  %3924 = vmatprep.subr.bf16.mxu0 %v10670_v3  ;;  %v10745_v63 = vld [vmem:[#allocation9 + $0x68c] ss:$16 sps:$4 sm:$0xff]   ;;  %v10740_v3 = vld [vmem:[#allocation9 + $0x680] ss:$16 sps:$4 sm:$0xff]  }
 0x257   : > { %3965 = vmatprep.subr.bf16.mxu1 %v10673_v26  ;;  %v10743_v26 = vld [vmem:[#allocation9 + $0x688] ss:$16 sps:$4 sm:$0xff]  }
 0x259   : > { %3925 = vmatpush1.bf16.msra.mxu0 %v10668_v27  ;;  %v10748_v27 = vld [vmem:[#allocation9 + $0x664] ss:$16 sps:$4 sm:$0xff]  }
 0x25a   : > { %3966 = vmatpush1.bf16.msra.mxu1 %v10671_v32  ;;  %3926 = vmatprep.subr.bf16.mxu0 %v10676_v10  ;;  %v10751_v32 = vld [vmem:[#allocation9 + $0x66c] ss:$16 sps:$4 sm:$0xff]   ;;  %v10746_v10 = vld [vmem:[#allocation9 + $0x660] ss:$16 sps:$4 sm:$0xff]  }
 0x25b   : > { %3967 = vmatprep.subr.bf16.mxu1 %v10679_v11  ;;  %v10749_v11 = vld [vmem:[#allocation9 + $0x668] ss:$16 sps:$4 sm:$0xff]  }
 0x25d   : > { %3927 = vmatpush2.bf16.msra.mxu0 %v10674_v12  ;;  %v10754_v12 = vld [vmem:[#allocation9 + $0x644] ss:$16 sps:$4 sm:$0xff]  }
 0x25e   : > { %3968 = vmatpush2.bf16.msra.mxu1 %v10677_v13  ;;  %3928 = vmatprep.subr.bf16.mxu0 %v10682_v2  ;;  %v10757_v13 = vld [vmem:[#allocation9 + $0x64c] ss:$16 sps:$4 sm:$0xff]   ;;  %v10752_v2 = vld [vmem:[#allocation9 + $0x640] ss:$16 sps:$4 sm:$0xff]  }
 0x25f   : > { %3969 = vmatprep.subr.bf16.mxu1 %v10685_v44  ;;  %v10755_v44 = vld [vmem:[#allocation9 + $0x648] ss:$16 sps:$4 sm:$0xff]  }
 0x261   : > { %3929 = vmatpush2.bf16.msra.mxu0 %v10680_v14  ;;  %v10760_v14 = vld [vmem:[#allocation9 + $0x624] ss:$16 sps:$4 sm:$0xff]  }
 0x262   : > { %3970 = vmatpush2.bf16.msra.mxu1 %v10683_v43  ;;  %3930 = vmatprep.subr.bf16.mxu0 %v10688_v4  ;;  %v10763_v43 = vld [vmem:[#allocation9 + $0x62c] ss:$16 sps:$4 sm:$0xff]   ;;  %v12899_v4 = vld [vmem:[#allocation9 + $0x620] ss:$16 sps:$4 sm:$0xff]  }
 0x263   : > { %3971 = vmatprep.subr.bf16.mxu1 %v10691_v6  ;;  %v12901_v6 = vld [vmem:[#allocation9 + $0x628] ss:$16 sps:$4 sm:$0xff]  }
 0x265   : > { %3931 = vmatpush2.bf16.msra.mxu0 %v10686_v5  ;;  %v12903_v5 = vld [vmem:[#allocation9 + $0x604] ss:$16 sps:$4 sm:$0xff]  }
 0x266   : > { %3972 = vmatpush2.bf16.msra.mxu1 %v10689_v7  ;;  %3932 = vmatprep.subr.bf16.mxu0 %v10694_v19  ;;  %v12905_v7 = vld [vmem:[#allocation9 + $0x60c] ss:$16 sps:$4 sm:$0xff]   ;;  %v12908_v19 = vld [vmem:[#allocation9 + $0x600] ss:$16 sps:$4 sm:$0xff]  }
 0x267   : > { %3973 = vmatprep.subr.bf16.mxu1 %v10697_v20  ;;  %v12912_v20 = vld [vmem:[#allocation9 + $0x608] ss:$16 sps:$4 sm:$0xff]  }
 0x269   : > { %3933 = vmatpush2.bf16.msra.mxu0 %v10692_v8  ;;  %v12914_v8 = vld [vmem:[#allocation9 + $0x7e4] ss:$16 sps:$4 sm:$0xff]  }
 0x26a   : > { %3974 = vmatpush2.bf16.msra.mxu1 %v10695_v17  ;;  %3934 = vmatprep.subr.bf16.mxu0 %v10700_v56  ;;  %v12917_v17 = vld [vmem:[#allocation9 + $0x7ec] ss:$16 sps:$4 sm:$0xff]   ;;  %v12920_v56 = vld [vmem:[#allocation9 + $0x7e0] ss:$16 sps:$4 sm:$0xff]  }
 0x26b   : > { %3975 = vmatprep.subr.bf16.mxu1 %v10703_v57  ;;  %v12924_v57 = vld [vmem:[#allocation9 + $0x7e8] ss:$16 sps:$4 sm:$0xff]  }
 0x26d   : > { %3935 = vmatpush2.bf16.msra.mxu0 %v10698_v46  ;;  %v12926_v46 = vld [vmem:[#allocation9 + $0x7c4] ss:$16 sps:$4 sm:$0xff]  }
 0x26e   : > { %3976 = vmatpush2.bf16.msra.mxu1 %v10701_v53  ;;  %3936 = vmatprep.subr.bf16.mxu0 %v10706_v62  ;;  %v12929_v53 = vld [vmem:[#allocation9 + $0x7cc] ss:$16 sps:$4 sm:$0xff]   ;;  %v12932_v62 = vld [vmem:[#allocation9 + $0x7c0] ss:$16 sps:$4 sm:$0xff]  }
 0x26f   : > { %3977 = vmatprep.subr.bf16.mxu1 %v10709_v9  ;;  %v12936_v9 = vld [vmem:[#allocation9 + $0x7c8] ss:$16 sps:$4 sm:$0xff]  }
 0x271   : > { %3937 = vmatpush2.bf16.msra.mxu0 %v10704_v25  ;;  %v12938_v25 = vld [vmem:[#allocation9 + $0x7a4] ss:$16 sps:$4 sm:$0xff]  }
 0x272   : > { %3978 = vmatpush2.bf16.msra.mxu1 %v10707_v18  ;;  %3938 = vmatprep.subr.bf16.mxu0 %v10712_v23  ;;  %v12941_v18 = vld [vmem:[#allocation9 + $0x7ac] ss:$16 sps:$4 sm:$0xff]   ;;  %v12944_v23 = vld [vmem:[#allocation9 + $0x7a0] ss:$16 sps:$4 sm:$0xff]  }
 0x273   : > { %3979 = vmatprep.subr.bf16.mxu1 %v10715_v24  ;;  %v12948_v24 = vld [vmem:[#allocation9 + $0x7a8] ss:$16 sps:$4 sm:$0xff]  }
 0x275   : > { %3939 = vmatpush2.bf16.msra.mxu0 %v10710_v29  ;;  %v12950_v29 = vld [vmem:[#allocation9 + $0x784] ss:$16 sps:$4 sm:$0xff]  }
 0x276   : > { %3980 = vmatpush2.bf16.msra.mxu1 %v10713_v30  ;;  %3940 = vmatprep.subr.bf16.mxu0 %v10718_v33  ;;  %v12953_v30 = vld [vmem:[#allocation9 + $0x78c] ss:$16 sps:$4 sm:$0xff]   ;;  %v12956_v33 = vld [vmem:[#allocation9 + $0x780] ss:$16 sps:$4 sm:$0xff]  }
 0x277   : > { %3981 = vmatprep.subr.bf16.mxu1 %v10721_v36  ;;  %v12962_v36 = vld [vmem:[#allocation9 + $0x764] ss:$16 sps:$4 sm:$0xff]  }
 0x279   : > { %3941 = vmatpush2.bf16.msra.mxu0 %v10716_v15  ;;  %v12968_v15 = vld [vmem:[#allocation9 + $0x760] ss:$16 sps:$4 sm:$0xff]  }
 0x27a   : > { %3982 = vmatpush2.bf16.msra.mxu1 %v10719_v1  ;;  %4397 = vmatprep.subr.bf16.mxu0 %v10724_v40  ;;  %v12972_v1 = vld [vmem:[#allocation9 + $0x768] ss:$16 sps:$4 sm:$0xff]   ;;  %v12977_v40 = vld [vmem:[#allocation9 + $0x74c] ss:$16 sps:$4 sm:$0xff]  }
 0x27b   : > { %4438 = vmatprep.subr.bf16.mxu1 %v10727_v41  ;;  %v12980_v41 = vld [vmem:[#allocation9 + $0x740] ss:$16 sps:$4 sm:$0xff]  }
 0x27c   : > { %3943 = vmatmul.mubr.bf16.vlgmr.msra.gmra.mxu0 %v12890_v47 }
 0x27d   : > { %3984 = vmatmul.mubr.bf16.vlgmr.msra.gmra.mxu1 %v12890_v47  ;;  %4398 = vmatpush1.bf16.msra.mxu0 %v10722_v45  ;;  %v12989_v45 = vld [vmem:[#allocation9 + $0x72c] ss:$16 sps:$4 sm:$0xff]  }
 0x27e   : > { %4429 = vmatprep.mubr.bf16.mxu0 %v12894_v51  ;;  %4439 = vmatpush1.bf16.msra.mxu1 %v10725_v48  ;;  %v12992_v48 = vld [vmem:[#allocation9 + $0x720] ss:$16 sps:$4 sm:$0xff]  }
 0x27f   : > { %4470 = vmatprep.mubr.bf16.mxu1 %v12894_v51  ;;  %4399 = vmatprep.subr.bf16.mxu0 %v10730_v50  ;;  %v12998_v50 = vld [vmem:[#allocation9 + $0x704] ss:$16 sps:$4 sm:$0xff]  }
 0x280   : > { %4440 = vmatprep.subr.bf16.mxu1 %v10733_v52  ;;  %v4064_v52 = vshll.u32 %v12863_v61, 16 }
 0x281   : > { %4400 = vmatpush1.bf16.msra.mxu0 %v10728_v31  ;;  %v13002_v31 = vld [vmem:[#allocation9 + $0x70c] ss:$16 sps:$4 sm:$0xff]  }
 0x282   : > { %4441 = vmatpush1.bf16.msra.mxu1 %v10731_v54  ;;  %4401 = vmatprep.subr.bf16.mxu0 %v10736_v55  ;;  %v13005_v54 = vld [vmem:[#allocation9 + $0x700] ss:$16 sps:$4 sm:$0xff]   ;;  %v13009_v55 = vld [vmem:[#allocation9 + $0x708] ss:$16 sps:$4 sm:$0xff]  }
 0x283   : > { %4442 = vmatprep.subr.bf16.mxu1 %v10739_v58  ;;  %v4066_v58 = vrot.slane %v4064_v52, 1  ;;  %v13050_v52 = vld [vmem:[#allocation9 + $0x8a4] ss:$16 sps:$4 sm:$0xff]  }
 0x284   : > { %13743 = vst [vmem:[#allocation31_spill] sm:$0xff] %v13050_v52 }
 0x285   : > { %4402 = vmatpush1.bf16.msra.mxu0 %v10734_v59  ;;  %v13011_v59 = vld [vmem:[#allocation9 + $0x8e4] ss:$16 sps:$4 sm:$0xff]  }
 0x286   : > { %4443 = vmatpush1.bf16.msra.mxu1 %v10737_v21  ;;  %4403 = vmatprep.subr.bf16.mxu0 %v10742_v22  ;;  %v13014_v21 = vld [vmem:[#allocation9 + $0x8ec] ss:$16 sps:$4 sm:$0xff]   ;;  %v4062_v22 = vshrl.u32 %v12863_v61, 16 }
 0x287   : > { %4444 = vmatprep.subr.bf16.mxu1 %v10745_v63  ;;  %v10824_v63 = vld [vmem:[#allocation2 + $0x4] ss:$8 sps:$4 sm:$0x1e]  }
 0x289   : > { %4404 = vmatpush1.bf16.msra.mxu0 %v10740_v3  ;;  %v13018_v3 = vld [vmem:[#allocation9 + $0x8e0] ss:$16 sps:$4 sm:$0xff]  }
 0x28a   : > { %4445 = vmatpush1.bf16.msra.mxu1 %v10743_v26  ;;  %4405 = vmatprep.subr.bf16.mxu0 %v10748_v27  ;;  %13737 = vst [vmem:[#allocation25_spill] sm:$0xff] %v13018_v3  ;;  %v13021_v26 = vor.u32 %v4066_v58, %v4062_v22  ;;  %v13024_v27 = vld [vmem:[#allocation9 + $0x8e8] ss:$16 sps:$4 sm:$0xff]   ;;  %v13054_v58 = vld [vmem:[#allocation9 + $0x8ac] ss:$16 sps:$4 sm:$0xff]  }
 0x28b   : > { %4446 = vmatprep.subr.bf16.mxu1 %v10751_v32  ;;  %13738 = vst [vmem:[#allocation26_spill] sm:$0xff] %v13024_v27  ;;  %v13027_v32 = vld [vmem:[#allocation9 + $0x8c4] ss:$16 sps:$4 sm:$0xff]   ;;  %13744 = vst [vmem:[#allocation32_spill] sm:$0xff] %v13054_v58 }
 0x28c   : > { %13739 = vst [vmem:[#allocation27_spill] sm:$0xff] %v13027_v32 }
 0x28d   : > { %4406 = vmatpush1.bf16.msra.mxu0 %v10746_v10 }
 0x28e   : > { %4447 = vmatpush1.bf16.msra.mxu1 %v10749_v11  ;;  %4407 = vmatprep.subr.bf16.mxu0 %v10754_v12  ;;  %v13034_v12 = vrot.slane %v10824_v63, 1 }
 0x28f   : > { %4448 = vmatprep.subr.bf16.mxu1 %v10757_v13  ;;  %v13036_v13 = vld [vmem:[#allocation9 + $0x8cc] ss:$16 sps:$4 sm:$0xff]  }
 0x290   : > { %13740 = vst [vmem:[#allocation28_spill] sm:$0xff] %v13036_v13 }
 0x291   : > { %4408 = vmatpush1.bf16.msra.mxu0 %v10752_v2  ;;  %v13040_v2 = vld [vmem:[#allocation9 + $0x8c0] ss:$16 sps:$4 sm:$0xff]  }
 0x292   : > { %4449 = vmatpush1.bf16.msra.mxu1 %v10755_v44  ;;  %4409 = vmatprep.subr.bf16.mxu0 %v10760_v14  ;;  %13741 = vst [vmem:[#allocation29_spill] sm:$0xff] %v13040_v2 }
 0x293   : > { %4450 = vmatprep.subr.bf16.mxu1 %v10763_v43  ;;  %v13048_v43 = vld [vmem:[#allocation9 + $0x8c8] ss:$16 sps:$4 sm:$0xff]  }
 0x294   : > { %13742 = vst [vmem:[#allocation30_spill] sm:$0xff] %v13048_v43 }
 0x295   : > { %4410 = vmatpush1.bf16.msra.mxu0 %v12899_v4 }
 0x296   : > { %4451 = vmatpush1.bf16.msra.mxu1 %v12901_v6  ;;  %4411 = vmatprep.subr.bf16.mxu0 %v12903_v5 }
 0x297   : > { %4452 = vmatprep.subr.bf16.mxu1 %v12905_v7 }
 0x299   : > { %4412 = vmatpush1.bf16.msra.mxu0 %v12908_v19 }
 0x29a   : > { %4453 = vmatpush1.bf16.msra.mxu1 %v12912_v20  ;;  %4413 = vmatprep.subr.bf16.mxu0 %v12914_v8 }
 0x29b   : > { %4454 = vmatprep.subr.bf16.mxu1 %v12917_v17 }
 0x29d   : > { %4414 = vmatpush2.bf16.msra.mxu0 %v12920_v56 }
 0x29e   : > { %4455 = vmatpush2.bf16.msra.mxu1 %v12924_v57  ;;  %4415 = vmatprep.subr.bf16.mxu0 %v12926_v46 }
 0x29f   : > { %4456 = vmatprep.subr.bf16.mxu1 %v12929_v53 }
 0x2a1   : > { %4416 = vmatpush2.bf16.msra.mxu0 %v12932_v62 }
 0x2a2   : > { %4457 = vmatpush2.bf16.msra.mxu1 %v12936_v9  ;;  %4417 = vmatprep.subr.bf16.mxu0 %v12938_v25 }
 0x2a3   : > { %4458 = vmatprep.subr.bf16.mxu1 %v12941_v18 }
 0x2a5   : > { %4418 = vmatpush2.bf16.msra.mxu0 %v12944_v23 }
 0x2a6   : > { %4459 = vmatpush2.bf16.msra.mxu1 %v12948_v24  ;;  %4419 = vmatprep.subr.bf16.mxu0 %v12950_v29 }
 0x2a7   : > { %4460 = vmatprep.subr.bf16.mxu1 %v12953_v30 }
 0x2a9   : > { %4420 = vmatpush2.bf16.msra.mxu0 %v12956_v33 }
 0x2aa   : > { %4461 = vmatpush2.bf16.msra.mxu1 %v12960_v35  ;;  %4421 = vmatprep.subr.bf16.mxu0 %v12962_v36 }
 0x2ab   : > { %4462 = vmatprep.subr.bf16.mxu1 %v12965_v38 }
 0x2ad   : > { %4422 = vmatpush2.bf16.msra.mxu0 %v12968_v15 }
 0x2ae   : > { %4463 = vmatpush2.bf16.msra.mxu1 %v12972_v1  ;;  %4423 = vmatprep.subr.bf16.mxu0 %v12974_v39 }
 0x2af   : > { %4464 = vmatprep.subr.bf16.mxu1 %v12977_v40 }
 0x2b1   : > { %4424 = vmatpush2.bf16.msra.mxu0 %v12980_v41 }
 0x2b2   : > { %4465 = vmatpush2.bf16.msra.mxu1 %v12984_v42  ;;  %4425 = vmatprep.subr.bf16.mxu0 %v12986_v0 }
 0x2b3   : > { %4466 = vmatprep.subr.bf16.mxu1 %v12989_v45 }
 0x2b5   : > { %4426 = vmatpush2.bf16.msra.mxu0 %v12992_v48 }
 0x2b6   : > { %4467 = vmatpush2.bf16.msra.mxu1 %v12996_v49  ;;  %4427 = vmatprep.subr.bf16.mxu0 %v12998_v50 }
 0x2b7   : > { %4468 = vmatprep.subr.bf16.mxu1 %v13002_v31 }
 0x2b9   : > { %4428 = vmatpush2.bf16.msra.mxu0 %v13005_v54 }
 0x2ba   : > { %4469 = vmatpush2.bf16.msra.mxu1 %v13009_v55  ;;  %4882 = vmatprep.subr.bf16.mxu0 %v13011_v59 }
 0x2bb   : > { %4923 = vmatprep.subr.bf16.mxu1 %v13014_v21 }
 0x2bc   : > { %4430 = vmatmul.mubr.bf16.vlgmr.msra.gmra.mxu0 %v13021_v26  ;;  %v13030_v10 = vpop.f32.mrf.mxu0  ;;  %v13032_v11 = vpop.f32.mrf.mxu1 }
 0x2bd   : > { %4471 = vmatmul.mubr.bf16.vlgmr.msra.gmra.mxu1 %v13021_v26  ;;  %4883 = vmatpush1.bf16.msra.mxu0 %v13018_v3  ;;  %v13064_v3 = vld [vmem:[#allocation9 + $0x884] ss:$16 sps:$4 sm:$0xff]  }
 0x2be   : > { %4914 = vmatprep.mubr.bf16.mxu0 %v13034_v12  ;;  %4924 = vmatpush1.bf16.msra.mxu1 %v13024_v27  ;;  %v13044_v44 = vpop.f32.mrf.mxu0  ;;  %v13046_v14 = vpop.f32.mrf.mxu1  ;;  %v13062_v27 = vld [vmem:[#allocation9 + $0x8a8] ss:$16 sps:$4 sm:$0xff]   ;;  %13747 = vst [vmem:[#allocation35_spill] sm:$0xff] %v13064_v3 }
 0x2bf   : > { %4955 = vmatprep.mubr.bf16.mxu1 %v13034_v12  ;;  %4884 = vmatprep.subr.bf16.mxu0 %v13027_v32  ;;  %13746 = vst [vmem:[#allocation34_spill] sm:$0xff] %v13062_v27  ;;  %v13067_v32 = vld [vmem:[#allocation9 + $0x88c] ss:$16 sps:$4 sm:$0xff]  }
 0x2c0   : > { %4925 = vmatprep.subr.bf16.mxu1 %v13036_v13  ;;  %v3056_v22 = vpop.f32.mrf.mxu0  ;;  %v3097_v63 = vpop.f32.mrf.mxu1  ;;  %13748 = vst [vmem:[#allocation36_spill] sm:$0xff] %v13067_v32 }
 0x2c1   : > { %4885 = vmatpush1.bf16.msra.mxu0 %v13040_v2  ;;  %v13070_v22 = vld [vmem:[#allocation9 + $0x880] ss:$16 sps:$4 sm:$0xff]   ;;  %v13079_v63 = vld [vmem:[#allocation9 + $0x86c] ss:$16 sps:$4 sm:$0xff]   ;;  %v11662_v2 = vld [vmem:[#allocation9 + $0x2c8] ss:$16 sps:$4 sm:$0xff]  }
 0x2c2   : > { %4926 = vmatpush1.bf16.msra.mxu1 %v13048_v43  ;;  %v3057_v37 = vpop.f32.mrf.mxu0  ;;  %v3098_v28 = vpop.f32.mrf.mxu1  ;;  %4886 = vmatprep.subr.bf16.mxu0 %v13050_v52  ;;  %13749 = vst [vmem:[#allocation37_spill] sm:$0xff] %v13070_v22  ;;  %13752 = vst [vmem:[#allocation40_spill] sm:$0xff] %v13079_v63 }
 0x2c3   : > { %4927 = vmatprep.subr.bf16.mxu1 %v13054_v58  ;;  %v13074_v37 = vld [vmem:[#allocation9 + $0x888] ss:$16 sps:$4 sm:$0xff]   ;;  %v13076_v28 = vld [vmem:[#allocation9 + $0x864] ss:$16 sps:$4 sm:$0xff]   ;;  %v13082_v58 = vld [vmem:[#allocation9 + $0x860] ss:$16 sps:$4 sm:$0xff]  }
 0x2c4   : > { %13750 = vst [vmem:[#allocation38_spill] sm:$0xff] %v13074_v37  ;;  %13751 = vst [vmem:[#allocation39_spill] sm:$0xff] %v13076_v28 }
 0x2c5   : > { %4887 = vmatpush1.bf16.msra.mxu0 %v13058_v16  ;;  %13753 = vst [vmem:[#allocation41_spill] sm:$0xff] %v13082_v58  ;;  %v13086_v16 = vld [vmem:[#allocation9 + $0x868] ss:$16 sps:$4 sm:$0xff]  }
 0x2c6   : > { %4928 = vmatpush1.bf16.msra.mxu1 %v13062_v27  ;;  %4888 = vmatprep.subr.bf16.mxu0 %v13064_v3  ;;  %13754 = vst [vmem:[#allocation42_spill] sm:$0xff] %v13086_v16  ;;  %v13088_v27 = vld [vmem:[#allocation9 + $0x844] ss:$16 sps:$4 sm:$0xff]   ;;  %v13091_v3 = vld [vmem:[#allocation9 + $0x84c] ss:$16 sps:$4 sm:$0xff]  }
 0x2c7   : > { %4929 = vmatprep.subr.bf16.mxu1 %v13067_v32  ;;  %13755 = vst [vmem:[#allocation43_spill] sm:$0xff] %v13088_v27  ;;  %13756 = vst [vmem:[#allocation44_spill] sm:$0xff] %v13091_v3  ;;  %v13094_v32 = vld [vmem:[#allocation9 + $0x840] ss:$16 sps:$4 sm:$0xff]  }
 0x2c8   : > { %13757 = vst [vmem:[#allocation45_spill] sm:$0xff] %v13094_v32 }
 0x2c9   : > { %4889 = vmatpush1.bf16.msra.mxu0 %v13070_v22  ;;  %v13098_v22 = vld [vmem:[#allocation9 + $0x848] ss:$16 sps:$4 sm:$0xff]  }
 0x2ca   : > { %4930 = vmatpush1.bf16.msra.mxu1 %v13074_v37  ;;  %4890 = vmatprep.subr.bf16.mxu0 %v13076_v28  ;;  %13758 = vst [vmem:[#allocation46_spill] sm:$0xff] %v13098_v22  ;;  %v13100_v37 = vld [vmem:[#allocation9 + $0x824] ss:$16 sps:$4 sm:$0xff]   ;;  %v13103_v28 = vld [vmem:[#allocation9 + $0x82c] ss:$16 sps:$4 sm:$0xff]  }
 0x2cb   : > { %4931 = vmatprep.subr.bf16.mxu1 %v13079_v63  ;;  %13759 = vst [vmem:[#allocation47_spill] sm:$0xff] %v13100_v37  ;;  %13760 = vst [vmem:[#allocation48_spill] sm:$0xff] %v13103_v28  ;;  %v13106_v63 = vld [vmem:[#allocation9 + $0x820] ss:$16 sps:$4 sm:$0xff]  }
 0x2cc   : > { %13761 = vst [vmem:[#allocation49_spill] sm:$0xff] %v13106_v63 }
 0x2cd   : > { %4891 = vmatpush1.bf16.msra.mxu0 %v13082_v58  ;;  %v13110_v58 = vld [vmem:[#allocation9 + $0x828] ss:$16 sps:$4 sm:$0xff]  }
 0x2ce   : > { %4932 = vmatpush1.bf16.msra.mxu1 %v13086_v16  ;;  %4892 = vmatprep.subr.bf16.mxu0 %v13088_v27  ;;  %13762 = vst [vmem:[#allocation50_spill] sm:$0xff] %v13110_v58  ;;  %v13112_v16 = vld [vmem:[#allocation9 + $0x804] ss:$16 sps:$4 sm:$0xff]   ;;  %v13115_v27 = vld [vmem:[#allocation9 + $0x80c] ss:$16 sps:$4 sm:$0xff]  }
 0x2cf   : > { %4933 = vmatprep.subr.bf16.mxu1 %v13091_v3  ;;  %13763 = vst [vmem:[#allocation51_spill] sm:$0xff] %v13112_v16  ;;  %13764 = vst [vmem:[#allocation52_spill] sm:$0xff] %v13115_v27  ;;  %v13118_v3 = vld [vmem:[#allocation9 + $0x800] ss:$16 sps:$4 sm:$0xff]  }
 0x2d0   : > { %13765 = vst [vmem:[#allocation53_spill] sm:$0xff] %v13118_v3 }
 0x2d1   : > { %4893 = vmatpush1.bf16.msra.mxu0 %v13094_v32  ;;  %v13122_v32 = vld [vmem:[#allocation9 + $0x808] ss:$16 sps:$4 sm:$0xff]  }
 0x2d2   : > { %4934 = vmatpush1.bf16.msra.mxu1 %v13098_v22  ;;  %4894 = vmatprep.subr.bf16.mxu0 %v13100_v37  ;;  %13766 = vst [vmem:[#allocation54_spill] sm:$0xff] %v13122_v32  ;;  %v13124_v22 = vld [vmem:[#allocation9 + $0x9e4] ss:$16 sps:$4 sm:$0xff]   ;;  %v13127_v37 = vld [vmem:[#allocation9 + $0x9ec] ss:$16 sps:$4 sm:$0xff]  }
 0x2d3   : > { %4935 = vmatprep.subr.bf16.mxu1 %v13103_v28  ;;  %13767 = vst [vmem:[#allocation55_spill] sm:$0xff] %v13124_v22  ;;  %13768 = vst [vmem:[#allocation56_spill] sm:$0xff] %v13127_v37  ;;  %v13130_v28 = vld [vmem:[#allocation9 + $0x9e0] ss:$16 sps:$4 sm:$0xff]  }
 0x2d4   : > { %13769 = vst [vmem:[#allocation57_spill] sm:$0xff] %v13130_v28 }
 0x2d5   : > { %4895 = vmatpush1.bf16.msra.mxu0 %v13106_v63  ;;  %v13134_v63 = vld [vmem:[#allocation9 + $0x9e8] ss:$16 sps:$4 sm:$0xff]  }
 0x2d6   : > { %4936 = vmatpush1.bf16.msra.mxu1 %v13110_v58  ;;  %4896 = vmatprep.subr.bf16.mxu0 %v13112_v16  ;;  %13770 = vst [vmem:[#allocation58_spill] sm:$0xff] %v13134_v63  ;;  %v13136_v58 = vld [vmem:[#allocation9 + $0x9c4] ss:$16 sps:$4 sm:$0xff]   ;;  %v13139_v16 = vld [vmem:[#allocation9 + $0x9cc] ss:$16 sps:$4 sm:$0xff]  }
 0x2d7   : > { %4937 = vmatprep.subr.bf16.mxu1 %v13115_v27  ;;  %13771 = vst [vmem:[#allocation59_spill] sm:$0xff] %v13136_v58  ;;  %13772 = vst [vmem:[#allocation60_spill] sm:$0xff] %v13139_v16  ;;  %v13142_v27 = vld [vmem:[#allocation9 + $0x9c0] ss:$16 sps:$4 sm:$0xff]  }
 0x2d8   : > { %13773 = vst [vmem:[#allocation61_spill] sm:$0xff] %v13142_v27 }
 0x2d9   : > { %4897 = vmatpush1.bf16.msra.mxu0 %v13118_v3  ;;  %v13146_v3 = vld [vmem:[#allocation9 + $0x9c8] ss:$16 sps:$4 sm:$0xff]  }
 0x2da   : > { %4938 = vmatpush1.bf16.msra.mxu1 %v13122_v32  ;;  %4898 = vmatprep.subr.bf16.mxu0 %v13124_v22  ;;  %13774 = vst [vmem:[#allocation62_spill] sm:$0xff] %v13146_v3  ;;  %v13148_v32 = vld [vmem:[#allocation9 + $0x9a4] ss:$16 sps:$4 sm:$0xff]   ;;  %v13151_v22 = vld [vmem:[#allocation9 + $0x9ac] ss:$16 sps:$4 sm:$0xff]  }
 0x2db   : > { %4939 = vmatprep.subr.bf16.mxu1 %v13127_v37  ;;  %13775 = vst [vmem:[#allocation63_spill] sm:$0xff] %v13148_v32  ;;  %13776 = vst [vmem:[#allocation64_spill] sm:$0xff] %v13151_v22  ;;  %v13154_v37 = vld [vmem:[#allocation9 + $0x9a0] ss:$16 sps:$4 sm:$0xff]  }
 0x2dc   : > { %13777 = vst [vmem:[#allocation65_spill] sm:$0xff] %v13154_v37 }
 0x2dd   : > { %4899 = vmatpush2.bf16.msra.mxu0 %v13130_v28  ;;  %v13158_v28 = vld [vmem:[#allocation9 + $0x9a8] ss:$16 sps:$4 sm:$0xff]  }
 0x2de   : > { %4940 = vmatpush2.bf16.msra.mxu1 %v13134_v63  ;;  %4900 = vmatprep.subr.bf16.mxu0 %v13136_v58  ;;  %13778 = vst [vmem:[#allocation66_spill] sm:$0xff] %v13158_v28  ;;  %v13160_v63 = vld [vmem:[#allocation9 + $0x984] ss:$16 sps:$4 sm:$0xff]   ;;  %v13163_v58 = vld [vmem:[#allocation9 + $0x98c] ss:$16 sps:$4 sm:$0xff]  }
 0x2df   : > { %4941 = vmatprep.subr.bf16.mxu1 %v13139_v16  ;;  %13779 = vst [vmem:[#allocation67_spill] sm:$0xff] %v13160_v63  ;;  %13780 = vst [vmem:[#allocation68_spill] sm:$0xff] %v13163_v58  ;;  %v13166_v16 = vld [vmem:[#allocation9 + $0x980] ss:$16 sps:$4 sm:$0xff]  }
 0x2e0   : > { %13781 = vst [vmem:[#allocation69_spill] sm:$0xff] %v13166_v16 }
 0x2e1   : > { %4901 = vmatpush2.bf16.msra.mxu0 %v13142_v27  ;;  %v13170_v27 = vld [vmem:[#allocation9 + $0x988] ss:$16 sps:$4 sm:$0xff]  }
 0x2e2   : > { %4942 = vmatpush2.bf16.msra.mxu1 %v13146_v3  ;;  %4902 = vmatprep.subr.bf16.mxu0 %v13148_v32  ;;  %13782 = vst [vmem:[#allocation70_spill] sm:$0xff] %v13170_v27  ;;  %v13172_v3 = vld [vmem:[#allocation9 + $0x964] ss:$16 sps:$4 sm:$0xff]   ;;  %v13175_v32 = vld [vmem:[#allocation9 + $0x96c] ss:$16 sps:$4 sm:$0xff]  }
 0x2e3   : > { %4943 = vmatprep.subr.bf16.mxu1 %v13151_v22  ;;  %13783 = vst [vmem:[#allocation71_spill] sm:$0xff] %v13172_v3  ;;  %13784 = vst [vmem:[#allocation72_spill] sm:$0xff] %v13175_v32  ;;  %v13178_v22 = vld [vmem:[#allocation9 + $0x960] ss:$16 sps:$4 sm:$0xff]  }
 0x2e4   : > { %13785 = vst [vmem:[#allocation73_spill] sm:$0xff] %v13178_v22 }
 0x2e5   : > { %4903 = vmatpush2.bf16.msra.mxu0 %v13154_v37  ;;  %v13182_v37 = vld [vmem:[#allocation9 + $0x968] ss:$16 sps:$4 sm:$0xff]  }
 0x2e6   : > { %4944 = vmatpush2.bf16.msra.mxu1 %v13158_v28  ;;  %4904 = vmatprep.subr.bf16.mxu0 %v13160_v63  ;;  %13786 = vst [vmem:[#allocation74_spill] sm:$0xff] %v13182_v37  ;;  %v13184_v28 = vld [vmem:[#allocation9 + $0x944] ss:$16 sps:$4 sm:$0xff]   ;;  %v13187_v63 = vld [vmem:[#allocation9 + $0x94c] ss:$16 sps:$4 sm:$0xff]  }
 0x2e7   : > { %4945 = vmatprep.subr.bf16.mxu1 %v13163_v58  ;;  %13787 = vst [vmem:[#allocation75_spill] sm:$0xff] %v13184_v28  ;;  %13788 = vst [vmem:[#allocation76_spill] sm:$0xff] %v13187_v63  ;;  %v13190_v58 = vld [vmem:[#allocation9 + $0x940] ss:$16 sps:$4 sm:$0xff]  }
 0x2e8   : > { %13789 = vst [vmem:[#allocation77_spill] sm:$0xff] %v13190_v58 }
 0x2e9   : > { %4905 = vmatpush2.bf16.msra.mxu0 %v13166_v16  ;;  %v13194_v16 = vld [vmem:[#allocation9 + $0x948] ss:$16 sps:$4 sm:$0xff]  }
 0x2ea   : > { %4946 = vmatpush2.bf16.msra.mxu1 %v13170_v27  ;;  %4906 = vmatprep.subr.bf16.mxu0 %v13172_v3  ;;  %13790 = vst [vmem:[#allocation78_spill] sm:$0xff] %v13194_v16  ;;  %v13196_v27 = vld [vmem:[#allocation9 + $0x924] ss:$16 sps:$4 sm:$0xff]   ;;  %v13199_v3 = vld [vmem:[#allocation9 + $0x92c] ss:$16 sps:$4 sm:$0xff]  }
 0x2eb   : > { %4947 = vmatprep.subr.bf16.mxu1 %v13175_v32  ;;  %13791 = vst [vmem:[#allocation79_spill] sm:$0xff] %v13196_v27  ;;  %13792 = vst [vmem:[#allocation80_spill] sm:$0xff] %v13199_v3  ;;  %v13202_v32 = vld [vmem:[#allocation9 + $0x920] ss:$16 sps:$4 sm:$0xff]  }
 0x2ec   : > { %13793 = vst [vmem:[#allocation81_spill] sm:$0xff] %v13202_v32 }
 0x2ed   : > { %4907 = vmatpush2.bf16.msra.mxu0 %v13178_v22  ;;  %v13206_v22 = vld [vmem:[#allocation9 + $0x928] ss:$16 sps:$4 sm:$0xff]  }
 0x2ee   : > { %4948 = vmatpush2.bf16.msra.mxu1 %v13182_v37  ;;  %4908 = vmatprep.subr.bf16.mxu0 %v13184_v28  ;;  %13794 = vst [vmem:[#allocation82_spill] sm:$0xff] %v13206_v22  ;;  %v13208_v37 = vld [vmem:[#allocation9 + $0x904] ss:$16 sps:$4 sm:$0xff]   ;;  %v13211_v28 = vld [vmem:[#allocation9 + $0x90c] ss:$16 sps:$4 sm:$0xff]  }
 0x2ef   : > { %4949 = vmatprep.subr.bf16.mxu1 %v13187_v63  ;;  %13795 = vst [vmem:[#allocation83_spill] sm:$0xff] %v13208_v37  ;;  %13796 = vst [vmem:[#allocation84_spill] sm:$0xff] %v13211_v28  ;;  %v13214_v63 = vld [vmem:[#allocation9 + $0x900] ss:$16 sps:$4 sm:$0xff]  }
 0x2f0   : > { %13797 = vst [vmem:[#allocation85_spill] sm:$0xff] %v13214_v63 }
 0x2f1   : > { %4909 = vmatpush2.bf16.msra.mxu0 %v13190_v58  ;;  %v13218_v58 = vld [vmem:[#allocation9 + $0x908] ss:$16 sps:$4 sm:$0xff]  }
 0x2f2   : > { %4950 = vmatpush2.bf16.msra.mxu1 %v13194_v16  ;;  %4910 = vmatprep.subr.bf16.mxu0 %v13196_v27  ;;  %13798 = vst [vmem:[#allocation86_spill] sm:$0xff] %v13218_v58  ;;  %v10916_v16 = vld [vmem:[#allocation2] ss:$8 sps:$4 sm:$0x1e]  }
 0x2f3   : > { %4951 = vmatprep.subr.bf16.mxu1 %v13199_v3  ;;  %v13223_v3 = vrot.slane %v10916_v16, 1  ;;  %v11655_v27 = vld [vmem:[#allocation9 + $0x2e4] ss:$16 sps:$4 sm:$0xff]   ;;  %v11658_v16 = vld [vmem:[#allocation9 + $0x2e8] ss:$16 sps:$4 sm:$0xff]  }
 0x2f5   : > { %4911 = vmatpush2.bf16.msra.mxu0 %v13202_v32  ;;  %13799 = vst [vmem:[#allocation87_spill] sm:$0xff] %v13223_v3  ;;  %v11656_v32 = vld [vmem:[#allocation9 + $0x2ec] ss:$16 sps:$4 sm:$0xff]  }
 0x2f6   : > { %4952 = vmatpush2.bf16.msra.mxu1 %v13206_v22  ;;  %4912 = vmatprep.subr.bf16.mxu0 %v13208_v37 }
 0x2f7   : > { %4953 = vmatprep.subr.bf16.mxu1 %v13211_v28  ;;  %v11660_v28 = vld [vmem:[#allocation9 + $0x2cc] ss:$16 sps:$4 sm:$0xff]  }
 0x2f9   : > { %4913 = vmatpush2.bf16.msra.mxu0 %v13214_v63  ;;  %v11657_v63 = vld [vmem:[#allocation9 + $0x2e0] ss:$16 sps:$4 sm:$0xff]  }
 0x2fa   : > { %4954 = vmatpush2.bf16.msra.mxu1 %v13218_v58  ;;  %4970 = vmatprep.subr.bf16.mxu0 %v11655_v27 }
 0x2fb   : > { %5011 = vmatprep.subr.bf16.mxu1 %v11656_v32 }
 0x2fc   : > { %v3461_v52 = vpop.f32.mrf.mxu0  ;;  %v3502_v43 = vpop.f32.mrf.mxu1  ;;  %4915 = vmatmul.mubr.bf16.vlgmr.msra.gmra.mxu0 %v13223_v3 }
 0x2fd   : > { %v13227_v37 = vadd.f32 %v3461_v52, %v13030_v10  ;;  %v13230_v22 = vadd.f32 %v3502_v43, %v13032_v11  ;;  %4956 = vmatmul.mubr.bf16.vlgmr.msra.gmra.mxu1 %v13223_v3  ;;  %4971 = vmatpush1.bf16.msra.mxu0 %v11657_v63  ;;  %v11659_v11 = vld [vmem:[#allocation9 + $0x2c4] ss:$16 sps:$4 sm:$0xff]   ;;  %v11661_v63 = vld [vmem:[#allocation9 + $0x2c0] ss:$16 sps:$4 sm:$0xff]  }
 0x2fe   : > { %5002 = vmatprep.mubr.bf16.mxu0 %v12881_v34  ;;  %5012 = vmatpush1.bf16.msra.mxu1 %v11658_v16  ;;  %v3463_v27 = vpop.f32.mrf.mxu0  ;;  %v3504_v32 = vpop.f32.mrf.mxu1  ;;  %v11663_v3 = vld [vmem:[#allocation9 + $0x2a4] ss:$16 sps:$4 sm:$0xff]  }
 0x2ff   : > { %5043 = vmatprep.mubr.bf16.mxu1 %v12881_v34  ;;  %v13236_v58 = vadd.f32 %v3463_v27, %v13044_v44  ;;  %v13239_v10 = vadd.f32 %v3504_v32, %v13046_v14  ;;  %4972 = vmatprep.subr.bf16.mxu0 %v11659_v11  ;;  %v11664_v34 = vld [vmem:[#allocation9 + $0x2ac] ss:$16 sps:$4 sm:$0xff]   ;;  %v11665_v44 = vld [vmem:[#allocation9 + $0x2a0] ss:$16 sps:$4 sm:$0xff]   ;;  %v11666_v14 = vld [vmem:[#allocation9 + $0x2a8] ss:$16 sps:$4 sm:$0xff]  }
 0x300   : > { %v3465_v43 = vpop.f32.mrf.mxu0  ;;  %v3506_v52 = vpop.f32.mrf.mxu1  ;;  %5013 = vmatprep.subr.bf16.mxu1 %v11660_v28  ;;  %v11667_v27 = vld [vmem:[#allocation9 + $0x284] ss:$16 sps:$4 sm:$0xff]   ;;  %v11668_v32 = vld [vmem:[#allocation9 + $0x28c] ss:$16 sps:$4 sm:$0xff]   ;;  %v11669_v11 = vld [vmem:[#allocation9 + $0x280] ss:$16 sps:$4 sm:$0xff]  }
 0x301   : > { %4973 = vmatpush1.bf16.msra.mxu0 %v11661_v63  ;;  %v11670_v28 = vld [vmem:[#allocation9 + $0x288] ss:$16 sps:$4 sm:$0xff]   ;;  %v11671_v43 = vld [vmem:[#allocation9 + $0x264] ss:$16 sps:$4 sm:$0xff]   ;;  %v11676_v63 = vld [vmem:[#allocation9 + $0x24c] ss:$16 sps:$4 sm:$0xff]  }
 0x302   : > { %5014 = vmatpush1.bf16.msra.mxu1 %v11662_v2  ;;  %v3466_v16 = vpop.f32.mrf.mxu0  ;;  %v3507_v13 = vpop.f32.mrf.mxu1  ;;  %4974 = vmatprep.subr.bf16.mxu0 %v11663_v3  ;;  %v11672_v2 = vld [vmem:[#allocation9 + $0x26c] ss:$16 sps:$4 sm:$0xff]   ;;  %v11674_v3 = vld [vmem:[#allocation9 + $0x268] ss:$16 sps:$4 sm:$0xff]   ;;  %v11675_v52 = vld [vmem:[#allocation9 + $0x244] ss:$16 sps:$4 sm:$0xff]  }
 0x303   : > { %5015 = vmatprep.subr.bf16.mxu1 %v11664_v34  ;;  %v11673_v13 = vld [vmem:[#allocation9 + $0x260] ss:$16 sps:$4 sm:$0xff]   ;;  %v11678_v34 = vld [vmem:[#allocation9 + $0x248] ss:$16 sps:$4 sm:$0xff]  }
 0x304   : > { %v11677_v16 = vld [vmem:[#allocation9 + $0x240] ss:$16 sps:$4 sm:$0xff]  }
 0x305   : > { %4975 = vmatpush1.bf16.msra.mxu0 %v11665_v44  ;;  %v11679_v44 = vld [vmem:[#allocation9 + $0x224] ss:$16 sps:$4 sm:$0xff]  }
 0x306   : > { %5016 = vmatpush1.bf16.msra.mxu1 %v11666_v14  ;;  %4976 = vmatprep.subr.bf16.mxu0 %v11667_v27  ;;  %v11680_v14 = vld [vmem:[#allocation9 + $0x22c] ss:$16 sps:$4 sm:$0xff]   ;;  %v11681_v27 = vld [vmem:[#allocation9 + $0x220] ss:$16 sps:$4 sm:$0xff]  }
 0x307   : > { %5017 = vmatprep.subr.bf16.mxu1 %v11668_v32  ;;  %v11682_v32 = vld [vmem:[#allocation9 + $0x228] ss:$16 sps:$4 sm:$0xff]  }
 0x309   : > { %4977 = vmatpush1.bf16.msra.mxu0 %v11669_v11  ;;  %v11683_v11 = vld [vmem:[#allocation9 + $0x204] ss:$16 sps:$4 sm:$0xff]  }
 0x30a   : > { %5018 = vmatpush1.bf16.msra.mxu1 %v11670_v28  ;;  %4978 = vmatprep.subr.bf16.mxu0 %v11671_v43  ;;  %v11684_v28 = vld [vmem:[#allocation9 + $0x20c] ss:$16 sps:$4 sm:$0xff]   ;;  %v11685_v43 = vld [vmem:[#allocation9 + $0x200] ss:$16 sps:$4 sm:$0xff]  }
 0x30b   : > { %5019 = vmatprep.subr.bf16.mxu1 %v11672_v2  ;;  %v11686_v2 = vld [vmem:[#allocation9 + $0x208] ss:$16 sps:$4 sm:$0xff]  }
 0x30d   : > { %4979 = vmatpush1.bf16.msra.mxu0 %v11673_v13  ;;  %v11687_v13 = vld [vmem:[#allocation9 + $0x3e4] ss:$16 sps:$4 sm:$0xff]  }
 0x30e   : > { %5020 = vmatpush1.bf16.msra.mxu1 %v11674_v3  ;;  %4980 = vmatprep.subr.bf16.mxu0 %v11675_v52  ;;  %v11688_v3 = vld [vmem:[#allocation9 + $0x3ec] ss:$16 sps:$4 sm:$0xff]   ;;  %v11689_v52 = vld [vmem:[#allocation9 + $0x3e0] ss:$16 sps:$4 sm:$0xff]  }
 0x30f   : > { %5021 = vmatprep.subr.bf16.mxu1 %v11676_v63  ;;  %v11690_v63 = vld [vmem:[#allocation9 + $0x3e8] ss:$16 sps:$4 sm:$0xff]  }
 0x311   : > { %4981 = vmatpush1.bf16.msra.mxu0 %v11677_v16  ;;  %v11691_v16 = vld [vmem:[#allocation9 + $0x3c4] ss:$16 sps:$4 sm:$0xff]  }
 0x312   : > { %5022 = vmatpush1.bf16.msra.mxu1 %v11678_v34  ;;  %4982 = vmatprep.subr.bf16.mxu0 %v11679_v44  ;;  %v11692_v34 = vld [vmem:[#allocation9 + $0x3cc] ss:$16 sps:$4 sm:$0xff]   ;;  %v11693_v44 = vld [vmem:[#allocation9 + $0x3c0] ss:$16 sps:$4 sm:$0xff]  }
 0x313   : > { %5023 = vmatprep.subr.bf16.mxu1 %v11680_v14  ;;  %v11694_v14 = vld [vmem:[#allocation9 + $0x3c8] ss:$16 sps:$4 sm:$0xff]  }
 0x315   : > { %4983 = vmatpush1.bf16.msra.mxu0 %v11681_v27  ;;  %v11695_v27 = vld [vmem:[#allocation9 + $0x3a4] ss:$16 sps:$4 sm:$0xff]  }
 0x316   : > { %5024 = vmatpush1.bf16.msra.mxu1 %v11682_v32  ;;  %4984 = vmatprep.subr.bf16.mxu0 %v11683_v11  ;;  %v11696_v32 = vld [vmem:[#allocation9 + $0x3ac] ss:$16 sps:$4 sm:$0xff]   ;;  %v11697_v11 = vld [vmem:[#allocation9 + $0x3a0] ss:$16 sps:$4 sm:$0xff]  }
 0x317   : > { %5025 = vmatprep.subr.bf16.mxu1 %v11684_v28  ;;  %v11698_v28 = vld [vmem:[#allocation9 + $0x3a8] ss:$16 sps:$4 sm:$0xff]  }
 0x319   : > { %4985 = vmatpush1.bf16.msra.mxu0 %v11685_v43  ;;  %v11699_v43 = vld [vmem:[#allocation9 + $0x384] ss:$16 sps:$4 sm:$0xff]  }
 0x31a   : > { %5026 = vmatpush1.bf16.msra.mxu1 %v11686_v2  ;;  %4986 = vmatprep.subr.bf16.mxu0 %v11687_v13  ;;  %v11700_v2 = vld [vmem:[#allocation9 + $0x38c] ss:$16 sps:$4 sm:$0xff]   ;;  %v11701_v13 = vld [vmem:[#allocation9 + $0x380] ss:$16 sps:$4 sm:$0xff]  }
 0x31b   : > { %5027 = vmatprep.subr.bf16.mxu1 %v11688_v3  ;;  %v11702_v3 = vld [vmem:[#allocation9 + $0x388] ss:$16 sps:$4 sm:$0xff]  }
 0x31d   : > { %4987 = vmatpush2.bf16.msra.mxu0 %v11689_v52  ;;  %v11703_v52 = vld [vmem:[#allocation9 + $0x364] ss:$16 sps:$4 sm:$0xff]  }
 0x31e   : > { %5028 = vmatpush2.bf16.msra.mxu1 %v11690_v63  ;;  %4988 = vmatprep.subr.bf16.mxu0 %v11691_v16  ;;  %v11704_v63 = vld [vmem:[#allocation9 + $0x36c] ss:$16 sps:$4 sm:$0xff]   ;;  %v11705_v16 = vld [vmem:[#allocation9 + $0x360] ss:$16 sps:$4 sm:$0xff]  }
 0x31f   : > { %5029 = vmatprep.subr.bf16.mxu1 %v11692_v34  ;;  %v11706_v34 = vld [vmem:[#allocation9 + $0x368] ss:$16 sps:$4 sm:$0xff]  }
 0x321   : > { %4989 = vmatpush2.bf16.msra.mxu0 %v11693_v44  ;;  %v11707_v44 = vld [vmem:[#allocation9 + $0x344] ss:$16 sps:$4 sm:$0xff]  }
 0x322   : > { %5030 = vmatpush2.bf16.msra.mxu1 %v11694_v14  ;;  %4990 = vmatprep.subr.bf16.mxu0 %v11695_v27  ;;  %v11708_v14 = vld [vmem:[#allocation9 + $0x34c] ss:$16 sps:$4 sm:$0xff]   ;;  %v11709_v27 = vld [vmem:[#allocation9 + $0x340] ss:$16 sps:$4 sm:$0xff]  }
 0x323   : > { %5031 = vmatprep.subr.bf16.mxu1 %v11696_v32  ;;  %v11710_v32 = vld [vmem:[#allocation9 + $0x348] ss:$16 sps:$4 sm:$0xff]  }
 0x325   : > { %4991 = vmatpush2.bf16.msra.mxu0 %v11697_v11  ;;  %v11711_v11 = vld [vmem:[#allocation9 + $0x324] ss:$16 sps:$4 sm:$0xff]  }
 0x326   : > { %5032 = vmatpush2.bf16.msra.mxu1 %v11698_v28  ;;  %4992 = vmatprep.subr.bf16.mxu0 %v11699_v43  ;;  %v11712_v28 = vld [vmem:[#allocation9 + $0x32c] ss:$16 sps:$4 sm:$0xff]   ;;  %v11713_v43 = vld [vmem:[#allocation9 + $0x320] ss:$16 sps:$4 sm:$0xff]  }
 0x327   : > { %5033 = vmatprep.subr.bf16.mxu1 %v11700_v2  ;;  %v11714_v2 = vld [vmem:[#allocation9 + $0x328] ss:$16 sps:$4 sm:$0xff]  }
 0x329   : > { %4993 = vmatpush2.bf16.msra.mxu0 %v11701_v13  ;;  %v11715_v13 = vld [vmem:[#allocation9 + $0x304] ss:$16 sps:$4 sm:$0xff]  }
 0x32a   : > { %5034 = vmatpush2.bf16.msra.mxu1 %v11702_v3  ;;  %4994 = vmatprep.subr.bf16.mxu0 %v11703_v52  ;;  %v11716_v3 = vld [vmem:[#allocation9 + $0x30c] ss:$16 sps:$4 sm:$0xff]   ;;  %v11717_v52 = vld [vmem:[#allocation9 + $0x300] ss:$16 sps:$4 sm:$0xff]  }
 0x32b   : > { %5035 = vmatprep.subr.bf16.mxu1 %v11704_v63  ;;  %v11718_v63 = vld [vmem:[#allocation9 + $0x308] ss:$16 sps:$4 sm:$0xff]  }
 0x32d   : > { %4995 = vmatpush2.bf16.msra.mxu0 %v11705_v16  ;;  %v11719_v16 = vld [vmem:[#allocation9 + $0xe4] ss:$16 sps:$4 sm:$0xff]  }
 0x32e   : > { %5036 = vmatpush2.bf16.msra.mxu1 %v11706_v34  ;;  %4996 = vmatprep.subr.bf16.mxu0 %v11707_v44  ;;  %v11720_v34 = vld [vmem:[#allocation9 + $0xec] ss:$16 sps:$4 sm:$0xff]  }
 0x32f   : > { %5037 = vmatprep.subr.bf16.mxu1 %v11708_v14 }
 0x331   : > { %4997 = vmatpush2.bf16.msra.mxu0 %v11709_v27 }
 0x332   : > { %5038 = vmatpush2.bf16.msra.mxu1 %v11710_v32  ;;  %4998 = vmatprep.subr.bf16.mxu0 %v11711_v11  ;;  %v11721_v32 = vld [vmem:[#allocation9 + $0xe0] ss:$16 sps:$4 sm:$0xff]  }
 0x333   : > { %5039 = vmatprep.subr.bf16.mxu1 %v11712_v28  ;;  %v11722_v28 = vld [vmem:[#allocation9 + $0xe8] ss:$16 sps:$4 sm:$0xff]  }
 0x335   : > { %4999 = vmatpush2.bf16.msra.mxu0 %v11713_v43 }
 0x336   : > { %5040 = vmatpush2.bf16.msra.mxu1 %v11714_v2  ;;  %5000 = vmatprep.subr.bf16.mxu0 %v11715_v13  ;;  %v11723_v13 = vld [vmem:[#allocation9 + $0xc4] ss:$16 sps:$4 sm:$0xff]  }
 0x337   : > { %5041 = vmatprep.subr.bf16.mxu1 %v11716_v3 }
 0x339   : > { %5001 = vmatpush2.bf16.msra.mxu0 %v11717_v52  ;;  %v11724_v52 = vld [vmem:[#allocation9 + $0xcc] ss:$16 sps:$4 sm:$0xff]  }
 0x33a   : > { %5042 = vmatpush2.bf16.msra.mxu1 %v11718_v63  ;;  %5052 = vmatprep.subr.bf16.mxu0 %v11719_v16  ;;  %v11725_v63 = vld [vmem:[#allocation9 + $0xc0] ss:$16 sps:$4 sm:$0xff]   ;;  %v11726_v16 = vld [vmem:[#allocation9 + $0xc8] ss:$16 sps:$4 sm:$0xff]  }
 0x33b   : > { %5093 = vmatprep.subr.bf16.mxu1 %v11720_v34 }
 0x33c   : > { %v3944_v44 = vpop.f32.mrf.mxu0  ;;  %5003 = vmatmul.mubr.bf16.vlgmr.msra.gmra.mxu0 %v12890_v47 }
 0x33d   : > { %v13243_v14 = vadd.f32 %v3944_v44, %v13227_v37  ;;  %v3985_v27 = vpop.f32.mrf.mxu1  ;;  %5044 = vmatmul.mubr.bf16.vlgmr.msra.gmra.mxu1 %v12890_v47  ;;  %5053 = vmatpush1.bf16.msra.mxu0 %v11721_v32  ;;  %v11727_v44 = vld [vmem:[#allocation9 + $0xa4] ss:$16 sps:$4 sm:$0xff]   ;;  %v11730_v32 = vld [vmem:[#allocation9 + $0xa8] ss:$16 sps:$4 sm:$0xff]  }
 0x33e   : > { %v13247_v11 = vadd.f32 %v3985_v27, %v13230_v22  ;;  %5084 = vmatprep.mubr.bf16.mxu0 %v12861_v60  ;;  %5094 = vmatpush1.bf16.msra.mxu1 %v11722_v28  ;;  %v3946_v43 = vpop.f32.mrf.mxu0  ;;  %v11729_v27 = vld [vmem:[#allocation9 + $0xa0] ss:$16 sps:$4 sm:$0xff]   ;;  %v11732_v28 = vld [vmem:[#allocation9 + $0x8c] ss:$16 sps:$4 sm:$0xff]  }
 0x33f   : > { %5125 = vmatprep.mubr.bf16.mxu1 %v12861_v60  ;;  %v13252_v2 = vadd.f32 %v3946_v43, %v13236_v58  ;;  %v3987_v37 = vpop.f32.mrf.mxu1  ;;  %5054 = vmatprep.subr.bf16.mxu0 %v11723_v13  ;;  %v11728_v58 = vld [vmem:[#allocation9 + $0xac] ss:$16 sps:$4 sm:$0xff]   ;;  %v11733_v43 = vld [vmem:[#allocation9 + $0x80] ss:$16 sps:$4 sm:$0xff]   ;;  %v11735_v13 = vld [vmem:[#allocation9 + $0x64] ss:$16 sps:$4 sm:$0xff]  }
 0x340   : > { %v13255_v47 = vadd.f32 %v3987_v37, %v13239_v10  ;;  %v3948_v3 = vpop.f32.mrf.mxu0  ;;  %5095 = vmatprep.subr.bf16.mxu1 %v11724_v52  ;;  %v11731_v10 = vld [vmem:[#allocation9 + $0x84] ss:$16 sps:$4 sm:$0xff]   ;;  %v11734_v37 = vld [vmem:[#allocation9 + $0x88] ss:$16 sps:$4 sm:$0xff]   ;;  %v11737_v52 = vld [vmem:[#allocation9 + $0x60] ss:$16 sps:$4 sm:$0xff]  }
 0x341   : > { %v3989_v22 = vpop.f32.mrf.mxu1  ;;  %5055 = vmatpush1.bf16.msra.mxu0 %v11725_v63  ;;  %v11736_v3 = vld [vmem:[#allocation9 + $0x6c] ss:$16 sps:$4 sm:$0xff]   ;;  %v11739_v63 = vld [vmem:[#allocation9 + $0x44] ss:$16 sps:$4 sm:$0xff]  }
 0x342   : > { %5096 = vmatpush1.bf16.msra.mxu1 %v11726_v16  ;;  %v3949_v34 = vpop.f32.mrf.mxu0  ;;  %5056 = vmatprep.subr.bf16.mxu0 %v11727_v44  ;;  %v11738_v22 = vld [vmem:[#allocation9 + $0x68] ss:$16 sps:$4 sm:$0xff]   ;;  %v11740_v16 = vld [vmem:[#allocation9 + $0x4c] ss:$16 sps:$4 sm:$0xff]  }
 0x343   : > { %v3990_v60 = vpop.f32.mrf.mxu1  ;;  %5097 = vmatprep.subr.bf16.mxu1 %v11728_v58  ;;  %v11741_v34 = vld [vmem:[#allocation9 + $0x40] ss:$16 sps:$4 sm:$0xff]   ;;  %v11742_v44 = vld [vmem:[#allocation9 + $0x48] ss:$16 sps:$4 sm:$0xff]   ;;  %v11744_v58 = vld [vmem:[#allocation9 + $0x2c] ss:$16 sps:$4 sm:$0xff]  }
 0x344   : > { %v11743_v60 = vld [vmem:[#allocation9 + $0x24] ss:$16 sps:$4 sm:$0xff]  }
 0x345   : > { %5057 = vmatpush1.bf16.msra.mxu0 %v11729_v27  ;;  %v11745_v27 = vld [vmem:[#allocation9 + $0x20] ss:$16 sps:$4 sm:$0xff]  }
 0x346   : > { %5098 = vmatpush1.bf16.msra.mxu1 %v11730_v32  ;;  %5058 = vmatprep.subr.bf16.mxu0 %v11731_v10  ;;  %v11746_v32 = vld [vmem:[#allocation9 + $0x28] ss:$16 sps:$4 sm:$0xff]   ;;  %v11747_v10 = vld [vmem:[#allocation9 + $0x4] ss:$16 sps:$4 sm:$0xff]  }
 0x347   : > { %5099 = vmatprep.subr.bf16.mxu1 %v11732_v28  ;;  %v11748_v28 = vld [vmem:[#allocation9 + $0xc] ss:$16 sps:$4 sm:$0xff]  }
 0x349   : > { %5059 = vmatpush1.bf16.msra.mxu0 %v11733_v43  ;;  %v11749_v43 = vld [vmem:[#allocation9] ss:$16 sps:$4 sm:$0xff]  }
 0x34a   : > { %5100 = vmatpush1.bf16.msra.mxu1 %v11734_v37  ;;  %5060 = vmatprep.subr.bf16.mxu0 %v11735_v13  ;;  %v11750_v37 = vld [vmem:[#allocation9 + $0x8] ss:$16 sps:$4 sm:$0xff]   ;;  %v11751_v13 = vld [vmem:[#allocation9 + $0x1e4] ss:$16 sps:$4 sm:$0xff]  }
 0x34b   : > { %5101 = vmatprep.subr.bf16.mxu1 %v11736_v3  ;;  %v11752_v3 = vld [vmem:[#allocation9 + $0x1ec] ss:$16 sps:$4 sm:$0xff]  }
 0x34d   : > { %5061 = vmatpush1.bf16.msra.mxu0 %v11737_v52  ;;  %v11753_v52 = vld [vmem:[#allocation9 + $0x1e0] ss:$16 sps:$4 sm:$0xff]  }
 0x34e   : > { %5102 = vmatpush1.bf16.msra.mxu1 %v11738_v22  ;;  %5062 = vmatprep.subr.bf16.mxu0 %v11739_v63  ;;  %v11754_v22 = vld [vmem:[#allocation9 + $0x1e8] ss:$16 sps:$4 sm:$0xff]   ;;  %v11755_v63 = vld [vmem:[#allocation9 + $0x1c4] ss:$16 sps:$4 sm:$0xff]  }
 0x34f   : > { %5103 = vmatprep.subr.bf16.mxu1 %v11740_v16  ;;  %v11756_v16 = vld [vmem:[#allocation9 + $0x1cc] ss:$16 sps:$4 sm:$0xff]  }
 0x351   : > { %5063 = vmatpush1.bf16.msra.mxu0 %v11741_v34  ;;  %v11757_v34 = vld [vmem:[#allocation9 + $0x1c0] ss:$16 sps:$4 sm:$0xff]  }
 0x352   : > { %5104 = vmatpush1.bf16.msra.mxu1 %v11742_v44  ;;  %5064 = vmatprep.subr.bf16.mxu0 %v11743_v60  ;;  %v11758_v44 = vld [vmem:[#allocation9 + $0x1c8] ss:$16 sps:$4 sm:$0xff]   ;;  %v11759_v60 = vld [vmem:[#allocation9 + $0x1a4] ss:$16 sps:$4 sm:$0xff]  }
 0x353   : > { %5105 = vmatprep.subr.bf16.mxu1 %v11744_v58  ;;  %v11760_v58 = vld [vmem:[#allocation9 + $0x1ac] ss:$16 sps:$4 sm:$0xff]  }
 0x355   : > { %5065 = vmatpush1.bf16.msra.mxu0 %v11745_v27  ;;  %v11761_v27 = vld [vmem:[#allocation9 + $0x1a0] ss:$16 sps:$4 sm:$0xff]  }
 0x356   : > { %5106 = vmatpush1.bf16.msra.mxu1 %v11746_v32  ;;  %5066 = vmatprep.subr.bf16.mxu0 %v11747_v10  ;;  %v11762_v32 = vld [vmem:[#allocation9 + $0x1a8] ss:$16 sps:$4 sm:$0xff]   ;;  %v11763_v10 = vld [vmem:[#allocation9 + $0x184] ss:$16 sps:$4 sm:$0xff]  }
 0x357   : > { %5107 = vmatprep.subr.bf16.mxu1 %v11748_v28  ;;  %v11764_v28 = vld [vmem:[#allocation9 + $0x18c] ss:$16 sps:$4 sm:$0xff]  }
 0x359   : > { %5067 = vmatpush1.bf16.msra.mxu0 %v11749_v43  ;;  %v11765_v43 = vld [vmem:[#allocation9 + $0x180] ss:$16 sps:$4 sm:$0xff]  }
 0x35a   : > { %5108 = vmatpush1.bf16.msra.mxu1 %v11750_v37  ;;  %5068 = vmatprep.subr.bf16.mxu0 %v11751_v13  ;;  %v11766_v37 = vld [vmem:[#allocation9 + $0x188] ss:$16 sps:$4 sm:$0xff]   ;;  %v11767_v13 = vld [vmem:[#allocation9 + $0x164] ss:$16 sps:$4 sm:$0xff]  }
 0x35b   : > { %5109 = vmatprep.subr.bf16.mxu1 %v11752_v3  ;;  %v11768_v3 = vld [vmem:[#allocation9 + $0x16c] ss:$16 sps:$4 sm:$0xff]  }
 0x35d   : > { %5069 = vmatpush2.bf16.msra.mxu0 %v11753_v52  ;;  %v11769_v52 = vld [vmem:[#allocation9 + $0x160] ss:$16 sps:$4 sm:$0xff]  }
 0x35e   : > { %5110 = vmatpush2.bf16.msra.mxu1 %v11754_v22  ;;  %5070 = vmatprep.subr.bf16.mxu0 %v11755_v63  ;;  %v11770_v22 = vld [vmem:[#allocation9 + $0x168] ss:$16 sps:$4 sm:$0xff]   ;;  %v11771_v63 = vld [vmem:[#allocation9 + $0x144] ss:$16 sps:$4 sm:$0xff]  }
 0x35f   : > { %5111 = vmatprep.subr.bf16.mxu1 %v11756_v16  ;;  %v11772_v16 = vld [vmem:[#allocation9 + $0x14c] ss:$16 sps:$4 sm:$0xff]  }
 0x361   : > { %5071 = vmatpush2.bf16.msra.mxu0 %v11757_v34  ;;  %v11773_v34 = vld [vmem:[#allocation9 + $0x140] ss:$16 sps:$4 sm:$0xff]  }
 0x362   : > { %5112 = vmatpush2.bf16.msra.mxu1 %v11758_v44  ;;  %5072 = vmatprep.subr.bf16.mxu0 %v11759_v60  ;;  %v11774_v44 = vld [vmem:[#allocation9 + $0x148] ss:$16 sps:$4 sm:$0xff]   ;;  %v11775_v60 = vld [vmem:[#allocation9 + $0x124] ss:$16 sps:$4 sm:$0xff]  }
 0x363   : > { %5113 = vmatprep.subr.bf16.mxu1 %v11760_v58  ;;  %v11776_v58 = vld [vmem:[#allocation9 + $0x12c] ss:$16 sps:$4 sm:$0xff]  }
 0x365   : > { %5073 = vmatpush2.bf16.msra.mxu0 %v11761_v27  ;;  %v11777_v27 = vld [vmem:[#allocation9 + $0x120] ss:$16 sps:$4 sm:$0xff]  }
 0x366   : > { %5114 = vmatpush2.bf16.msra.mxu1 %v11762_v32  ;;  %5074 = vmatprep.subr.bf16.mxu0 %v11763_v10  ;;  %v11778_v32 = vld [vmem:[#allocation9 + $0x128] ss:$16 sps:$4 sm:$0xff]   ;;  %v11779_v10 = vld [vmem:[#allocation9 + $0x104] ss:$16 sps:$4 sm:$0xff]  }
 0x367   : > { %5115 = vmatprep.subr.bf16.mxu1 %v11764_v28  ;;  %v11780_v28 = vld [vmem:[#allocation9 + $0x10c] ss:$16 sps:$4 sm:$0xff]  }
 0x369   : > { %5075 = vmatpush2.bf16.msra.mxu0 %v11765_v43  ;;  %v11781_v43 = vld [vmem:[#allocation9 + $0x100] ss:$16 sps:$4 sm:$0xff]  }
 0x36a   : > { %5116 = vmatpush2.bf16.msra.mxu1 %v11766_v37  ;;  %5076 = vmatprep.subr.bf16.mxu0 %v11767_v13  ;;  %v11782_v37 = vld [vmem:[#allocation9 + $0x108] ss:$16 sps:$4 sm:$0xff]   ;;  %v11783_v13 = vld [vmem:[#allocation9 + $0x4e4] ss:$16 sps:$4 sm:$0xff]  }
 0x36b   : > { %5117 = vmatprep.subr.bf16.mxu1 %v11768_v3  ;;  %v11784_v3 = vld [vmem:[#allocation9 + $0x4ec] ss:$16 sps:$4 sm:$0xff]  }
 0x36d   : > { %5077 = vmatpush2.bf16.msra.mxu0 %v11769_v52 }
 0x36e   : > { %5118 = vmatpush2.bf16.msra.mxu1 %v11770_v22  ;;  %5078 = vmatprep.subr.bf16.mxu0 %v11771_v63 }
 0x36f   : > { %5119 = vmatprep.subr.bf16.mxu1 %v11772_v16  ;;  %v11785_v16 = vld [vmem:[#allocation9 + $0x4e0] ss:$16 sps:$4 sm:$0xff]  }
 0x371   : > { %5079 = vmatpush2.bf16.msra.mxu0 %v11773_v34 }
 0x372   : > { %5120 = vmatpush2.bf16.msra.mxu1 %v11774_v44  ;;  %5080 = vmatprep.subr.bf16.mxu0 %v11775_v60  ;;  %v11786_v44 = vld [vmem:[#allocation9 + $0x4e8] ss:$16 sps:$4 sm:$0xff]  }
 0x373   : > { %5121 = vmatprep.subr.bf16.mxu1 %v11776_v58 }
 0x375   : > { %5081 = vmatpush2.bf16.msra.mxu0 %v11777_v27  ;;  %v11787_v27 = vld [vmem:[#allocation9 + $0x4c4] ss:$16 sps:$4 sm:$0xff]  }
 0x376   : > { %5122 = vmatpush2.bf16.msra.mxu1 %v11778_v32  ;;  %5082 = vmatprep.subr.bf16.mxu0 %v11779_v10  ;;  %v11788_v10 = vld [vmem:[#allocation9 + $0x4cc] ss:$16 sps:$4 sm:$0xff]  }
 0x377   : > { %5123 = vmatprep.subr.bf16.mxu1 %v11780_v28  ;;  %v11789_v28 = vld [vmem:[#allocation9 + $0x4c0] ss:$16 sps:$4 sm:$0xff]  }
 0x379   : > { %5083 = vmatpush2.bf16.msra.mxu0 %v11781_v43  ;;  %v11790_v43 = vld [vmem:[#allocation9 + $0x4c8] ss:$16 sps:$4 sm:$0xff]  }
 0x37a   : > { %5124 = vmatpush2.bf16.msra.mxu1 %v11782_v37  ;;  %5134 = vmatprep.subr.bf16.mxu0 %v11783_v13  ;;  %v11791_v13 = vld [vmem:[#allocation9 + $0x4a4] ss:$16 sps:$4 sm:$0xff]  }
 0x37b   : > { %5175 = vmatprep.subr.bf16.mxu1 %v11784_v3  ;;  %v11793_v3 = vld [vmem:[#allocation9 + $0x4a0] ss:$16 sps:$4 sm:$0xff]  }
 0x37c   : > { %v4431_v52 = vpop.f32.mrf.mxu0  ;;  %5085 = vmatmul.mubr.bf16.vlgmr.msra.gmra.mxu0 %v12863_v61 }
 0x37d   : > { %v13259_v22 = vadd.f32 %v4431_v52, %v13243_v14  ;;  %v4472_v63 = vpop.f32.mrf.mxu1  ;;  %5126 = vmatmul.mubr.bf16.vlgmr.msra.gmra.mxu1 %v12863_v61  ;;  %5135 = vmatpush1.bf16.msra.mxu0 %v11785_v16  ;;  %v11794_v52 = vld [vmem:[#allocation9 + $0x4a8] ss:$16 sps:$4 sm:$0xff]   ;;  %v11797_v16 = vld [vmem:[#allocation9 + $0x480] ss:$16 sps:$4 sm:$0xff]  }
 0x37e   : > { %v13263_v34 = vadd.f32 %v4472_v63, %v13247_v11  ;;  %5166 = vmatprep.mubr.bf16.mxu0 %v12894_v51  ;;  %5176 = vmatpush1.bf16.msra.mxu1 %v11786_v44  ;;  %v4433_v60 = vpop.f32.mrf.mxu0  ;;  %v11796_v63 = vld [vmem:[#allocation9 + $0x48c] ss:$16 sps:$4 sm:$0xff]   ;;  %v11798_v44 = vld [vmem:[#allocation9 + $0x488] ss:$16 sps:$4 sm:$0xff]  }
 0x37f   : > { %5207 = vmatprep.mubr.bf16.mxu1 %v12894_v51  ;;  %v13268_v58 = vadd.f32 %v4433_v60, %v13252_v2  ;;  %v4474_v14 = vpop.f32.mrf.mxu1  ;;  %5136 = vmatprep.subr.bf16.mxu0 %v11787_v27  ;;  %v11792_v2 = vld [vmem:[#allocation9 + $0x4ac] ss:$16 sps:$4 sm:$0xff]   ;;  %v11799_v60 = vld [vmem:[#allocation9 + $0x464] ss:$16 sps:$4 sm:$0xff]   ;;  %v11801_v27 = vld [vmem:[#allocation9 + $0x460] ss:$16 sps:$4 sm:$0xff]  }
 0x380   : > { %v13271_v61 = vadd.f32 %v4474_v14, %v13255_v47  ;;  %v4435_v32 = vpop.f32.mrf.mxu0  ;;  %5177 = vmatprep.subr.bf16.mxu1 %v11788_v10  ;;  %v11795_v47 = vld [vmem:[#allocation9 + $0x484] ss:$16 sps:$4 sm:$0xff]   ;;  %v11800_v14 = vld [vmem:[#allocation9 + $0x46c] ss:$16 sps:$4 sm:$0xff]  }
 0x381   : > { %v4476_v11 = vpop.f32.mrf.mxu1  ;;  %5137 = vmatpush1.bf16.msra.mxu0 %v11789_v28  ;;  %v11802_v32 = vld [vmem:[#allocation9 + $0x468] ss:$16 sps:$4 sm:$0xff]   ;;  %v11803_v10 = vld [vmem:[#allocation9 + $0x444] ss:$16 sps:$4 sm:$0xff]   ;;  %v11805_v28 = vld [vmem:[#allocation9 + $0x440] ss:$16 sps:$4 sm:$0xff]  }
 0x382   : > { %5178 = vmatpush1.bf16.msra.mxu1 %v11790_v43  ;;  %v4436_v37 = vpop.f32.mrf.mxu0  ;;  %5138 = vmatprep.subr.bf16.mxu0 %v11791_v13  ;;  %v11804_v11 = vld [vmem:[#allocation9 + $0x44c] ss:$16 sps:$4 sm:$0xff]   ;;  %v11806_v43 = vld [vmem:[#allocation9 + $0x448] ss:$16 sps:$4 sm:$0xff]  }
 0x383   : > { %v4477_v51 = vpop.f32.mrf.mxu1  ;;  %5179 = vmatprep.subr.bf16.mxu1 %v11792_v2  ;;  %v11807_v37 = vld [vmem:[#allocation9 + $0x424] ss:$16 sps:$4 sm:$0xff]   ;;  %v11808_v13 = vld [vmem:[#allocation9 + $0x42c] ss:$16 sps:$4 sm:$0xff]   ;;  %v11810_v2 = vld [vmem:[#allocation9 + $0x428] ss:$16 sps:$4 sm:$0xff]  }
 0x384   : > { %v11809_v51 = vld [vmem:[#allocation9 + $0x420] ss:$16 sps:$4 sm:$0xff]  }
 0x385   : > { %5139 = vmatpush1.bf16.msra.mxu0 %v11793_v3  ;;  %v11811_v3 = vld [vmem:[#allocation9 + $0x404] ss:$16 sps:$4 sm:$0xff]  }
 0x386   : > { %5180 = vmatpush1.bf16.msra.mxu1 %v11794_v52  ;;  %5140 = vmatprep.subr.bf16.mxu0 %v11795_v47  ;;  %v11812_v52 = vld [vmem:[#allocation9 + $0x40c] ss:$16 sps:$4 sm:$0xff]   ;;  %v11813_v47 = vld [vmem:[#allocation9 + $0x400] ss:$16 sps:$4 sm:$0xff]  }
 0x387   : > { %5181 = vmatprep.subr.bf16.mxu1 %v11796_v63  ;;  %v11814_v63 = vld [vmem:[#allocation9 + $0x408] ss:$16 sps:$4 sm:$0xff]  }
 0x389   : > { %5141 = vmatpush1.bf16.msra.mxu0 %v11797_v16  ;;  %v11815_v16 = vld [vmem:[#allocation9 + $0x5e4] ss:$16 sps:$4 sm:$0xff]  }
 0x38a   : > { %5182 = vmatpush1.bf16.msra.mxu1 %v11798_v44  ;;  %5142 = vmatprep.subr.bf16.mxu0 %v11799_v60  ;;  %v11816_v44 = vld [vmem:[#allocation9 + $0x5ec] ss:$16 sps:$4 sm:$0xff]   ;;  %v11817_v60 = vld [vmem:[#allocation9 + $0x5e0] ss:$16 sps:$4 sm:$0xff]  }
 0x38b   : > { %5183 = vmatprep.subr.bf16.mxu1 %v11800_v14  ;;  %v11818_v14 = vld [vmem:[#allocation9 + $0x5e8] ss:$16 sps:$4 sm:$0xff]  }
 0x38d   : > { %5143 = vmatpush1.bf16.msra.mxu0 %v11801_v27  ;;  %v11819_v27 = vld [vmem:[#allocation9 + $0x5c4] ss:$16 sps:$4 sm:$0xff]  }
 0x38e   : > { %5184 = vmatpush1.bf16.msra.mxu1 %v11802_v32  ;;  %5144 = vmatprep.subr.bf16.mxu0 %v11803_v10  ;;  %v11820_v32 = vld [vmem:[#allocation9 + $0x5cc] ss:$16 sps:$4 sm:$0xff]   ;;  %v11821_v10 = vld [vmem:[#allocation9 + $0x5c0] ss:$16 sps:$4 sm:$0xff]  }
 0x38f   : > { %5185 = vmatprep.subr.bf16.mxu1 %v11804_v11  ;;  %v11822_v11 = vld [vmem:[#allocation9 + $0x5c8] ss:$16 sps:$4 sm:$0xff]  }
 0x391   : > { %5145 = vmatpush1.bf16.msra.mxu0 %v11805_v28  ;;  %v11823_v28 = vld [vmem:[#allocation9 + $0x5a4] ss:$16 sps:$4 sm:$0xff]  }
 0x392   : > { %5186 = vmatpush1.bf16.msra.mxu1 %v11806_v43  ;;  %5146 = vmatprep.subr.bf16.mxu0 %v11807_v37  ;;  %v11824_v43 = vld [vmem:[#allocation9 + $0x5ac] ss:$16 sps:$4 sm:$0xff]   ;;  %v11825_v37 = vld [vmem:[#allocation9 + $0x5a0] ss:$16 sps:$4 sm:$0xff]  }
 0x393   : > { %5187 = vmatprep.subr.bf16.mxu1 %v11808_v13  ;;  %v11826_v13 = vld [vmem:[#allocation9 + $0x5a8] ss:$16 sps:$4 sm:$0xff]  }
 0x395   : > { %5147 = vmatpush1.bf16.msra.mxu0 %v11809_v51  ;;  %v11827_v51 = vld [vmem:[#allocation9 + $0x584] ss:$16 sps:$4 sm:$0xff]  }
 0x396   : > { %5188 = vmatpush1.bf16.msra.mxu1 %v11810_v2  ;;  %5148 = vmatprep.subr.bf16.mxu0 %v11811_v3  ;;  %v11828_v2 = vld [vmem:[#allocation9 + $0x58c] ss:$16 sps:$4 sm:$0xff]   ;;  %v11829_v3 = vld [vmem:[#allocation9 + $0x580] ss:$16 sps:$4 sm:$0xff]  }
 0x397   : > { %5189 = vmatprep.subr.bf16.mxu1 %v11812_v52  ;;  %v11830_v52 = vld [vmem:[#allocation9 + $0x588] ss:$16 sps:$4 sm:$0xff]  }
 0x399   : > { %5149 = vmatpush1.bf16.msra.mxu0 %v11813_v47  ;;  %v11831_v47 = vld [vmem:[#allocation9 + $0x564] ss:$16 sps:$4 sm:$0xff]  }
 0x39a   : > { %5190 = vmatpush1.bf16.msra.mxu1 %v11814_v63  ;;  %5150 = vmatprep.subr.bf16.mxu0 %v11815_v16  ;;  %v11832_v63 = vld [vmem:[#allocation9 + $0x56c] ss:$16 sps:$4 sm:$0xff]   ;;  %v11833_v16 = vld [vmem:[#allocation9 + $0x560] ss:$16 sps:$4 sm:$0xff]  }
 0x39b   : > { %5191 = vmatprep.subr.bf16.mxu1 %v11816_v44  ;;  %v11834_v44 = vld [vmem:[#allocation9 + $0x568] ss:$16 sps:$4 sm:$0xff]  }
 0x39d   : > { %5151 = vmatpush2.bf16.msra.mxu0 %v11817_v60  ;;  %v11835_v60 = vld [vmem:[#allocation9 + $0x544] ss:$16 sps:$4 sm:$0xff]  }
 0x39e   : > { %5192 = vmatpush2.bf16.msra.mxu1 %v11818_v14  ;;  %5152 = vmatprep.subr.bf16.mxu0 %v11819_v27  ;;  %v11836_v14 = vld [vmem:[#allocation9 + $0x54c] ss:$16 sps:$4 sm:$0xff]   ;;  %v11837_v27 = vld [vmem:[#allocation9 + $0x540] ss:$16 sps:$4 sm:$0xff]  }
 0x39f   : > { %5193 = vmatprep.subr.bf16.mxu1 %v11820_v32  ;;  %v11838_v32 = vld [vmem:[#allocation9 + $0x548] ss:$16 sps:$4 sm:$0xff]  }
 0x3a1   : > { %5153 = vmatpush2.bf16.msra.mxu0 %v11821_v10  ;;  %v11839_v10 = vld [vmem:[#allocation9 + $0x524] ss:$16 sps:$4 sm:$0xff]  }
 0x3a2   : > { %5194 = vmatpush2.bf16.msra.mxu1 %v11822_v11  ;;  %5154 = vmatprep.subr.bf16.mxu0 %v11823_v28  ;;  %v11840_v11 = vld [vmem:[#allocation9 + $0x52c] ss:$16 sps:$4 sm:$0xff]   ;;  %v11841_v28 = vld [vmem:[#allocation9 + $0x520] ss:$16 sps:$4 sm:$0xff]  }
 0x3a3   : > { %5195 = vmatprep.subr.bf16.mxu1 %v11824_v43  ;;  %v11842_v43 = vld [vmem:[#allocation9 + $0x528] ss:$16 sps:$4 sm:$0xff]  }
 0x3a5   : > { %5155 = vmatpush2.bf16.msra.mxu0 %v11825_v37  ;;  %v11843_v37 = vld [vmem:[#allocation9 + $0x504] ss:$16 sps:$4 sm:$0xff]  }
 0x3a6   : > { %5196 = vmatpush2.bf16.msra.mxu1 %v11826_v13  ;;  %5156 = vmatprep.subr.bf16.mxu0 %v11827_v51  ;;  %v11844_v13 = vld [vmem:[#allocation9 + $0x50c] ss:$16 sps:$4 sm:$0xff]   ;;  %v11845_v51 = vld [vmem:[#allocation9 + $0x500] ss:$16 sps:$4 sm:$0xff]  }
 0x3a7   : > { %5197 = vmatprep.subr.bf16.mxu1 %v11828_v2  ;;  %v11846_v2 = vld [vmem:[#allocation9 + $0x508] ss:$16 sps:$4 sm:$0xff]  }
 0x3a9   : > { %5157 = vmatpush2.bf16.msra.mxu0 %v11829_v3  ;;  %v11847_v3 = vld [vmem:[#allocation9 + $0x6e4] ss:$16 sps:$4 sm:$0xff]  }
 0x3aa   : > { %5198 = vmatpush2.bf16.msra.mxu1 %v11830_v52  ;;  %5158 = vmatprep.subr.bf16.mxu0 %v11831_v47  ;;  %v11848_v52 = vld [vmem:[#allocation9 + $0x6ec] ss:$16 sps:$4 sm:$0xff]  }
 0x3ab   : > { %5199 = vmatprep.subr.bf16.mxu1 %v11832_v63 }
 0x3ad   : > { %5159 = vmatpush2.bf16.msra.mxu0 %v11833_v16 }
 0x3ae   : > { %5200 = vmatpush2.bf16.msra.mxu1 %v11834_v44  ;;  %5160 = vmatprep.subr.bf16.mxu0 %v11835_v60  ;;  %v11849_v44 = vld [vmem:[#allocation9 + $0x6e0] ss:$16 sps:$4 sm:$0xff]  }
 0x3af   : > { %5201 = vmatprep.subr.bf16.mxu1 %v11836_v14  ;;  %v11850_v14 = vld [vmem:[#allocation9 + $0x6e8] ss:$16 sps:$4 sm:$0xff]  }
 0x3b1   : > { %5161 = vmatpush2.bf16.msra.mxu0 %v11837_v27 }
 0x3b2   : > { %5202 = vmatpush2.bf16.msra.mxu1 %v11838_v32  ;;  %5162 = vmatprep.subr.bf16.mxu0 %v11839_v10  ;;  %v11851_v10 = vld [vmem:[#allocation9 + $0x6c4] ss:$16 sps:$4 sm:$0xff]  }
 0x3b3   : > { %5203 = vmatprep.subr.bf16.mxu1 %v11840_v11 }
 0x3b5   : > { %5163 = vmatpush2.bf16.msra.mxu0 %v11841_v28  ;;  %v11852_v28 = vld [vmem:[#allocation9 + $0x6cc] ss:$16 sps:$4 sm:$0xff]  }
 0x3b6   : > { %5204 = vmatpush2.bf16.msra.mxu1 %v11842_v43  ;;  %5164 = vmatprep.subr.bf16.mxu0 %v11843_v37  ;;  %v11853_v37 = vld [vmem:[#allocation9 + $0x6c0] ss:$16 sps:$4 sm:$0xff]  }
 0x3b7   : > { %5205 = vmatprep.subr.bf16.mxu1 %v11844_v13 }
 0x3b9   : > { %5165 = vmatpush2.bf16.msra.mxu0 %v11845_v51  ;;  %v11855_v51 = vld [vmem:[#allocation9 + $0x6a4] ss:$16 sps:$4 sm:$0xff]  }
 0x3ba   : > { %5206 = vmatpush2.bf16.msra.mxu1 %v11846_v2  ;;  %5220 = vmatprep.subr.bf16.mxu0 %v11847_v3  ;;  %v11856_v3 = vld [vmem:[#allocation9 + $0x6ac] ss:$16 sps:$4 sm:$0xff]  }
 0x3bb   : > { %5261 = vmatprep.subr.bf16.mxu1 %v11848_v52  ;;  %v11857_v52 = vld [vmem:[#allocation9 + $0x6a0] ss:$16 sps:$4 sm:$0xff]  }
 0x3bc   : > { %v4916_v47 = vpop.f32.mrf.mxu0  ;;  %5167 = vmatmul.mubr.bf16.vlgmr.msra.gmra.mxu0 %v13021_v26 }
 0x3bd   : > { %v13275_v63 = vadd.f32 %v4916_v47, %v13259_v22  ;;  %v4957_v16 = vpop.f32.mrf.mxu1  ;;  %5208 = vmatmul.mubr.bf16.vlgmr.msra.gmra.mxu1 %v13021_v26  ;;  %5221 = vmatpush1.bf16.msra.mxu0 %v11849_v44  ;;  %v11859_v47 = vld [vmem:[#allocation9 + $0x684] ss:$16 sps:$4 sm:$0xff]   ;;  %v11861_v44 = vld [vmem:[#allocation9 + $0x680] ss:$16 sps:$4 sm:$0xff]  }
 0x3be   : > { %v13279_v60 = vadd.f32 %v4957_v16, %v13263_v34  ;;  %5252 = vmatprep.mubr.bf16.mxu0 %v13034_v12  ;;  %5262 = vmatpush1.bf16.msra.mxu1 %v11850_v14  ;;  %v4918_v27 = vpop.f32.mrf.mxu0  ;;  %v11860_v16 = vld [vmem:[#allocation9 + $0x68c] ss:$16 sps:$4 sm:$0xff]   ;;  %v11862_v14 = vld [vmem:[#allocation9 + $0x688] ss:$16 sps:$4 sm:$0xff]  }
 0x3bf   : > { %5293 = vmatprep.mubr.bf16.mxu1 %v13034_v12  ;;  %v13284_v32 = vadd.f32 %v4918_v27, %v13268_v58  ;;  %v4959_v22 = vpop.f32.mrf.mxu1  ;;  %5222 = vmatprep.subr.bf16.mxu0 %v11851_v10  ;;  %v11854_v58 = vld [vmem:[#allocation9 + $0x6c8] ss:$16 sps:$4 sm:$0xff]   ;;  %v11863_v27 = vld [vmem:[#allocation9 + $0x664] ss:$16 sps:$4 sm:$0xff]   ;;  %v11865_v10 = vld [vmem:[#allocation9 + $0x660] ss:$16 sps:$4 sm:$0xff]  }
 0x3c0   : > { %v4968_v26 = vmax.f32 %v13275_v63, %v13279_v60  ;;  %v13289_v11 = vadd.f32 %v4959_v22, %v13271_v61  ;;  %v4920_v34 = vpop.f32.mrf.mxu0  ;;  %5263 = vmatprep.subr.bf16.mxu1 %v11852_v28  ;;  %v11858_v61 = vld [vmem:[#allocation9 + $0x6a8] ss:$16 sps:$4 sm:$0xff]   ;;  %v11864_v22 = vld [vmem:[#allocation9 + $0x66c] ss:$16 sps:$4 sm:$0xff]   ;;  %v11867_v28 = vld [vmem:[#allocation9 + $0x644] ss:$16 sps:$4 sm:$0xff]  }
 0x3c1   : > { %v4961_v43 = vpop.f32.mrf.mxu1  ;;  %5223 = vmatpush1.bf16.msra.mxu0 %v11853_v37  ;;  %v11866_v34 = vld [vmem:[#allocation9 + $0x668] ss:$16 sps:$4 sm:$0xff]   ;;  %v11869_v37 = vld [vmem:[#allocation9 + $0x640] ss:$16 sps:$4 sm:$0xff]  }
 0x3c2   : > { %v4969_v12 = vmax.f32 %v13284_v32, %v13289_v11  ;;  %5264 = vmatpush1.bf16.msra.mxu1 %v11854_v58  ;;  %v4921_v13 = vpop.f32.mrf.mxu0  ;;  %5224 = vmatprep.subr.bf16.mxu0 %v11855_v51  ;;  %v11868_v43 = vld [vmem:[#allocation9 + $0x64c] ss:$16 sps:$4 sm:$0xff]   ;;  %v11870_v58 = vld [vmem:[#allocation9 + $0x648] ss:$16 sps:$4 sm:$0xff]   ;;  %v11016_v60 = vld [vmem:[#allocation12 + $0xe0] ss:$16 sps:$4 sm:$0xff]  }
 0x3c3   : > { %v4962_v2 = vpop.f32.mrf.mxu1  ;;  %5265 = vmatprep.subr.bf16.mxu1 %v11856_v3  ;;  %v11871_v13 = vld [vmem:[#allocation9 + $0x624] ss:$16 sps:$4 sm:$0xff]   ;;  %v11872_v51 = vld [vmem:[#allocation9 + $0x62c] ss:$16 sps:$4 sm:$0xff]  }
 0x3c4   : > { %v13830_v2 = vld [vmem:[#allocation54_spill] sm:$0xff]  ;;  %v13831_v3 = vld [vmem:[#allocation55_spill] sm:$0xff] }
 0x3c5   : > { %5225 = vmatpush1.bf16.msra.mxu0 %v11857_v52  ;;  %v13832_v52 = vld [vmem:[#allocation56_spill] sm:$0xff]  ;;  %v11024_v32 = vld [vmem:[#allocation12 + $0xc4] ss:$16 sps:$4 sm:$0xff]  }
 0x3c6   : > { %5266 = vmatpush1.bf16.msra.mxu1 %v11858_v61  ;;  %5226 = vmatprep.subr.bf16.mxu0 %v11859_v47  ;;  %v13833_v61 = vld [vmem:[#allocation57_spill] sm:$0xff]  ;;  %v13834_v47 = vld [vmem:[#allocation58_spill] sm:$0xff] }
 0x3c7   : > { %5267 = vmatprep.subr.bf16.mxu1 %v11860_v16  ;;  %v13835_v16 = vld [vmem:[#allocation59_spill] sm:$0xff]  ;;  %v11027_v11 = vld [vmem:[#allocation12 + $0xcc] ss:$16 sps:$4 sm:$0xff]  }
 0x3c9   : > { %5227 = vmatpush1.bf16.msra.mxu0 %v11861_v44  ;;  %v13836_v44 = vld [vmem:[#allocation60_spill] sm:$0xff] }
 0x3ca   : > { %5268 = vmatpush1.bf16.msra.mxu1 %v11862_v14  ;;  %5228 = vmatprep.subr.bf16.mxu0 %v11863_v27  ;;  %v13837_v14 = vld [vmem:[#allocation61_spill] sm:$0xff]  ;;  %v13838_v27 = vld [vmem:[#allocation62_spill] sm:$0xff] }
 0x3cb   : > { %5269 = vmatprep.subr.bf16.mxu1 %v11864_v22  ;;  %v13839_v22 = vld [vmem:[#allocation63_spill] sm:$0xff] }
 0x3cd   : > { %5229 = vmatpush1.bf16.msra.mxu0 %v11865_v10  ;;  %v13840_v10 = vld [vmem:[#allocation64_spill] sm:$0xff] }
 0x3ce   : > { %5270 = vmatpush1.bf16.msra.mxu1 %v11866_v34  ;;  %5230 = vmatprep.subr.bf16.mxu0 %v11867_v28  ;;  %v13841_v34 = vld [vmem:[#allocation65_spill] sm:$0xff]  ;;  %v13842_v28 = vld [vmem:[#allocation66_spill] sm:$0xff] }
 0x3cf   : > { %5271 = vmatprep.subr.bf16.mxu1 %v11868_v43  ;;  %v13843_v43 = vld [vmem:[#allocation67_spill] sm:$0xff] }
 0x3d1   : > { %5231 = vmatpush1.bf16.msra.mxu0 %v11869_v37  ;;  %v13844_v37 = vld [vmem:[#allocation68_spill] sm:$0xff] }
 0x3d2   : > { %5272 = vmatpush1.bf16.msra.mxu1 %v11870_v58  ;;  %5232 = vmatprep.subr.bf16.mxu0 %v11871_v13  ;;  %v13845_v58 = vld [vmem:[#allocation69_spill] sm:$0xff]  ;;  %v13846_v13 = vld [vmem:[#allocation70_spill] sm:$0xff] }
 0x3d3   : > { %5273 = vmatprep.subr.bf16.mxu1 %v11872_v51  ;;  %v13847_v51 = vld [vmem:[#allocation71_spill] sm:$0xff] }
 0x3d5   : > { %5233 = vmatpush1.bf16.msra.mxu0 %v12899_v4  ;;  %v10919_v4 = vld [vmem:[#allocation3 + $0xc] ss:$-8 sps:$4 sm:$0x1e]  }
 0x3d6   : > { %5274 = vmatpush1.bf16.msra.mxu1 %v12901_v6  ;;  %5234 = vmatprep.subr.bf16.mxu0 %v12903_v5  ;;  %v13800_v5 = vld [vmem:[#allocation87_spill] sm:$0xff] }
 0x3d7   : > { %5275 = vmatprep.subr.bf16.mxu1 %v12905_v7  ;;  %v5317_v7 = vrot.slane %v10919_v4, 1  ;;  %v13848_v4 = vld [vmem:[#allocation72_spill] sm:$0xff] }
 0x3d9   : > { %5235 = vmatpush1.bf16.msra.mxu0 %v12908_v19 }
 0x3da   : > { %5276 = vmatpush1.bf16.msra.mxu1 %v12912_v20  ;;  %5236 = vmatprep.subr.bf16.mxu0 %v12914_v8  ;;  %v13801_v20 = vld [vmem:[#allocation25_spill] sm:$0xff]  ;;  %v13802_v8 = vld [vmem:[#allocation26_spill] sm:$0xff] }
 0x3db   : > { %5277 = vmatprep.subr.bf16.mxu1 %v12917_v17 }
 0x3dd   : > { %5237 = vmatpush2.bf16.msra.mxu0 %v12920_v56 }
 0x3de   : > { %5278 = vmatpush2.bf16.msra.mxu1 %v12924_v57  ;;  %5238 = vmatprep.subr.bf16.mxu0 %v12926_v46  ;;  %v13803_v57 = vld [vmem:[#allocation27_spill] sm:$0xff] }
 0x3df   : > { %5279 = vmatprep.subr.bf16.mxu1 %v12929_v53  ;;  %v13804_v53 = vld [vmem:[#allocation28_spill] sm:$0xff] }
 0x3e1   : > { %5239 = vmatpush2.bf16.msra.mxu0 %v12932_v62 }
 0x3e2   : > { %5280 = vmatpush2.bf16.msra.mxu1 %v12936_v9  ;;  %5240 = vmatprep.subr.bf16.mxu0 %v12938_v25  ;;  %v13805_v9 = vld [vmem:[#allocation29_spill] sm:$0xff]  ;;  %v13806_v25 = vld [vmem:[#allocation30_spill] sm:$0xff] }
 0x3e3   : > { %5281 = vmatprep.subr.bf16.mxu1 %v12941_v18 }
 0x3e5   : > { %5241 = vmatpush2.bf16.msra.mxu0 %v12944_v23  ;;  %v13807_v23 = vld [vmem:[#allocation31_spill] sm:$0xff] }
 0x3e6   : > { %5282 = vmatpush2.bf16.msra.mxu1 %v12948_v24  ;;  %5242 = vmatprep.subr.bf16.mxu0 %v12950_v29  ;;  %v13808_v29 = vld [vmem:[#allocation32_spill] sm:$0xff] }
 0x3e7   : > { %5283 = vmatprep.subr.bf16.mxu1 %v12953_v30  ;;  %v13809_v30 = vld [vmem:[#allocation33_spill] sm:$0xff] }
 0x3e9   : > { %5243 = vmatpush2.bf16.msra.mxu0 %v12956_v33  ;;  %v13810_v33 = vld [vmem:[#allocation34_spill] sm:$0xff] }
 0x3ea   : > { %5284 = vmatpush2.bf16.msra.mxu1 %v12960_v35  ;;  %5244 = vmatprep.subr.bf16.mxu0 %v12962_v36  ;;  %v13811_v35 = vld [vmem:[#allocation35_spill] sm:$0xff]  ;;  %v13812_v36 = vld [vmem:[#allocation36_spill] sm:$0xff] }
 0x3eb   : > { %5285 = vmatprep.subr.bf16.mxu1 %v12965_v38  ;;  %v13813_v38 = vld [vmem:[#allocation37_spill] sm:$0xff] }
 0x3ed   : > { %5245 = vmatpush2.bf16.msra.mxu0 %v12968_v15  ;;  %v13814_v15 = vld [vmem:[#allocation38_spill] sm:$0xff] }
 0x3ee   : > { %5286 = vmatpush2.bf16.msra.mxu1 %v12972_v1  ;;  %5246 = vmatprep.subr.bf16.mxu0 %v12974_v39  ;;  %v13815_v1 = vld [vmem:[#allocation39_spill] sm:$0xff]  ;;  %v13816_v39 = vld [vmem:[#allocation40_spill] sm:$0xff] }
 0x3ef   : > { %5287 = vmatprep.subr.bf16.mxu1 %v12977_v40  ;;  %v13817_v40 = vld [vmem:[#allocation41_spill] sm:$0xff] }
 0x3f1   : > { %5247 = vmatpush2.bf16.msra.mxu0 %v12980_v41  ;;  %v13818_v41 = vld [vmem:[#allocation42_spill] sm:$0xff] }
 0x3f2   : > { %5288 = vmatpush2.bf16.msra.mxu1 %v12984_v42  ;;  %5248 = vmatprep.subr.bf16.mxu0 %v12986_v0  ;;  %v13819_v42 = vld [vmem:[#allocation43_spill] sm:$0xff]  ;;  %v13820_v0 = vld [vmem:[#allocation44_spill] sm:$0xff] }
 0x3f3   : > { %5289 = vmatprep.subr.bf16.mxu1 %v12989_v45  ;;  %v13821_v45 = vld [vmem:[#allocation45_spill] sm:$0xff] }
 0x3f5   : > { %5249 = vmatpush2.bf16.msra.mxu0 %v12992_v48  ;;  %v13822_v48 = vld [vmem:[#allocation46_spill] sm:$0xff] }
 0x3f6   : > { %5290 = vmatpush2.bf16.msra.mxu1 %v12996_v49  ;;  %5250 = vmatprep.subr.bf16.mxu0 %v12998_v50  ;;  %v13823_v49 = vld [vmem:[#allocation47_spill] sm:$0xff]  ;;  %v13824_v50 = vld [vmem:[#allocation48_spill] sm:$0xff] }
 0x3f7   : > { %5291 = vmatprep.subr.bf16.mxu1 %v13002_v31  ;;  %v13825_v31 = vld [vmem:[#allocation49_spill] sm:$0xff] }
 0x3f9   : > { %5251 = vmatpush2.bf16.msra.mxu0 %v13005_v54  ;;  %v13826_v54 = vld [vmem:[#allocation50_spill] sm:$0xff] }
 0x3fa   : > { %5292 = vmatpush2.bf16.msra.mxu1 %v13009_v55  ;;  %5320 = vmatprep.subr.bf16.mxu0 %v13011_v59  ;;  %v13827_v55 = vld [vmem:[#allocation51_spill] sm:$0xff]  ;;  %v13828_v59 = vld [vmem:[#allocation52_spill] sm:$0xff] }
 0x3fb   : > { %5361 = vmatprep.subr.bf16.mxu1 %v13014_v21  ;;  %v13829_v21 = vld [vmem:[#allocation53_spill] sm:$0xff] }
 0x3fc   : > { %v13333_v6 = vpop.f32.mrf.mxu0  ;;  %5253 = vmatmul.mubr.bf16.vlgmr.msra.gmra.mxu0 %v13800_v5 }
 0x3fd   : > { %v13336_v19 = vpop.f32.mrf.mxu1  ;;  %5294 = vmatmul.mubr.bf16.vlgmr.msra.gmra.mxu1 %v13800_v5  ;;  %5321 = vmatpush1.bf16.msra.mxu0 %v13801_v20  ;;  %v13849_v5 = vld [vmem:[#allocation73_spill] sm:$0xff]  ;;  %v13851_v20 = vld [vmem:[#allocation75_spill] sm:$0xff] }
 0x3fe   : > { %5352 = vmatprep.mubr.bf16.mxu0 %v5317_v7  ;;  %5362 = vmatpush1.bf16.msra.mxu1 %v13802_v8  ;;  %v13341_v17 = vpop.f32.mrf.mxu0  ;;  %v13852_v8 = vld [vmem:[#allocation76_spill] sm:$0xff] }
 0x3ff   : > { %5393 = vmatprep.mubr.bf16.mxu1 %v5317_v7  ;;  %v13343_v56 = vpop.f32.mrf.mxu1  ;;  %5322 = vmatprep.subr.bf16.mxu0 %v13803_v57  ;;  %v13850_v7 = vld [vmem:[#allocation74_spill] sm:$0xff]  ;;  %v13853_v57 = vld [vmem:[#allocation77_spill] sm:$0xff] }
 0x400   : > { %v5008_v46 = vpop.f32.mrf.mxu0  ;;  %5363 = vmatprep.subr.bf16.mxu1 %v13804_v53  ;;  %v13855_v53 = vld [vmem:[#allocation79_spill] sm:$0xff] }
 0x401   : > { %v5049_v62 = vpop.f32.mrf.mxu1  ;;  %5323 = vmatpush1.bf16.msra.mxu0 %v13805_v9  ;;  %v13854_v46 = vld [vmem:[#allocation78_spill] sm:$0xff]  ;;  %v13857_v9 = vld [vmem:[#allocation81_spill] sm:$0xff] }
 0x402   : > { %5364 = vmatpush1.bf16.msra.mxu1 %v13806_v25  ;;  %v5009_v18 = vpop.f32.mrf.mxu0  ;;  %5324 = vmatprep.subr.bf16.mxu0 %v13807_v23  ;;  %v13856_v62 = vld [vmem:[#allocation80_spill] sm:$0xff]  ;;  %v10917_v25 = vld [vmem:[#allocation3 + $0x8] ss:$-8 sps:$4 sm:$0x1e]  }
 0x403   : > { %v5050_v24 = vpop.f32.mrf.mxu1  ;;  %5365 = vmatprep.subr.bf16.mxu1 %v13808_v29  ;;  %v13858_v18 = vld [vmem:[#allocation82_spill] sm:$0xff]  ;;  %v13859_v23 = vld [vmem:[#allocation83_spill] sm:$0xff]  ;;  %v13861_v29 = vld [vmem:[#allocation85_spill] sm:$0xff] }
 0x404   : > { %v13860_v24 = vld [vmem:[#allocation84_spill] sm:$0xff] }
 0x405   : > { %5325 = vmatpush1.bf16.msra.mxu0 %v13809_v30  ;;  %v5316_v30 = vrot.slane %v10917_v25, 1  ;;  %v10977_v25 = vld [vmem:[#allocation12 + $0x3c8] ss:$16 sps:$4 sm:$0xff]  }
 0x406   : > { %5366 = vmatpush1.bf16.msra.mxu1 %v13810_v33  ;;  %5326 = vmatprep.subr.bf16.mxu0 %v13811_v35  ;;  %v13862_v33 = vld [vmem:[#allocation86_spill] sm:$0xff] }
 0x407   : > { %5367 = vmatprep.subr.bf16.mxu1 %v13812_v36 }
 0x409   : > { %5327 = vmatpush1.bf16.msra.mxu0 %v13813_v38 }
 0x40a   : > { %5368 = vmatpush1.bf16.msra.mxu1 %v13814_v15  ;;  %5328 = vmatprep.subr.bf16.mxu0 %v13815_v1 }
 0x40b   : > { %5369 = vmatprep.subr.bf16.mxu1 %v13816_v39 }
 0x40d   : > { %5329 = vmatpush1.bf16.msra.mxu0 %v13817_v40 }
 0x40e   : > { %5370 = vmatpush1.bf16.msra.mxu1 %v13818_v41  ;;  %5330 = vmatprep.subr.bf16.mxu0 %v13819_v42 }
 0x40f   : > { %5371 = vmatprep.subr.bf16.mxu1 %v13820_v0 }
 0x411   : > { %5331 = vmatpush1.bf16.msra.mxu0 %v13821_v45 }
 0x412   : > { %5372 = vmatpush1.bf16.msra.mxu1 %v13822_v48  ;;  %5332 = vmatprep.subr.bf16.mxu0 %v13823_v49  ;;  %v10920_v49 = vld [vmem:[#allocation12 + $0x2e0] ss:$16 sps:$4 sm:$0xff]  }
 0x413   : > { %5373 = vmatprep.subr.bf16.mxu1 %v13824_v50  ;;  %v10923_v50 = vld [vmem:[#allocation12 + $0x2e8] ss:$16 sps:$4 sm:$0xff]  }
 0x415   : > { %5333 = vmatpush1.bf16.msra.mxu0 %v13825_v31  ;;  %v10925_v31 = vld [vmem:[#allocation12 + $0x2ec] ss:$16 sps:$4 sm:$0xff]  }
 0x416   : > { %5374 = vmatpush1.bf16.msra.mxu1 %v13826_v54  ;;  %5334 = vmatprep.subr.bf16.mxu0 %v13827_v55  ;;  %v10928_v54 = vld [vmem:[#allocation12 + $0x2c4] ss:$16 sps:$4 sm:$0xff]   ;;  %v10926_v55 = vld [vmem:[#allocation12 + $0x2c0] ss:$16 sps:$4 sm:$0xff]  }
 0x417   : > { %5375 = vmatprep.subr.bf16.mxu1 %v13828_v59  ;;  %v10934_v59 = vld [vmem:[#allocation12 + $0x2a4] ss:$16 sps:$4 sm:$0xff]  }
 0x419   : > { %5335 = vmatpush1.bf16.msra.mxu0 %v13829_v21  ;;  %v10932_v21 = vld [vmem:[#allocation12 + $0x2a0] ss:$16 sps:$4 sm:$0xff]  }
 0x41a   : > { %5376 = vmatpush1.bf16.msra.mxu1 %v13830_v2  ;;  %5336 = vmatprep.subr.bf16.mxu0 %v13831_v3  ;;  %v10935_v2 = vld [vmem:[#allocation12 + $0x2a8] ss:$16 sps:$4 sm:$0xff]   ;;  %v10940_v3 = vld [vmem:[#allocation12 + $0x284] ss:$16 sps:$4 sm:$0xff]  }
 0x41b   : > { %5377 = vmatprep.subr.bf16.mxu1 %v13832_v52  ;;  %v10943_v52 = vld [vmem:[#allocation12 + $0x28c] ss:$16 sps:$4 sm:$0xff]  }
 0x41d   : > { %5337 = vmatpush2.bf16.msra.mxu0 %v13833_v61  ;;  %v10938_v61 = vld [vmem:[#allocation12 + $0x280] ss:$16 sps:$4 sm:$0xff]  }
 0x41e   : > { %5378 = vmatpush2.bf16.msra.mxu1 %v13834_v47  ;;  %5338 = vmatprep.subr.bf16.mxu0 %v13835_v16  ;;  %v10941_v47 = vld [vmem:[#allocation12 + $0x288] ss:$16 sps:$4 sm:$0xff]   ;;  %v10946_v16 = vld [vmem:[#allocation12 + $0x264] ss:$16 sps:$4 sm:$0xff]  }
 0x41f   : > { %5379 = vmatprep.subr.bf16.mxu1 %v13836_v44  ;;  %v10949_v44 = vld [vmem:[#allocation12 + $0x26c] ss:$16 sps:$4 sm:$0xff]  }
 0x421   : > { %5339 = vmatpush2.bf16.msra.mxu0 %v13837_v14  ;;  %v10944_v14 = vld [vmem:[#allocation12 + $0x260] ss:$16 sps:$4 sm:$0xff]  }
 0x422   : > { %5380 = vmatpush2.bf16.msra.mxu1 %v13838_v27  ;;  %5340 = vmatprep.subr.bf16.mxu0 %v13839_v22  ;;  %v10947_v27 = vld [vmem:[#allocation12 + $0x268] ss:$16 sps:$4 sm:$0xff]   ;;  %v10952_v22 = vld [vmem:[#allocation12 + $0x244] ss:$16 sps:$4 sm:$0xff]  }
 0x423   : > { %5381 = vmatprep.subr.bf16.mxu1 %v13840_v10  ;;  %v10955_v10 = vld [vmem:[#allocation12 + $0x24c] ss:$16 sps:$4 sm:$0xff]  }
 0x425   : > { %5341 = vmatpush2.bf16.msra.mxu0 %v13841_v34  ;;  %v10950_v34 = vld [vmem:[#allocation12 + $0x240] ss:$16 sps:$4 sm:$0xff]  }
 0x426   : > { %5382 = vmatpush2.bf16.msra.mxu1 %v13842_v28  ;;  %5342 = vmatprep.subr.bf16.mxu0 %v13843_v43  ;;  %v10953_v28 = vld [vmem:[#allocation12 + $0x248] ss:$16 sps:$4 sm:$0xff]   ;;  %v10958_v43 = vld [vmem:[#allocation12 + $0x224] ss:$16 sps:$4 sm:$0xff]  }
 0x427   : > { %5383 = vmatprep.subr.bf16.mxu1 %v13844_v37  ;;  %v10961_v37 = vld [vmem:[#allocation12 + $0x22c] ss:$16 sps:$4 sm:$0xff]  }
 0x429   : > { %5343 = vmatpush2.bf16.msra.mxu0 %v13845_v58  ;;  %v10956_v58 = vld [vmem:[#allocation12 + $0x220] ss:$16 sps:$4 sm:$0xff]  }
 0x42a   : > { %5384 = vmatpush2.bf16.msra.mxu1 %v13846_v13  ;;  %5344 = vmatprep.subr.bf16.mxu0 %v13847_v51  ;;  %v10959_v13 = vld [vmem:[#allocation12 + $0x228] ss:$16 sps:$4 sm:$0xff]   ;;  %v10964_v51 = vld [vmem:[#allocation12 + $0x204] ss:$16 sps:$4 sm:$0xff]  }
 0x42b   : > { %5385 = vmatprep.subr.bf16.mxu1 %v13848_v4  ;;  %v10967_v4 = vld [vmem:[#allocation12 + $0x20c] ss:$16 sps:$4 sm:$0xff]  }
 0x42d   : > { %5345 = vmatpush2.bf16.msra.mxu0 %v13849_v5  ;;  %v10962_v5 = vld [vmem:[#allocation12 + $0x200] ss:$16 sps:$4 sm:$0xff]  }
 0x42e   : > { %5386 = vmatpush2.bf16.msra.mxu1 %v13850_v7  ;;  %5346 = vmatprep.subr.bf16.mxu0 %v13851_v20  ;;  %v10965_v7 = vld [vmem:[#allocation12 + $0x208] ss:$16 sps:$4 sm:$0xff]   ;;  %v10970_v20 = vld [vmem:[#allocation12 + $0x3e4] ss:$16 sps:$4 sm:$0xff]  }
 0x42f   : > { %5387 = vmatprep.subr.bf16.mxu1 %v13852_v8  ;;  %v10973_v8 = vld [vmem:[#allocation12 + $0x3ec] ss:$16 sps:$4 sm:$0xff]  }
 0x431   : > { %5347 = vmatpush2.bf16.msra.mxu0 %v13853_v57  ;;  %v10968_v57 = vld [vmem:[#allocation12 + $0x3e0] ss:$16 sps:$4 sm:$0xff]  }
 0x432   : > { %5388 = vmatpush2.bf16.msra.mxu1 %v13854_v46  ;;  %5348 = vmatprep.subr.bf16.mxu0 %v13855_v53  ;;  %v10971_v46 = vld [vmem:[#allocation12 + $0x3e8] ss:$16 sps:$4 sm:$0xff]   ;;  %v10976_v53 = vld [vmem:[#allocation12 + $0x3c4] ss:$16 sps:$4 sm:$0xff]  }
 0x433   : > { %5389 = vmatprep.subr.bf16.mxu1 %v13856_v62  ;;  %v10979_v62 = vld [vmem:[#allocation12 + $0x3cc] ss:$16 sps:$4 sm:$0xff]  }
 0x435   : > { %5349 = vmatpush2.bf16.msra.mxu0 %v13857_v9  ;;  %v10974_v9 = vld [vmem:[#allocation12 + $0x3c0] ss:$16 sps:$4 sm:$0xff]  }
 0x436   : > { %5390 = vmatpush2.bf16.msra.mxu1 %v13858_v18  ;;  %5350 = vmatprep.subr.bf16.mxu0 %v13859_v23  ;;  %v10982_v18 = vld [vmem:[#allocation12 + $0x3a4] ss:$16 sps:$4 sm:$0xff]   ;;  %v10985_v23 = vld [vmem:[#allocation12 + $0x3ac] ss:$16 sps:$4 sm:$0xff]  }
 0x437   : > { %5391 = vmatprep.subr.bf16.mxu1 %v13860_v24  ;;  %v10980_v24 = vld [vmem:[#allocation12 + $0x3a0] ss:$16 sps:$4 sm:$0xff]  }
 0x439   : > { %5351 = vmatpush2.bf16.msra.mxu0 %v13861_v29  ;;  %v10983_v29 = vld [vmem:[#allocation12 + $0x3a8] ss:$16 sps:$4 sm:$0xff]  }
 0x43a   : > { %5392 = vmatpush2.bf16.msra.mxu1 %v13862_v33  ;;  %v10991_v33 = vld [vmem:[#allocation12 + $0x38c] ss:$16 sps:$4 sm:$0xff]  }
 0x43b   : > { %5925 = vmatprep.subr.bf16.mxu1 %v10925_v31 }
 0x43c   : > { %v5086_v35 = vpop.f32.mrf.mxu0  ;;  %5353 = vmatmul.mubr.bf16.vlgmr.msra.gmra.mxu0 %v5316_v30 }
 0x43d   : > { %v13406_v36 = vadd.f32 %v5086_v35, %v13333_v6  ;;  %v5127_v38 = vpop.f32.mrf.mxu1  ;;  %5394 = vmatmul.mubr.bf16.vlgmr.msra.gmra.mxu1 %v5316_v30  ;;  %v10922_v6 = vld [vmem:[#allocation12 + $0x2e4] ss:$16 sps:$4 sm:$0xff]   ;;  %v10986_v35 = vld [vmem:[#allocation12 + $0x380] ss:$16 sps:$4 sm:$0xff]  }
 0x43e   : > { %v13409_v15 = vadd.f32 %v5127_v38, %v13336_v19  ;;  %v5088_v1 = vpop.f32.mrf.mxu0  ;;  %5884 = vmatprep.subr.bf16.mxu0 %v10922_v6  ;;  %v10931_v19 = vld [vmem:[#allocation12 + $0x2cc] ss:$16 sps:$4 sm:$0xff]   ;;  %5926 = vmatpush1.bf16.msra.mxu1 %v10923_v50  ;;  %v10988_v30 = vld [vmem:[#allocation12 + $0x384] ss:$16 sps:$4 sm:$0xff]   ;;  %v10989_v38 = vld [vmem:[#allocation12 + $0x388] ss:$16 sps:$4 sm:$0xff]  }
 0x43f   : > { %v13412_v39 = vadd.f32 %v5088_v1, %v13341_v17  ;;  %v5129_v40 = vpop.f32.mrf.mxu1  ;;  %5885 = vmatpush1.bf16.msra.mxu0 %v10920_v49  ;;  %v10929_v17 = vld [vmem:[#allocation12 + $0x2c8] ss:$16 sps:$4 sm:$0xff]   ;;  %5927 = vmatprep.subr.bf16.mxu1 %v10931_v19  ;;  %v10992_v6 = vld [vmem:[#allocation12 + $0x360] ss:$16 sps:$4 sm:$0xff]  }
 0x440   : > { %v13415_v41 = vadd.f32 %v5129_v40, %v13343_v56  ;;  %v5090_v42 = vpop.f32.mrf.mxu0  ;;  %5886 = vmatprep.subr.bf16.mxu0 %v10928_v54  ;;  %v10937_v56 = vld [vmem:[#allocation12 + $0x2ac] ss:$16 sps:$4 sm:$0xff]   ;;  %v10995_v50 = vld [vmem:[#allocation12 + $0x368] ss:$16 sps:$4 sm:$0xff]  }
 0x441   : > { %v5131_v0 = vpop.f32.mrf.mxu1 }
 0x442   : > { %v5091_v45 = vpop.f32.mrf.mxu0  ;;  %5928 = vmatpush1.bf16.msra.mxu1 %v10929_v17  ;;  %v10994_v0 = vld [vmem:[#allocation12 + $0x364] ss:$16 sps:$4 sm:$0xff]  }
 0x443   : > { %v5132_v48 = vpop.f32.mrf.mxu1  ;;  %5887 = vmatpush1.bf16.msra.mxu0 %v10926_v55  ;;  %5929 = vmatprep.subr.bf16.mxu1 %v10937_v56  ;;  %v10997_v45 = vld [vmem:[#allocation12 + $0x36c] ss:$16 sps:$4 sm:$0xff]  }
 0x444   : > { %5888 = vmatprep.subr.bf16.mxu0 %v10934_v59  ;;  %v11003_v59 = vld [vmem:[#allocation12 + $0x34c] ss:$16 sps:$4 sm:$0xff]  }
 0x446   : > { %5930 = vmatpush1.bf16.msra.mxu1 %v10935_v2  ;;  %v11001_v2 = vld [vmem:[#allocation12 + $0x348] ss:$16 sps:$4 sm:$0xff]  }
 0x447   : > { %5889 = vmatpush1.bf16.msra.mxu0 %v10932_v21  ;;  %5931 = vmatprep.subr.bf16.mxu1 %v10943_v52  ;;  %v10998_v21 = vld [vmem:[#allocation12 + $0x340] ss:$16 sps:$4 sm:$0xff]  }
 0x448   : > { %5890 = vmatprep.subr.bf16.mxu0 %v10940_v3  ;;  %v11009_v3 = vld [vmem:[#allocation12 + $0x32c] ss:$16 sps:$4 sm:$0xff]   ;;  %v11004_v52 = vld [vmem:[#allocation12 + $0x320] ss:$16 sps:$4 sm:$0xff]  }
 0x44a   : > { %5932 = vmatpush1.bf16.msra.mxu1 %v10941_v47  ;;  %v11015_v47 = vld [vmem:[#allocation12 + $0x30c] ss:$16 sps:$4 sm:$0xff]  }
 0x44b   : > { %5891 = vmatpush1.bf16.msra.mxu0 %v10938_v61  ;;  %5933 = vmatprep.subr.bf16.mxu1 %v10949_v44  ;;  %v11007_v61 = vld [vmem:[#allocation12 + $0x328] ss:$16 sps:$4 sm:$0xff]  }
 0x44c   : > { %5892 = vmatprep.subr.bf16.mxu0 %v10946_v16  ;;  %v11010_v16 = vld [vmem:[#allocation12 + $0x300] ss:$16 sps:$4 sm:$0xff]   ;;  %v11013_v44 = vld [vmem:[#allocation12 + $0x308] ss:$16 sps:$4 sm:$0xff]  }
 0x44e   : > { %5934 = vmatpush1.bf16.msra.mxu1 %v10947_v27  ;;  %v11021_v27 = vld [vmem:[#allocation12 + $0xec] ss:$16 sps:$4 sm:$0xff]  }
 0x44f   : > { %5893 = vmatpush1.bf16.msra.mxu0 %v10944_v14  ;;  %5935 = vmatprep.subr.bf16.mxu1 %v10955_v10  ;;  %v11018_v14 = vld [vmem:[#allocation12 + $0xe4] ss:$16 sps:$4 sm:$0xff]  }
 0x450   : > { %5894 = vmatprep.subr.bf16.mxu0 %v10952_v22 }
 0x452   : > { %5936 = vmatpush1.bf16.msra.mxu1 %v10953_v28 }
 0x453   : > { %5895 = vmatpush1.bf16.msra.mxu0 %v10950_v34  ;;  %5937 = vmatprep.subr.bf16.mxu1 %v10961_v37 }
 0x454   : > { %5896 = vmatprep.subr.bf16.mxu0 %v10958_v43 }
 0x456   : > { %5938 = vmatpush1.bf16.msra.mxu1 %v10959_v13 }
 0x457   : > { %5897 = vmatpush1.bf16.msra.mxu0 %v10956_v58  ;;  %5939 = vmatprep.subr.bf16.mxu1 %v10967_v4 }
 0x458   : > { %5898 = vmatprep.subr.bf16.mxu0 %v10964_v51 }
 0x45a   : > { %5940 = vmatpush1.bf16.msra.mxu1 %v10965_v7 }
 0x45b   : > { %5899 = vmatpush1.bf16.msra.mxu0 %v10962_v5  ;;  %5941 = vmatprep.subr.bf16.mxu1 %v10973_v8 }
 0x45c   : > { %5900 = vmatprep.subr.bf16.mxu0 %v10970_v20 }
 0x45e   : > { %5942 = vmatpush2.bf16.msra.mxu1 %v10971_v46 }
 0x45f   : > { %5901 = vmatpush2.bf16.msra.mxu0 %v10968_v57  ;;  %5943 = vmatprep.subr.bf16.mxu1 %v10979_v62  ;;  %v5410_v57 = vld [vmem:[#allocation10] sm:$0x3] }
 0x460   : > { %5902 = vmatprep.subr.bf16.mxu0 %v10976_v53 }
 0x462   : > { %5944 = vmatpush2.bf16.msra.mxu1 %v10977_v25 }
 0x463   : > { %5903 = vmatpush2.bf16.msra.mxu0 %v10974_v9  ;;  %5945 = vmatprep.subr.bf16.mxu1 %v10985_v23  ;;  %v13863_v23 = vld [vmem:[#allocation23_spill] sm:$0xff] }
 0x464   : > { %5904 = vmatprep.subr.bf16.mxu0 %v10982_v18 }
 0x466   : > { %5946 = vmatpush2.bf16.msra.mxu1 %v10983_v29 }
 0x467   : > { %5905 = vmatpush2.bf16.msra.mxu0 %v10980_v24  ;;  %5947 = vmatprep.subr.bf16.mxu1 %v10991_v33  ;;  %v5415_v24 = vrot.slane %v5410_v57, %v13863_v23 }
 0x468   : > { %5906 = vmatprep.subr.bf16.mxu0 %v10988_v30 }
 0x46a   : > { %5948 = vmatpush2.bf16.msra.mxu1 %v10989_v38 }
 0x46b   : > { %5907 = vmatpush2.bf16.msra.mxu0 %v10986_v35  ;;  %5949 = vmatprep.subr.bf16.mxu1 %v10997_v45 }
 0x46c   : > { %5908 = vmatprep.subr.bf16.mxu0 %v10994_v0 }
 0x46e   : > { %5950 = vmatpush2.bf16.msra.mxu1 %v10995_v50 }
 0x46f   : > { %5909 = vmatpush2.bf16.msra.mxu0 %v10992_v6  ;;  %5951 = vmatprep.subr.bf16.mxu1 %v11003_v59  ;;  %v11028_v59 = vld [vmem:[#allocation12 + $0xa0] ss:$16 sps:$4 sm:$0xff]  }
 0x472   : > { %5952 = vmatpush2.bf16.msra.mxu1 %v11001_v2  ;;  %v11039_v2 = vld [vmem:[#allocation12 + $0x8c] ss:$16 sps:$4 sm:$0xff]  }
 0x473   : > { %5953 = vmatprep.subr.bf16.mxu1 %v11009_v3  ;;  %v11042_v3 = vld [vmem:[#allocation12 + $0x64] ss:$16 sps:$4 sm:$0xff]  }
 0x476   : > { %5954 = vmatpush2.bf16.msra.mxu1 %v11007_v61  ;;  %v11040_v61 = vld [vmem:[#allocation12 + $0x60] ss:$16 sps:$4 sm:$0xff]  }
 0x477   : > { %5955 = vmatprep.subr.bf16.mxu1 %v11015_v47  ;;  %v11048_v47 = vld [vmem:[#allocation12 + $0x44] ss:$16 sps:$4 sm:$0xff]  }
 0x47a   : > { %5956 = vmatpush2.bf16.msra.mxu1 %v11013_v44  ;;  %v11046_v44 = vld [vmem:[#allocation12 + $0x40] ss:$16 sps:$4 sm:$0xff]  }
 0x47b   : > { %6327 = vmatprep.subr.bf16.mxu1 %v11021_v27  ;;  %v11054_v27 = vld [vmem:[#allocation12 + $0x24] ss:$16 sps:$4 sm:$0xff]  }
 0x47c   : > { %v5168_v1 = vpop.f32.mrf.mxu0 }
 0x47d   : > { %v5216_v40 = vadd.f32 %v5168_v1, %v13406_v36  ;;  %v5209_v42 = vpop.f32.mrf.mxu1  ;;  %v11000_v36 = vld [vmem:[#allocation12 + $0x344] ss:$16 sps:$4 sm:$0xff]   ;;  %v13864_v1 = vld [vmem:[#allocation24_spill] sm:$0xff] }
 0x47e   : > { %v5218_v48 = vadd.f32 %v5209_v42, %v13409_v15  ;;  %v5170_v49 = vpop.f32.mrf.mxu0  ;;  %5910 = vmatprep.subr.bf16.mxu0 %v11000_v36  ;;  %v11033_v36 = vld [vmem:[#allocation12 + $0xac] ss:$16 sps:$4 sm:$0xff]  }
 0x47f   : > { %v5217_v31 = vadd.f32 %v5170_v49, %v13412_v39  ;;  %v5211_v54 = vpop.f32.mrf.mxu1  ;;  %5911 = vmatpush2.bf16.msra.mxu0 %v10998_v21  ;;  %v11006_v39 = vld [vmem:[#allocation12 + $0x324] ss:$16 sps:$4 sm:$0xff]  }
 0x480   : > { %v5219_v19 = vadd.f32 %v5211_v54, %v13415_v41  ;;  %v5172_v55 = vpop.f32.mrf.mxu0  ;;  %5912 = vmatprep.subr.bf16.mxu0 %v11006_v39  ;;  %v11012_v41 = vld [vmem:[#allocation12 + $0x304] ss:$16 sps:$4 sm:$0xff]   ;;  %v11037_v39 = vld [vmem:[#allocation12 + $0x88] ss:$16 sps:$4 sm:$0xff]  }
 0x481   : > { %v5213_v17 = vpop.f32.mrf.mxu1  ;;  %v11025_v55 = vld [vmem:[#allocation12 + $0xc8] ss:$16 sps:$4 sm:$0xff]   ;;  %v11036_v21 = vld [vmem:[#allocation12 + $0x84] ss:$16 sps:$4 sm:$0xff]  }
 0x482   : > { %v5173_v56 = vpop.f32.mrf.mxu0  ;;  %v11030_v17 = vld [vmem:[#allocation12 + $0xa4] ss:$16 sps:$4 sm:$0xff]  }
 0x483   : > { %v5214_v15 = vpop.f32.mrf.mxu1  ;;  %5913 = vmatpush2.bf16.msra.mxu0 %v11004_v52  ;;  %v11031_v56 = vld [vmem:[#allocation12 + $0xa8] ss:$16 sps:$4 sm:$0xff]   ;;  %v11045_v52 = vld [vmem:[#allocation12 + $0x6c] ss:$16 sps:$4 sm:$0xff]  }
 0x484   : > { %5914 = vmatprep.subr.bf16.mxu0 %v11012_v41  ;;  %v11034_v15 = vld [vmem:[#allocation12 + $0x80] ss:$16 sps:$4 sm:$0xff]   ;;  %v11043_v41 = vld [vmem:[#allocation12 + $0x68] ss:$16 sps:$4 sm:$0xff]  }
 0x487   : > { %5915 = vmatpush2.bf16.msra.mxu0 %v11010_v16  ;;  %v11051_v16 = vld [vmem:[#allocation12 + $0x4c] ss:$16 sps:$4 sm:$0xff]  }
 0x488   : > { %6286 = vmatprep.subr.bf16.mxu0 %v11018_v14  ;;  %v11049_v14 = vld [vmem:[#allocation12 + $0x48] ss:$16 sps:$4 sm:$0xff]  }
 0x4bc   : > { %v5254_v22 = vpop.f32.mrf.mxu0 }
 0x4bd   : > { %v5302_v10 = vadd.f32 %v5254_v22, %v5216_v40  ;;  %v5295_v34 = vpop.f32.mrf.mxu1  ;;  %v5419_v40 = vrot.slane %v5410_v57, %v13864_v1  ;;  %v11057_v22 = vld [vmem:[#allocation12 + $0x2c] ss:$16 sps:$4 sm:$0xff]   ;;  %v11073_v57 = vld [vmem:[#allocation12 + $0x1c8] ss:$16 sps:$4 sm:$0xff]  }
 0x4be   : > { %v5304_v28 = vadd.f32 %v5295_v34, %v5218_v48  ;;  %v5256_v43 = vpop.f32.mrf.mxu0  ;;  %v11055_v34 = vld [vmem:[#allocation12 + $0x28] ss:$16 sps:$4 sm:$0xff]  }
 0x4bf   : > { %v5297_v37 = vpop.f32.mrf.mxu1  ;;  %v5303_v7 = vadd.f32 %v5256_v43, %v5217_v31  ;;  %v11063_v43 = vld [vmem:[#allocation12 + $0xc] ss:$16 sps:$4 sm:$0xff]  }
 0x4c0   : > { %v5258_v58 = vpop.f32.mrf.mxu0  ;;  %v5305_v46 = vadd.f32 %v5297_v37, %v5219_v19  ;;  %v11058_v37 = vld [vmem:[#allocation12] ss:$16 sps:$4 sm:$0xff]  }
 0x4c1   : > { %v5299_v13 = vpop.f32.mrf.mxu1  ;;  %v11061_v58 = vld [vmem:[#allocation12 + $0x8] ss:$16 sps:$4 sm:$0xff]  }
 0x4c2   : > { %v5259_v51 = vpop.f32.mrf.mxu0  ;;  %v11066_v13 = vld [vmem:[#allocation12 + $0x1e4] ss:$16 sps:$4 sm:$0xff]  }
 0x4c3   : > { %v5300_v4 = vpop.f32.mrf.mxu1  ;;  %v11069_v51 = vld [vmem:[#allocation12 + $0x1ec] ss:$16 sps:$4 sm:$0xff]  }
 0x4c4   : > { %v11064_v4 = vld [vmem:[#allocation12 + $0x1e0] ss:$16 sps:$4 sm:$0xff]  }
 0x4fc   : > { %v5354_v5 = vpop.f32.mrf.mxu0 }
 0x4fd   : > { %v5402_v20 = vadd.f32 %v5354_v5, %v5302_v10  ;;  %v5395_v8 = vpop.f32.mrf.mxu1  ;;  %v11052_v10 = vld [vmem:[#allocation12 + $0x20] ss:$16 sps:$4 sm:$0xff]   ;;  %v11067_v5 = vld [vmem:[#allocation12 + $0x1e8] ss:$16 sps:$4 sm:$0xff]  }
 0x4fe   : > { %v5404_v53 = vadd.f32 %v5395_v8, %v5304_v28  ;;  %v5356_v62 = vpop.f32.mrf.mxu0  ;;  %v11060_v28 = vld [vmem:[#allocation12 + $0x4] ss:$16 sps:$4 sm:$0xff]   ;;  %v11070_v8 = vld [vmem:[#allocation12 + $0x1c0] ss:$16 sps:$4 sm:$0xff]  }
 0x4ff   : > { %v5403_v9 = vadd.f32 %v5356_v62, %v5303_v7  ;;  %v5397_v25 = vpop.f32.mrf.mxu1  ;;  %v11072_v7 = vld [vmem:[#allocation12 + $0x1c4] ss:$16 sps:$4 sm:$0xff]   ;;  %v11076_v62 = vld [vmem:[#allocation12 + $0x1a0] ss:$16 sps:$4 sm:$0xff]  }
 0x500   : > { %v5406_v18 = vmax.f32 %v5402_v20, %v5404_v53  ;;  %v5405_v29 = vadd.f32 %v5397_v25, %v5305_v46  ;;  %v5358_v30 = vpop.f32.mrf.mxu0  ;;  %v11075_v20 = vld [vmem:[#allocation12 + $0x1cc] ss:$16 sps:$4 sm:$0xff]   ;;  %v11078_v46 = vld [vmem:[#allocation12 + $0x1a4] ss:$16 sps:$4 sm:$0xff]  }
 0x501   : > { %v5399_v33 = vpop.f32.mrf.mxu1  ;;  %v11081_v53 = vld [vmem:[#allocation12 + $0x1ac] ss:$16 sps:$4 sm:$0xff]   ;;  %v11084_v25 = vld [vmem:[#allocation12 + $0x184] ss:$16 sps:$4 sm:$0xff]  }
 0x502   : > { %v5408_v35 = vmax.f32 %v4968_v26, %v5406_v18  ;;  %v5407_v38 = vmax.f32 %v5403_v9, %v5405_v29  ;;  %v5359_v42 = vpop.f32.mrf.mxu0  ;;  %v11019_v26 = vld [vmem:[#allocation12 + $0xe8] ss:$16 sps:$4 sm:$0xff]   ;;  %v11087_v18 = vld [vmem:[#allocation12 + $0x18c] ss:$16 sps:$4 sm:$0xff]   ;;  %v11090_v30 = vld [vmem:[#allocation12 + $0x164] ss:$16 sps:$4 sm:$0xff]  }
 0x503   : > { %v5400_v0 = vpop.f32.mrf.mxu1  ;;  %v11079_v9 = vld [vmem:[#allocation12 + $0x1a8] ss:$16 sps:$4 sm:$0xff]   ;;  %v11093_v33 = vld [vmem:[#allocation12 + $0x16c] ss:$16 sps:$4 sm:$0xff]  }
 0x504   : > { %v5422_v45 = vadd.f32 %v5415_v24, %v5408_v35  ;;  %v5409_v48 = vmax.f32 %v4969_v12, %v5407_v38  ;;  %v11022_v12 = vld [vmem:[#allocation12 + $0xc0] ss:$16 sps:$4 sm:$0xff]   ;;  %v11085_v29 = vld [vmem:[#allocation12 + $0x188] ss:$16 sps:$4 sm:$0xff]   ;;  %v11099_v42 = vld [vmem:[#allocation12 + $0x14c] ss:$16 sps:$4 sm:$0xff]  }
 0x505   : > { %v11082_v24 = vld [vmem:[#allocation12 + $0x180] ss:$16 sps:$4 sm:$0xff]   ;;  %v11091_v38 = vld [vmem:[#allocation12 + $0x168] ss:$16 sps:$4 sm:$0xff]  }
 0x506   : > { %v5424_v49 = vmax.f32 %v5422_v45, 0.0  ;;  %v5423_v6 = vadd.f32 %v5419_v40, %v5409_v48  ;;  %v11088_v35 = vld [vmem:[#allocation12 + $0x160] ss:$16 sps:$4 sm:$0xff]   ;;  %v11096_v40 = vld [vmem:[#allocation12 + $0x144] ss:$16 sps:$4 sm:$0xff]  }
 0x507   : > { %v11094_v0 = vld [vmem:[#allocation12 + $0x140] ss:$16 sps:$4 sm:$0xff]   ;;  %v11097_v45 = vld [vmem:[#allocation12 + $0x148] ss:$16 sps:$4 sm:$0xff]   ;;  %v11102_v48 = vld [vmem:[#allocation12 + $0x124] ss:$16 sps:$4 sm:$0xff]  }
 0x508   : > { %v5425_v50 = vmax.f32 %v5423_v6, 0.0  ;;  %v13429_v31 = vpack.c.bf16 %v5424_v49, %v5424_v49  ;;  %v11105_v49 = vld [vmem:[#allocation12 + $0x12c] ss:$16 sps:$4 sm:$0xff]   ;;  %v11100_v6 = vld [vmem:[#allocation12 + $0x120] ss:$16 sps:$4 sm:$0xff]  }
 0x50a   : > { %v13431_v54 = vpack.c.bf16 %v5425_v50, %v5425_v50  ;;  %v13437_v19 = vshrl.u32 %v13429_v31, 16  ;;  %v11103_v50 = vld [vmem:[#allocation12 + $0x128] ss:$16 sps:$4 sm:$0xff]  }
 0x50c   : > { %v13434_v63 = vshrl.u32 %v13431_v54, 16 }
 0x50e   : > { %5916 = vmatprep.mubr.bf16.mxu0 %v13434_v63  ;;  %5957 = vmatprep.mubr.bf16.mxu1 %v13434_v63 }
 0x50f   : > { %5917 = vmatmul.mubr.bf16.vlgmr.msra.gmra.mxu0 %v13437_v19  ;;  %5958 = vmatmul.mubr.bf16.vlgmr.msra.gmra.mxu1 %v13437_v19 }
 0x510   : > { %6287 = vmatpush1.bf16.msra.mxu0 %v11016_v60  ;;  %6328 = vmatpush1.bf16.msra.mxu1 %v11019_v26  ;;  %v11108_v60 = vld [vmem:[#allocation12 + $0x104] ss:$16 sps:$4 sm:$0xff]   ;;  %v11111_v26 = vld [vmem:[#allocation12 + $0x10c] ss:$16 sps:$4 sm:$0xff]  }
 0x511   : > { %6318 = vmatprep.mubr.bf16.mxu0 %v13431_v54  ;;  %6359 = vmatprep.mubr.bf16.mxu1 %v13431_v54 }
 0x512   : > { %6288 = vmatprep.subr.bf16.mxu0 %v11024_v32  ;;  %6329 = vmatprep.subr.bf16.mxu1 %v11027_v11  ;;  %v11106_v32 = vld [vmem:[#allocation12 + $0x100] ss:$16 sps:$4 sm:$0xff]   ;;  %v11109_v11 = vld [vmem:[#allocation12 + $0x108] ss:$16 sps:$4 sm:$0xff]  }
 0x514   : > { %6289 = vmatpush1.bf16.msra.mxu0 %v11022_v12  ;;  %6330 = vmatpush1.bf16.msra.mxu1 %v11025_v55  ;;  %v11114_v12 = vld [vmem:[#allocation12 + $0x4e4] ss:$16 sps:$4 sm:$0xff]   ;;  %v11117_v55 = vld [vmem:[#allocation12 + $0x4ec] ss:$16 sps:$4 sm:$0xff]  }
 0x515   : > { %6290 = vmatprep.subr.bf16.mxu0 %v11030_v17  ;;  %6331 = vmatprep.subr.bf16.mxu1 %v11033_v36  ;;  %v11112_v17 = vld [vmem:[#allocation12 + $0x4e0] ss:$16 sps:$4 sm:$0xff]   ;;  %v11115_v36 = vld [vmem:[#allocation12 + $0x4e8] ss:$16 sps:$4 sm:$0xff]  }
 0x518   : > { %6291 = vmatpush1.bf16.msra.mxu0 %v11028_v59  ;;  %6332 = vmatpush1.bf16.msra.mxu1 %v11031_v56  ;;  %v6435_v59 = vrot.slane %v13431_v54, 1  ;;  %v11120_v56 = vld [vmem:[#allocation12 + $0x4c4] ss:$16 sps:$4 sm:$0xff]  }
 0x519   : > { %6292 = vmatprep.subr.bf16.mxu0 %v11036_v21  ;;  %6333 = vmatprep.subr.bf16.mxu1 %v11039_v2  ;;  %v11123_v21 = vld [vmem:[#allocation12 + $0x4cc] ss:$16 sps:$4 sm:$0xff]   ;;  %v11118_v2 = vld [vmem:[#allocation12 + $0x4c0] ss:$16 sps:$4 sm:$0xff]  }
 0x51c   : > { %6293 = vmatpush1.bf16.msra.mxu0 %v11034_v15  ;;  %6334 = vmatpush1.bf16.msra.mxu1 %v11037_v39  ;;  %v11121_v15 = vld [vmem:[#allocation12 + $0x4c8] ss:$16 sps:$4 sm:$0xff]   ;;  %v11126_v39 = vld [vmem:[#allocation12 + $0x4a4] ss:$16 sps:$4 sm:$0xff]  }
 0x51d   : > { %6294 = vmatprep.subr.bf16.mxu0 %v11042_v3  ;;  %6335 = vmatprep.subr.bf16.mxu1 %v11045_v52  ;;  %v11129_v3 = vld [vmem:[#allocation12 + $0x4ac] ss:$16 sps:$4 sm:$0xff]   ;;  %v11124_v52 = vld [vmem:[#allocation12 + $0x4a0] ss:$16 sps:$4 sm:$0xff]  }
 0x520   : > { %6295 = vmatpush1.bf16.msra.mxu0 %v11040_v61  ;;  %6336 = vmatpush1.bf16.msra.mxu1 %v11043_v41  ;;  %v11127_v61 = vld [vmem:[#allocation12 + $0x4a8] ss:$16 sps:$4 sm:$0xff]   ;;  %v11132_v41 = vld [vmem:[#allocation12 + $0x484] ss:$16 sps:$4 sm:$0xff]  }
 0x521   : > { %6296 = vmatprep.subr.bf16.mxu0 %v11048_v47  ;;  %6337 = vmatprep.subr.bf16.mxu1 %v11051_v16  ;;  %v11135_v47 = vld [vmem:[#allocation12 + $0x48c] ss:$16 sps:$4 sm:$0xff]   ;;  %v11130_v16 = vld [vmem:[#allocation12 + $0x480] ss:$16 sps:$4 sm:$0xff]  }
 0x524   : > { %6297 = vmatpush1.bf16.msra.mxu0 %v11046_v44  ;;  %6338 = vmatpush1.bf16.msra.mxu1 %v11049_v14  ;;  %v11133_v44 = vld [vmem:[#allocation12 + $0x488] ss:$16 sps:$4 sm:$0xff]   ;;  %v11138_v14 = vld [vmem:[#allocation12 + $0x464] ss:$16 sps:$4 sm:$0xff]  }
 0x525   : > { %6298 = vmatprep.subr.bf16.mxu0 %v11054_v27  ;;  %6339 = vmatprep.subr.bf16.mxu1 %v11057_v22  ;;  %v11141_v27 = vld [vmem:[#allocation12 + $0x46c] ss:$16 sps:$4 sm:$0xff]   ;;  %v11136_v22 = vld [vmem:[#allocation12 + $0x460] ss:$16 sps:$4 sm:$0xff]  }
 0x528   : > { %6299 = vmatpush1.bf16.msra.mxu0 %v11052_v10  ;;  %6340 = vmatpush1.bf16.msra.mxu1 %v11055_v34  ;;  %v11139_v10 = vld [vmem:[#allocation12 + $0x468] ss:$16 sps:$4 sm:$0xff]   ;;  %v11144_v34 = vld [vmem:[#allocation12 + $0x444] ss:$16 sps:$4 sm:$0xff]  }
 0x529   : > { %6300 = vmatprep.subr.bf16.mxu0 %v11060_v28  ;;  %6341 = vmatprep.subr.bf16.mxu1 %v11063_v43  ;;  %v11147_v28 = vld [vmem:[#allocation12 + $0x44c] ss:$16 sps:$4 sm:$0xff]   ;;  %v11142_v43 = vld [vmem:[#allocation12 + $0x440] ss:$16 sps:$4 sm:$0xff]  }
 0x52c   : > { %6301 = vmatpush1.bf16.msra.mxu0 %v11058_v37  ;;  %6342 = vmatpush1.bf16.msra.mxu1 %v11061_v58  ;;  %v11145_v37 = vld [vmem:[#allocation12 + $0x448] ss:$16 sps:$4 sm:$0xff]   ;;  %v11150_v58 = vld [vmem:[#allocation12 + $0x424] ss:$16 sps:$4 sm:$0xff]  }
 0x52d   : > { %6302 = vmatprep.subr.bf16.mxu0 %v11066_v13  ;;  %6343 = vmatprep.subr.bf16.mxu1 %v11069_v51  ;;  %v11153_v13 = vld [vmem:[#allocation12 + $0x42c] ss:$16 sps:$4 sm:$0xff]   ;;  %v11148_v51 = vld [vmem:[#allocation12 + $0x420] ss:$16 sps:$4 sm:$0xff]  }
 0x530   : > { %6303 = vmatpush2.bf16.msra.mxu0 %v11064_v4  ;;  %6344 = vmatpush2.bf16.msra.mxu1 %v11067_v5  ;;  %v11151_v4 = vld [vmem:[#allocation12 + $0x428] ss:$16 sps:$4 sm:$0xff]   ;;  %v11156_v5 = vld [vmem:[#allocation12 + $0x404] ss:$16 sps:$4 sm:$0xff]  }
 0x531   : > { %6304 = vmatprep.subr.bf16.mxu0 %v11072_v7  ;;  %6345 = vmatprep.subr.bf16.mxu1 %v11075_v20  ;;  %v11159_v7 = vld [vmem:[#allocation12 + $0x40c] ss:$16 sps:$4 sm:$0xff]   ;;  %v11154_v20 = vld [vmem:[#allocation12 + $0x400] ss:$16 sps:$4 sm:$0xff]  }
 0x534   : > { %6305 = vmatpush2.bf16.msra.mxu0 %v11070_v8  ;;  %6346 = vmatpush2.bf16.msra.mxu1 %v11073_v57  ;;  %v11157_v8 = vld [vmem:[#allocation12 + $0x408] ss:$16 sps:$4 sm:$0xff]   ;;  %v11162_v57 = vld [vmem:[#allocation12 + $0x5e4] ss:$16 sps:$4 sm:$0xff]  }
 0x535   : > { %6306 = vmatprep.subr.bf16.mxu0 %v11078_v46  ;;  %6347 = vmatprep.subr.bf16.mxu1 %v11081_v53  ;;  %v11165_v46 = vld [vmem:[#allocation12 + $0x5ec] ss:$16 sps:$4 sm:$0xff]   ;;  %v11160_v53 = vld [vmem:[#allocation12 + $0x5e0] ss:$16 sps:$4 sm:$0xff]  }
 0x538   : > { %6307 = vmatpush2.bf16.msra.mxu0 %v11076_v62  ;;  %6348 = vmatpush2.bf16.msra.mxu1 %v11079_v9  ;;  %v11163_v62 = vld [vmem:[#allocation12 + $0x5e8] ss:$16 sps:$4 sm:$0xff]   ;;  %v11168_v9 = vld [vmem:[#allocation12 + $0x5c4] ss:$16 sps:$4 sm:$0xff]  }
 0x539   : > { %6308 = vmatprep.subr.bf16.mxu0 %v11084_v25  ;;  %6349 = vmatprep.subr.bf16.mxu1 %v11087_v18  ;;  %v11171_v25 = vld [vmem:[#allocation12 + $0x5cc] ss:$16 sps:$4 sm:$0xff]   ;;  %v11166_v18 = vld [vmem:[#allocation12 + $0x5c0] ss:$16 sps:$4 sm:$0xff]  }
 0x53c   : > { %6309 = vmatpush2.bf16.msra.mxu0 %v11082_v24  ;;  %6350 = vmatpush2.bf16.msra.mxu1 %v11085_v29  ;;  %v11169_v24 = vld [vmem:[#allocation12 + $0x5c8] ss:$16 sps:$4 sm:$0xff]   ;;  %v11174_v29 = vld [vmem:[#allocation12 + $0x5a4] ss:$16 sps:$4 sm:$0xff]  }
 0x53d   : > { %6310 = vmatprep.subr.bf16.mxu0 %v11090_v30  ;;  %6351 = vmatprep.subr.bf16.mxu1 %v11093_v33  ;;  %v11177_v30 = vld [vmem:[#allocation12 + $0x5ac] ss:$16 sps:$4 sm:$0xff]   ;;  %v11172_v33 = vld [vmem:[#allocation12 + $0x5a0] ss:$16 sps:$4 sm:$0xff]  }
 0x540   : > { %6311 = vmatpush2.bf16.msra.mxu0 %v11088_v35  ;;  %6352 = vmatpush2.bf16.msra.mxu1 %v11091_v38  ;;  %v11175_v35 = vld [vmem:[#allocation12 + $0x5a8] ss:$16 sps:$4 sm:$0xff]   ;;  %v11180_v38 = vld [vmem:[#allocation12 + $0x584] ss:$16 sps:$4 sm:$0xff]  }
 0x541   : > { %6312 = vmatprep.subr.bf16.mxu0 %v11096_v40  ;;  %6353 = vmatprep.subr.bf16.mxu1 %v11099_v42  ;;  %v11183_v40 = vld [vmem:[#allocation12 + $0x58c] ss:$16 sps:$4 sm:$0xff]   ;;  %v11178_v42 = vld [vmem:[#allocation12 + $0x580] ss:$16 sps:$4 sm:$0xff]  }
 0x544   : > { %6313 = vmatpush2.bf16.msra.mxu0 %v11094_v0  ;;  %6354 = vmatpush2.bf16.msra.mxu1 %v11097_v45  ;;  %v11181_v0 = vld [vmem:[#allocation12 + $0x588] ss:$16 sps:$4 sm:$0xff]   ;;  %v11186_v45 = vld [vmem:[#allocation12 + $0x564] ss:$16 sps:$4 sm:$0xff]  }
 0x545   : > { %6314 = vmatprep.subr.bf16.mxu0 %v11102_v48  ;;  %6355 = vmatprep.subr.bf16.mxu1 %v11105_v49  ;;  %v11189_v48 = vld [vmem:[#allocation12 + $0x56c] ss:$16 sps:$4 sm:$0xff]   ;;  %v11184_v49 = vld [vmem:[#allocation12 + $0x560] ss:$16 sps:$4 sm:$0xff]  }
 0x548   : > { %6315 = vmatpush2.bf16.msra.mxu0 %v11100_v6  ;;  %6356 = vmatpush2.bf16.msra.mxu1 %v11103_v50  ;;  %v11187_v6 = vld [vmem:[#allocation12 + $0x568] ss:$16 sps:$4 sm:$0xff]   ;;  %v11192_v50 = vld [vmem:[#allocation12 + $0x544] ss:$16 sps:$4 sm:$0xff]  }
 0x549   : > { %6316 = vmatprep.subr.bf16.mxu0 %v11108_v60  ;;  %6357 = vmatprep.subr.bf16.mxu1 %v11111_v26  ;;  %v11195_v60 = vld [vmem:[#allocation12 + $0x54c] ss:$16 sps:$4 sm:$0xff]   ;;  %v11190_v26 = vld [vmem:[#allocation12 + $0x540] ss:$16 sps:$4 sm:$0xff]  }
 0x54c   : > { %6317 = vmatpush2.bf16.msra.mxu0 %v11106_v32  ;;  %6358 = vmatpush2.bf16.msra.mxu1 %v11109_v11  ;;  %v11193_v32 = vld [vmem:[#allocation12 + $0x548] ss:$16 sps:$4 sm:$0xff]   ;;  %v11198_v11 = vld [vmem:[#allocation12 + $0x524] ss:$16 sps:$4 sm:$0xff]  }
 0x54d   : > { %6758 = vmatprep.subr.bf16.mxu0 %v11114_v12  ;;  %6799 = vmatprep.subr.bf16.mxu1 %v11117_v55  ;;  %v11201_v12 = vld [vmem:[#allocation12 + $0x52c] ss:$16 sps:$4 sm:$0xff]   ;;  %v11196_v55 = vld [vmem:[#allocation12 + $0x520] ss:$16 sps:$4 sm:$0xff]  }
 0x54f   : > { %6319 = vmatmul.mubr.bf16.vlgmr.msra.gmra.mxu0 %v13429_v31  ;;  %6360 = vmatmul.mubr.bf16.vlgmr.msra.gmra.mxu1 %v13429_v31 }
 0x550   : > { %6759 = vmatpush1.bf16.msra.mxu0 %v11112_v17  ;;  %6790 = vmatprep.mubr.bf16.mxu0 %v6435_v59  ;;  %v11199_v17 = vld [vmem:[#allocation12 + $0x528] ss:$16 sps:$4 sm:$0xff]  }
 0x551   : > { %6800 = vmatpush1.bf16.msra.mxu1 %v11115_v36  ;;  %6831 = vmatprep.mubr.bf16.mxu1 %v6435_v59  ;;  %v11204_v36 = vld [vmem:[#allocation12 + $0x504] ss:$16 sps:$4 sm:$0xff]   ;;  %v11207_v59 = vld [vmem:[#allocation12 + $0x50c] ss:$16 sps:$4 sm:$0xff]  }
 0x552   : > { %6760 = vmatprep.subr.bf16.mxu0 %v11120_v56  ;;  %6801 = vmatprep.subr.bf16.mxu1 %v11123_v21  ;;  %v11202_v56 = vld [vmem:[#allocation12 + $0x500] ss:$16 sps:$4 sm:$0xff]   ;;  %v11205_v21 = vld [vmem:[#allocation12 + $0x508] ss:$16 sps:$4 sm:$0xff]  }
 0x554   : > { %6761 = vmatpush1.bf16.msra.mxu0 %v11118_v2  ;;  %v11210_v2 = vld [vmem:[#allocation12 + $0x6e4] ss:$16 sps:$4 sm:$0xff]  }
 0x555   : > { %6802 = vmatpush1.bf16.msra.mxu1 %v11121_v15  ;;  %6762 = vmatprep.subr.bf16.mxu0 %v11126_v39  ;;  %v11213_v15 = vld [vmem:[#allocation12 + $0x6ec] ss:$16 sps:$4 sm:$0xff]   ;;  %v11208_v39 = vld [vmem:[#allocation12 + $0x6e0] ss:$16 sps:$4 sm:$0xff]  }
 0x556   : > { %6803 = vmatprep.subr.bf16.mxu1 %v11129_v3  ;;  %v6434_v3 = vrot.slane %v13429_v31, 1 }
 0x558   : > { %6763 = vmatpush1.bf16.msra.mxu0 %v11124_v52  ;;  %v11211_v52 = vld [vmem:[#allocation12 + $0x6e8] ss:$16 sps:$4 sm:$0xff]  }
 0x559   : > { %6804 = vmatpush1.bf16.msra.mxu1 %v11127_v61  ;;  %6764 = vmatprep.subr.bf16.mxu0 %v11132_v41  ;;  %v11216_v61 = vld [vmem:[#allocation12 + $0x6c4] ss:$16 sps:$4 sm:$0xff]   ;;  %v6909_v41 = vrot.slane %v13434_v63, 1 }
 0x55a   : > { %6805 = vmatprep.subr.bf16.mxu1 %v11135_v47  ;;  %v11219_v47 = vld [vmem:[#allocation12 + $0x6cc] ss:$16 sps:$4 sm:$0xff]  }
 0x55c   : > { %6765 = vmatpush1.bf16.msra.mxu0 %v11130_v16  ;;  %v11214_v16 = vld [vmem:[#allocation12 + $0x6c0] ss:$16 sps:$4 sm:$0xff]  }
 0x55d   : > { %6806 = vmatpush1.bf16.msra.mxu1 %v11133_v44  ;;  %6766 = vmatprep.subr.bf16.mxu0 %v11138_v14  ;;  %v11217_v44 = vld [vmem:[#allocation12 + $0x6c8] ss:$16 sps:$4 sm:$0xff]   ;;  %v11222_v14 = vld [vmem:[#allocation12 + $0x6a4] ss:$16 sps:$4 sm:$0xff]  }
 0x55e   : > { %6807 = vmatprep.subr.bf16.mxu1 %v11141_v27  ;;  %v11225_v27 = vld [vmem:[#allocation12 + $0x6ac] ss:$16 sps:$4 sm:$0xff]  }
 0x560   : > { %6767 = vmatpush1.bf16.msra.mxu0 %v11136_v22  ;;  %v11220_v22 = vld [vmem:[#allocation12 + $0x6a0] ss:$16 sps:$4 sm:$0xff]  }
 0x561   : > { %6808 = vmatpush1.bf16.msra.mxu1 %v11139_v10  ;;  %6768 = vmatprep.subr.bf16.mxu0 %v11144_v34  ;;  %v11223_v10 = vld [vmem:[#allocation12 + $0x6a8] ss:$16 sps:$4 sm:$0xff]   ;;  %v11228_v34 = vld [vmem:[#allocation12 + $0x684] ss:$16 sps:$4 sm:$0xff]  }
 0x562   : > { %6809 = vmatprep.subr.bf16.mxu1 %v11147_v28  ;;  %v11231_v28 = vld [vmem:[#allocation12 + $0x68c] ss:$16 sps:$4 sm:$0xff]  }
 0x564   : > { %6769 = vmatpush1.bf16.msra.mxu0 %v11142_v43  ;;  %v11226_v43 = vld [vmem:[#allocation12 + $0x680] ss:$16 sps:$4 sm:$0xff]  }
 0x565   : > { %6810 = vmatpush1.bf16.msra.mxu1 %v11145_v37  ;;  %6770 = vmatprep.subr.bf16.mxu0 %v11150_v58  ;;  %v11229_v37 = vld [vmem:[#allocation12 + $0x688] ss:$16 sps:$4 sm:$0xff]   ;;  %v11234_v58 = vld [vmem:[#allocation12 + $0x664] ss:$16 sps:$4 sm:$0xff]  }
 0x566   : > { %6811 = vmatprep.subr.bf16.mxu1 %v11153_v13  ;;  %v11237_v13 = vld [vmem:[#allocation12 + $0x66c] ss:$16 sps:$4 sm:$0xff]  }
 0x568   : > { %6771 = vmatpush1.bf16.msra.mxu0 %v11148_v51  ;;  %v11232_v51 = vld [vmem:[#allocation12 + $0x660] ss:$16 sps:$4 sm:$0xff]  }
 0x569   : > { %6812 = vmatpush1.bf16.msra.mxu1 %v11151_v4  ;;  %6772 = vmatprep.subr.bf16.mxu0 %v11156_v5  ;;  %v11235_v4 = vld [vmem:[#allocation12 + $0x668] ss:$16 sps:$4 sm:$0xff]   ;;  %v11240_v5 = vld [vmem:[#allocation12 + $0x644] ss:$16 sps:$4 sm:$0xff]  }
 0x56a   : > { %6813 = vmatprep.subr.bf16.mxu1 %v11159_v7  ;;  %v11243_v7 = vld [vmem:[#allocation12 + $0x64c] ss:$16 sps:$4 sm:$0xff]  }
 0x56c   : > { %6773 = vmatpush1.bf16.msra.mxu0 %v11154_v20  ;;  %v11238_v20 = vld [vmem:[#allocation12 + $0x640] ss:$16 sps:$4 sm:$0xff]  }
 0x56d   : > { %6814 = vmatpush1.bf16.msra.mxu1 %v11157_v8  ;;  %6774 = vmatprep.subr.bf16.mxu0 %v11162_v57  ;;  %v11241_v8 = vld [vmem:[#allocation12 + $0x648] ss:$16 sps:$4 sm:$0xff]   ;;  %v11246_v57 = vld [vmem:[#allocation12 + $0x624] ss:$16 sps:$4 sm:$0xff]  }
 0x56e   : > { %6815 = vmatprep.subr.bf16.mxu1 %v11165_v46  ;;  %v11249_v46 = vld [vmem:[#allocation12 + $0x62c] ss:$16 sps:$4 sm:$0xff]  }
 0x570   : > { %6775 = vmatpush2.bf16.msra.mxu0 %v11160_v53  ;;  %v11244_v53 = vld [vmem:[#allocation12 + $0x620] ss:$16 sps:$4 sm:$0xff]  }
 0x571   : > { %6816 = vmatpush2.bf16.msra.mxu1 %v11163_v62  ;;  %6776 = vmatprep.subr.bf16.mxu0 %v11168_v9  ;;  %v11247_v62 = vld [vmem:[#allocation12 + $0x628] ss:$16 sps:$4 sm:$0xff]   ;;  %v11252_v9 = vld [vmem:[#allocation12 + $0x604] ss:$16 sps:$4 sm:$0xff]  }
 0x572   : > { %6817 = vmatprep.subr.bf16.mxu1 %v11171_v25  ;;  %v11255_v25 = vld [vmem:[#allocation12 + $0x60c] ss:$16 sps:$4 sm:$0xff]  }
 0x574   : > { %6777 = vmatpush2.bf16.msra.mxu0 %v11166_v18  ;;  %v11250_v18 = vld [vmem:[#allocation12 + $0x600] ss:$16 sps:$4 sm:$0xff]  }
 0x575   : > { %6818 = vmatpush2.bf16.msra.mxu1 %v11169_v24  ;;  %6778 = vmatprep.subr.bf16.mxu0 %v11174_v29  ;;  %v11253_v24 = vld [vmem:[#allocation12 + $0x608] ss:$16 sps:$4 sm:$0xff]   ;;  %v11258_v29 = vld [vmem:[#allocation12 + $0x7e4] ss:$16 sps:$4 sm:$0xff]  }
 0x576   : > { %6819 = vmatprep.subr.bf16.mxu1 %v11177_v30  ;;  %v11261_v30 = vld [vmem:[#allocation12 + $0x7ec] ss:$16 sps:$4 sm:$0xff]  }
 0x578   : > { %6779 = vmatpush2.bf16.msra.mxu0 %v11172_v33  ;;  %v11256_v33 = vld [vmem:[#allocation12 + $0x7e0] ss:$16 sps:$4 sm:$0xff]  }
 0x579   : > { %6820 = vmatpush2.bf16.msra.mxu1 %v11175_v35  ;;  %6780 = vmatprep.subr.bf16.mxu0 %v11180_v38  ;;  %v11259_v35 = vld [vmem:[#allocation12 + $0x7e8] ss:$16 sps:$4 sm:$0xff]   ;;  %v11264_v38 = vld [vmem:[#allocation12 + $0x7c4] ss:$16 sps:$4 sm:$0xff]  }
 0x57a   : > { %6821 = vmatprep.subr.bf16.mxu1 %v11183_v40  ;;  %v11267_v40 = vld [vmem:[#allocation12 + $0x7cc] ss:$16 sps:$4 sm:$0xff]  }
 0x57c   : > { %6781 = vmatpush2.bf16.msra.mxu0 %v11178_v42  ;;  %v11262_v42 = vld [vmem:[#allocation12 + $0x7c0] ss:$16 sps:$4 sm:$0xff]  }
 0x57d   : > { %6822 = vmatpush2.bf16.msra.mxu1 %v11181_v0  ;;  %6782 = vmatprep.subr.bf16.mxu0 %v11186_v45  ;;  %v11265_v0 = vld [vmem:[#allocation12 + $0x7c8] ss:$16 sps:$4 sm:$0xff]   ;;  %v11270_v45 = vld [vmem:[#allocation12 + $0x7a4] ss:$16 sps:$4 sm:$0xff]  }
 0x57e   : > { %6823 = vmatprep.subr.bf16.mxu1 %v11189_v48  ;;  %v11273_v48 = vld [vmem:[#allocation12 + $0x7ac] ss:$16 sps:$4 sm:$0xff]  }
 0x580   : > { %6783 = vmatpush2.bf16.msra.mxu0 %v11184_v49  ;;  %v11268_v49 = vld [vmem:[#allocation12 + $0x7a0] ss:$16 sps:$4 sm:$0xff]  }
 0x581   : > { %6824 = vmatpush2.bf16.msra.mxu1 %v11187_v6  ;;  %6784 = vmatprep.subr.bf16.mxu0 %v11192_v50  ;;  %v11271_v6 = vld [vmem:[#allocation12 + $0x7a8] ss:$16 sps:$4 sm:$0xff]   ;;  %v11276_v50 = vld [vmem:[#allocation12 + $0x784] ss:$16 sps:$4 sm:$0xff]  }
 0x582   : > { %6825 = vmatprep.subr.bf16.mxu1 %v11195_v60  ;;  %v11279_v60 = vld [vmem:[#allocation12 + $0x78c] ss:$16 sps:$4 sm:$0xff]  }
 0x584   : > { %6785 = vmatpush2.bf16.msra.mxu0 %v11190_v26  ;;  %v11274_v26 = vld [vmem:[#allocation12 + $0x780] ss:$16 sps:$4 sm:$0xff]  }
 0x585   : > { %6826 = vmatpush2.bf16.msra.mxu1 %v11193_v32  ;;  %6786 = vmatprep.subr.bf16.mxu0 %v11198_v11  ;;  %v11277_v32 = vld [vmem:[#allocation12 + $0x788] ss:$16 sps:$4 sm:$0xff]   ;;  %v11282_v11 = vld [vmem:[#allocation12 + $0x764] ss:$16 sps:$4 sm:$0xff]  }
 0x586   : > { %6827 = vmatprep.subr.bf16.mxu1 %v11201_v12  ;;  %v11285_v12 = vld [vmem:[#allocation12 + $0x76c] ss:$16 sps:$4 sm:$0xff]  }
 0x588   : > { %6787 = vmatpush2.bf16.msra.mxu0 %v11196_v55  ;;  %v11280_v55 = vld [vmem:[#allocation12 + $0x760] ss:$16 sps:$4 sm:$0xff]  }
 0x589   : > { %6828 = vmatpush2.bf16.msra.mxu1 %v11199_v17  ;;  %6788 = vmatprep.subr.bf16.mxu0 %v11204_v36  ;;  %v11283_v17 = vld [vmem:[#allocation12 + $0x768] ss:$16 sps:$4 sm:$0xff]   ;;  %v11288_v36 = vld [vmem:[#allocation12 + $0x744] ss:$16 sps:$4 sm:$0xff]  }
 0x58a   : > { %6829 = vmatprep.subr.bf16.mxu1 %v11207_v59  ;;  %v11291_v59 = vld [vmem:[#allocation12 + $0x74c] ss:$16 sps:$4 sm:$0xff]  }
 0x58c   : > { %6789 = vmatpush2.bf16.msra.mxu0 %v11202_v56  ;;  %v11286_v56 = vld [vmem:[#allocation12 + $0x740] ss:$16 sps:$4 sm:$0xff]  }
 0x58d   : > { %6830 = vmatpush2.bf16.msra.mxu1 %v11205_v21  ;;  %7232 = vmatprep.subr.bf16.mxu0 %v11210_v2  ;;  %v11289_v21 = vld [vmem:[#allocation12 + $0x748] ss:$16 sps:$4 sm:$0xff]   ;;  %v11294_v2 = vld [vmem:[#allocation12 + $0x724] ss:$16 sps:$4 sm:$0xff]  }
 0x58e   : > { %7273 = vmatprep.subr.bf16.mxu1 %v11213_v15  ;;  %v11297_v15 = vld [vmem:[#allocation12 + $0x72c] ss:$16 sps:$4 sm:$0xff]  }
 0x58f   : > { %6791 = vmatmul.mubr.bf16.vlgmr.msra.gmra.mxu0 %v6434_v3 }
 0x590   : > { %6832 = vmatmul.mubr.bf16.vlgmr.msra.gmra.mxu1 %v6434_v3  ;;  %7233 = vmatpush1.bf16.msra.mxu0 %v11208_v39  ;;  %v11292_v39 = vld [vmem:[#allocation12 + $0x720] ss:$16 sps:$4 sm:$0xff]   ;;  %v11295_v3 = vld [vmem:[#allocation12 + $0x728] ss:$16 sps:$4 sm:$0xff]  }
 0x591   : > { %7264 = vmatprep.mubr.bf16.mxu0 %v6909_v41  ;;  %7274 = vmatpush1.bf16.msra.mxu1 %v11211_v52  ;;  %v11300_v52 = vld [vmem:[#allocation12 + $0x704] ss:$16 sps:$4 sm:$0xff]  }
 0x592   : > { %7305 = vmatprep.mubr.bf16.mxu1 %v6909_v41  ;;  %7234 = vmatprep.subr.bf16.mxu0 %v11216_v61  ;;  %v11303_v61 = vld [vmem:[#allocation12 + $0x70c] ss:$16 sps:$4 sm:$0xff]   ;;  %v11298_v41 = vld [vmem:[#allocation12 + $0x700] ss:$16 sps:$4 sm:$0xff]  }
 0x593   : > { %7275 = vmatprep.subr.bf16.mxu1 %v11219_v47  ;;  %v11301_v47 = vld [vmem:[#allocation12 + $0x708] ss:$16 sps:$4 sm:$0xff]  }
 0x594   : > { %7235 = vmatpush1.bf16.msra.mxu0 %v11214_v16  ;;  %v11306_v16 = vld [vmem:[#allocation12 + $0x8e4] ss:$16 sps:$4 sm:$0xff]  }
 0x595   : > { %7276 = vmatpush1.bf16.msra.mxu1 %v11217_v44  ;;  %7236 = vmatprep.subr.bf16.mxu0 %v11222_v14  ;;  %v11309_v44 = vld [vmem:[#allocation12 + $0x8ec] ss:$16 sps:$4 sm:$0xff]   ;;  %v11304_v14 = vld [vmem:[#allocation12 + $0x8e0] ss:$16 sps:$4 sm:$0xff]  }
 0x596   : > { %7277 = vmatprep.subr.bf16.mxu1 %v11225_v27  ;;  %v6908_v27 = vrot.slane %v13437_v19, 1 }
 0x598   : > { %7237 = vmatpush1.bf16.msra.mxu0 %v11220_v22  ;;  %v11307_v22 = vld [vmem:[#allocation12 + $0x8e8] ss:$16 sps:$4 sm:$0xff]  }
 0x599   : > { %7278 = vmatpush1.bf16.msra.mxu1 %v11223_v10  ;;  %7238 = vmatprep.subr.bf16.mxu0 %v11228_v34  ;;  %v11312_v10 = vld [vmem:[#allocation12 + $0x8c4] ss:$16 sps:$4 sm:$0xff]  }
 0x59a   : > { %7279 = vmatprep.subr.bf16.mxu1 %v11231_v28 }
 0x59c   : > { %7239 = vmatpush1.bf16.msra.mxu0 %v11226_v43  ;;  %v7383_v43 = vrot.slane %v13431_v54, 2 }
 0x59d   : > { %7280 = vmatpush1.bf16.msra.mxu1 %v11229_v37  ;;  %7240 = vmatprep.subr.bf16.mxu0 %v11234_v58  ;;  %v11315_v37 = vld [vmem:[#allocation12 + $0x8cc] ss:$16 sps:$4 sm:$0xff]   ;;  %v11310_v58 = vld [vmem:[#allocation12 + $0x8c0] ss:$16 sps:$4 sm:$0xff]  }
 0x59e   : > { %7281 = vmatprep.subr.bf16.mxu1 %v11237_v13 }
 0x5a0   : > { %7241 = vmatpush1.bf16.msra.mxu0 %v11232_v51 }
 0x5a1   : > { %7282 = vmatpush1.bf16.msra.mxu1 %v11235_v4  ;;  %7242 = vmatprep.subr.bf16.mxu0 %v11240_v5  ;;  %v11313_v4 = vld [vmem:[#allocation12 + $0x8c8] ss:$16 sps:$4 sm:$0xff]   ;;  %v11318_v5 = vld [vmem:[#allocation12 + $0x8a4] ss:$16 sps:$4 sm:$0xff]  }
 0x5a2   : > { %7283 = vmatprep.subr.bf16.mxu1 %v11243_v7  ;;  %v11321_v7 = vld [vmem:[#allocation12 + $0x8ac] ss:$16 sps:$4 sm:$0xff]  }
 0x5a4   : > { %7243 = vmatpush1.bf16.msra.mxu0 %v11238_v20 }
 0x5a5   : > { %7284 = vmatpush1.bf16.msra.mxu1 %v11241_v8  ;;  %7244 = vmatprep.subr.bf16.mxu0 %v11246_v57  ;;  %v11316_v57 = vld [vmem:[#allocation12 + $0x8a0] ss:$16 sps:$4 sm:$0xff]  }
 0x5a6   : > { %7285 = vmatprep.subr.bf16.mxu1 %v11249_v46 }
 0x5a8   : > { %7245 = vmatpush1.bf16.msra.mxu0 %v11244_v53 }
 0x5a9   : > { %7286 = vmatpush1.bf16.msra.mxu1 %v11247_v62  ;;  %7246 = vmatprep.subr.bf16.mxu0 %v11252_v9  ;;  %v11319_v62 = vld [vmem:[#allocation12 + $0x8a8] ss:$16 sps:$4 sm:$0xff]   ;;  %v11324_v9 = vld [vmem:[#allocation12 + $0x884] ss:$16 sps:$4 sm:$0xff]  }
 0x5aa   : > { %7287 = vmatprep.subr.bf16.mxu1 %v11255_v25  ;;  %v11327_v25 = vld [vmem:[#allocation12 + $0x88c] ss:$16 sps:$4 sm:$0xff]  }
 0x5ac   : > { %7247 = vmatpush1.bf16.msra.mxu0 %v11250_v18  ;;  %v11322_v18 = vld [vmem:[#allocation12 + $0x880] ss:$16 sps:$4 sm:$0xff]  }
 0x5ad   : > { %7288 = vmatpush1.bf16.msra.mxu1 %v11253_v24  ;;  %7248 = vmatprep.subr.bf16.mxu0 %v11258_v29  ;;  %v11325_v24 = vld [vmem:[#allocation12 + $0x888] ss:$16 sps:$4 sm:$0xff]   ;;  %v11330_v29 = vld [vmem:[#allocation12 + $0x864] ss:$16 sps:$4 sm:$0xff]  }
 0x5ae   : > { %7289 = vmatprep.subr.bf16.mxu1 %v11261_v30  ;;  %v11333_v30 = vld [vmem:[#allocation12 + $0x86c] ss:$16 sps:$4 sm:$0xff]  }
 0x5b0   : > { %7249 = vmatpush2.bf16.msra.mxu0 %v11256_v33  ;;  %v11328_v33 = vld [vmem:[#allocation12 + $0x860] ss:$16 sps:$4 sm:$0xff]  }
 0x5b1   : > { %7290 = vmatpush2.bf16.msra.mxu1 %v11259_v35  ;;  %7250 = vmatprep.subr.bf16.mxu0 %v11264_v38  ;;  %v11331_v35 = vld [vmem:[#allocation12 + $0x868] ss:$16 sps:$4 sm:$0xff]   ;;  %v11336_v38 = vld [vmem:[#allocation12 + $0x844] ss:$16 sps:$4 sm:$0xff]  }
 0x5b2   : > { %7291 = vmatprep.subr.bf16.mxu1 %v11267_v40  ;;  %v11339_v40 = vld [vmem:[#allocation12 + $0x84c] ss:$16 sps:$4 sm:$0xff]  }
 0x5b4   : > { %7251 = vmatpush2.bf16.msra.mxu0 %v11262_v42  ;;  %v11334_v42 = vld [vmem:[#allocation12 + $0x840] ss:$16 sps:$4 sm:$0xff]  }
 0x5b5   : > { %7292 = vmatpush2.bf16.msra.mxu1 %v11265_v0  ;;  %7252 = vmatprep.subr.bf16.mxu0 %v11270_v45  ;;  %v11337_v0 = vld [vmem:[#allocation12 + $0x848] ss:$16 sps:$4 sm:$0xff]   ;;  %v11342_v45 = vld [vmem:[#allocation12 + $0x824] ss:$16 sps:$4 sm:$0xff]  }
 0x5b6   : > { %7293 = vmatprep.subr.bf16.mxu1 %v11273_v48  ;;  %v11345_v48 = vld [vmem:[#allocation12 + $0x82c] ss:$16 sps:$4 sm:$0xff]  }
 0x5b8   : > { %7253 = vmatpush2.bf16.msra.mxu0 %v11268_v49  ;;  %v11340_v49 = vld [vmem:[#allocation12 + $0x820] ss:$16 sps:$4 sm:$0xff]  }
 0x5b9   : > { %7294 = vmatpush2.bf16.msra.mxu1 %v11271_v6  ;;  %7254 = vmatprep.subr.bf16.mxu0 %v11276_v50  ;;  %v11343_v6 = vld [vmem:[#allocation12 + $0x828] ss:$16 sps:$4 sm:$0xff]   ;;  %v11348_v50 = vld [vmem:[#allocation12 + $0x804] ss:$16 sps:$4 sm:$0xff]  }
 0x5ba   : > { %7295 = vmatprep.subr.bf16.mxu1 %v11279_v60  ;;  %v11351_v60 = vld [vmem:[#allocation12 + $0x80c] ss:$16 sps:$4 sm:$0xff]  }
 0x5bc   : > { %7255 = vmatpush2.bf16.msra.mxu0 %v11274_v26  ;;  %v11346_v26 = vld [vmem:[#allocation12 + $0x800] ss:$16 sps:$4 sm:$0xff]  }
 0x5bd   : > { %7296 = vmatpush2.bf16.msra.mxu1 %v11277_v32  ;;  %7256 = vmatprep.subr.bf16.mxu0 %v11282_v11  ;;  %v11349_v32 = vld [vmem:[#allocation12 + $0x808] ss:$16 sps:$4 sm:$0xff]   ;;  %v11354_v11 = vld [vmem:[#allocation12 + $0x9e4] ss:$16 sps:$4 sm:$0xff]  }
 0x5be   : > { %7297 = vmatprep.subr.bf16.mxu1 %v11285_v12  ;;  %v11357_v12 = vld [vmem:[#allocation12 + $0x9ec] ss:$16 sps:$4 sm:$0xff]  }
 0x5c0   : > { %7257 = vmatpush2.bf16.msra.mxu0 %v11280_v55  ;;  %v11352_v55 = vld [vmem:[#allocation12 + $0x9e0] ss:$16 sps:$4 sm:$0xff]  }
 0x5c1   : > { %7298 = vmatpush2.bf16.msra.mxu1 %v11283_v17  ;;  %7258 = vmatprep.subr.bf16.mxu0 %v11288_v36  ;;  %v11355_v17 = vld [vmem:[#allocation12 + $0x9e8] ss:$16 sps:$4 sm:$0xff]   ;;  %v11360_v36 = vld [vmem:[#allocation12 + $0x9c4] ss:$16 sps:$4 sm:$0xff]  }
 0x5c2   : > { %7299 = vmatprep.subr.bf16.mxu1 %v11291_v59  ;;  %v11363_v59 = vld [vmem:[#allocation12 + $0x9cc] ss:$16 sps:$4 sm:$0xff]  }
 0x5c4   : > { %7259 = vmatpush2.bf16.msra.mxu0 %v11286_v56  ;;  %v11358_v56 = vld [vmem:[#allocation12 + $0x9c0] ss:$16 sps:$4 sm:$0xff]  }
 0x5c5   : > { %7300 = vmatpush2.bf16.msra.mxu1 %v11289_v21  ;;  %7260 = vmatprep.subr.bf16.mxu0 %v11294_v2  ;;  %v11361_v21 = vld [vmem:[#allocation12 + $0x9c8] ss:$16 sps:$4 sm:$0xff]   ;;  %v11366_v2 = vld [vmem:[#allocation12 + $0x9a4] ss:$16 sps:$4 sm:$0xff]  }
 0x5c6   : > { %7301 = vmatprep.subr.bf16.mxu1 %v11297_v15  ;;  %v11369_v15 = vld [vmem:[#allocation12 + $0x9ac] ss:$16 sps:$4 sm:$0xff]  }
 0x5c8   : > { %7261 = vmatpush2.bf16.msra.mxu0 %v11292_v39  ;;  %v11364_v39 = vld [vmem:[#allocation12 + $0x9a0] ss:$16 sps:$4 sm:$0xff]  }
 0x5c9   : > { %7302 = vmatpush2.bf16.msra.mxu1 %v11295_v3  ;;  %7262 = vmatprep.subr.bf16.mxu0 %v11300_v52  ;;  %v11367_v3 = vld [vmem:[#allocation12 + $0x9a8] ss:$16 sps:$4 sm:$0xff]   ;;  %v11372_v52 = vld [vmem:[#allocation12 + $0x984] ss:$16 sps:$4 sm:$0xff]  }
 0x5ca   : > { %7303 = vmatprep.subr.bf16.mxu1 %v11303_v61  ;;  %v11375_v61 = vld [vmem:[#allocation12 + $0x98c] ss:$16 sps:$4 sm:$0xff]  }
 0x5cc   : > { %7263 = vmatpush2.bf16.msra.mxu0 %v11298_v41  ;;  %v11370_v41 = vld [vmem:[#allocation12 + $0x980] ss:$16 sps:$4 sm:$0xff]  }
 0x5cd   : > { %7304 = vmatpush2.bf16.msra.mxu1 %v11301_v47  ;;  %7706 = vmatprep.subr.bf16.mxu0 %v11306_v16  ;;  %v11373_v47 = vld [vmem:[#allocation12 + $0x988] ss:$16 sps:$4 sm:$0xff]   ;;  %v11378_v16 = vld [vmem:[#allocation12 + $0x964] ss:$16 sps:$4 sm:$0xff]  }
 0x5ce   : > { %7747 = vmatprep.subr.bf16.mxu1 %v11309_v44  ;;  %v11381_v44 = vld [vmem:[#allocation12 + $0x96c] ss:$16 sps:$4 sm:$0xff]  }
 0x5cf   : > { %7265 = vmatmul.mubr.bf16.vlgmr.msra.gmra.mxu0 %v6908_v27  ;;  %v13451_v34 = vpop.f32.mrf.mxu0  ;;  %v13453_v28 = vpop.f32.mrf.mxu1 }
 0x5d0   : > { %7306 = vmatmul.mubr.bf16.vlgmr.msra.gmra.mxu1 %v6908_v27  ;;  %7707 = vmatpush1.bf16.msra.mxu0 %v11304_v14  ;;  %v11376_v14 = vld [vmem:[#allocation12 + $0x960] ss:$16 sps:$4 sm:$0xff]   ;;  %v11379_v27 = vld [vmem:[#allocation12 + $0x968] ss:$16 sps:$4 sm:$0xff]  }
 0x5d1   : > { %7738 = vmatprep.mubr.bf16.mxu0 %v7383_v43  ;;  %7748 = vmatpush1.bf16.msra.mxu1 %v11307_v22  ;;  %v13456_v13 = vpop.f32.mrf.mxu0  ;;  %v13458_v51 = vpop.f32.mrf.mxu1  ;;  %v11384_v22 = vld [vmem:[#allocation12 + $0x944] ss:$16 sps:$4 sm:$0xff]  }
 0x5d2   : > { %7779 = vmatprep.mubr.bf16.mxu1 %v7383_v43  ;;  %7708 = vmatprep.subr.bf16.mxu0 %v11312_v10  ;;  %v11387_v10 = vld [vmem:[#allocation12 + $0x94c] ss:$16 sps:$4 sm:$0xff]   ;;  %v11382_v43 = vld [vmem:[#allocation12 + $0x940] ss:$16 sps:$4 sm:$0xff]  }
 0x5d3   : > { %7749 = vmatprep.subr.bf16.mxu1 %v11315_v37  ;;  %v5922_v20 = vpop.f32.mrf.mxu0  ;;  %v5963_v8 = vpop.f32.mrf.mxu1  ;;  %v11385_v37 = vld [vmem:[#allocation12 + $0x948] ss:$16 sps:$4 sm:$0xff]  }
 0x5d4   : > { %7709 = vmatpush1.bf16.msra.mxu0 %v11310_v58  ;;  %v11390_v58 = vld [vmem:[#allocation12 + $0x924] ss:$16 sps:$4 sm:$0xff]   ;;  %v11399_v8 = vld [vmem:[#allocation12 + $0x90c] ss:$16 sps:$4 sm:$0xff]  }
 0x5d5   : > { %7750 = vmatpush1.bf16.msra.mxu1 %v11313_v4  ;;  %v5923_v46 = vpop.f32.mrf.mxu0  ;;  %v5964_v53 = vpop.f32.mrf.mxu1  ;;  %7710 = vmatprep.subr.bf16.mxu0 %v11318_v5  ;;  %v11393_v4 = vld [vmem:[#allocation12 + $0x92c] ss:$16 sps:$4 sm:$0xff]   ;;  %v11388_v5 = vld [vmem:[#allocation12 + $0x920] ss:$16 sps:$4 sm:$0xff]   ;;  %v11396_v20 = vld [vmem:[#allocation12 + $0x904] ss:$16 sps:$4 sm:$0xff]  }
 0x5d6   : > { %7751 = vmatprep.subr.bf16.mxu1 %v11321_v7  ;;  %v11391_v7 = vld [vmem:[#allocation12 + $0x928] ss:$16 sps:$4 sm:$0xff]   ;;  %v11402_v53 = vld [vmem:[#allocation12 + $0xae4] ss:$16 sps:$4 sm:$0xff]  }
 0x5d7   : > { %v11397_v46 = vld [vmem:[#allocation12 + $0x908] ss:$16 sps:$4 sm:$0xff]  }
 0x5d8   : > { %7711 = vmatpush1.bf16.msra.mxu0 %v11316_v57  ;;  %v11394_v57 = vld [vmem:[#allocation12 + $0x900] ss:$16 sps:$4 sm:$0xff]  }
 0x5d9   : > { %7752 = vmatpush1.bf16.msra.mxu1 %v11319_v62  ;;  %7712 = vmatprep.subr.bf16.mxu0 %v11324_v9  ;;  %v11405_v62 = vld [vmem:[#allocation12 + $0xaec] ss:$16 sps:$4 sm:$0xff]   ;;  %v11400_v9 = vld [vmem:[#allocation12 + $0xae0] ss:$16 sps:$4 sm:$0xff]  }
 0x5da   : > { %7753 = vmatprep.subr.bf16.mxu1 %v11327_v25  ;;  %v7382_v25 = vrot.slane %v13429_v31, 2 }
 0x5dc   : > { %7713 = vmatpush1.bf16.msra.mxu0 %v11322_v18  ;;  %v11403_v18 = vld [vmem:[#allocation12 + $0xae8] ss:$16 sps:$4 sm:$0xff]  }
 0x5dd   : > { %7754 = vmatpush1.bf16.msra.mxu1 %v11325_v24  ;;  %7714 = vmatprep.subr.bf16.mxu0 %v11330_v29  ;;  %v11408_v24 = vld [vmem:[#allocation12 + $0xac4] ss:$16 sps:$4 sm:$0xff]  }
 0x5de   : > { %7755 = vmatprep.subr.bf16.mxu1 %v11333_v30 }
 0x5e0   : > { %7715 = vmatpush1.bf16.msra.mxu0 %v11328_v33  ;;  %v7857_v33 = vrot.slane %v13434_v63, 2 }
 0x5e1   : > { %7756 = vmatpush1.bf16.msra.mxu1 %v11331_v35  ;;  %7716 = vmatprep.subr.bf16.mxu0 %v11336_v38  ;;  %v11411_v35 = vld [vmem:[#allocation12 + $0xacc] ss:$16 sps:$4 sm:$0xff]  }
 0x5e2   : > { %7757 = vmatprep.subr.bf16.mxu1 %v11339_v40 }
 0x5e4   : > { %7717 = vmatpush1.bf16.msra.mxu0 %v11334_v42  ;;  %v11406_v42 = vld [vmem:[#allocation12 + $0xac0] ss:$16 sps:$4 sm:$0xff]  }
 0x5e5   : > { %7758 = vmatpush1.bf16.msra.mxu1 %v11337_v0  ;;  %7718 = vmatprep.subr.bf16.mxu0 %v11342_v45 }
 0x5e6   : > { %7759 = vmatprep.subr.bf16.mxu1 %v11345_v48  ;;  %v11409_v48 = vld [vmem:[#allocation12 + $0xac8] ss:$16 sps:$4 sm:$0xff]  }
 0x5e8   : > { %7719 = vmatpush1.bf16.msra.mxu0 %v11340_v49  ;;  %v11414_v49 = vld [vmem:[#allocation12 + $0xaa4] ss:$16 sps:$4 sm:$0xff]  }
 0x5e9   : > { %7760 = vmatpush1.bf16.msra.mxu1 %v11343_v6  ;;  %7720 = vmatprep.subr.bf16.mxu0 %v11348_v50 }
 0x5ea   : > { %7761 = vmatprep.subr.bf16.mxu1 %v11351_v60  ;;  %v11412_v60 = vld [vmem:[#allocation12 + $0xaa0] ss:$16 sps:$4 sm:$0xff]  }
 0x5ec   : > { %7721 = vmatpush1.bf16.msra.mxu0 %v11346_v26 }
 0x5ed   : > { %7762 = vmatpush1.bf16.msra.mxu1 %v11349_v32  ;;  %7722 = vmatprep.subr.bf16.mxu0 %v11354_v11  ;;  %v11415_v11 = vld [vmem:[#allocation12 + $0xaa8] ss:$16 sps:$4 sm:$0xff]  }
 0x5ee   : > { %7763 = vmatprep.subr.bf16.mxu1 %v11357_v12  ;;  %v11420_v12 = vld [vmem:[#allocation12 + $0xa84] ss:$16 sps:$4 sm:$0xff]  }
 0x5f0   : > { %7723 = vmatpush2.bf16.msra.mxu0 %v11352_v55  ;;  %v11423_v55 = vld [vmem:[#allocation12 + $0xa8c] ss:$16 sps:$4 sm:$0xff]  }
 0x5f1   : > { %7764 = vmatpush2.bf16.msra.mxu1 %v11355_v17  ;;  %7724 = vmatprep.subr.bf16.mxu0 %v11360_v36  ;;  %v11426_v17 = vld [vmem:[#allocation12 + $0xa64] ss:$16 sps:$4 sm:$0xff]   ;;  %v11429_v36 = vld [vmem:[#allocation12 + $0xa6c] ss:$16 sps:$4 sm:$0xff]  }
 0x5f2   : > { %7765 = vmatprep.subr.bf16.mxu1 %v11363_v59  ;;  %v11424_v59 = vld [vmem:[#allocation12 + $0xa60] ss:$16 sps:$4 sm:$0xff]  }
 0x5f4   : > { %7725 = vmatpush2.bf16.msra.mxu0 %v11358_v56  ;;  %v11427_v56 = vld [vmem:[#allocation12 + $0xa68] ss:$16 sps:$4 sm:$0xff]  }
 0x5f5   : > { %7766 = vmatpush2.bf16.msra.mxu1 %v11361_v21  ;;  %7726 = vmatprep.subr.bf16.mxu0 %v11366_v2  ;;  %v11432_v21 = vld [vmem:[#allocation12 + $0xa44] ss:$16 sps:$4 sm:$0xff]   ;;  %v11435_v2 = vld [vmem:[#allocation12 + $0xa4c] ss:$16 sps:$4 sm:$0xff]  }
 0x5f6   : > { %7767 = vmatprep.subr.bf16.mxu1 %v11369_v15  ;;  %v11430_v15 = vld [vmem:[#allocation12 + $0xa40] ss:$16 sps:$4 sm:$0xff]  }
 0x5f8   : > { %7727 = vmatpush2.bf16.msra.mxu0 %v11364_v39  ;;  %v11433_v39 = vld [vmem:[#allocation12 + $0xa48] ss:$16 sps:$4 sm:$0xff]  }
 0x5f9   : > { %7768 = vmatpush2.bf16.msra.mxu1 %v11367_v3  ;;  %7728 = vmatprep.subr.bf16.mxu0 %v11372_v52  ;;  %v11438_v3 = vld [vmem:[#allocation12 + $0xa24] ss:$16 sps:$4 sm:$0xff]   ;;  %v11441_v52 = vld [vmem:[#allocation12 + $0xa2c] ss:$16 sps:$4 sm:$0xff]  }
 0x5fa   : > { %7769 = vmatprep.subr.bf16.mxu1 %v11375_v61  ;;  %v11436_v61 = vld [vmem:[#allocation12 + $0xa20] ss:$16 sps:$4 sm:$0xff]  }
 0x5fc   : > { %7729 = vmatpush2.bf16.msra.mxu0 %v11370_v41  ;;  %v11439_v41 = vld [vmem:[#allocation12 + $0xa28] ss:$16 sps:$4 sm:$0xff]  }
 0x5fd   : > { %7770 = vmatpush2.bf16.msra.mxu1 %v11373_v47  ;;  %7730 = vmatprep.subr.bf16.mxu0 %v11378_v16  ;;  %v11444_v47 = vld [vmem:[#allocation12 + $0xa04] ss:$16 sps:$4 sm:$0xff]   ;;  %v11447_v16 = vld [vmem:[#allocation12 + $0xa0c] ss:$16 sps:$4 sm:$0xff]  }
 0x5fe   : > { %7771 = vmatprep.subr.bf16.mxu1 %v11381_v44  ;;  %v11442_v44 = vld [vmem:[#allocation12 + $0xa00] ss:$16 sps:$4 sm:$0xff]  }
 0x600   : > { %7731 = vmatpush2.bf16.msra.mxu0 %v11376_v14  ;;  %v11445_v14 = vld [vmem:[#allocation12 + $0xa08] ss:$16 sps:$4 sm:$0xff]  }
 0x601   : > { %7772 = vmatpush2.bf16.msra.mxu1 %v11379_v27  ;;  %7732 = vmatprep.subr.bf16.mxu0 %v11384_v22  ;;  %v11450_v27 = vld [vmem:[#allocation12 + $0xbe4] ss:$16 sps:$4 sm:$0xff]   ;;  %v11453_v22 = vld [vmem:[#allocation12 + $0xbec] ss:$16 sps:$4 sm:$0xff]  }
 0x602   : > { %7773 = vmatprep.subr.bf16.mxu1 %v11387_v10  ;;  %v11448_v10 = vld [vmem:[#allocation12 + $0xbe0] ss:$16 sps:$4 sm:$0xff]  }
 0x604   : > { %7733 = vmatpush2.bf16.msra.mxu0 %v11382_v43  ;;  %v11451_v43 = vld [vmem:[#allocation12 + $0xbe8] ss:$16 sps:$4 sm:$0xff]  }
 0x605   : > { %7774 = vmatpush2.bf16.msra.mxu1 %v11385_v37  ;;  %7734 = vmatprep.subr.bf16.mxu0 %v11390_v58  ;;  %v11456_v37 = vld [vmem:[#allocation12 + $0xbc4] ss:$16 sps:$4 sm:$0xff]   ;;  %v11459_v58 = vld [vmem:[#allocation12 + $0xbcc] ss:$16 sps:$4 sm:$0xff]  }
 0x606   : > { %7775 = vmatprep.subr.bf16.mxu1 %v11393_v4  ;;  %v11454_v4 = vld [vmem:[#allocation12 + $0xbc0] ss:$16 sps:$4 sm:$0xff]  }
 0x608   : > { %7735 = vmatpush2.bf16.msra.mxu0 %v11388_v5  ;;  %v11457_v5 = vld [vmem:[#allocation12 + $0xbc8] ss:$16 sps:$4 sm:$0xff]  }
 0x609   : > { %7776 = vmatpush2.bf16.msra.mxu1 %v11391_v7  ;;  %7736 = vmatprep.subr.bf16.mxu0 %v11396_v20  ;;  %v11462_v7 = vld [vmem:[#allocation12 + $0xba4] ss:$16 sps:$4 sm:$0xff]   ;;  %v11465_v20 = vld [vmem:[#allocation12 + $0xbac] ss:$16 sps:$4 sm:$0xff]  }
 0x60a   : > { %7777 = vmatprep.subr.bf16.mxu1 %v11399_v8  ;;  %v11460_v8 = vld [vmem:[#allocation12 + $0xba0] ss:$16 sps:$4 sm:$0xff]  }
 0x60c   : > { %7737 = vmatpush2.bf16.msra.mxu0 %v11394_v57  ;;  %v11463_v57 = vld [vmem:[#allocation12 + $0xba8] ss:$16 sps:$4 sm:$0xff]  }
 0x60d   : > { %7778 = vmatpush2.bf16.msra.mxu1 %v11397_v46  ;;  %8180 = vmatprep.subr.bf16.mxu0 %v11402_v53  ;;  %v11468_v46 = vld [vmem:[#allocation12 + $0xb84] ss:$16 sps:$4 sm:$0xff]   ;;  %v11471_v53 = vld [vmem:[#allocation12 + $0xb8c] ss:$16 sps:$4 sm:$0xff]  }
 0x60e   : > { %8221 = vmatprep.subr.bf16.mxu1 %v11405_v62  ;;  %v11466_v62 = vld [vmem:[#allocation12 + $0xb80] ss:$16 sps:$4 sm:$0xff]  }
 0x60f   : > { %v6320_v29 = vpop.f32.mrf.mxu0  ;;  %v6361_v30 = vpop.f32.mrf.mxu1  ;;  %7739 = vmatmul.mubr.bf16.vlgmr.msra.gmra.mxu0 %v7382_v25 }
 0x610   : > { %v13463_v38 = vadd.f32 %v6320_v29, %v13451_v34  ;;  %v13466_v40 = vadd.f32 %v6361_v30, %v13453_v28  ;;  %7780 = vmatmul.mubr.bf16.vlgmr.msra.gmra.mxu1 %v7382_v25  ;;  %8181 = vmatpush1.bf16.msra.mxu0 %v11400_v9  ;;  %v11417_v34 = vld [vmem:[#allocation12 + $0xaac] ss:$16 sps:$4 sm:$0xff]   ;;  %v11469_v9 = vld [vmem:[#allocation12 + $0xb88] ss:$16 sps:$4 sm:$0xff]   ;;  %v11474_v25 = vld [vmem:[#allocation12 + $0xb64] ss:$16 sps:$4 sm:$0xff]  }
 0x611   : > { %8212 = vmatprep.mubr.bf16.mxu0 %v7857_v33  ;;  %8222 = vmatpush1.bf16.msra.mxu1 %v11403_v18  ;;  %v6322_v0 = vpop.f32.mrf.mxu0  ;;  %v6363_v45 = vpop.f32.mrf.mxu1  ;;  %v11477_v18 = vld [vmem:[#allocation12 + $0xb6c] ss:$16 sps:$4 sm:$0xff]   ;;  %v11475_v29 = vld [vmem:[#allocation12 + $0xb68] ss:$16 sps:$4 sm:$0xff]   ;;  %v11480_v30 = vld [vmem:[#allocation12 + $0xb44] ss:$16 sps:$4 sm:$0xff]  }
 0x612   : > { %8253 = vmatprep.mubr.bf16.mxu1 %v7857_v33  ;;  %v13469_v6 = vadd.f32 %v6322_v0, %v13456_v13  ;;  %v13472_v63 = vadd.f32 %v6363_v45, %v13458_v51  ;;  %8182 = vmatprep.subr.bf16.mxu0 %v11408_v24  ;;  %v11418_v13 = vld [vmem:[#allocation12 + $0xa80] ss:$16 sps:$4 sm:$0xff]   ;;  %v11421_v51 = vld [vmem:[#allocation12 + $0xa88] ss:$16 sps:$4 sm:$0xff]   ;;  %v11483_v33 = vld [vmem:[#allocation12 + $0xb4c] ss:$16 sps:$4 sm:$0xff]  }
 0x613   : > { %v6324_v28 = vpop.f32.mrf.mxu0  ;;  %v6365_v50 = vpop.f32.mrf.mxu1  ;;  %8223 = vmatprep.subr.bf16.mxu1 %v11411_v35  ;;  %v11472_v24 = vld [vmem:[#allocation12 + $0xb60] ss:$16 sps:$4 sm:$0xff]   ;;  %v11486_v0 = vld [vmem:[#allocation12 + $0xb24] ss:$16 sps:$4 sm:$0xff]   ;;  %v11489_v45 = vld [vmem:[#allocation12 + $0xb2c] ss:$16 sps:$4 sm:$0xff]  }
 0x614   : > { %8183 = vmatpush1.bf16.msra.mxu0 %v11406_v42  ;;  %v11478_v35 = vld [vmem:[#allocation12 + $0xb40] ss:$16 sps:$4 sm:$0xff]   ;;  %v11481_v42 = vld [vmem:[#allocation12 + $0xb48] ss:$16 sps:$4 sm:$0xff]   ;;  %v11495_v28 = vld [vmem:[#allocation12 + $0xb0c] ss:$16 sps:$4 sm:$0xff]  }
 0x615   : > { %8224 = vmatpush1.bf16.msra.mxu1 %v11409_v48  ;;  %v6325_v26 = vpop.f32.mrf.mxu0  ;;  %v6366_v32 = vpop.f32.mrf.mxu1  ;;  %8184 = vmatprep.subr.bf16.mxu0 %v11414_v49  ;;  %v11484_v48 = vld [vmem:[#allocation12 + $0xb20] ss:$16 sps:$4 sm:$0xff]   ;;  %v11487_v49 = vld [vmem:[#allocation12 + $0xb28] ss:$16 sps:$4 sm:$0xff]  }
 0x616   : > { %8225 = vmatprep.subr.bf16.mxu1 %v11417_v34  ;;  %v11492_v34 = vld [vmem:[#allocation12 + $0xb04] ss:$16 sps:$4 sm:$0xff]   ;;  %v11490_v50 = vld [vmem:[#allocation12 + $0xb00] ss:$16 sps:$4 sm:$0xff]   ;;  %v11501_v32 = vld [vmem:[#allocation12 + $0xcec] ss:$16 sps:$4 sm:$0xff]  }
 0x617   : > { %v11498_v26 = vld [vmem:[#allocation12 + $0xce4] ss:$16 sps:$4 sm:$0xff]  }
 0x618   : > { %8185 = vmatpush1.bf16.msra.mxu0 %v11412_v60  ;;  %v11493_v60 = vld [vmem:[#allocation12 + $0xb08] ss:$16 sps:$4 sm:$0xff]  }
 0x619   : > { %8226 = vmatpush1.bf16.msra.mxu1 %v11415_v11  ;;  %8186 = vmatprep.subr.bf16.mxu0 %v11420_v12  ;;  %v11496_v11 = vld [vmem:[#allocation12 + $0xce0] ss:$16 sps:$4 sm:$0xff]   ;;  %v7856_v12 = vrot.slane %v13437_v19, 2 }
 0x61a   : > { %8227 = vmatprep.subr.bf16.mxu1 %v11423_v55  ;;  %v11499_v55 = vld [vmem:[#allocation12 + $0xce8] ss:$16 sps:$4 sm:$0xff]  }
 0x61c   : > { %8187 = vmatpush1.bf16.msra.mxu0 %v11418_v13  ;;  %v11504_v13 = vld [vmem:[#allocation12 + $0xcc4] ss:$16 sps:$4 sm:$0xff]  }
 0x61d   : > { %8228 = vmatpush1.bf16.msra.mxu1 %v11421_v51  ;;  %8188 = vmatprep.subr.bf16.mxu0 %v11426_v17  ;;  %v8331_v17 = vrot.slane %v13431_v54, 3 }
 0x61e   : > { %8229 = vmatprep.subr.bf16.mxu1 %v11429_v36  ;;  %v11507_v36 = vld [vmem:[#allocation12 + $0xccc] ss:$16 sps:$4 sm:$0xff]  }
 0x620   : > { %8189 = vmatpush1.bf16.msra.mxu0 %v11424_v59 }
 0x621   : > { %8230 = vmatpush1.bf16.msra.mxu1 %v11427_v56  ;;  %8190 = vmatprep.subr.bf16.mxu0 %v11432_v21  ;;  %v11502_v21 = vld [vmem:[#allocation12 + $0xcc0] ss:$16 sps:$4 sm:$0xff]  }
 0x622   : > { %8231 = vmatprep.subr.bf16.mxu1 %v11435_v2 }
 0x624   : > { %8191 = vmatpush1.bf16.msra.mxu0 %v11430_v15  ;;  %v11505_v15 = vld [vmem:[#allocation12 + $0xcc8] ss:$16 sps:$4 sm:$0xff]  }
 0x625   : > { %8232 = vmatpush1.bf16.msra.mxu1 %v11433_v39  ;;  %8192 = vmatprep.subr.bf16.mxu0 %v11438_v3  ;;  %v11510_v39 = vld [vmem:[#allocation12 + $0xca4] ss:$16 sps:$4 sm:$0xff]  }
 0x626   : > { %8233 = vmatprep.subr.bf16.mxu1 %v11441_v52 }
 0x628   : > { %8193 = vmatpush1.bf16.msra.mxu0 %v11436_v61 }
 0x629   : > { %8234 = vmatpush1.bf16.msra.mxu1 %v11439_v41  ;;  %8194 = vmatprep.subr.bf16.mxu0 %v11444_v47 }
 0x62a   : > { %8235 = vmatprep.subr.bf16.mxu1 %v11447_v16  ;;  %v11511_v16 = vld [vmem:[#allocation12 + $0xca8] ss:$16 sps:$4 sm:$0xff]  }
 0x62c   : > { %8195 = vmatpush1.bf16.msra.mxu0 %v11442_v44  ;;  %v11516_v44 = vld [vmem:[#allocation12 + $0xc84] ss:$16 sps:$4 sm:$0xff]  }
 0x62d   : > { %8236 = vmatpush1.bf16.msra.mxu1 %v11445_v14  ;;  %8196 = vmatprep.subr.bf16.mxu0 %v11450_v27  ;;  %v11514_v27 = vld [vmem:[#allocation12 + $0xc80] ss:$16 sps:$4 sm:$0xff]  }
 0x62e   : > { %8237 = vmatprep.subr.bf16.mxu1 %v11453_v22  ;;  %v11517_v22 = vld [vmem:[#allocation12 + $0xc88] ss:$16 sps:$4 sm:$0xff]  }
 0x630   : > { %8197 = vmatpush2.bf16.msra.mxu0 %v11448_v10  ;;  %v11525_v10 = vld [vmem:[#allocation12 + $0xc6c] ss:$16 sps:$4 sm:$0xff]  }
 0x631   : > { %8238 = vmatpush2.bf16.msra.mxu1 %v11451_v43  ;;  %8198 = vmatprep.subr.bf16.mxu0 %v11456_v37  ;;  %v11520_v43 = vld [vmem:[#allocation12 + $0xc60] ss:$16 sps:$4 sm:$0xff]   ;;  %v11523_v37 = vld [vmem:[#allocation12 + $0xc68] ss:$16 sps:$4 sm:$0xff]  }
 0x632   : > { %8239 = vmatprep.subr.bf16.mxu1 %v11459_v58  ;;  %v11528_v58 = vld [vmem:[#allocation12 + $0xc44] ss:$16 sps:$4 sm:$0xff]  }
 0x634   : > { %8199 = vmatpush2.bf16.msra.mxu0 %v11454_v4  ;;  %v11531_v4 = vld [vmem:[#allocation12 + $0xc4c] ss:$16 sps:$4 sm:$0xff]  }
 0x635   : > { %8240 = vmatpush2.bf16.msra.mxu1 %v11457_v5  ;;  %8200 = vmatprep.subr.bf16.mxu0 %v11462_v7  ;;  %v11526_v5 = vld [vmem:[#allocation12 + $0xc40] ss:$16 sps:$4 sm:$0xff]   ;;  %v11529_v7 = vld [vmem:[#allocation12 + $0xc48] ss:$16 sps:$4 sm:$0xff]  }
 0x636   : > { %8241 = vmatprep.subr.bf16.mxu1 %v11465_v20  ;;  %v11534_v20 = vld [vmem:[#allocation12 + $0xc24] ss:$16 sps:$4 sm:$0xff]  }
 0x638   : > { %8201 = vmatpush2.bf16.msra.mxu0 %v11460_v8  ;;  %v11537_v8 = vld [vmem:[#allocation12 + $0xc2c] ss:$16 sps:$4 sm:$0xff]  }
 0x639   : > { %8242 = vmatpush2.bf16.msra.mxu1 %v11463_v57  ;;  %8202 = vmatprep.subr.bf16.mxu0 %v11468_v46  ;;  %v11532_v57 = vld [vmem:[#allocation12 + $0xc20] ss:$16 sps:$4 sm:$0xff]   ;;  %v11535_v46 = vld [vmem:[#allocation12 + $0xc28] ss:$16 sps:$4 sm:$0xff]  }
 0x63a   : > { %8243 = vmatprep.subr.bf16.mxu1 %v11471_v53  ;;  %v11540_v53 = vld [vmem:[#allocation12 + $0xc04] ss:$16 sps:$4 sm:$0xff]  }
 0x63c   : > { %8203 = vmatpush2.bf16.msra.mxu0 %v11466_v62  ;;  %v11543_v62 = vld [vmem:[#allocation12 + $0xc0c] ss:$16 sps:$4 sm:$0xff]  }
 0x63d   : > { %8244 = vmatpush2.bf16.msra.mxu1 %v11469_v9  ;;  %8204 = vmatprep.subr.bf16.mxu0 %v11474_v25  ;;  %v11538_v9 = vld [vmem:[#allocation12 + $0xc00] ss:$16 sps:$4 sm:$0xff]   ;;  %v11541_v25 = vld [vmem:[#allocation12 + $0xc08] ss:$16 sps:$4 sm:$0xff]  }
 0x63e   : > { %8245 = vmatprep.subr.bf16.mxu1 %v11477_v18  ;;  %v11546_v18 = vld [vmem:[#allocation12 + $0xde4] ss:$16 sps:$4 sm:$0xff]  }
 0x640   : > { %8205 = vmatpush2.bf16.msra.mxu0 %v11472_v24  ;;  %v11549_v24 = vld [vmem:[#allocation12 + $0xdec] ss:$16 sps:$4 sm:$0xff]  }
 0x641   : > { %8246 = vmatpush2.bf16.msra.mxu1 %v11475_v29  ;;  %8206 = vmatprep.subr.bf16.mxu0 %v11480_v30  ;;  %v11544_v29 = vld [vmem:[#allocation12 + $0xde0] ss:$16 sps:$4 sm:$0xff]   ;;  %v11547_v30 = vld [vmem:[#allocation12 + $0xde8] ss:$16 sps:$4 sm:$0xff]  }
 0x642   : > { %8247 = vmatprep.subr.bf16.mxu1 %v11483_v33  ;;  %v11552_v33 = vld [vmem:[#allocation12 + $0xdc4] ss:$16 sps:$4 sm:$0xff]  }
 0x644   : > { %8207 = vmatpush2.bf16.msra.mxu0 %v11478_v35  ;;  %v11555_v35 = vld [vmem:[#allocation12 + $0xdcc] ss:$16 sps:$4 sm:$0xff]  }
 0x645   : > { %8248 = vmatpush2.bf16.msra.mxu1 %v11481_v42  ;;  %8208 = vmatprep.subr.bf16.mxu0 %v11486_v0  ;;  %v11550_v42 = vld [vmem:[#allocation12 + $0xdc0] ss:$16 sps:$4 sm:$0xff]   ;;  %v11553_v0 = vld [vmem:[#allocation12 + $0xdc8] ss:$16 sps:$4 sm:$0xff]  }
 0x646   : > { %8249 = vmatprep.subr.bf16.mxu1 %v11489_v45  ;;  %v11558_v45 = vld [vmem:[#allocation12 + $0xda4] ss:$16 sps:$4 sm:$0xff]  }
 0x648   : > { %8209 = vmatpush2.bf16.msra.mxu0 %v11484_v48  ;;  %v11561_v48 = vld [vmem:[#allocation12 + $0xdac] ss:$16 sps:$4 sm:$0xff]  }
 0x649   : > { %8250 = vmatpush2.bf16.msra.mxu1 %v11487_v49  ;;  %8210 = vmatprep.subr.bf16.mxu0 %v11492_v34  ;;  %v11556_v49 = vld [vmem:[#allocation12 + $0xda0] ss:$16 sps:$4 sm:$0xff]   ;;  %v11559_v34 = vld [vmem:[#allocation12 + $0xda8] ss:$16 sps:$4 sm:$0xff]  }
 0x64a   : > { %8251 = vmatprep.subr.bf16.mxu1 %v11495_v28  ;;  %v11564_v28 = vld [vmem:[#allocation12 + $0xd84] ss:$16 sps:$4 sm:$0xff]  }
 0x64c   : > { %8211 = vmatpush2.bf16.msra.mxu0 %v11490_v50  ;;  %v11567_v50 = vld [vmem:[#allocation12 + $0xd8c] ss:$16 sps:$4 sm:$0xff]  }
 0x64d   : > { %8252 = vmatpush2.bf16.msra.mxu1 %v11493_v60  ;;  %8654 = vmatprep.subr.bf16.mxu0 %v11498_v26  ;;  %v11562_v60 = vld [vmem:[#allocation12 + $0xd80] ss:$16 sps:$4 sm:$0xff]   ;;  %v11565_v26 = vld [vmem:[#allocation12 + $0xd88] ss:$16 sps:$4 sm:$0xff]  }
 0x64e   : > { %8695 = vmatprep.subr.bf16.mxu1 %v11501_v32  ;;  %v11570_v32 = vld [vmem:[#allocation12 + $0xd64] ss:$16 sps:$4 sm:$0xff]  }
 0x64f   : > { %v6792_v51 = vpop.f32.mrf.mxu0  ;;  %8213 = vmatmul.mubr.bf16.vlgmr.msra.gmra.mxu0 %v7856_v12 }
 0x650   : > { %v13477_v59 = vadd.f32 %v6792_v51, %v13463_v38  ;;  %v6833_v56 = vpop.f32.mrf.mxu1  ;;  %8254 = vmatmul.mubr.bf16.vlgmr.msra.gmra.mxu1 %v7856_v12  ;;  %8655 = vmatpush1.bf16.msra.mxu0 %v11496_v11  ;;  %v11513_v38 = vld [vmem:[#allocation12 + $0xcac] ss:$16 sps:$4 sm:$0xff]   ;;  %v11568_v12 = vld [vmem:[#allocation12 + $0xd60] ss:$16 sps:$4 sm:$0xff]  }
 0x651   : > { %v13480_v2 = vadd.f32 %v6833_v56, %v13466_v40  ;;  %8686 = vmatprep.mubr.bf16.mxu0 %v8331_v17  ;;  %8696 = vmatpush1.bf16.msra.mxu1 %v11499_v55  ;;  %v6794_v19 = vpop.f32.mrf.mxu0  ;;  %v11508_v40 = vld [vmem:[#allocation12 + $0xca0] ss:$16 sps:$4 sm:$0xff]   ;;  %v11573_v11 = vld [vmem:[#allocation12 + $0xd6c] ss:$16 sps:$4 sm:$0xff]   ;;  %v11571_v55 = vld [vmem:[#allocation12 + $0xd68] ss:$16 sps:$4 sm:$0xff]  }
 0x652   : > { %8727 = vmatprep.mubr.bf16.mxu1 %v8331_v17  ;;  %v13483_v3 = vadd.f32 %v6794_v19, %v13469_v6  ;;  %v6835_v54 = vpop.f32.mrf.mxu1  ;;  %8656 = vmatprep.subr.bf16.mxu0 %v11504_v13  ;;  %v11519_v6 = vld [vmem:[#allocation12 + $0xc8c] ss:$16 sps:$4 sm:$0xff]   ;;  %v11576_v13 = vld [vmem:[#allocation12 + $0xd44] ss:$16 sps:$4 sm:$0xff]   ;;  %v11574_v17 = vld [vmem:[#allocation12 + $0xd40] ss:$16 sps:$4 sm:$0xff]  }
 0x653   : > { %v13486_v52 = vadd.f32 %v6835_v54, %v13472_v63  ;;  %v6796_v61 = vpop.f32.mrf.mxu0  ;;  %8697 = vmatprep.subr.bf16.mxu1 %v11507_v36  ;;  %v11522_v63 = vld [vmem:[#allocation12 + $0xc64] ss:$16 sps:$4 sm:$0xff]   ;;  %v11579_v51 = vld [vmem:[#allocation12 + $0xd4c] ss:$16 sps:$4 sm:$0xff]   ;;  %v11577_v36 = vld [vmem:[#allocation12 + $0xd48] ss:$16 sps:$4 sm:$0xff]  }
 0x654   : > { %v6837_v41 = vpop.f32.mrf.mxu1  ;;  %8657 = vmatpush1.bf16.msra.mxu0 %v11502_v21  ;;  %v11582_v56 = vld [vmem:[#allocation12 + $0xd24] ss:$16 sps:$4 sm:$0xff]   ;;  %v11585_v21 = vld [vmem:[#allocation12 + $0xd2c] ss:$16 sps:$4 sm:$0xff]   ;;  %v11580_v19 = vld [vmem:[#allocation12 + $0xd20] ss:$16 sps:$4 sm:$0xff]  }
 0x655   : > { %8698 = vmatpush1.bf16.msra.mxu1 %v11505_v15  ;;  %v6797_v47 = vpop.f32.mrf.mxu0  ;;  %8658 = vmatprep.subr.bf16.mxu0 %v11510_v39  ;;  %v11583_v15 = vld [vmem:[#allocation12 + $0xd28] ss:$16 sps:$4 sm:$0xff]   ;;  %v11588_v39 = vld [vmem:[#allocation12 + $0xd04] ss:$16 sps:$4 sm:$0xff]   ;;  %v11591_v54 = vld [vmem:[#allocation12 + $0xd0c] ss:$16 sps:$4 sm:$0xff]  }
 0x656   : > { %v6838_v14 = vpop.f32.mrf.mxu1  ;;  %8699 = vmatprep.subr.bf16.mxu1 %v11513_v38  ;;  %v11586_v38 = vld [vmem:[#allocation12 + $0xd00] ss:$16 sps:$4 sm:$0xff]   ;;  %v11589_v61 = vld [vmem:[#allocation12 + $0xd08] ss:$16 sps:$4 sm:$0xff]   ;;  %v8330_v41 = vrot.slane %v13429_v31, 3 }
 0x657   : > { %v11592_v31 = vld [vmem:[%s13634_s7 + $0x78] sm:$0xff]  }
 0x658   : > { %8659 = vmatpush1.bf16.msra.mxu0 %v11508_v40 }
 0x659   : > { %8700 = vmatpush1.bf16.msra.mxu1 %v11511_v16  ;;  %8660 = vmatprep.subr.bf16.mxu0 %v11516_v44 }
 0x65a   : > { %8701 = vmatprep.subr.bf16.mxu1 %v11519_v6 }
 0x65c   : > { %8661 = vmatpush1.bf16.msra.mxu0 %v11514_v27 }
 0x65d   : > { %8702 = vmatpush1.bf16.msra.mxu1 %v11517_v22  ;;  %8662 = vmatprep.subr.bf16.mxu0 %v11522_v63 }
 0x65e   : > { %8703 = vmatprep.subr.bf16.mxu1 %v11525_v10 }
 0x660   : > { %8663 = vmatpush1.bf16.msra.mxu0 %v11520_v43 }
 0x661   : > { %8704 = vmatpush1.bf16.msra.mxu1 %v11523_v37  ;;  %8664 = vmatprep.subr.bf16.mxu0 %v11528_v58  ;;  %v11597_v58 = vld [vmem:[%s13634_s7 + $0xf0] sm:$0xff]  }
 0x662   : > { %8705 = vmatprep.subr.bf16.mxu1 %v11531_v4  ;;  %v11598_v4 = vld [vmem:[%s13634_s7 + $0x30] sm:$0xff]  }
 0x664   : > { %8665 = vmatpush1.bf16.msra.mxu0 %v11526_v5  ;;  %v11599_v5 = vld [vmem:[%s13634_s7 + $0xb0] sm:$0xff]  }
 0x665   : > { %8706 = vmatpush1.bf16.msra.mxu1 %v11529_v7  ;;  %8666 = vmatprep.subr.bf16.mxu0 %v11534_v20  ;;  %v11600_v7 = vld [vmem:[%s13634_s7 + $0x68] sm:$0xff]  }
 0x666   : > { %8707 = vmatprep.subr.bf16.mxu1 %v11537_v8  ;;  %v11601_v20 = vld [vmem:[%s13634_s7 + $0xe8] sm:$0xff]  }
 0x667   : > { %v11602_v8 = vld [vmem:[%s13634_s7 + $0x28] sm:$0xff]  }
 0x668   : > { %8667 = vmatpush1.bf16.msra.mxu0 %v11532_v57  ;;  %v11603_v57 = vld [vmem:[%s13634_s7 + $0xa8] sm:$0xff]  }
 0x669   : > { %8708 = vmatpush1.bf16.msra.mxu1 %v11535_v46  ;;  %8668 = vmatprep.subr.bf16.mxu0 %v11540_v53  ;;  %v11604_v46 = vld [vmem:[%s13634_s7 + $0x60] sm:$0xff]  }
 0x66a   : > { %8709 = vmatprep.subr.bf16.mxu1 %v11543_v62  ;;  %v11605_v53 = vld [vmem:[%s13634_s7 + $0xe0] sm:$0xff]  }
 0x66b   : > { %v11606_v62 = vld [vmem:[%s13634_s7 + $0x20] sm:$0xff]  }
 0x66c   : > { %8669 = vmatpush1.bf16.msra.mxu0 %v11538_v9  ;;  %v11607_v9 = vld [vmem:[%s13634_s7 + $0xa0] sm:$0xff]  }
 0x66d   : > { %8710 = vmatpush1.bf16.msra.mxu1 %v11541_v25  ;;  %8670 = vmatprep.subr.bf16.mxu0 %v11546_v18  ;;  %v11608_v25 = vld [vmem:[%s13634_s7 + $0x58] sm:$0xff]  }
 0x66e   : > { %8711 = vmatprep.subr.bf16.mxu1 %v11549_v24  ;;  %v11609_v18 = vld [vmem:[%s13634_s7 + $0xd8] sm:$0xff]  }
 0x66f   : > { %v11610_v24 = vld [vmem:[%s13634_s7 + $0x18] sm:$0xff]  }
 0x670   : > { %8671 = vmatpush2.bf16.msra.mxu0 %v11544_v29  ;;  %v11611_v29 = vld [vmem:[%s13634_s7 + $0x98] sm:$0xff]  }
 0x671   : > { %8712 = vmatpush2.bf16.msra.mxu1 %v11547_v30  ;;  %8672 = vmatprep.subr.bf16.mxu0 %v11552_v33  ;;  %v11612_v33 = vld [vmem:[%s13634_s7 + $0x50] sm:$0xff]  }
 0x672   : > { %8713 = vmatprep.subr.bf16.mxu1 %v11555_v35  ;;  %v11613_v35 = vld [vmem:[%s13634_s7 + $0xd0] sm:$0xff]  }
 0x674   : > { %8673 = vmatpush2.bf16.msra.mxu0 %v11550_v42 }
 0x675   : > { %8714 = vmatpush2.bf16.msra.mxu1 %v11553_v0  ;;  %8674 = vmatprep.subr.bf16.mxu0 %v11558_v45  ;;  %v11614_v45 = vld [vmem:[%s13634_s7 + $0x10] sm:$0xff]  }
 0x676   : > { %8715 = vmatprep.subr.bf16.mxu1 %v11561_v48  ;;  %v11615_v48 = vld [vmem:[%s13634_s7 + $0x90] sm:$0xff]  }
 0x678   : > { %8675 = vmatpush2.bf16.msra.mxu0 %v11556_v49 }
 0x679   : > { %8716 = vmatpush2.bf16.msra.mxu1 %v11559_v34  ;;  %8676 = vmatprep.subr.bf16.mxu0 %v11564_v28 }
 0x67a   : > { %8717 = vmatprep.subr.bf16.mxu1 %v11567_v50 }
 0x67c   : > { %8677 = vmatpush2.bf16.msra.mxu0 %v11562_v60 }
 0x67d   : > { %8718 = vmatpush2.bf16.msra.mxu1 %v11565_v26  ;;  %8678 = vmatprep.subr.bf16.mxu0 %v11570_v32  ;;  %v11616_v32 = vld [vmem:[%s13634_s7 + $0x48] sm:$0xff]  }
 0x67e   : > { %8719 = vmatprep.subr.bf16.mxu1 %v11573_v11  ;;  %v11617_v11 = vld [vmem:[%s13634_s7 + $0xc8] sm:$0xff]  }
 0x680   : > { %8679 = vmatpush2.bf16.msra.mxu0 %v11568_v12 }
 0x681   : > { %8720 = vmatpush2.bf16.msra.mxu1 %v11571_v55  ;;  %8680 = vmatprep.subr.bf16.mxu0 %v11576_v13  ;;  %v11618_v55 = vld [vmem:[%s13634_s7 + $0x8] sm:$0xff]  }
 0x682   : > { %8721 = vmatprep.subr.bf16.mxu1 %v11579_v51  ;;  %v11619_v13 = vld [vmem:[%s13634_s7 + $0x88] sm:$0xff]  }
 0x684   : > { %8681 = vmatpush2.bf16.msra.mxu0 %v11574_v17 }
 0x685   : > { %8722 = vmatpush2.bf16.msra.mxu1 %v11577_v36  ;;  %8682 = vmatprep.subr.bf16.mxu0 %v11582_v56  ;;  %v11620_v36 = vld [vmem:[%s13634_s7 + $0x40] sm:$0xff]  }
 0x686   : > { %8723 = vmatprep.subr.bf16.mxu1 %v11585_v21  ;;  %v11621_v56 = vld [vmem:[%s13634_s7 + $0xc0] sm:$0xff]  }
 0x687   : > { %v11622_v21 = vld [vmem:[%s13634_s7] sm:$0xff]  }
 0x688   : > { %8683 = vmatpush2.bf16.msra.mxu0 %v11580_v19  ;;  %v11623_v19 = vld [vmem:[%s13634_s7 + $0x80] sm:$0xff]  }
 0x689   : > { %8724 = vmatpush2.bf16.msra.mxu1 %v11583_v15  ;;  %8684 = vmatprep.subr.bf16.mxu0 %v11588_v39 }
 0x68a   : > { %8725 = vmatprep.subr.bf16.mxu1 %v11591_v54 }
 0x68c   : > { %8685 = vmatpush2.bf16.msra.mxu0 %v11586_v38 }
 0x68d   : > { %8726 = vmatpush2.bf16.msra.mxu1 %v11589_v61  ;;  %10213 = vmatprep.subr.bf16.mxu0 %v11592_v31 }
 0x68f   : > { %v7266_v40 = vpop.f32.mrf.mxu0  ;;  %8687 = vmatmul.mubr.bf16.vlgmr.msra.gmra.mxu0 %v8330_v41 }
 0x690   : > { %v7314_v47 = vadd.f32 %v7266_v40, %v13477_v59  ;;  %v7307_v16 = vpop.f32.mrf.mxu1  ;;  %8728 = vmatmul.mubr.bf16.vlgmr.msra.gmra.mxu1 %v8330_v41  ;;  %v11593_v59 = vld [vmem:[%s13634_s7 + $0xf8] sm:$0xff]  }
 0x691   : > { %v7316_v44 = vadd.f32 %v7307_v16, %v13480_v2  ;;  %v7268_v14 = vpop.f32.mrf.mxu0  ;;  %v11594_v2 = vld [vmem:[%s13634_s7 + $0x38] sm:$0xff]   ;;  %10235 = vmatprep.subr.bf16.mxu1 %v11593_v59 }
 0x692   : > { %v7315_v6 = vadd.f32 %v7268_v14, %v13483_v3  ;;  %v7309_v27 = vpop.f32.mrf.mxu1  ;;  %v11595_v3 = vld [vmem:[%s13634_s7 + $0xb8] sm:$0xff]   ;;  %10214 = vmatpush3.bf16.msra.mxu0 %v11594_v2  ;;  %v8740_v14 = vld [vmem:[#allocation13] sm:$0xf] }
 0x693   : > { %v7317_v22 = vadd.f32 %v7309_v27, %v13486_v52  ;;  %v7270_v63 = vpop.f32.mrf.mxu0  ;;  %v11596_v52 = vld [vmem:[%s13634_s7 + $0x70] sm:$0xff]   ;;  %10236 = vmatpush3.bf16.msra.mxu1 %v11595_v3  ;;  %v8749_v2 = vrot.slane %v8740_v14, %v13864_v1 }
 0x694   : > { %v7311_v10 = vpop.f32.mrf.mxu1  ;;  %10215 = vmatprep.subr.bf16.mxu0 %v11596_v52  ;;  %10237 = vmatprep.subr.bf16.mxu1 %v11597_v58  ;;  %v8745_v63 = vrot.slane %v8740_v14, %v13863_v23 }
 0x695   : > { %v7271_v43 = vpop.f32.mrf.mxu0 }
 0x696   : > { %v7312_v37 = vpop.f32.mrf.mxu1  ;;  %10216 = vmatpush3.bf16.msra.mxu0 %v11598_v4 }
 0x697   : > { %10238 = vmatpush3.bf16.msra.mxu1 %v11599_v5  ;;  %10217 = vmatprep.subr.bf16.mxu0 %v11600_v7 }
 0x698   : > { %10239 = vmatprep.subr.bf16.mxu1 %v11601_v20 }
 0x69a   : > { %10218 = vmatpush3.bf16.msra.mxu0 %v11602_v8 }
 0x69b   : > { %10240 = vmatpush3.bf16.msra.mxu1 %v11603_v57  ;;  %10219 = vmatprep.subr.bf16.mxu0 %v11604_v46 }
 0x69c   : > { %10241 = vmatprep.subr.bf16.mxu1 %v11605_v53 }
 0x69e   : > { %10220 = vmatpush3.bf16.msra.mxu0 %v11606_v62 }
 0x69f   : > { %10242 = vmatpush3.bf16.msra.mxu1 %v11607_v9  ;;  %10221 = vmatprep.subr.bf16.mxu0 %v11608_v25 }
 0x6a0   : > { %10243 = vmatprep.subr.bf16.mxu1 %v11609_v18 }
 0x6a2   : > { %10222 = vmatpush3.bf16.msra.mxu0 %v11610_v24 }
 0x6a3   : > { %10244 = vmatpush3.bf16.msra.mxu1 %v11611_v29  ;;  %10223 = vmatprep.subr.bf16.mxu0 %v11612_v33 }
 0x6a4   : > { %10245 = vmatprep.subr.bf16.mxu1 %v11613_v35 }
 0x6a6   : > { %10224 = vmatpush3.bf16.msra.mxu0 %v11614_v45 }
 0x6a7   : > { %10246 = vmatpush3.bf16.msra.mxu1 %v11615_v48  ;;  %10225 = vmatprep.subr.bf16.mxu0 %v11616_v32  ;;  %v8838_v48 = vld [vmem:[#allocation15] sm:$0x1] }
 0x6a8   : > { %10247 = vmatprep.subr.bf16.mxu1 %v11617_v11 }
 0x6aa   : > { %10226 = vmatpush3.bf16.msra.mxu0 %v11618_v55 }
 0x6ab   : > { %10248 = vmatpush3.bf16.msra.mxu1 %v11619_v13  ;;  %10227 = vmatprep.subr.bf16.mxu0 %v11620_v36 }
 0x6ac   : > { %10249 = vmatprep.subr.bf16.mxu1 %v11621_v56 }
 0x6ae   : > { %10228 = vmatpush3.bf16.msra.mxu0 %v11622_v21 }
 0x6af   : > { %10250 = vmatpush3.bf16.msra.mxu1 %v11623_v19 }
 0x6cf   : > { %v7740_v30 = vpop.f32.mrf.mxu0 }
 0x6d0   : > { %v7788_v42 = vadd.f32 %v7740_v30, %v7314_v47  ;;  %v7781_v0 = vpop.f32.mrf.mxu1 }
 0x6d1   : > { %v7790_v49 = vadd.f32 %v7781_v0, %v7316_v44  ;;  %v7742_v34 = vpop.f32.mrf.mxu0 }
 0x6d2   : > { %v7789_v28 = vadd.f32 %v7742_v34, %v7315_v6  ;;  %v7783_v50 = vpop.f32.mrf.mxu1  ;;  %v13865_v6 = vld [vmem:[#allocation22_spill] sm:$0xff] }
 0x6d3   : > { %v7791_v60 = vadd.f32 %v7783_v50, %v7317_v22  ;;  %v7744_v26 = vpop.f32.mrf.mxu0  ;;  %v8752_v27 = vsub.s32 2, %v13865_v6  ;;  %v8756_v22 = vsub.s32 3, %v13865_v6 }
 0x6d4   : > { %v7785_v12 = vpop.f32.mrf.mxu1 }
 0x6d5   : > { %v7745_v51 = vpop.f32.mrf.mxu0  ;;  %v8753_v43 = vrot.slane %v8740_v14, %v8752_v27  ;;  %v8757_v4 = vrot.slane %v8740_v14, %v8756_v22 }
 0x6d6   : > { %v7786_v17 = vpop.f32.mrf.mxu1 }
 0x70f   : > { %v8214_v15 = vpop.f32.mrf.mxu0 }
 0x710   : > { %v8262_v39 = vadd.f32 %v8214_v15, %v7788_v42  ;;  %v8255_v54 = vpop.f32.mrf.mxu1 }
 0x711   : > { %v8264_v38 = vadd.f32 %v8255_v54, %v7790_v49  ;;  %v8216_v61 = vpop.f32.mrf.mxu0 }
 0x712   : > { %v8257_v41 = vpop.f32.mrf.mxu1  ;;  %v8263_v37 = vadd.f32 %v8216_v61, %v7789_v28 }
 0x713   : > { %v8218_v40 = vpop.f32.mrf.mxu0  ;;  %v8265_v3 = vadd.f32 %v8257_v41, %v7791_v60 }
 0x714   : > { %v8259_v47 = vpop.f32.mrf.mxu1 }
 0x715   : > { %v8219_v16 = vpop.f32.mrf.mxu0 }
 0x716   : > { %v8260_v44 = vpop.f32.mrf.mxu1 }
 0x74f   : > { %v8688_v10 = vpop.f32.mrf.mxu0 }
 0x750   : > { %v8736_v31 = vadd.f32 %v8688_v10, %v8262_v39  ;;  %v8729_v59 = vpop.f32.mrf.mxu1 }
 0x751   : > { %v8738_v52 = vadd.f32 %v8729_v59, %v8264_v38  ;;  %v8690_v58 = vpop.f32.mrf.mxu0 }
 0x752   : > { %v8762_v5 = vadd.f32 %v8745_v63, %v8736_v31  ;;  %v8737_v7 = vadd.f32 %v8690_v58, %v8263_v37  ;;  %v8731_v20 = vpop.f32.mrf.mxu1 }
 0x753   : > { %v8764_v8 = vadd.f32 %v8753_v43, %v8738_v52  ;;  %v8739_v57 = vadd.f32 %v8731_v20, %v8265_v3  ;;  %v8692_v46 = vpop.f32.mrf.mxu0 }
 0x754   : > { %v8763_v53 = vadd.f32 %v8749_v2, %v8737_v7  ;;  %v8733_v62 = vpop.f32.mrf.mxu1  ;;  %v8766_v23 = vmax.f32 %v8762_v5, 0.0 }
 0x755   : > { %v8765_v9 = vadd.f32 %v8757_v4, %v8739_v57  ;;  %v8693_v25 = vpop.f32.mrf.mxu0  ;;  %v8768_v18 = vmax.f32 %v8764_v8, 0.0 }
 0x756   : > { %v8767_v24 = vmax.f32 %v8763_v53, 0.0  ;;  %v8734_v29 = vpop.f32.mrf.mxu1  ;;  %v8770_v33 = vpack.c.bf16 %v8766_v23, %v8766_v23 }
 0x757   : > { %v8769_v1 = vmax.f32 %v8765_v9, 0.0  ;;  %v8772_v42 = vpack.c.bf16 %v8768_v18, %v8768_v18 }
 0x758   : > { %v8771_v30 = vpack.c.bf16 %v8767_v24, %v8767_v24 }
 0x759   : > { %v8773_v35 = vpack.c.bf16 %v8769_v1, %v8769_v1 }
 0x75a   : > { %9063 = vmatprep.mubr.bf16.mxu0 %v8771_v30 }
 0x75b   : > { %9103 = vmatprep.mubr.bf16.mxu1 %v8773_v35  ;;  %9064 = vmatmul.mubr.bf16.vlgmr.msra.gmra.mxu0 %v8770_v33 }
 0x75c   : > { %9104 = vmatmul.mubr.bf16.vlgmr.msra.gmra.mxu1 %v8772_v42 }
 0x81b   : > { %v10229_v0 = vpop.f32.mrf.mxu0 }
 0x81c   : > { %v10251_v45 = vpop.f32.mrf.mxu1 }
 0x81d   : > { %v10230_v49 = vpop.f32.mrf.mxu0 }
 0x81e   : > { %v10231_v34 = vadd.f32 %v10230_v49, %v10229_v0  ;;  %v10252_v28 = vpop.f32.mrf.mxu1 }
 0x81f   : > { %v10232_v50 = vpop.f32.mrf.mxu0  ;;  %v10253_v26 = vadd.f32 %v10252_v28, %v10251_v45 }
 0x820   : > { %v9066_v60 = vadd.f32 %v10231_v34, %v8838_v48  ;;  %v10254_v32 = vpop.f32.mrf.mxu1 }
 0x821   : > { %v10233_v11 = vpop.f32.mrf.mxu0 }
 0x822   : > { %v9106_v12 = vadd.f32 %v10253_v26, %v9066_v60  ;;  %v10255_v55 = vpop.f32.mrf.mxu1 }
 0x824   : > { %9112 = vst.msk [vmem:[%s418_s25] sm:$0x1] %vm9111_vm0, %v9106_v12 }
 0x825   : > { %12068 = shalt.err (!%p12065_p3)
}
 0x826   : > { %s12069_s26 = scalar_lea.hbm %s9124_s28, 16  ;;  %s12073_s27 = scalar_lea.hbm %s13636_s9, 32 }
 0x827   : > { %p12070_p9 = scmp.ne.s32.totalorder %s9124_s28, %s12069_s26  ;;  %p12074_p5 = scmp.lt.s32.totalorder %s9124_s28, %s13636_s9 }
 0x828   : > { %p12075_p6 = scmp.lt.s32.totalorder %s12073_s27, %s12069_s26 }
 0x829   : > { %p12071_p4 = pnand %p12070_p9, %p13866_p8 }
 0x82a   : > { %p12076_p10 = por %p12075_p6, %p12074_p5 }
 0x82b   : > { %p12072_p12 = pneg %p12071_p4 }
 0x82d   : > { %p12077_p7 = pnand %p12076_p10, %p12072_p12 }
 0x82f   : > { %12080 = shalt.err (!%p12077_p7)
}
 0x830   : > { %10285 = dma.vmem_to_hbm [thread:$0]  (%p13866_p8), %s9127_s16, 16, %s9124_s28, %s9114_s23  }
 0x831 PF: > { %p10327_p11 = scmp.ge.s32.totalorder %s12131_s12, 2  ;;  %s9138_s17 = sand.u32 1, %s12119_s30  }
 0x832   : > { %p13867_p0 = scmp.ne.s32.totalorder %s13712_s20, 0  ;;  %s9139_s14 = scalar_lea.sflag [#allocation6], %s9138_s17 }
 0x834   : > { %p10310_p1 = pnand %p10327_p11, %p13867_p0 }
 0x836   : > { %p10311_p2 = pneg %p10310_p1 }
 0x838   : > { %12114 = dma.done.wait (%p10311_p2), %s9139_s14, 16  }
 0x839   : > { %12116 = vsyncadd (%p10311_p2), %s9139_s14, 4294967280  ;;  %p23_p13 = scmp.ge.s32.totalorder %s12219_s15, 4   ;;  %s13868_s30 = smov %s12123_s10 }
 0x83a   : > { %s13869_s10 = smov %s12127_s11  ;;  %s13870_s11 = smov %s12230_s18 }
 0x83b   : > { %s13871_s12 = smov %s12219_s15  ;;  %25 = sbr.rel (!%p23_p13) target bundleno = 9 (0x9), region = 131 }
 0x840   :  { %9143 = vsyncpa [#allocation5], 1 }
 0x841   :  { %9145 = vsyncpa [#allocation5 + $0x1], 1 }
 0x842   :  { %9146 = vsyncpa [#allocation8], 1 }
 0x843   :  { %9147 = vsyncpa [#allocation11], 1 }
 0x844   :  { %9148 = vsyncpa [#allocation14], 1 }
 0x845   :  { %9149 = vsyncpa [#allocation6], 1 }
 0x846   :  { %9151 = vsyncpa [#allocation6 + $0x1], 1 }

</bundles_post_ra>
